<compile_context>
chip_gen: v6e
topology: v6e:2x2x1
jax: 0.10.0
libtpu: 0.0.40
codegen_flags: <defaults>
</compile_context>

<pallas_src>
import numpy as np

import jax
import jax.numpy as jnp
from jax import lax
from jax.experimental import pallas as pl
from jax.experimental.pallas import tpu as pltpu

LEAKY_SLOPE = 0.01   # PyTorch nn.LeakyReLU default negative_slope
C_PAD = 128          # lane-dense padded channel count for the final layer / output
K = 3                # conv kernel size (all layers)
BLOCK_B = 8          # images per grid step (8-16 good on v5e/v6e, 16-32 on v7x)


# ----------------------------------------------------------------------------
# Host / trace-time helpers
# ----------------------------------------------------------------------------
def _conv_out(n, k, s):
    return (n - k) // s + 1


def _gather_mats(Hi, Wi, k, s):
    """Constant 0/1 gather matrices G[kk, p_out, p_in] (row-selection per tap)."""
    Ho, Wo = _conv_out(Hi, k, s), _conv_out(Wi, k, s)
    g = np.zeros((k * k, Ho * Wo, Hi * Wi), dtype=np.float32)
    for ky in range(k):
        for kx in range(k):
            kk = ky * k + kx
            for ho in range(Ho):
                for wo in range(Wo):
                    g[kk, ho * Wo + wo, (s * ho + ky) * Wi + (s * wo + kx)] = 1.0
    return g, Ho, Wo


def _layer12_patch_index(H, W, k):
    """Flat pixel indices for the fused layer-1/layer-2 im2col.

    Row p2 = (ho, wo) is a conv-2 output position; column kk*9 + j packs the
    conv-2 tap kk=(ky,kx) and the conv-1 patch element j=(dy,dx):
        pixel = (2*(2*ho+ky)+dy, 2*(2*wo+kx)+dx)     (both convs: k=3, stride 2)
    """
    H1, W1 = _conv_out(H, k, 2), _conv_out(W, k, 2)
    H2, W2 = _conv_out(H1, k, 2), _conv_out(W1, k, 2)
    idx = np.zeros((H2 * W2, k * k * k * k), dtype=np.int32)
    for ho in range(H2):
        for wo in range(W2):
            p2 = ho * W2 + wo
            col = 0
            for ky in range(k):
                for kx in range(k):
                    for dy in range(k):
                        for dx in range(k):
                            r = 2 * (2 * ho + ky) + dy
                            c = 2 * (2 * wo + kx) + dx
                            idx[p2, col] = r * W + c
                            col += 1
    return idx, H2, W2


# ----------------------------------------------------------------------------
# Fused Pallas kernel: whole MnistModel forward for Bt images per grid step
# ----------------------------------------------------------------------------
def _fused_mnist_kernel(p1_ref, w1_ref, b1_ref, w2_ref, b2_ref,
                        g3_ref, w3_ref, b3_ref,
                        g4_ref, w4_ref, b4_ref, out_ref):
    f32, bf16 = jnp.float32, jnp.bfloat16

    def leaky(y):  # f32 elementwise
        return jnp.where(y > 0, y, LEAKY_SLOPE * y)

    # Layers 1+2: one wide matmul each.  The 9 conv-2 taps live side by side on
    # the lane axis (block-diagonal W1), so layer 2 is a single K=288 matmul.
    p = p1_ref[...].astype(bf16)                                          # (Bt*P2, 81)
    a1 = jnp.dot(p, w1_ref[...], preferred_element_type=f32)             # (Bt*P2, 288)
    a1 = leaky(a1 + b1_ref[...])
    a2 = jnp.dot(a1.astype(bf16), w2_ref[...], preferred_element_type=f32)  # (Bt*P2, 64)
    a2 = leaky(a2 + b2_ref[...]).astype(bf16)

    n_taps = g3_ref.shape[0]

    # Layer 3: 9 taps; block-diagonal 0/1 gather (exact) + shared-weight matmul.
    m3 = g3_ref.shape[1]
    acc3 = [jnp.zeros((m3, w3_ref.shape[2]), f32) for _ in range(2)]
    for kk in range(n_taps):  # static unroll
        gath = jnp.dot(g3_ref[kk], a2, preferred_element_type=f32).astype(bf16)   # (Bt*P3, 64)
        acc3[kk % 2] = acc3[kk % 2] + jnp.dot(gath, w3_ref[kk],
                                              preferred_element_type=f32)
    a3 = leaky(acc3[0] + acc3[1] + b3_ref[...]).astype(bf16)              # (Bt*P3, 128)

    # Layer 4 with the spatial mean folded into the gather (rows are 0 / 0.25):
    # directly produces one lane-dense logits row per image.
    m4 = g4_ref.shape[1]
    acc4 = [jnp.zeros((m4, w4_ref.shape[2]), f32) for _ in range(2)]
    for kk in range(n_taps):
        gath = jnp.dot(g4_ref[kk], a3, preferred_element_type=f32).astype(bf16)   # (Bt, 128)
        acc4[kk % 2] = acc4[kk % 2] + jnp.dot(gath, w4_ref[kk],
                                              preferred_element_type=f32)
    out_ref[...] = (acc4[0] + acc4[1] + b4_ref[...]).astype(out_ref.dtype)  # (Bt, 128)


# ----------------------------------------------------------------------------
# Wrapper
# ----------------------------------------------------------------------------
def mnist_model_forward(x_nchw, params, block_b=BLOCK_B):
    """x_nchw: (B, 1, 28, 28) float32 -> logits (B, 10)."""
    B, cin0, H, W = x_nchw.shape
    assert cin0 == 1
    (w1, b1), (w2, b2), (w3, b3), (w4, b4) = params
    k = K
    n_classes = w4.shape[0]
    bf16, f32 = jnp.bfloat16, jnp.float32

    Bt = block_b
    Bpad = ((B + Bt - 1) // Bt) * Bt
    n_steps = Bpad // Bt

    # ---- fused layer-1/2 im2col: one constant-index gather (done by XLA) -----
    idx, H2, W2 = _layer12_patch_index(H, W, k)
    P2 = H2 * W2
    p1 = x_nchw.reshape(B, H * W)[:, idx]                     # (B, P2, 81)
    p1 = p1.reshape(B * P2, k ** 4)                           # rows image-major
    if Bpad != B:
        p1 = jnp.pad(p1, ((0, (Bpad - B) * P2), (0, 0)))

    # ---- weights in matmul form (tap-major), bf16 for the MXU -----------------
    c1, c2, c3 = w1.shape[0], w2.shape[0], w3.shape[0]
    w1m = jnp.transpose(w1, (2, 3, 1, 0)).reshape(k * k, c1)                     # (9, 32)
    w1b = jnp.kron(jnp.eye(k * k, dtype=f32), w1m).astype(bf16)                  # (81, 288)
    w2r = jnp.transpose(w2, (2, 3, 1, 0)).reshape(k * k * w2.shape[1], c2).astype(bf16)   # (288, 64)
    w3m = jnp.transpose(w3, (2, 3, 1, 0)).reshape(k * k, w3.shape[1], c3).astype(bf16)    # (9, 64, 128)
    w4m = jnp.transpose(w4, (2, 3, 1, 0)).reshape(k * k, w4.shape[1], n_classes)
    w4m = jnp.pad(w4m, ((0, 0), (0, 0), (0, C_PAD - n_classes))).astype(bf16)             # (9, 128, 128)

    b1t = jnp.tile(b1, k * k).reshape(1, -1).astype(f32)      # (1, 288)
    b2m = b2.reshape(1, -1).astype(f32)
    b3m = b3.reshape(1, -1).astype(f32)
    b4m = jnp.pad(b4, (0, C_PAD - n_classes)).reshape(1, C_PAD).astype(f32)

    # ---- constant gathers (layers 3/4), block-diagonal over the Bt images -----
    g3_np, H3, W3 = _gather_mats(H2, W2, k, 1)                # (9, 16, 36)
    g4_np, _, _ = _gather_mats(H3, W3, k, 1)                  # (9, 4, 16)
    g4m_np = g4_np.mean(axis=1, keepdims=True)                # (9, 1, 16): mean folded in (exact)
    P3 = H3 * W3
    eye_b = np.eye(Bt, dtype=np.float32)
    g3b = jnp.asarray(np.stack([np.kron(eye_b, g3_np[kk]) for kk in range(k * k)]),
                      dtype=bf16)                             # (9, Bt*16, Bt*36)
    g4b = jnp.asarray(np.stack([np.kron(eye_b, g4m_np[kk]) for kk in range(k * k)]),
                      dtype=bf16)                             # (9, Bt, Bt*16)

    # ---- cost estimate --------------------------------------------------------
    M2, M3, M4 = Bt * P2, Bt * P3, Bt
    flops_step = (2 * M2 * (k ** 4) * (k * k * c1)            # layer 1 (block-diag)
                  + 2 * M2 * (k * k * c1) * c2                # layer 2 (wide-K)
                  + k * k * (2 * M3 * M2 * c2 + 2 * M3 * c2 * c3)
                  + k * k * (2 * M4 * M3 * c3 + 2 * M4 * c3 * C_PAD))
    const_bytes = 2 * (w1b.size + w2r.size + w3m.size + w4m.size + g3b.size + g4b.size) \
        + 4 * (b1t.size + b2m.size + b3m.size + b4m.size)
    bytes_accessed = 4 * p1.size + const_bytes + 4 * Bpad * C_PAD

    out = pl.pallas_call(
        _fused_mnist_kernel,
        out_shape=jax.ShapeDtypeStruct((Bpad, C_PAD), jnp.float32),
        grid=(n_steps,),
        in_specs=[
            pl.BlockSpec((Bt * P2, k ** 4), lambda i: (i, 0)),   # per-block patches
            pl.BlockSpec(w1b.shape, lambda i: (0, 0)),           # VMEM-resident constants
            pl.BlockSpec(b1t.shape, lambda i: (0, 0)),
            pl.BlockSpec(w2r.shape, lambda i: (0, 0)),
            pl.BlockSpec(b2m.shape, lambda i: (0, 0)),
            pl.BlockSpec(g3b.shape, lambda i: (0, 0, 0)),
            pl.BlockSpec(w3m.shape, lambda i: (0, 0, 0)),
            pl.BlockSpec(b3m.shape, lambda i: (0, 0)),
            pl.BlockSpec(g4b.shape, lambda i: (0, 0, 0)),
            pl.BlockSpec(w4m.shape, lambda i: (0, 0, 0)),
            pl.BlockSpec(b4m.shape, lambda i: (0, 0)),
        ],
        out_specs=pl.BlockSpec((Bt, C_PAD), lambda i: (i, 0)),   # full (8,128) unmasked store
        compiler_params=pltpu.CompilerParams(
            dimension_semantics=("parallel",),
            vmem_limit_bytes=16 * 1024 * 1024),
        cost_estimate=pl.CostEstimate(
            flops=int(flops_step * n_steps), transcendentals=0,
            bytes_accessed=int(bytes_accessed)),
    )(p1, w1b, b1t, w2r, b2m, g3b, w3m, b3m, g4b, w4m, b4m)

    return out[:B, :n_classes]


# ----------------------------------------------------------------------------
# Parameters (PyTorch weight layout) and pure-XLA reference for self-checking
# ----------------------------------------------------------------------------
def init_params(key):
    specs = [(32, 1, 3, 3), (64, 32, 3, 3), (128, 64, 3, 3), (10, 128, 3, 3)]
    params = []
    for i, shape in enumerate(specs):
        kw, kb = jax.random.split(jax.random.fold_in(key, i))
        cout, cin, kh, kwid = shape
        fan_in = cin * kh * kwid
        w = jax.random.normal(kw, shape, dtype=jnp.float32) * (2.0 / fan_in) ** 0.5
        b = jax.random.normal(kb, (cout,), dtype=jnp.float32) * 0.01
        params.append((w, b))
    return params


def _reference_forward(x_nchw, params):
    strides = (2, 2, 1, 1)
    x = x_nchw
    for i, (w, b) in enumerate(params):
        x = lax.conv_general_dilated(
            x, w, window_strides=(strides[i],) * 2, padding="VALID",
            dimension_numbers=("NCHW", "OIHW", "NCHW"),
            precision=lax.Precision.HIGHEST)
        x = x + b.reshape(1, -1, 1, 1)
        if i < len(params) - 1:
            x = jnp.where(x > 0, x, LEAKY_SLOPE * x)
    return jnp.mean(x, axis=(2, 3))


if __name__ == "__main__":
    key = jax.random.PRNGKey(0)
    k_x, k_p = jax.random.split(key)
    # MNIST-shaped input: batch=2, 1 channel, 28x28 (NCHW, matching PyTorch).
    x = jax.random.normal(k_x, (2, 1, 28, 28), dtype=jnp.float32)
    params = init_params(k_p)

    out = jax.jit(mnist_model_forward)(x, params)
    out = jax.block_until_ready(out)
    assert out.shape == (2, 10), out.shape
    assert out.dtype == jnp.float32

    # bf16 matmul operands (f32 accumulation) drift ~1e-3..1e-2 vs the f32 reference.
    ref = _reference_forward(x, params)
    err = float(jnp.max(jnp.abs(out - ref)))
    assert jnp.allclose(out, ref, atol=5e-2, rtol=5e-2), err
    print("KERNEL_OK")
</pallas_src>

<mosaic_0001>
module attributes {stable_mosaic.version = 11 : i64} {
  func.func @_fused_mnist_kernel(%arg0: i32, %arg1: memref<288x81xf32, #tpu.memory_space<vmem>>, %arg2: memref<81x288xbf16, #tpu.memory_space<vmem>>, %arg3: memref<1x288xf32, #tpu.memory_space<vmem>>, %arg4: memref<288x64xbf16, #tpu.memory_space<vmem>>, %arg5: memref<1x64xf32, #tpu.memory_space<vmem>>, %arg6: memref<9x128x288xbf16, #tpu.memory_space<vmem>>, %arg7: memref<9x64x128xbf16, #tpu.memory_space<vmem>>, %arg8: memref<1x128xf32, #tpu.memory_space<vmem>>, %arg9: memref<9x8x128xbf16, #tpu.memory_space<vmem>>, %arg10: memref<9x128x128xbf16, #tpu.memory_space<vmem>>, %arg11: memref<1x128xf32, #tpu.memory_space<vmem>>, %arg12: memref<8x128xf32, #tpu.memory_space<vmem>>) attributes {dimension_semantics = [#tpu.dimension_semantics<parallel>], iteration_bounds = array<i64: 1>, scalar_prefetch = 0 : i64, scratch_operands = 0 : i64, tpu.core_type = #tpu.core_type<tc>, window_params = [{transform_indices = @transform_0, window_bounds = array<i64: 288, 81>}, {pipeline_mode = #tpu.pipeline_mode<synchronous>, transform_indices = @transform_1, window_bounds = array<i64: 81, 288>}, {pipeline_mode = #tpu.pipeline_mode<synchronous>, transform_indices = @transform_2, window_bounds = array<i64: 1, 288>}, {pipeline_mode = #tpu.pipeline_mode<synchronous>, transform_indices = @transform_3, window_bounds = array<i64: 288, 64>}, {pipeline_mode = #tpu.pipeline_mode<synchronous>, transform_indices = @transform_4, window_bounds = array<i64: 1, 64>}, {pipeline_mode = #tpu.pipeline_mode<synchronous>, transform_indices = @transform_5, window_bounds = array<i64: 9, 128, 288>}, {pipeline_mode = #tpu.pipeline_mode<synchronous>, transform_indices = @transform_6, window_bounds = array<i64: 9, 64, 128>}, {pipeline_mode = #tpu.pipeline_mode<synchronous>, transform_indices = @transform_7, window_bounds = array<i64: 1, 128>}, {pipeline_mode = #tpu.pipeline_mode<synchronous>, transform_indices = @transform_8, window_bounds = array<i64: 9, 8, 128>}, {pipeline_mode = #tpu.pipeline_mode<synchronous>, transform_indices = @transform_9, window_bounds = array<i64: 9, 128, 128>}, {pipeline_mode = #tpu.pipeline_mode<synchronous>, transform_indices = @transform_10, window_bounds = array<i64: 1, 128>}, {transform_indices = @transform_11, window_bounds = array<i64: 8, 128>}]} {
    %c0 = arith.constant 0 : index
    %c0_0 = arith.constant 0 : index
    %0 = vector.load %arg1[%c0, %c0_0] : memref<288x81xf32, #tpu.memory_space<vmem>>, vector<288x81xf32>
    %1 = arith.truncf %0 : vector<288x81xf32> to vector<288x81xbf16>
    %c0_1 = arith.constant 0 : index
    %c0_2 = arith.constant 0 : index
    %2 = vector.load %arg2[%c0_1, %c0_2] : memref<81x288xbf16, #tpu.memory_space<vmem>>, vector<81x288xbf16>
    %cst = arith.constant dense<0.000000e+00> : vector<288x288xf32>
    %3 = tpu.matmul %1, %2, %cst {dimension_numbers = #tpu.dot_dimension_numbers<[1], [0], [0], [1], [0, 0, 1, 1], [], []>} : vector<288x81xbf16>, vector<81x288xbf16>, vector<288x288xf32> -> vector<288x288xf32>
    %c0_3 = arith.constant 0 : index
    %c0_4 = arith.constant 0 : index
    %4 = vector.load %arg3[%c0_3, %c0_4] : memref<1x288xf32, #tpu.memory_space<vmem>>, vector<1x288xf32>
    %5 = vector.broadcast %4 : vector<1x288xf32> to vector<288x288xf32>
    %6 = arith.addf %3, %5 : vector<288x288xf32>
    %cst_5 = arith.constant 0.000000e+00 : f32
    %7 = vector.broadcast %cst_5 : f32 to vector<288x288xf32>
    %8 = arith.cmpf ogt, %6, %7 : vector<288x288xf32>
    %cst_6 = arith.constant 0.00999999977 : f32
    %9 = vector.broadcast %cst_6 : f32 to vector<288x288xf32>
    %10 = arith.mulf %9, %6 : vector<288x288xf32>
    %11 = arith.select %8, %6, %10 : vector<288x288xi1>, vector<288x288xf32>
    %12 = arith.truncf %11 : vector<288x288xf32> to vector<288x288xbf16>
    %c0_7 = arith.constant 0 : index
    %c0_8 = arith.constant 0 : index
    %13 = vector.load %arg4[%c0_7, %c0_8] : memref<288x64xbf16, #tpu.memory_space<vmem>>, vector<288x64xbf16>
    %cst_9 = arith.constant dense<0.000000e+00> : vector<288x64xf32>
    %14 = tpu.matmul %12, %13, %cst_9 {dimension_numbers = #tpu.dot_dimension_numbers<[1], [0], [0], [1], [0, 0, 1, 1], [], []>} : vector<288x288xbf16>, vector<288x64xbf16>, vector<288x64xf32> -> vector<288x64xf32>
    %c0_10 = arith.constant 0 : index
    %c0_11 = arith.constant 0 : index
    %15 = vector.load %arg5[%c0_10, %c0_11] : memref<1x64xf32, #tpu.memory_space<vmem>>, vector<1x64xf32>
    %16 = vector.broadcast %15 : vector<1x64xf32> to vector<288x64xf32>
    %17 = arith.addf %14, %16 : vector<288x64xf32>
    %cst_12 = arith.constant 0.000000e+00 : f32
    %18 = vector.broadcast %cst_12 : f32 to vector<288x64xf32>
    %19 = arith.cmpf ogt, %17, %18 : vector<288x64xf32>
    %cst_13 = arith.constant 0.00999999977 : f32
    %20 = vector.broadcast %cst_13 : f32 to vector<288x64xf32>
    %21 = arith.mulf %20, %17 : vector<288x64xf32>
    %22 = arith.select %19, %17, %21 : vector<288x64xi1>, vector<288x64xf32>
    %23 = arith.truncf %22 : vector<288x64xf32> to vector<288x64xbf16>
    %cst_14 = arith.constant 0.000000e+00 : f32
    %24 = vector.broadcast %cst_14 : f32 to vector<128x128xf32>
    %cst_15 = arith.constant 0.000000e+00 : f32
    %25 = vector.broadcast %cst_15 : f32 to vector<128x128xf32>
    %c0_16 = arith.constant 0 : index
    %c0_17 = arith.constant 0 : index
    %c0_18 = arith.constant 0 : index
    %26 = vector.load %arg6[%c0_16, %c0_17, %c0_18] : memref<9x128x288xbf16, #tpu.memory_space<vmem>>, vector<1x128x288xbf16>
    %27 = vector.shape_cast %26 : vector<1x128x288xbf16> to vector<128x288xbf16>
    %cst_19 = arith.constant dense<0.000000e+00> : vector<128x64xf32>
    %28 = tpu.matmul %27, %23, %cst_19 {dimension_numbers = #tpu.dot_dimension_numbers<[1], [0], [0], [1], [0, 0, 1, 1], [], []>} : vector<128x288xbf16>, vector<288x64xbf16>, vector<128x64xf32> -> vector<128x64xf32>
    %29 = arith.truncf %28 : vector<128x64xf32> to vector<128x64xbf16>
    %c0_20 = arith.constant 0 : index
    %c0_21 = arith.constant 0 : index
    %c0_22 = arith.constant 0 : index
    %30 = vector.load %arg7[%c0_20, %c0_21, %c0_22] : memref<9x64x128xbf16, #tpu.memory_space<vmem>>, vector<1x64x128xbf16>
    %31 = vector.shape_cast %30 : vector<1x64x128xbf16> to vector<64x128xbf16>
    %cst_23 = arith.constant dense<0.000000e+00> : vector<128x128xf32>
    %32 = tpu.matmul %29, %31, %cst_23 {dimension_numbers = #tpu.dot_dimension_numbers<[1], [0], [0], [1], [0, 0, 1, 1], [], []>} : vector<128x64xbf16>, vector<64x128xbf16>, vector<128x128xf32> -> vector<128x128xf32>
    %33 = arith.addf %24, %32 : vector<128x128xf32>
    %c1 = arith.constant 1 : index
    %c0_24 = arith.constant 0 : index
    %c0_25 = arith.constant 0 : index
    %34 = vector.load %arg6[%c1, %c0_24, %c0_25] : memref<9x128x288xbf16, #tpu.memory_space<vmem>>, vector<1x128x288xbf16>
    %35 = vector.shape_cast %34 : vector<1x128x288xbf16> to vector<128x288xbf16>
    %cst_26 = arith.constant dense<0.000000e+00> : vector<128x64xf32>
    %36 = tpu.matmul %35, %23, %cst_26 {dimension_numbers = #tpu.dot_dimension_numbers<[1], [0], [0], [1], [0, 0, 1, 1], [], []>} : vector<128x288xbf16>, vector<288x64xbf16>, vector<128x64xf32> -> vector<128x64xf32>
    %37 = arith.truncf %36 : vector<128x64xf32> to vector<128x64xbf16>
    %c1_27 = arith.constant 1 : index
    %c0_28 = arith.constant 0 : index
    %c0_29 = arith.constant 0 : index
    %38 = vector.load %arg7[%c1_27, %c0_28, %c0_29] : memref<9x64x128xbf16, #tpu.memory_space<vmem>>, vector<1x64x128xbf16>
    %39 = vector.shape_cast %38 : vector<1x64x128xbf16> to vector<64x128xbf16>
    %cst_30 = arith.constant dense<0.000000e+00> : vector<128x128xf32>
    %40 = tpu.matmul %37, %39, %cst_30 {dimension_numbers = #tpu.dot_dimension_numbers<[1], [0], [0], [1], [0, 0, 1, 1], [], []>} : vector<128x64xbf16>, vector<64x128xbf16>, vector<128x128xf32> -> vector<128x128xf32>
    %41 = arith.addf %25, %40 : vector<128x128xf32>
    %c2 = arith.constant 2 : index
    %c0_31 = arith.constant 0 : index
    %c0_32 = arith.constant 0 : index
    %42 = vector.load %arg6[%c2, %c0_31, %c0_32] : memref<9x128x288xbf16, #tpu.memory_space<vmem>>, vector<1x128x288xbf16>
    %43 = vector.shape_cast %42 : vector<1x128x288xbf16> to vector<128x288xbf16>
    %cst_33 = arith.constant dense<0.000000e+00> : vector<128x64xf32>
    %44 = tpu.matmul %43, %23, %cst_33 {dimension_numbers = #tpu.dot_dimension_numbers<[1], [0], [0], [1], [0, 0, 1, 1], [], []>} : vector<128x288xbf16>, vector<288x64xbf16>, vector<128x64xf32> -> vector<128x64xf32>
    %45 = arith.truncf %44 : vector<128x64xf32> to vector<128x64xbf16>
    %c2_34 = arith.constant 2 : index
    %c0_35 = arith.constant 0 : index
    %c0_36 = arith.constant 0 : index
    %46 = vector.load %arg7[%c2_34, %c0_35, %c0_36] : memref<9x64x128xbf16, #tpu.memory_space<vmem>>, vector<1x64x128xbf16>
    %47 = vector.shape_cast %46 : vector<1x64x128xbf16> to vector<64x128xbf16>
    %cst_37 = arith.constant dense<0.000000e+00> : vector<128x128xf32>
    %48 = tpu.matmul %45, %47, %cst_37 {dimension_numbers = #tpu.dot_dimension_numbers<[1], [0], [0], [1], [0, 0, 1, 1], [], []>} : vector<128x64xbf16>, vector<64x128xbf16>, vector<128x128xf32> -> vector<128x128xf32>
    %49 = arith.addf %33, %48 : vector<128x128xf32>
    %c3 = arith.constant 3 : index
    %c0_38 = arith.constant 0 : index
    %c0_39 = arith.constant 0 : index
    %50 = vector.load %arg6[%c3, %c0_38, %c0_39] : memref<9x128x288xbf16, #tpu.memory_space<vmem>>, vector<1x128x288xbf16>
    %51 = vector.shape_cast %50 : vector<1x128x288xbf16> to vector<128x288xbf16>
    %cst_40 = arith.constant dense<0.000000e+00> : vector<128x64xf32>
    %52 = tpu.matmul %51, %23, %cst_40 {dimension_numbers = #tpu.dot_dimension_numbers<[1], [0], [0], [1], [0, 0, 1, 1], [], []>} : vector<128x288xbf16>, vector<288x64xbf16>, vector<128x64xf32> -> vector<128x64xf32>
    %53 = arith.truncf %52 : vector<128x64xf32> to vector<128x64xbf16>
    %c3_41 = arith.constant 3 : index
    %c0_42 = arith.constant 0 : index
    %c0_43 = arith.constant 0 : index
    %54 = vector.load %arg7[%c3_41, %c0_42, %c0_43] : memref<9x64x128xbf16, #tpu.memory_space<vmem>>, vector<1x64x128xbf16>
    %55 = vector.shape_cast %54 : vector<1x64x128xbf16> to vector<64x128xbf16>
    %cst_44 = arith.constant dense<0.000000e+00> : vector<128x128xf32>
    %56 = tpu.matmul %53, %55, %cst_44 {dimension_numbers = #tpu.dot_dimension_numbers<[1], [0], [0], [1], [0, 0, 1, 1], [], []>} : vector<128x64xbf16>, vector<64x128xbf16>, vector<128x128xf32> -> vector<128x128xf32>
    %57 = arith.addf %41, %56 : vector<128x128xf32>
    %c4 = arith.constant 4 : index
    %c0_45 = arith.constant 0 : index
    %c0_46 = arith.constant 0 : index
    %58 = vector.load %arg6[%c4, %c0_45, %c0_46] : memref<9x128x288xbf16, #tpu.memory_space<vmem>>, vector<1x128x288xbf16>
    %59 = vector.shape_cast %58 : vector<1x128x288xbf16> to vector<128x288xbf16>
    %cst_47 = arith.constant dense<0.000000e+00> : vector<128x64xf32>
    %60 = tpu.matmul %59, %23, %cst_47 {dimension_numbers = #tpu.dot_dimension_numbers<[1], [0], [0], [1], [0, 0, 1, 1], [], []>} : vector<128x288xbf16>, vector<288x64xbf16>, vector<128x64xf32> -> vector<128x64xf32>
    %61 = arith.truncf %60 : vector<128x64xf32> to vector<128x64xbf16>
    %c4_48 = arith.constant 4 : index
    %c0_49 = arith.constant 0 : index
    %c0_50 = arith.constant 0 : index
    %62 = vector.load %arg7[%c4_48, %c0_49, %c0_50] : memref<9x64x128xbf16, #tpu.memory_space<vmem>>, vector<1x64x128xbf16>
    %63 = vector.shape_cast %62 : vector<1x64x128xbf16> to vector<64x128xbf16>
    %cst_51 = arith.constant dense<0.000000e+00> : vector<128x128xf32>
    %64 = tpu.matmul %61, %63, %cst_51 {dimension_numbers = #tpu.dot_dimension_numbers<[1], [0], [0], [1], [0, 0, 1, 1], [], []>} : vector<128x64xbf16>, vector<64x128xbf16>, vector<128x128xf32> -> vector<128x128xf32>
    %65 = arith.addf %49, %64 : vector<128x128xf32>
    %c5 = arith.constant 5 : index
    %c0_52 = arith.constant 0 : index
    %c0_53 = arith.constant 0 : index
    %66 = vector.load %arg6[%c5, %c0_52, %c0_53] : memref<9x128x288xbf16, #tpu.memory_space<vmem>>, vector<1x128x288xbf16>
    %67 = vector.shape_cast %66 : vector<1x128x288xbf16> to vector<128x288xbf16>
    %cst_54 = arith.constant dense<0.000000e+00> : vector<128x64xf32>
    %68 = tpu.matmul %67, %23, %cst_54 {dimension_numbers = #tpu.dot_dimension_numbers<[1], [0], [0], [1], [0, 0, 1, 1], [], []>} : vector<128x288xbf16>, vector<288x64xbf16>, vector<128x64xf32> -> vector<128x64xf32>
    %69 = arith.truncf %68 : vector<128x64xf32> to vector<128x64xbf16>
    %c5_55 = arith.constant 5 : index
    %c0_56 = arith.constant 0 : index
    %c0_57 = arith.constant 0 : index
    %70 = vector.load %arg7[%c5_55, %c0_56, %c0_57] : memref<9x64x128xbf16, #tpu.memory_space<vmem>>, vector<1x64x128xbf16>
    %71 = vector.shape_cast %70 : vector<1x64x128xbf16> to vector<64x128xbf16>
    %cst_58 = arith.constant dense<0.000000e+00> : vector<128x128xf32>
    %72 = tpu.matmul %69, %71, %cst_58 {dimension_numbers = #tpu.dot_dimension_numbers<[1], [0], [0], [1], [0, 0, 1, 1], [], []>} : vector<128x64xbf16>, vector<64x128xbf16>, vector<128x128xf32> -> vector<128x128xf32>
    %73 = arith.addf %57, %72 : vector<128x128xf32>
    %c6 = arith.constant 6 : index
    %c0_59 = arith.constant 0 : index
    %c0_60 = arith.constant 0 : index
    %74 = vector.load %arg6[%c6, %c0_59, %c0_60] : memref<9x128x288xbf16, #tpu.memory_space<vmem>>, vector<1x128x288xbf16>
    %75 = vector.shape_cast %74 : vector<1x128x288xbf16> to vector<128x288xbf16>
    %cst_61 = arith.constant dense<0.000000e+00> : vector<128x64xf32>
    %76 = tpu.matmul %75, %23, %cst_61 {dimension_numbers = #tpu.dot_dimension_numbers<[1], [0], [0], [1], [0, 0, 1, 1], [], []>} : vector<128x288xbf16>, vector<288x64xbf16>, vector<128x64xf32> -> vector<128x64xf32>
    %77 = arith.truncf %76 : vector<128x64xf32> to vector<128x64xbf16>
    %c6_62 = arith.constant 6 : index
    %c0_63 = arith.constant 0 : index
    %c0_64 = arith.constant 0 : index
    %78 = vector.load %arg7[%c6_62, %c0_63, %c0_64] : memref<9x64x128xbf16, #tpu.memory_space<vmem>>, vector<1x64x128xbf16>
    %79 = vector.shape_cast %78 : vector<1x64x128xbf16> to vector<64x128xbf16>
    %cst_65 = arith.constant dense<0.000000e+00> : vector<128x128xf32>
    %80 = tpu.matmul %77, %79, %cst_65 {dimension_numbers = #tpu.dot_dimension_numbers<[1], [0], [0], [1], [0, 0, 1, 1], [], []>} : vector<128x64xbf16>, vector<64x128xbf16>, vector<128x128xf32> -> vector<128x128xf32>
    %81 = arith.addf %65, %80 : vector<128x128xf32>
    %c7 = arith.constant 7 : index
    %c0_66 = arith.constant 0 : index
    %c0_67 = arith.constant 0 : index
    %82 = vector.load %arg6[%c7, %c0_66, %c0_67] : memref<9x128x288xbf16, #tpu.memory_space<vmem>>, vector<1x128x288xbf16>
    %83 = vector.shape_cast %82 : vector<1x128x288xbf16> to vector<128x288xbf16>
    %cst_68 = arith.constant dense<0.000000e+00> : vector<128x64xf32>
    %84 = tpu.matmul %83, %23, %cst_68 {dimension_numbers = #tpu.dot_dimension_numbers<[1], [0], [0], [1], [0, 0, 1, 1], [], []>} : vector<128x288xbf16>, vector<288x64xbf16>, vector<128x64xf32> -> vector<128x64xf32>
    %85 = arith.truncf %84 : vector<128x64xf32> to vector<128x64xbf16>
    %c7_69 = arith.constant 7 : index
    %c0_70 = arith.constant 0 : index
    %c0_71 = arith.constant 0 : index
    %86 = vector.load %arg7[%c7_69, %c0_70, %c0_71] : memref<9x64x128xbf16, #tpu.memory_space<vmem>>, vector<1x64x128xbf16>
    %87 = vector.shape_cast %86 : vector<1x64x128xbf16> to vector<64x128xbf16>
    %cst_72 = arith.constant dense<0.000000e+00> : vector<128x128xf32>
    %88 = tpu.matmul %85, %87, %cst_72 {dimension_numbers = #tpu.dot_dimension_numbers<[1], [0], [0], [1], [0, 0, 1, 1], [], []>} : vector<128x64xbf16>, vector<64x128xbf16>, vector<128x128xf32> -> vector<128x128xf32>
    %89 = arith.addf %73, %88 : vector<128x128xf32>
    %c8 = arith.constant 8 : index
    %c0_73 = arith.constant 0 : index
    %c0_74 = arith.constant 0 : index
    %90 = vector.load %arg6[%c8, %c0_73, %c0_74] : memref<9x128x288xbf16, #tpu.memory_space<vmem>>, vector<1x128x288xbf16>
    %91 = vector.shape_cast %90 : vector<1x128x288xbf16> to vector<128x288xbf16>
    %cst_75 = arith.constant dense<0.000000e+00> : vector<128x64xf32>
    %92 = tpu.matmul %91, %23, %cst_75 {dimension_numbers = #tpu.dot_dimension_numbers<[1], [0], [0], [1], [0, 0, 1, 1], [], []>} : vector<128x288xbf16>, vector<288x64xbf16>, vector<128x64xf32> -> vector<128x64xf32>
    %93 = arith.truncf %92 : vector<128x64xf32> to vector<128x64xbf16>
    %c8_76 = arith.constant 8 : index
    %c0_77 = arith.constant 0 : index
    %c0_78 = arith.constant 0 : index
    %94 = vector.load %arg7[%c8_76, %c0_77, %c0_78] : memref<9x64x128xbf16, #tpu.memory_space<vmem>>, vector<1x64x128xbf16>
    %95 = vector.shape_cast %94 : vector<1x64x128xbf16> to vector<64x128xbf16>
    %cst_79 = arith.constant dense<0.000000e+00> : vector<128x128xf32>
    %96 = tpu.matmul %93, %95, %cst_79 {dimension_numbers = #tpu.dot_dimension_numbers<[1], [0], [0], [1], [0, 0, 1, 1], [], []>} : vector<128x64xbf16>, vector<64x128xbf16>, vector<128x128xf32> -> vector<128x128xf32>
    %97 = arith.addf %81, %96 : vector<128x128xf32>
    %98 = arith.addf %97, %89 : vector<128x128xf32>
    %c0_80 = arith.constant 0 : index
    %c0_81 = arith.constant 0 : index
    %99 = vector.load %arg8[%c0_80, %c0_81] : memref<1x128xf32, #tpu.memory_space<vmem>>, vector<1x128xf32>
    %100 = vector.broadcast %99 : vector<1x128xf32> to vector<128x128xf32>
    %101 = arith.addf %98, %100 : vector<128x128xf32>
    %cst_82 = arith.constant 0.000000e+00 : f32
    %102 = vector.broadcast %cst_82 : f32 to vector<128x128xf32>
    %103 = arith.cmpf ogt, %101, %102 : vector<128x128xf32>
    %cst_83 = arith.constant 0.00999999977 : f32
    %104 = vector.broadcast %cst_83 : f32 to vector<128x128xf32>
    %105 = arith.mulf %104, %101 : vector<128x128xf32>
    %106 = arith.select %103, %101, %105 : vector<128x128xi1>, vector<128x128xf32>
    %107 = arith.truncf %106 : vector<128x128xf32> to vector<128x128xbf16>
    %cst_84 = arith.constant 0.000000e+00 : f32
    %108 = vector.broadcast %cst_84 : f32 to vector<8x128xf32>
    %cst_85 = arith.constant 0.000000e+00 : f32
    %109 = vector.broadcast %cst_85 : f32 to vector<8x128xf32>
    %c0_86 = arith.constant 0 : index
    %c0_87 = arith.constant 0 : index
    %c0_88 = arith.constant 0 : index
    %110 = vector.load %arg9[%c0_86, %c0_87, %c0_88] : memref<9x8x128xbf16, #tpu.memory_space<vmem>>, vector<1x8x128xbf16>
    %111 = vector.shape_cast %110 : vector<1x8x128xbf16> to vector<8x128xbf16>
    %cst_89 = arith.constant dense<0.000000e+00> : vector<8x128xf32>
    %112 = tpu.matmul %111, %107, %cst_89 {dimension_numbers = #tpu.dot_dimension_numbers<[1], [0], [0], [1], [0, 0, 1, 1], [], []>} : vector<8x128xbf16>, vector<128x128xbf16>, vector<8x128xf32> -> vector<8x128xf32>
    %113 = arith.truncf %112 : vector<8x128xf32> to vector<8x128xbf16>
    %c0_90 = arith.constant 0 : index
    %c0_91 = arith.constant 0 : index
    %c0_92 = arith.constant 0 : index
    %114 = vector.load %arg10[%c0_90, %c0_91, %c0_92] : memref<9x128x128xbf16, #tpu.memory_space<vmem>>, vector<1x128x128xbf16>
    %115 = vector.shape_cast %114 : vector<1x128x128xbf16> to vector<128x128xbf16>
    %cst_93 = arith.constant dense<0.000000e+00> : vector<8x128xf32>
    %116 = tpu.matmul %113, %115, %cst_93 {dimension_numbers = #tpu.dot_dimension_numbers<[1], [0], [0], [1], [0, 0, 1, 1], [], []>} : vector<8x128xbf16>, vector<128x128xbf16>, vector<8x128xf32> -> vector<8x128xf32>
    %117 = arith.addf %108, %116 : vector<8x128xf32>
    %c1_94 = arith.constant 1 : index
    %c0_95 = arith.constant 0 : index
    %c0_96 = arith.constant 0 : index
    %118 = vector.load %arg9[%c1_94, %c0_95, %c0_96] : memref<9x8x128xbf16, #tpu.memory_space<vmem>>, vector<1x8x128xbf16>
    %119 = vector.shape_cast %118 : vector<1x8x128xbf16> to vector<8x128xbf16>
    %cst_97 = arith.constant dense<0.000000e+00> : vector<8x128xf32>
    %120 = tpu.matmul %119, %107, %cst_97 {dimension_numbers = #tpu.dot_dimension_numbers<[1], [0], [0], [1], [0, 0, 1, 1], [], []>} : vector<8x128xbf16>, vector<128x128xbf16>, vector<8x128xf32> -> vector<8x128xf32>
    %121 = arith.truncf %120 : vector<8x128xf32> to vector<8x128xbf16>
    %c1_98 = arith.constant 1 : index
    %c0_99 = arith.constant 0 : index
    %c0_100 = arith.constant 0 : index
    %122 = vector.load %arg10[%c1_98, %c0_99, %c0_100] : memref<9x128x128xbf16, #tpu.memory_space<vmem>>, vector<1x128x128xbf16>
    %123 = vector.shape_cast %122 : vector<1x128x128xbf16> to vector<128x128xbf16>
    %cst_101 = arith.constant dense<0.000000e+00> : vector<8x128xf32>
    %124 = tpu.matmul %121, %123, %cst_101 {dimension_numbers = #tpu.dot_dimension_numbers<[1], [0], [0], [1], [0, 0, 1, 1], [], []>} : vector<8x128xbf16>, vector<128x128xbf16>, vector<8x128xf32> -> vector<8x128xf32>
    %125 = arith.addf %109, %124 : vector<8x128xf32>
    %c2_102 = arith.constant 2 : index
    %c0_103 = arith.constant 0 : index
    %c0_104 = arith.constant 0 : index
    %126 = vector.load %arg9[%c2_102, %c0_103, %c0_104] : memref<9x8x128xbf16, #tpu.memory_space<vmem>>, vector<1x8x128xbf16>
    %127 = vector.shape_cast %126 : vector<1x8x128xbf16> to vector<8x128xbf16>
    %cst_105 = arith.constant dense<0.000000e+00> : vector<8x128xf32>
    %128 = tpu.matmul %127, %107, %cst_105 {dimension_numbers = #tpu.dot_dimension_numbers<[1], [0], [0], [1], [0, 0, 1, 1], [], []>} : vector<8x128xbf16>, vector<128x128xbf16>, vector<8x128xf32> -> vector<8x128xf32>
    %129 = arith.truncf %128 : vector<8x128xf32> to vector<8x128xbf16>
    %c2_106 = arith.constant 2 : index
    %c0_107 = arith.constant 0 : index
    %c0_108 = arith.constant 0 : index
    %130 = vector.load %arg10[%c2_106, %c0_107, %c0_108] : memref<9x128x128xbf16, #tpu.memory_space<vmem>>, vector<1x128x128xbf16>
    %131 = vector.shape_cast %130 : vector<1x128x128xbf16> to vector<128x128xbf16>
    %cst_109 = arith.constant dense<0.000000e+00> : vector<8x128xf32>
    %132 = tpu.matmul %129, %131, %cst_109 {dimension_numbers = #tpu.dot_dimension_numbers<[1], [0], [0], [1], [0, 0, 1, 1], [], []>} : vector<8x128xbf16>, vector<128x128xbf16>, vector<8x128xf32> -> vector<8x128xf32>
    %133 = arith.addf %117, %132 : vector<8x128xf32>
    %c3_110 = arith.constant 3 : index
    %c0_111 = arith.constant 0 : index
    %c0_112 = arith.constant 0 : index
    %134 = vector.load %arg9[%c3_110, %c0_111, %c0_112] : memref<9x8x128xbf16, #tpu.memory_space<vmem>>, vector<1x8x128xbf16>
    %135 = vector.shape_cast %134 : vector<1x8x128xbf16> to vector<8x128xbf16>
    %cst_113 = arith.constant dense<0.000000e+00> : vector<8x128xf32>
    %136 = tpu.matmul %135, %107, %cst_113 {dimension_numbers = #tpu.dot_dimension_numbers<[1], [0], [0], [1], [0, 0, 1, 1], [], []>} : vector<8x128xbf16>, vector<128x128xbf16>, vector<8x128xf32> -> vector<8x128xf32>
    %137 = arith.truncf %136 : vector<8x128xf32> to vector<8x128xbf16>
    %c3_114 = arith.constant 3 : index
    %c0_115 = arith.constant 0 : index
    %c0_116 = arith.constant 0 : index
    %138 = vector.load %arg10[%c3_114, %c0_115, %c0_116] : memref<9x128x128xbf16, #tpu.memory_space<vmem>>, vector<1x128x128xbf16>
    %139 = vector.shape_cast %138 : vector<1x128x128xbf16> to vector<128x128xbf16>
    %cst_117 = arith.constant dense<0.000000e+00> : vector<8x128xf32>
    %140 = tpu.matmul %137, %139, %cst_117 {dimension_numbers = #tpu.dot_dimension_numbers<[1], [0], [0], [1], [0, 0, 1, 1], [], []>} : vector<8x128xbf16>, vector<128x128xbf16>, vector<8x128xf32> -> vector<8x128xf32>
    %141 = arith.addf %125, %140 : vector<8x128xf32>
    %c4_118 = arith.constant 4 : index
    %c0_119 = arith.constant 0 : index
    %c0_120 = arith.constant 0 : index
    %142 = vector.load %arg9[%c4_118, %c0_119, %c0_120] : memref<9x8x128xbf16, #tpu.memory_space<vmem>>, vector<1x8x128xbf16>
    %143 = vector.shape_cast %142 : vector<1x8x128xbf16> to vector<8x128xbf16>
    %cst_121 = arith.constant dense<0.000000e+00> : vector<8x128xf32>
    %144 = tpu.matmul %143, %107, %cst_121 {dimension_numbers = #tpu.dot_dimension_numbers<[1], [0], [0], [1], [0, 0, 1, 1], [], []>} : vector<8x128xbf16>, vector<128x128xbf16>, vector<8x128xf32> -> vector<8x128xf32>
    %145 = arith.truncf %144 : vector<8x128xf32> to vector<8x128xbf16>
    %c4_122 = arith.constant 4 : index
    %c0_123 = arith.constant 0 : index
    %c0_124 = arith.constant 0 : index
    %146 = vector.load %arg10[%c4_122, %c0_123, %c0_124] : memref<9x128x128xbf16, #tpu.memory_space<vmem>>, vector<1x128x128xbf16>
    %147 = vector.shape_cast %146 : vector<1x128x128xbf16> to vector<128x128xbf16>
    %cst_125 = arith.constant dense<0.000000e+00> : vector<8x128xf32>
    %148 = tpu.matmul %145, %147, %cst_125 {dimension_numbers = #tpu.dot_dimension_numbers<[1], [0], [0], [1], [0, 0, 1, 1], [], []>} : vector<8x128xbf16>, vector<128x128xbf16>, vector<8x128xf32> -> vector<8x128xf32>
    %149 = arith.addf %133, %148 : vector<8x128xf32>
    %c5_126 = arith.constant 5 : index
    %c0_127 = arith.constant 0 : index
    %c0_128 = arith.constant 0 : index
    %150 = vector.load %arg9[%c5_126, %c0_127, %c0_128] : memref<9x8x128xbf16, #tpu.memory_space<vmem>>, vector<1x8x128xbf16>
    %151 = vector.shape_cast %150 : vector<1x8x128xbf16> to vector<8x128xbf16>
    %cst_129 = arith.constant dense<0.000000e+00> : vector<8x128xf32>
    %152 = tpu.matmul %151, %107, %cst_129 {dimension_numbers = #tpu.dot_dimension_numbers<[1], [0], [0], [1], [0, 0, 1, 1], [], []>} : vector<8x128xbf16>, vector<128x128xbf16>, vector<8x128xf32> -> vector<8x128xf32>
    %153 = arith.truncf %152 : vector<8x128xf32> to vector<8x128xbf16>
    %c5_130 = arith.constant 5 : index
    %c0_131 = arith.constant 0 : index
    %c0_132 = arith.constant 0 : index
    %154 = vector.load %arg10[%c5_130, %c0_131, %c0_132] : memref<9x128x128xbf16, #tpu.memory_space<vmem>>, vector<1x128x128xbf16>
    %155 = vector.shape_cast %154 : vector<1x128x128xbf16> to vector<128x128xbf16>
    %cst_133 = arith.constant dense<0.000000e+00> : vector<8x128xf32>
    %156 = tpu.matmul %153, %155, %cst_133 {dimension_numbers = #tpu.dot_dimension_numbers<[1], [0], [0], [1], [0, 0, 1, 1], [], []>} : vector<8x128xbf16>, vector<128x128xbf16>, vector<8x128xf32> -> vector<8x128xf32>
    %157 = arith.addf %141, %156 : vector<8x128xf32>
    %c6_134 = arith.constant 6 : index
    %c0_135 = arith.constant 0 : index
    %c0_136 = arith.constant 0 : index
    %158 = vector.load %arg9[%c6_134, %c0_135, %c0_136] : memref<9x8x128xbf16, #tpu.memory_space<vmem>>, vector<1x8x128xbf16>
    %159 = vector.shape_cast %158 : vector<1x8x128xbf16> to vector<8x128xbf16>
    %cst_137 = arith.constant dense<0.000000e+00> : vector<8x128xf32>
    %160 = tpu.matmul %159, %107, %cst_137 {dimension_numbers = #tpu.dot_dimension_numbers<[1], [0], [0], [1], [0, 0, 1, 1], [], []>} : vector<8x128xbf16>, vector<128x128xbf16>, vector<8x128xf32> -> vector<8x128xf32>
    %161 = arith.truncf %160 : vector<8x128xf32> to vector<8x128xbf16>
    %c6_138 = arith.constant 6 : index
    %c0_139 = arith.constant 0 : index
    %c0_140 = arith.constant 0 : index
    %162 = vector.load %arg10[%c6_138, %c0_139, %c0_140] : memref<9x128x128xbf16, #tpu.memory_space<vmem>>, vector<1x128x128xbf16>
    %163 = vector.shape_cast %162 : vector<1x128x128xbf16> to vector<128x128xbf16>
    %cst_141 = arith.constant dense<0.000000e+00> : vector<8x128xf32>
    %164 = tpu.matmul %161, %163, %cst_141 {dimension_numbers = #tpu.dot_dimension_numbers<[1], [0], [0], [1], [0, 0, 1, 1], [], []>} : vector<8x128xbf16>, vector<128x128xbf16>, vector<8x128xf32> -> vector<8x128xf32>
    %165 = arith.addf %149, %164 : vector<8x128xf32>
    %c7_142 = arith.constant 7 : index
    %c0_143 = arith.constant 0 : index
    %c0_144 = arith.constant 0 : index
    %166 = vector.load %arg9[%c7_142, %c0_143, %c0_144] : memref<9x8x128xbf16, #tpu.memory_space<vmem>>, vector<1x8x128xbf16>
    %167 = vector.shape_cast %166 : vector<1x8x128xbf16> to vector<8x128xbf16>
    %cst_145 = arith.constant dense<0.000000e+00> : vector<8x128xf32>
    %168 = tpu.matmul %167, %107, %cst_145 {dimension_numbers = #tpu.dot_dimension_numbers<[1], [0], [0], [1], [0, 0, 1, 1], [], []>} : vector<8x128xbf16>, vector<128x128xbf16>, vector<8x128xf32> -> vector<8x128xf32>
    %169 = arith.truncf %168 : vector<8x128xf32> to vector<8x128xbf16>
    %c7_146 = arith.constant 7 : index
    %c0_147 = arith.constant 0 : index
    %c0_148 = arith.constant 0 : index
    %170 = vector.load %arg10[%c7_146, %c0_147, %c0_148] : memref<9x128x128xbf16, #tpu.memory_space<vmem>>, vector<1x128x128xbf16>
    %171 = vector.shape_cast %170 : vector<1x128x128xbf16> to vector<128x128xbf16>
    %cst_149 = arith.constant dense<0.000000e+00> : vector<8x128xf32>
    %172 = tpu.matmul %169, %171, %cst_149 {dimension_numbers = #tpu.dot_dimension_numbers<[1], [0], [0], [1], [0, 0, 1, 1], [], []>} : vector<8x128xbf16>, vector<128x128xbf16>, vector<8x128xf32> -> vector<8x128xf32>
    %173 = arith.addf %157, %172 : vector<8x128xf32>
    %c8_150 = arith.constant 8 : index
    %c0_151 = arith.constant 0 : index
    %c0_152 = arith.constant 0 : index
    %174 = vector.load %arg9[%c8_150, %c0_151, %c0_152] : memref<9x8x128xbf16, #tpu.memory_space<vmem>>, vector<1x8x128xbf16>
    %175 = vector.shape_cast %174 : vector<1x8x128xbf16> to vector<8x128xbf16>
    %cst_153 = arith.constant dense<0.000000e+00> : vector<8x128xf32>
    %176 = tpu.matmul %175, %107, %cst_153 {dimension_numbers = #tpu.dot_dimension_numbers<[1], [0], [0], [1], [0, 0, 1, 1], [], []>} : vector<8x128xbf16>, vector<128x128xbf16>, vector<8x128xf32> -> vector<8x128xf32>
    %177 = arith.truncf %176 : vector<8x128xf32> to vector<8x128xbf16>
    %c8_154 = arith.constant 8 : index
    %c0_155 = arith.constant 0 : index
    %c0_156 = arith.constant 0 : index
    %178 = vector.load %arg10[%c8_154, %c0_155, %c0_156] : memref<9x128x128xbf16, #tpu.memory_space<vmem>>, vector<1x128x128xbf16>
    %179 = vector.shape_cast %178 : vector<1x128x128xbf16> to vector<128x128xbf16>
    %cst_157 = arith.constant dense<0.000000e+00> : vector<8x128xf32>
    %180 = tpu.matmul %177, %179, %cst_157 {dimension_numbers = #tpu.dot_dimension_numbers<[1], [0], [0], [1], [0, 0, 1, 1], [], []>} : vector<8x128xbf16>, vector<128x128xbf16>, vector<8x128xf32> -> vector<8x128xf32>
    %181 = arith.addf %165, %180 : vector<8x128xf32>
    %182 = arith.addf %181, %173 : vector<8x128xf32>
    %c0_158 = arith.constant 0 : index
    %c0_159 = arith.constant 0 : index
    %183 = vector.load %arg11[%c0_158, %c0_159] : memref<1x128xf32, #tpu.memory_space<vmem>>, vector<1x128xf32>
    %184 = vector.broadcast %183 : vector<1x128xf32> to vector<8x128xf32>
    %185 = arith.addf %182, %184 : vector<8x128xf32>
    %c0_160 = arith.constant 0 : index
    %c0_161 = arith.constant 0 : index
    %186 = vector.load %arg12[%c0_160, %c0_161] : memref<8x128xf32, #tpu.memory_space<vmem>>, vector<8x128xf32>
    tpu.vector_store %arg12[%c0_160, %c0_161], %185 {strides = array<i32>} : memref<8x128xf32, #tpu.memory_space<vmem>>, vector<8x128xf32>,
    return
  }
  func.func @transform_0(%arg0: i32) -> (i32, i32) {
    %c0_i32 = arith.constant 0 : i32
    %c0_i32_0 = arith.constant 0 : i32
    return %arg0, %c0_i32 : i32, i32
  }
  func.func @transform_1(%arg0: i32) -> (i32, i32) {
    %c0_i32 = arith.constant 0 : i32
    %c0_i32_0 = arith.constant 0 : i32
    %c0_i32_1 = arith.constant 0 : i32
    return %c0_i32, %c0_i32_0 : i32, i32
  }
  func.func @transform_2(%arg0: i32) -> (i32, i32) {
    %c0_i32 = arith.constant 0 : i32
    %c0_i32_0 = arith.constant 0 : i32
    %c0_i32_1 = arith.constant 0 : i32
    return %c0_i32, %c0_i32_0 : i32, i32
  }
  func.func @transform_3(%arg0: i32) -> (i32, i32) {
    %c0_i32 = arith.constant 0 : i32
    %c0_i32_0 = arith.constant 0 : i32
    %c0_i32_1 = arith.constant 0 : i32
    return %c0_i32, %c0_i32_0 : i32, i32
  }
  func.func @transform_4(%arg0: i32) -> (i32, i32) {
    %c0_i32 = arith.constant 0 : i32
    %c0_i32_0 = arith.constant 0 : i32
    %c0_i32_1 = arith.constant 0 : i32
    return %c0_i32, %c0_i32_0 : i32, i32
  }
  func.func @transform_5(%arg0: i32) -> (i32, i32, i32) {
    %c0_i32 = arith.constant 0 : i32
    %c0_i32_0 = arith.constant 0 : i32
    %c0_i32_1 = arith.constant 0 : i32
    %c0_i32_2 = arith.constant 0 : i32
    return %c0_i32, %c0_i32_0, %c0_i32_1 : i32, i32, i32
  }
  func.func @transform_6(%arg0: i32) -> (i32, i32, i32) {
    %c0_i32 = arith.constant 0 : i32
    %c0_i32_0 = arith.constant 0 : i32
    %c0_i32_1 = arith.constant 0 : i32
    %c0_i32_2 = arith.constant 0 : i32
    return %c0_i32, %c0_i32_0, %c0_i32_1 : i32, i32, i32
  }
  func.func @transform_7(%arg0: i32) -> (i32, i32) {
    %c0_i32 = arith.constant 0 : i32
    %c0_i32_0 = arith.constant 0 : i32
    %c0_i32_1 = arith.constant 0 : i32
    return %c0_i32, %c0_i32_0 : i32, i32
  }
  func.func @transform_8(%arg0: i32) -> (i32, i32, i32) {
    %c0_i32 = arith.constant 0 : i32
    %c0_i32_0 = arith.constant 0 : i32
    %c0_i32_1 = arith.constant 0 : i32
    %c0_i32_2 = arith.constant 0 : i32
    return %c0_i32, %c0_i32_0, %c0_i32_1 : i32, i32, i32
  }
  func.func @transform_9(%arg0: i32) -> (i32, i32, i32) {
    %c0_i32 = arith.constant 0 : i32
    %c0_i32_0 = arith.constant 0 : i32
    %c0_i32_1 = arith.constant 0 : i32
    %c0_i32_2 = arith.constant 0 : i32
    return %c0_i32, %c0_i32_0, %c0_i32_1 : i32, i32, i32
  }
  func.func @transform_10(%arg0: i32) -> (i32, i32) {
    %c0_i32 = arith.constant 0 : i32
    %c0_i32_0 = arith.constant 0 : i32
    %c0_i32_1 = arith.constant 0 : i32
    return %c0_i32, %c0_i32_0 : i32, i32
  }
  func.func @transform_11(%arg0: i32) -> (i32, i32) {
    %c0_i32 = arith.constant 0 : i32
    %c0_i32_0 = arith.constant 0 : i32
    return %arg0, %c0_i32 : i32, i32
  }
}

</mosaic_0001>

<bundles_post_ra>
// kernel: mul.4
= control target key start
LH: loop header
LB: loop body
LE: loop exit
PB: predicated region body
PF: predicated region fallthrough
CT: control target
= control target key end

     0   :  { %vm17_vm0 = vcmask 261120   ;;  %s62_s0 = inlined_call_operand.vmem [shape: f32[3,3,32], index: 0, kind: input, shape index: {}]   ;;  %s63_s1 = inlined_call_operand.vmem [shape: f32[9,32], index: 1, kind: output, shape index: {}]  }
   0x1   :  { %v30_v0 = vld [vmem:[%s62_s0 + $0x8] sm:$0xf]  ;;  %v31_v1 = vld [vmem:[%s62_s0 + $0x4] sm:$0xf]  ;;  %v14_v2 = vld [vmem:[%s62_s0] sm:$0xf] }
   0x2   :  { %9 = vst [vmem:[#allocation0] sm:$0xf] %v30_v0  ;;  %13 = vst [vmem:[#allocation0 + $0x10] sm:$0xf] %v31_v1 }
   0x3   :  { %15 = vst [vmem:[#allocation0 + $0x8] sm:$0xf] %v14_v2 }
   0x9   :  { %v20_v4 = vld [vmem:[#allocation0 + $0x10] sm:$0x7]   ;;  %v25_v5 = vld [vmem:[#allocation0] sm:$0x7]  }
   0xa   :  { %v16_v3 = vld [vmem:[#allocation0 + $0x8] sm:$0x7]   ;;  %32 = vst.msk [vmem:[%s63_s1 + $0x3] sm:$0x7] %vm17_vm0, %v20_v4   ;;  %33 = vst.msk [vmem:[%s63_s1 + $0x6] sm:$0x7] %vm17_vm0, %v25_v5  }
   0xb   :  { %18 = vst.msk [vmem:[%s63_s1] sm:$0x7] %vm17_vm0, %v16_v3  }

// kernel: tile.8
= control target key start
LH: loop header
LB: loop body
LE: loop exit
PB: predicated region body
PF: predicated region fallthrough
CT: control target
= control target key end

     0   :  { %s28_s0 = inlined_call_operand.vmem [shape: f32[32], index: 0, kind: input, shape index: {}]   ;;  %s29_s1 = inlined_call_operand.vmem [shape: f32[9,32], index: 1, kind: output, shape index: {}]  }
   0x1   :  { %v4_v0 = vld [vmem:[%s28_s0] ss:$0 sm:$0xff] }
   0x2   :  { %5 = vst [vmem:[%s29_s1] sm:$0xff] %v4_v0  ;;  %8 = vst [vmem:[%s29_s1 + $0x8] sm:$0xff] %v4_v0 }

// kernel: tile.9
= control target key start
LH: loop header
LB: loop body
LE: loop exit
PB: predicated region body
PF: predicated region fallthrough
CT: control target
= control target key end

     0   :  { %s6_s6 = smov 3  ;;  %s13_s11 = smov 3  ;;  %vm3_vm0 = vcmask 261120   ;;  %vm10_vm1 = vcmask 1048320   ;;  %vm17_vm2 = vcmask 785920   ;;  %vm24_vm3 = vcmask 523520   ;;  %s90_s0 = inlined_call_operand.vmem [shape: f32[9,32], index: 0, kind: input, shape index: {}]   ;;  %s91_s1 = inlined_call_operand.vmem [shape: f32[1,288], index: 1, kind: output, shape index: {}]  }
   0x1   :  { %v2_v0 = vld [vmem:[%s90_s0] ss:$4 sm:$0x7]   ;;  %v48_v1 = vld [vmem:[%s90_s0 + $0x3] ss:$4 sm:%s6_s6]   ;;  %s56_s12 = smov 96  }
   0x2   :  { %8 = vrot.lane.b32.xlu0 %v48_v1, %s56_s12  ;;  %s20_s13 = smov 3  ;;  %4 = vst.msk [vmem:[#allocation0] ss:$8 sm:$0x7] %vm3_vm0, %v2_v0   ;;  %v49_v2 = vld [vmem:[%s90_s0 + $0x2] ss:$4 sm:%s13_s11]  }
   0x3   :  { %v50_v3 = vld [vmem:[%s90_s0 + $0x1] ss:$4 sm:%s20_s13]   ;;  %s57_s0 = smov 32   ;;  %s58_s18 = smov 64  }
   0x4   :  { %22 = vrot.lane.b32.xlu1 %v50_v3, %s57_s0 }
   0x6   :  { %15 = vrot.lane.b32.xlu0 %v49_v2, %s58_s18 }
   0x9   :  { %v41_v4 = vld [vmem:[#allocation0 + $0x10] sm:$0x1] }
   0xa   :  { %52 = vst [vmem:[%s91_s1 + $0x2] sm:$0x1] %v41_v4 }
  0x74   :  { %v9_v5 = vpop.permute.xlu0 %8  }
  0x75   :  { %11 = vst.msk [vmem:[#allocation0] ss:$8 sm:$0x3] %vm10_vm1, %v9_v5  }
  0x76   :  { %v23_v6 = vpop.permute.xlu1 %22  }
  0x78   :  { %v16_v7 = vpop.permute.xlu0 %15  }
  0x79   :  { %18 = vst.msk [vmem:[#allocation0] ss:$8 sm:$0x3] %vm17_vm2, %v16_v7  }
  0x7a   :  { %25 = vst.msk [vmem:[#allocation0] ss:$8 sm:$0x3] %vm24_vm3, %v23_v6  }
  0x81   :  { %v30_v8 = vld [vmem:[#allocation0] sm:$0x1]  ;;  %v35_v9 = vld [vmem:[#allocation0 + $0x8] sm:$0x1] }
  0x82   :  { %33 = vst [vmem:[%s91_s1] sm:$0x1] %v30_v8  ;;  %51 = vst [vmem:[%s91_s1 + $0x1] sm:$0x1] %v35_v9 }

// kernel: mnist_model_forward.1
= control target key start
LH: loop header
LB: loop body
LE: loop exit
PB: predicated region body
PF: predicated region fallthrough
CT: control target
= control target key end

     0   :  { %vm275_vm0 = vcmask 1040384   ;;  %v11343_v1 = vmov 0   ;;  %vm220_vm1 = vcmask 662528   ;;  %vm1206_vm4 = vcmask 261120   ;;  %s14415_s1 = inlined_call_operand.vmem [shape: bf16[81,288], index: 1, kind: input, shape index: {}]   ;;  %s14416_s0 = inlined_call_operand.vmem [shape: f32[288,81], index: 0, kind: input, shape index: {}]   ;;  %s14417_s3 = inlined_call_operand.vmem [shape: bf16[288,64], index: 3, kind: input, shape index: {}]   ;;  %s14418_s2 = inlined_call_operand.vmem [shape: f32[1,288], index: 2, kind: input, shape index: {}]   ;;  %s14419_s4 = inlined_call_operand.vmem [shape: f32[1,64], index: 4, kind: input, shape index: {}]   ;;  %s14420_s5 = inlined_call_operand.vmem [shape: bf16[9,128,288], index: 5, kind: input, shape index: {}]   ;;  %s14421_s6 = inlined_call_operand.vmem [shape: bf16[9,64,128], index: 6, kind: input, shape index: {}]   ;;  %s14422_s9 = inlined_call_operand.vmem [shape: bf16[9,128,128], index: 9, kind: input, shape index: {}]   ;;  %s14423_s7 = inlined_call_operand.vmem [shape: f32[1,128], index: 7, kind: input, shape index: {}]   ;;  %s14424_s8 = inlined_call_operand.vmem [shape: bf16[9,8,128], index: 8, kind: input, shape index: {}]   ;;  %s14425_s10 = inlined_call_operand.vmem [shape: f32[1,128], index: 10, kind: input, shape index: {}]   ;;  %s14426_s11 = inlined_call_operand.vmem [shape: f32[8,128], index: 11, kind: output, shape index: {}]  }
   0x1   :  { %v113_v0 = vld [vmem:[%s14415_s1 + $0x78] sm:$0x11]  ;;  %v277_v2 = vsel %vm275_vm0, 65535, %v11343_v1  ;;  %319 = vmatprep.mubr.bf16.mxu0 %v11343_v1  ;;  %v10906_v4 = vld [vmem:[%s14415_s1 + $0x80] ss:$0 sps:$4 sm:$0x11]  }
   0x2   :  { %v8077_v3 = vcombine.high %v113_v0, %v113_v0  ;;  %v8076_v5 = vcombine.low %v113_v0, %v113_v0  ;;  %v10908_v6 = vld [vmem:[%s14415_s1 + $0x64] ss:$12 sps:$4 sm:$0xff]   ;;  %v285_v8 = vand.u32 %v10906_v4, %v277_v2  ;;  %v10910_v10 = vld [vmem:[%s14415_s1 + $0x68] ss:$12 sps:$4 sm:$0xff]   ;;  %v10911_v11 = vld [vmem:[%s14415_s1 + $0x60] ss:$12 sps:$4 sm:$0xff]  }
   0x3   :  { %v10912_v12 = vld [vmem:[%s14415_s1 + $0x4c] ss:$12 sps:$4 sm:$0xff]   ;;  %v10914_v13 = vld [vmem:[%s14415_s1 + $0x50] ss:$12 sps:$4 sm:$0xff]   ;;  %v10915_v14 = vld [vmem:[%s14415_s1 + $0x48] ss:$12 sps:$4 sm:$0xff]  }
   0x4   :  { %v282_v7 = vand.u32 %v8077_v3, %v277_v2  ;;  %v279_v9 = vand.u32 %v8076_v5, %v277_v2  ;;  %10058 = vmatprep.subr.bf16.mxu1 %v285_v8  ;;  %v10916_v15 = vld [vmem:[%s14415_s1 + $0x34] ss:$12 sps:$4 sm:$0xff]   ;;  %v10918_v16 = vld [vmem:[%s14415_s1 + $0x38] ss:$12 sps:$4 sm:$0xff]   ;;  %v40_v18 = vld [vmem:[%s14416_s0 + $0x8] sm:$0xff] }
   0x5   :  { %10059 = vmatpush3.bf16.msra.mxu1 %v285_v8  ;;  %v39_v17 = vld [vmem:[%s14416_s0] sm:$0xff]  ;;  %v10919_v19 = vld [vmem:[%s14415_s1 + $0x30] ss:$12 sps:$4 sm:$0xff]   ;;  %v10926_v25 = vld [vmem:[%s14415_s1 + $0x8] ss:$12 sps:$4 sm:$0xff]  }
   0x6   :  { %291 = vmatprep.subr.bf16.mxu0 %v282_v7  ;;  %10060 = vmatprep.subr.bf16.mxu1 %v10910_v10  ;;  %v75_v20 = vpack.c.bf16 %v40_v18, %v39_v17  ;;  %v10920_v21 = vld [vmem:[%s14415_s1 + $0x1c] ss:$12 sps:$4 sm:$0xff]   ;;  %v10922_v22 = vld [vmem:[%s14415_s1 + $0x20] ss:$12 sps:$4 sm:$0xff]   ;;  %v10923_v23 = vld [vmem:[%s14415_s1 + $0x18] ss:$12 sps:$4 sm:$0xff]  }
   0x7   :  { %292 = vmatpush1.bf16.msra.mxu0 %v279_v9  ;;  %v10924_v24 = vld [vmem:[%s14415_s1 + $0x4] ss:$12 sps:$4 sm:$0xff]   ;;  %v10927_v26 = vld [vmem:[%s14415_s1] ss:$12 sps:$4 sm:$0xff]   ;;  %v42_v28 = vld [vmem:[%s14416_s0 + $0x18] sm:$0xff] }
   0x8   :  { %293 = vmatprep.subr.bf16.mxu0 %v10908_v6  ;;  %10070 = vmatprep.mubr.msk.bf16.mxu1 %vm220_vm1, %v75_v20  ;;  %v41_v27 = vld [vmem:[%s14416_s0 + $0x10] sm:$0xff]  ;;  %v43_v29 = vld [vmem:[%s14416_s0 + $0x20] sm:$0xff]  ;;  %v44_v30 = vld [vmem:[%s14416_s0 + $0x28] sm:$0xff] }
   0x9   :  { %10061 = vmatpush3.bf16.msra.mxu1 %v10910_v10  ;;  %v76_v31 = vpack.c.bf16 %v42_v28, %v41_v27  ;;  %v77_v32 = vpack.c.bf16 %v44_v30, %v43_v29  ;;  %v45_v33 = vld [vmem:[%s14416_s0 + $0x30] sm:$0xff]  ;;  %v46_v34 = vld [vmem:[%s14416_s0 + $0x38] sm:$0xff]  ;;  %v47_v35 = vld [vmem:[%s14416_s0 + $0x40] sm:$0xff] }
   0xa   :  { %10062 = vmatprep.subr.bf16.mxu1 %v10914_v13  ;;  %v48_v36 = vld [vmem:[%s14416_s0 + $0x48] sm:$0xff]  ;;  %v78_v37 = vpack.c.bf16 %v46_v34, %v45_v33  ;;  %v49_v39 = vld [vmem:[%s14416_s0 + $0x50] sm:$0xff]  ;;  %v50_v40 = vld [vmem:[%s14416_s0 + $0x58] sm:$0xff]  ;;  %v117_v33 = vlaneseq }
   0xb   :  { %294 = vmatpush1.bf16.msra.mxu0 %v10911_v11  ;;  %v79_v38 = vpack.c.bf16 %v48_v36, %v47_v35  ;;  %v51_v41 = vld [vmem:[%s14416_s0 + $0x60] sm:$0xff]  ;;  %v10928_v42 = vld [vmem:[%s14417_s3 + $0x38] sm:$0xff]   ;;  %v52_v43 = vld [vmem:[%s14416_s0 + $0x68] sm:$0xff]  ;;  %v80_v45 = vpack.c.bf16 %v50_v40, %v49_v39 }
   0xc   :  { %295 = vmatprep.subr.bf16.mxu0 %v10912_v12  ;;  %v10929_v44 = vld [vmem:[%s14417_s3 + $0x30] sm:$0xff]   ;;  %v11518_v46 = vpack.c.bf16 %v52_v43, %v51_v41  ;;  %v10930_v48 = vld [vmem:[%s14417_s3 + $0x28] sm:$0xff]   ;;  %v54_v49 = vld [vmem:[%s14416_s0 + $0x78] sm:$0xff]  ;;  %v118_v34 = vshrl.u32 %v117_v33, 7 }
   0xd   :  { %10063 = vmatpush3.bf16.msra.mxu1 %v10914_v13  ;;  %v53_v47 = vld [vmem:[%s14416_s0 + $0x70] sm:$0xff]  ;;  %v55_v50 = vld [vmem:[%s14416_s0 + $0x80] sm:$0xff]  ;;  %v56_v51 = vld [vmem:[%s14416_s0 + $0x88] sm:$0xff] }
   0xe   :  { %10064 = vmatprep.subr.bf16.mxu1 %v10918_v16  ;;  %v10931_v52 = vld [vmem:[%s14417_s3 + $0x20] sm:$0xff]   ;;  %v11544_v53 = vpack.c.bf16 %v54_v49, %v53_v47  ;;  %v11547_v54 = vpack.c.bf16 %v56_v51, %v55_v50  ;;  %v10932_v55 = vld [vmem:[%s14417_s3 + $0x18] sm:$0xff]   ;;  %v57_v56 = vld [vmem:[%s14416_s0 + $0x90] sm:$0xff]  ;;  %v119_v35 = vsub.s32 0, %v118_v34  ;;  %v127_v36 = vsub.s32 2, %v118_v34 }
   0xf   :  { %296 = vmatpush1.bf16.msra.mxu0 %v10915_v14  ;;  %v58_v57 = vld [vmem:[%s14416_s0 + $0x98] sm:$0xff]  ;;  %v59_v58 = vld [vmem:[%s14416_s0 + $0xa0] sm:$0xff]  ;;  %v60_v59 = vld [vmem:[%s14416_s0 + $0xa8] sm:$0xff] }
  0x10   :  { %297 = vmatprep.subr.bf16.mxu0 %v10916_v15  ;;  %v10933_v60 = vld [vmem:[%s14417_s3 + $0x10] sm:$0xff]   ;;  %v11574_v61 = vpack.c.bf16 %v58_v57, %v57_v56  ;;  %v11577_v62 = vpack.c.bf16 %v60_v59, %v59_v58  ;;  %v10934_v63 = vld [vmem:[%s14417_s3 + $0x8] sm:$0xff]   ;;  %v62_v2 = vld [vmem:[%s14416_s0 + $0xb8] sm:$0xff] }
  0x11   :  { %10065 = vmatpush3.bf16.msra.mxu1 %v10918_v16  ;;  %v61_v0 = vld [vmem:[%s14416_s0 + $0xb0] sm:$0xff]  ;;  %v63_v3 = vld [vmem:[%s14416_s0 + $0xc0] sm:$0xff]  ;;  %v64_v4 = vld [vmem:[%s14416_s0 + $0xc8] sm:$0xff] }
  0x12   :  { %10066 = vmatprep.subr.bf16.mxu1 %v10922_v22  ;;  %v10935_v5 = vld [vmem:[%s14417_s3] sm:$0xff]   ;;  %v11604_v6 = vpack.c.bf16 %v62_v2, %v61_v0  ;;  %v11607_v7 = vpack.c.bf16 %v64_v4, %v63_v3  ;;  %v10936_v8 = vld [vmem:[%s14417_s3 + $0x78] sm:$0xff]   ;;  %v65_v9 = vld [vmem:[%s14416_s0 + $0xd0] sm:$0xff] }
  0x13   :  { %298 = vmatpush1.bf16.msra.mxu0 %v10919_v19  ;;  %v66_v10 = vld [vmem:[%s14416_s0 + $0xd8] sm:$0xff]  ;;  %v67_v11 = vld [vmem:[%s14416_s0 + $0xe0] sm:$0xff]  ;;  %v68_v12 = vld [vmem:[%s14416_s0 + $0xe8] sm:$0xff] }
  0x14   :  { %299 = vmatprep.subr.bf16.mxu0 %v10920_v21  ;;  %v10937_v13 = vld [vmem:[%s14417_s3 + $0x70] sm:$0xff]   ;;  %v88_v14 = vpack.c.bf16 %v66_v10, %v65_v9  ;;  %v89_v15 = vpack.c.bf16 %v68_v12, %v67_v11  ;;  %v10938_v16 = vld [vmem:[%s14417_s3 + $0x68] sm:$0xff]   ;;  %v70_v18 = vld [vmem:[%s14416_s0 + $0xf8] sm:$0xff] }
  0x15   :  { %10067 = vmatpush3.bf16.msra.mxu1 %v10922_v22  ;;  %v69_v17 = vld [vmem:[%s14416_s0 + $0xf0] sm:$0xff]  ;;  %v10939_v19 = vld [vmem:[%s14417_s3 + $0x60] sm:$0xff]   ;;  %v72_v22 = vld [vmem:[%s14416_s0 + $0x108] sm:$0xff] }
  0x16   :  { %10068 = vmatprep.subr.bf16.mxu1 %v10926_v25  ;;  %v71_v21 = vld [vmem:[%s14416_s0 + $0x100] sm:$0xff]  ;;  %v10940_v27 = vld [vmem:[%s14417_s3 + $0x58] sm:$0xff]   ;;  %v10941_v28 = vld [vmem:[%s14417_s3 + $0x50] sm:$0xff]  }
  0x17   :  { %300 = vmatpush1.bf16.msra.mxu0 %v10923_v23  ;;  %v91_v23 = vpack.c.bf16 %v72_v22, %v71_v21  ;;  %v10942_v29 = vld [vmem:[%s14417_s3 + $0x88] sm:$0xff]  }
  0x18   :  { %301 = vmatprep.subr.bf16.mxu0 %v10924_v24  ;;  %v73_v24 = vld [vmem:[%s14416_s0 + $0x110] sm:$0xff]  ;;  %v10943_v30 = vld [vmem:[%s14417_s3 + $0x48] sm:$0xff]  }
  0x19   :  { %10069 = vmatpush3.bf16.msra.mxu1 %v10926_v25  ;;  %v74_v25 = vld [vmem:[%s14416_s0 + $0x118] sm:$0xff] }
  0x1a   :  { %1261 = vmatprep.subr.bf16.mxu1 %v11343_v1 }
  0x1b   :  { %302 = vmatpush1.bf16.msra.mxu0 %v10927_v26  ;;  %v92_v26 = vpack.c.bf16 %v74_v25, %v73_v24 }
  0x1c   :  { %10071 = vmatmul.mubr.msk.bf16.vlgmr.msra.gmra.mxu1 %vm220_vm1, %v76_v31  ;;  %10106 = vmatprep.subr.bf16.mxu0 %v10942_v29 }
  0x1d   :  { %10074 = vmatprep.mubr.msk.bf16.mxu1 %vm220_vm1, %v77_v32  ;;  %1262 = vmatpush1.bf16.msra.mxu1 %v10928_v42 }
  0x1e   :  { %8079 = vmatmul.mubr.msk.bf16.vlgmr.msra.gmra.mxu0 %vm220_vm1, %v75_v20  ;;  %1263 = vmatprep.subr.bf16.mxu1 %v11343_v1  ;;  %v90_v20 = vpack.c.bf16 %v70_v18, %v69_v17 }
  0x1f   :  { %329 = vmatprep.mubr.bf16.mxu0 %v11343_v1  ;;  %10107 = vmatpush3.bf16.msra.mxu0 %v10942_v29 }
  0x21   :  { %1264 = vmatpush1.bf16.msra.mxu1 %v10929_v44 }
  0x22   :  { %1265 = vmatprep.subr.bf16.mxu1 %v11343_v1 }
  0x24   :  { %10075 = vmatmul.mubr.msk.bf16.gmra.mxu1 %vm220_vm1, %v78_v37 }
  0x25   :  { %10078 = vmatprep.mubr.msk.bf16.mxu1 %vm220_vm1, %v79_v38  ;;  %1266 = vmatpush1.bf16.msra.mxu1 %v10930_v48 }
  0x26   :  { %8080 = vmatmul.mubr.msk.bf16.gmra.mxu0 %vm220_vm1, %v76_v31  ;;  %1267 = vmatprep.subr.bf16.mxu1 %v11343_v1  ;;  %v10944_v31 = vld [vmem:[%s14417_s3 + $0x80] sm:$0xff]  }
  0x27   :  { %339 = vmatprep.mubr.bf16.mxu0 %v11343_v1  ;;  %10108 = vmatprep.subr.bf16.mxu0 %v10944_v31 }
  0x28   :  { %10109 = vmatpush3.bf16.msra.mxu0 %v10944_v31 }
  0x29   :  { %1268 = vmatpush1.bf16.msra.mxu1 %v10931_v52 }
  0x2a   :  { %1269 = vmatprep.subr.bf16.mxu1 %v11343_v1 }
  0x2c   :  { %10079 = vmatmul.mubr.msk.bf16.gmra.mxu1 %vm220_vm1, %v80_v45 }
  0x2d   :  { %10082 = vmatprep.mubr.msk.bf16.mxu1 %vm220_vm1, %v11518_v46  ;;  %1270 = vmatpush1.bf16.msra.mxu1 %v10932_v55 }
  0x2e   :  { %8081 = vmatmul.mubr.msk.bf16.gmra.mxu0 %vm220_vm1, %v77_v32  ;;  %1271 = vmatprep.subr.bf16.mxu1 %v11343_v1  ;;  %v10945_v32 = vld [vmem:[%s14417_s3 + $0x40] sm:$0xff]  }
  0x2f   :  { %349 = vmatprep.mubr.bf16.mxu0 %v11343_v1 }
  0x31   :  { %1272 = vmatpush1.bf16.msra.mxu1 %v10933_v60 }
  0x32   :  { %1273 = vmatprep.subr.bf16.mxu1 %v11343_v1 }
  0x34   :  { %10083 = vmatmul.mubr.msk.bf16.gmra.mxu1 %vm220_vm1, %v11544_v53 }
  0x35   :  { %10086 = vmatprep.mubr.msk.bf16.mxu1 %vm220_vm1, %v11547_v54  ;;  %1274 = vmatpush1.bf16.msra.mxu1 %v10934_v63 }
  0x36   :  { %8082 = vmatmul.mubr.msk.bf16.gmra.mxu0 %vm220_vm1, %v78_v37  ;;  %1275 = vmatprep.subr.bf16.mxu1 %v11343_v1  ;;  %v115_v37 = vld [vmem:[%s14418_s2] sm:$0x7] }
  0x37   :  { %359 = vmatprep.mubr.bf16.mxu0 %v11343_v1  ;;  %v11721_v39 = vrot.slane %v115_v37, %v119_v35  ;;  %v11723_v40 = vrot.slane %v115_v37, %v127_v36 }
  0x39   :  { %1276 = vmatpush1.bf16.msra.mxu1 %v10935_v5 }
  0x3a   :  { %1277 = vmatprep.subr.bf16.mxu1 %v11343_v1 }
  0x3c   :  { %10087 = vmatmul.mubr.msk.bf16.gmra.mxu1 %vm220_vm1, %v11574_v61 }
  0x3d   :  { %10090 = vmatprep.mubr.msk.bf16.mxu1 %vm220_vm1, %v11577_v62  ;;  %1278 = vmatpush2.bf16.msra.mxu1 %v10936_v8 }
  0x3e   :  { %8083 = vmatmul.mubr.msk.bf16.gmra.mxu0 %vm220_vm1, %v79_v38  ;;  %1279 = vmatprep.subr.bf16.mxu1 %v11343_v1  ;;  %v123_v38 = vsub.s32 1, %v118_v34 }
  0x3f   :  { %369 = vmatprep.mubr.bf16.mxu0 %v11343_v1 }
  0x40   :  { %v11725_v43 = vrot.slane %v115_v37, %v123_v38 }
  0x41   :  { %1280 = vmatpush2.bf16.msra.mxu1 %v10937_v13 }
  0x42   :  { %1281 = vmatprep.subr.bf16.mxu1 %v11343_v1 }
  0x44   :  { %10091 = vmatmul.mubr.msk.bf16.gmra.mxu1 %vm220_vm1, %v11604_v6 }
  0x45   :  { %10094 = vmatprep.mubr.msk.bf16.mxu1 %vm220_vm1, %v11607_v7  ;;  %1282 = vmatpush2.bf16.msra.mxu1 %v10938_v16 }
  0x46   :  { %8084 = vmatmul.mubr.msk.bf16.gmra.mxu0 %vm220_vm1, %v80_v45  ;;  %1283 = vmatprep.subr.bf16.mxu1 %v11343_v1 }
  0x47   :  { %379 = vmatprep.mubr.bf16.mxu0 %v11343_v1 }
  0x49   :  { %1284 = vmatpush2.bf16.msra.mxu1 %v10939_v19 }
  0x4a   :  { %1285 = vmatprep.subr.bf16.mxu1 %v11343_v1 }
  0x4c   :  { %10095 = vmatmul.mubr.msk.bf16.gmra.mxu1 %vm220_vm1, %v88_v14 }
  0x4d   :  { %10098 = vmatprep.mubr.msk.bf16.mxu1 %vm220_vm1, %v89_v15  ;;  %1286 = vmatpush2.bf16.msra.mxu1 %v10940_v27 }
  0x4e   :  { %8085 = vmatmul.mubr.msk.bf16.gmra.mxu0 %vm220_vm1, %v11518_v46  ;;  %1287 = vmatprep.subr.bf16.mxu1 %v11343_v1 }
  0x4f   :  { %389 = vmatprep.mubr.bf16.mxu0 %v11343_v1 }
  0x51   :  { %1288 = vmatpush2.bf16.msra.mxu1 %v10941_v28 }
  0x52   :  { %1289 = vmatprep.subr.bf16.mxu1 %v11343_v1 }
  0x54   :  { %10099 = vmatmul.mubr.msk.bf16.gmra.mxu1 %vm220_vm1, %v90_v20 }
  0x55   :  { %10102 = vmatprep.mubr.msk.bf16.mxu1 %vm220_vm1, %v91_v23  ;;  %1290 = vmatpush2.bf16.msra.mxu1 %v10943_v30 }
  0x56   :  { %8086 = vmatmul.mubr.msk.bf16.gmra.mxu0 %vm220_vm1, %v11544_v53  ;;  %1291 = vmatprep.subr.bf16.mxu1 %v11343_v1 }
  0x57   :  { %399 = vmatprep.mubr.bf16.mxu0 %v11343_v1 }
  0x59   :  { %1292 = vmatpush2.bf16.msra.mxu1 %v10945_v32 }
  0x5c   :  { %10103 = vmatmul.mubr.msk.bf16.gmra.mxu1 %vm220_vm1, %v92_v26 }
  0x5e   :  { %8087 = vmatmul.mubr.msk.bf16.gmra.mxu0 %vm220_vm1, %v11547_v54 }
  0x5f   :  { %409 = vmatprep.mubr.bf16.mxu0 %v11343_v1 }
  0x66   :  { %8088 = vmatmul.mubr.msk.bf16.gmra.mxu0 %vm220_vm1, %v11574_v61 }
  0x67   :  { %419 = vmatprep.mubr.bf16.mxu0 %v11343_v1 }
  0x6e   :  { %8089 = vmatmul.mubr.msk.bf16.gmra.mxu0 %vm220_vm1, %v11577_v62 }
  0x6f   :  { %429 = vmatprep.mubr.bf16.mxu0 %v11343_v1 }
  0x76   :  { %8090 = vmatmul.mubr.msk.bf16.gmra.mxu0 %vm220_vm1, %v11604_v6 }
  0x77   :  { %439 = vmatprep.mubr.bf16.mxu0 %v11343_v1 }
  0x7e   :  { %8091 = vmatmul.mubr.msk.bf16.gmra.mxu0 %vm220_vm1, %v11607_v7 }
  0x7f   :  { %449 = vmatprep.mubr.bf16.mxu0 %v11343_v1 }
  0x86   :  { %8092 = vmatmul.mubr.msk.bf16.gmra.mxu0 %vm220_vm1, %v88_v14 }
  0x87   :  { %459 = vmatprep.mubr.bf16.mxu0 %v11343_v1 }
  0x8e   :  { %8093 = vmatmul.mubr.msk.bf16.gmra.mxu0 %vm220_vm1, %v89_v15 }
  0x8f   :  { %469 = vmatprep.mubr.bf16.mxu0 %v11343_v1 }
  0x96   :  { %8094 = vmatmul.mubr.msk.bf16.gmra.mxu0 %vm220_vm1, %v90_v20 }
  0x97   :  { %479 = vmatprep.mubr.bf16.mxu0 %v11343_v1 }
  0x9e   :  { %8095 = vmatmul.mubr.msk.bf16.gmra.mxu0 %vm220_vm1, %v91_v23 }
  0x9f   :  { %489 = vmatprep.mubr.bf16.mxu0 %v11343_v1 }
  0xa6   :  { %8096 = vmatmul.mubr.msk.bf16.gmra.mxu0 %vm220_vm1, %v92_v26 }
  0xdc   :  { %v10072_v42 = vpop.f32.mrf.mxu1 }
  0xdd   :  { %v543_v44 = vadd.f32 %v10072_v42, %v11723_v40 }
  0xde   :  { %v321_v41 = vpop.f32.mrf.mxu0  ;;  %v534_v46 = vpop.f32.mrf.mxu1 }
  0xdf   :  { %v322_v1 = vadd.f32 %v321_v41, %v11721_v39  ;;  %v793_v48 = vmul.f32 0.01, %v543_v44  ;;  %v535_v50 = vadd.f32 %v534_v46, %v11723_v40  ;;  %vm685_vm3 = vcmp.gt.f32.partialorder %v543_v44, 0.0 }
  0xe0   :  { %v323_v45 = vpop.f32.mrf.mxu0  ;;  %v10073_v52 = vpop.f32.mrf.mxu1 }
  0xe1   :  { %vm677_vm2 = vcmp.gt.f32.partialorder %v322_v1, 0.0  ;;  %v785_v47 = vmul.f32 0.01, %v322_v1  ;;  %v324_v49 = vadd.f32 %v323_v45, %v11725_v43  ;;  %v546_v55 = vadd.f32 %v10073_v52, %v11723_v40 }
  0xe2   :  { %v325_v51 = vpop.f32.mrf.mxu0  ;;  %vm679_vm6 = vcmp.gt.f32.partialorder %v535_v50, 0.0  ;;  %v787_v57 = vmul.f32 0.01, %v535_v50  ;;  %v537_v59 = vpop.f32.mrf.mxu1  ;;  %v901_v62 = vsel %vm685_vm3, %v543_v44, %v793_v48 }
  0xe3   :  { %v893_v53 = vsel %vm677_vm2, %v322_v1, %v785_v47  ;;  %v326_v54 = vadd.f32 %v325_v51, %v11721_v39  ;;  %vm678_vm5 = vcmp.gt.f32.partialorder %v324_v49, 0.0  ;;  %v786_v56 = vmul.f32 0.01, %v324_v49 }
  0xe4   :  { %v327_v58 = vpop.f32.mrf.mxu0  ;;  %vm688_vm8 = vcmp.gt.f32.partialorder %v546_v55, 0.0  ;;  %v796_v61 = vmul.f32 0.01, %v546_v55  ;;  %v895_v63 = vsel %vm679_vm6, %v535_v50, %v787_v57  ;;  %v538_v2 = vadd.f32 %v537_v59, %v11723_v40  ;;  %v10076_v4 = vpop.f32.mrf.mxu1 }
  0xe5   :  { %vm680_vm7 = vcmp.gt.f32.partialorder %v326_v54, 0.0  ;;  %v788_v60 = vmul.f32 0.01, %v326_v54  ;;  %v328_v0 = vadd.f32 %v327_v58, %v11725_v43  ;;  %v559_v8 = vadd.f32 %v10076_v4, %v11723_v40 }
  0xe6   :  { %v331_v3 = vpop.f32.mrf.mxu0  ;;  %v904_v6 = vsel %vm688_vm8, %v546_v55, %v796_v61  ;;  %v894_v12 = vsel %vm678_vm5, %v324_v49, %v786_v56  ;;  %v550_v13 = vpop.f32.mrf.mxu1  ;;  %vm682_vm10 = vcmp.gt.f32.partialorder %v538_v2, 0.0  ;;  %v790_v15 = vmul.f32 0.01, %v538_v2 }
  0xe7   :  { %v896_v5 = vsel %vm680_vm7, %v326_v54, %v788_v60  ;;  %v332_v7 = vadd.f32 %v331_v3, %v11721_v39  ;;  %vm681_vm9 = vcmp.gt.f32.partialorder %v328_v0, 0.0  ;;  %v789_v10 = vmul.f32 0.01, %v328_v0 }
  0xe8   :  { %v1001_v9 = vpack.c.bf16 %v896_v5, %v893_v53  ;;  %v333_v11 = vpop.f32.mrf.mxu0  ;;  %v1006_v14 = vpack.c.bf16 %v904_v6, %v901_v62  ;;  %vm697_vm12 = vcmp.gt.f32.partialorder %v559_v8, 0.0  ;;  %v805_v19 = vmul.f32 0.01, %v559_v8  ;;  %v10077_v20 = vpop.f32.mrf.mxu1 }
  0xe9   :  { %vm683_vm11 = vcmp.gt.f32.partialorder %v332_v7, 0.0  ;;  %v334_v16 = vadd.f32 %v333_v11, %v11725_v43  ;;  %v897_v18 = vsel %vm681_vm9, %v328_v0, %v789_v10  ;;  %v898_v21 = vsel %vm682_vm10, %v538_v2, %v790_v15 }
  0xea   :  { %v335_v17 = vpop.f32.mrf.mxu0  ;;  %v1002_v23 = vpack.c.bf16 %v897_v18, %v894_v12  ;;  %v551_v24 = vadd.f32 %v550_v13, %v11723_v40  ;;  %v1003_v25 = vpack.c.bf16 %v898_v21, %v895_v63  ;;  %v791_v26 = vmul.f32 0.01, %v332_v7  ;;  %v553_v29 = vpop.f32.mrf.mxu1 }
  0xeb   :  { %v336_v22 = vadd.f32 %v335_v17, %v11721_v39  ;;  %vm684_vm13 = vcmp.gt.f32.partialorder %v334_v16, 0.0  ;;  %v792_v27 = vmul.f32 0.01, %v334_v16  ;;  %v913_v31 = vsel %vm697_vm12, %v559_v8, %v805_v19 }
  0xec   :  { %v337_v28 = vpop.f32.mrf.mxu0  ;;  %1293 = vmatprep.mubr.bf16.mxu1 %v1002_v23  ;;  %vm691_vm15 = vcmp.gt.f32.partialorder %v551_v24, 0.0  ;;  %10110 = vmatprep.mubr.msk.bf16.mxu0 %vm1206_vm4, %v1003_v25  ;;  %v799_v34 = vmul.f32 0.01, %v551_v24  ;;  %v562_v35 = vadd.f32 %v10077_v20, %v11723_v40  ;;  %v554_v36 = vadd.f32 %v553_v29, %v11723_v40  ;;  %v10080_v37 = vpop.f32.mrf.mxu1 }
  0xed   :  { %vm686_vm14 = vcmp.gt.f32.partialorder %v336_v22, 0.0  ;;  %v338_v30 = vadd.f32 %v337_v28, %v11725_v43  ;;  %v794_v32 = vmul.f32 0.01, %v336_v22  ;;  %1294 = vmatmul.mubr.bf16.vlgmr.msra.gmra.mxu1 %v1001_v9  ;;  %10111 = vmatmul.mubr.msk.bf16.vlgmr.msra.gmra.mxu0 %vm1206_vm4, %v1006_v14  ;;  %v900_v42 = vsel %vm684_vm13, %v334_v16, %v792_v27 }
  0xee   :  { %v341_v33 = vpop.f32.mrf.mxu0  ;;  %v907_v44 = vsel %vm691_vm15, %v551_v24, %v799_v34  ;;  %vm700_vm1 = vcmp.gt.f32.partialorder %v562_v35, 0.0  ;;  %v808_v45 = vmul.f32 0.01, %v562_v35  ;;  %v899_v46 = vsel %vm683_vm11, %v332_v7, %v791_v26  ;;  %v566_v47 = vpop.f32.mrf.mxu1 }
  0xef   :  { %vm687_vm0 = vcmp.gt.f32.partialorder %v338_v30, 0.0  ;;  %v795_v38 = vmul.f32 0.01, %v338_v30  ;;  %v342_v41 = vadd.f32 %v341_v33, %v11721_v39  ;;  %vm694_vm2 = vcmp.gt.f32.partialorder %v554_v36, 0.0 }
  0xf0   :  { %v343_v1 = vpop.f32.mrf.mxu0  ;;  %v802_v50 = vmul.f32 0.01, %v554_v36  ;;  %v916_v52 = vsel %vm700_vm1, %v562_v35, %v808_v45  ;;  %v902_v54 = vsel %vm686_vm14, %v336_v22, %v794_v32  ;;  %v575_v55 = vadd.f32 %v10080_v37, %v11723_v40  ;;  %v10081_v56 = vpop.f32.mrf.mxu1 }
  0xf1   :  { %v797_v48 = vmul.f32 0.01, %v342_v41  ;;  %v344_v49 = vadd.f32 %v343_v1, %v11725_v43  ;;  %v903_v53 = vsel %vm687_vm0, %v338_v30, %v795_v38  ;;  %vm689_vm3 = vcmp.gt.f32.partialorder %v342_v41, 0.0 }
  0xf2   :  { %v345_v51 = vpop.f32.mrf.mxu0  ;;  %v1012_v59 = vpack.c.bf16 %v916_v52, %v913_v31  ;;  %v910_v61 = vsel %vm694_vm2, %v554_v36, %v802_v50  ;;  %v1005_v62 = vpack.c.bf16 %v903_v53, %v900_v42  ;;  %v1004_v63 = vpack.c.bf16 %v902_v54, %v899_v46  ;;  %v569_v0 = vpop.f32.mrf.mxu1 }
  0xf3   :  { %vm690_vm5 = vcmp.gt.f32.partialorder %v344_v49, 0.0  ;;  %v798_v57 = vmul.f32 0.01, %v344_v49  ;;  %v346_v58 = vadd.f32 %v345_v51, %v11721_v39  ;;  %v1009_v4 = vpack.c.bf16 %v910_v61, %v907_v44 }
  0xf4   :  { %v347_v60 = vpop.f32.mrf.mxu0  ;;  %1301 = vmatprep.mubr.bf16.mxu1 %v1005_v62  ;;  %v905_v6 = vsel %vm689_vm3, %v342_v41, %v797_v48  ;;  %vm709_vm7 = vcmp.gt.f32.partialorder %v575_v55, 0.0  ;;  %v817_v7 = vmul.f32 0.01, %v575_v55  ;;  %v567_v8 = vadd.f32 %v566_v47, %v11723_v40  ;;  %v10084_v9 = vpop.f32.mrf.mxu1 }
  0xf5   :  { %vm692_vm6 = vcmp.gt.f32.partialorder %v346_v58, 0.0  ;;  %v800_v2 = vmul.f32 0.01, %v346_v58  ;;  %v348_v3 = vadd.f32 %v347_v60, %v11725_v43  ;;  %1302 = vmatmul.mubr.bf16.gmra.mxu1 %v1004_v63  ;;  %10114 = vmatprep.mubr.msk.bf16.mxu0 %vm1206_vm4, %v1009_v4  ;;  %v906_v14 = vsel %vm690_vm5, %v344_v49, %v798_v57 }
  0xf6   :  { %v351_v5 = vpop.f32.mrf.mxu0  ;;  %10115 = vmatmul.mubr.msk.bf16.gmra.mxu0 %vm1206_vm4, %v1012_v59  ;;  %vm703_vm9 = vcmp.gt.f32.partialorder %v567_v8, 0.0  ;;  %v811_v16 = vmul.f32 0.01, %v567_v8  ;;  %v582_v17 = vpop.f32.mrf.mxu1  ;;  %v925_v21 = vsel %vm709_vm7, %v575_v55, %v817_v7  ;;  %v578_v24 = vadd.f32 %v10081_v56, %v11723_v40 }
  0xf7   :  { %vm693_vm8 = vcmp.gt.f32.partialorder %v348_v3, 0.0  ;;  %v801_v10 = vmul.f32 0.01, %v348_v3  ;;  %v352_v11 = vadd.f32 %v351_v5, %v11721_v39  ;;  %v908_v12 = vsel %vm692_vm6, %v346_v58, %v800_v2 }
  0xf8   :  { %v353_v13 = vpop.f32.mrf.mxu0  ;;  %v1007_v15 = vpack.c.bf16 %v908_v12, %v905_v6  ;;  %v570_v25 = vadd.f32 %v569_v0, %v11723_v40  ;;  %v10085_v26 = vpop.f32.mrf.mxu1  ;;  %v919_v29 = vsel %vm703_vm9, %v567_v8, %v811_v16  ;;  %vm712_vm12 = vcmp.gt.f32.partialorder %v578_v24, 0.0 }
  0xf9   :  { %v803_v18 = vmul.f32 0.01, %v352_v11  ;;  %v354_v19 = vadd.f32 %v353_v13, %v11725_v43  ;;  %v909_v20 = vsel %vm693_vm8, %v348_v3, %v801_v10  ;;  %vm695_vm10 = vcmp.gt.f32.partialorder %v352_v11, 0.0 }
  0xfa   :  { %v355_v22 = vpop.f32.mrf.mxu0  ;;  %v1008_v23 = vpack.c.bf16 %v909_v20, %v906_v14  ;;  %v820_v31 = vmul.f32 0.01, %v578_v24  ;;  %vm706_vm13 = vcmp.gt.f32.partialorder %v570_v25, 0.0  ;;  %v814_v32 = vmul.f32 0.01, %v570_v25  ;;  %v585_v33 = vpop.f32.mrf.mxu1 }
  0xfb   :  { %vm696_vm11 = vcmp.gt.f32.partialorder %v354_v19, 0.0  ;;  %v804_v27 = vmul.f32 0.01, %v354_v19  ;;  %v356_v28 = vadd.f32 %v355_v22, %v11721_v39  ;;  %v911_v36 = vsel %vm695_vm10, %v352_v11, %v803_v18 }
  0xfc   :  { %v357_v30 = vpop.f32.mrf.mxu0  ;;  %1309 = vmatprep.mubr.bf16.mxu1 %v1008_v23  ;;  %v928_v38 = vsel %vm712_vm12, %v578_v24, %v820_v31  ;;  %v922_v41 = vsel %vm706_vm13, %v570_v25, %v814_v32  ;;  %v591_v42 = vadd.f32 %v10084_v9, %v11723_v40  ;;  %v583_v1 = vadd.f32 %v582_v17, %v11723_v40  ;;  %v10088_v44 = vpop.f32.mrf.mxu1 }
  0xfd   :  { %vm698_vm14 = vcmp.gt.f32.partialorder %v356_v28, 0.0  ;;  %v806_v34 = vmul.f32 0.01, %v356_v28  ;;  %v358_v35 = vadd.f32 %v357_v30, %v11725_v43  ;;  %1310 = vmatmul.mubr.bf16.gmra.mxu1 %v1007_v15  ;;  %v1018_v47 = vpack.c.bf16 %v928_v38, %v925_v21 }
  0xfe   :  { %v361_v37 = vpop.f32.mrf.mxu0  ;;  %v1015_v49 = vpack.c.bf16 %v922_v41, %v919_v29  ;;  %vm721_vm0 = vcmp.gt.f32.partialorder %v591_v42, 0.0  ;;  %v829_v51 = vmul.f32 0.01, %v591_v42  ;;  %v598_v52 = vpop.f32.mrf.mxu1  ;;  %v912_v55 = vsel %vm696_vm11, %v354_v19, %v804_v27 }
  0xff   :  { %vm699_vm15 = vcmp.gt.f32.partialorder %v358_v35, 0.0  ;;  %v807_v45 = vmul.f32 0.01, %v358_v35  ;;  %v362_v46 = vadd.f32 %v361_v37, %v11721_v39  ;;  %v914_v50 = vsel %vm698_vm14, %v356_v28, %v806_v34 }
 0x100   :  { %v363_v48 = vpop.f32.mrf.mxu0  ;;  %v1010_v59 = vpack.c.bf16 %v914_v50, %v911_v36  ;;  %10118 = vmatprep.mubr.msk.bf16.mxu0 %vm1206_vm4, %v1015_v49  ;;  %v10089_v60 = vpop.f32.mrf.mxu1  ;;  %v937_v62 = vsel %vm721_vm0, %v591_v42, %v829_v51  ;;  %vm715_vm3 = vcmp.gt.f32.partialorder %v583_v1, 0.0  ;;  %v823_v2 = vmul.f32 0.01, %v583_v1 }
 0x101   :  { %v809_v53 = vmul.f32 0.01, %v362_v46  ;;  %v364_v54 = vadd.f32 %v363_v48, %v11725_v43  ;;  %v915_v56 = vsel %vm699_vm15, %v358_v35, %v807_v45  ;;  %vm701_vm1 = vcmp.gt.f32.partialorder %v362_v46, 0.0  ;;  %10119 = vmatmul.mubr.msk.bf16.gmra.mxu0 %vm1206_vm4, %v1018_v47 }
 0x102   :  { %v365_v57 = vpop.f32.mrf.mxu0  ;;  %v1011_v58 = vpack.c.bf16 %v915_v56, %v912_v55  ;;  %v594_v3 = vadd.f32 %v10085_v26, %v11723_v40  ;;  %v586_v4 = vadd.f32 %v585_v33, %v11723_v40  ;;  %v11783_v5 = vpop.f32.mrf.mxu1  ;;  %v607_v11 = vadd.f32 %v10088_v44, %v11723_v40 }
 0x103   :  { %vm702_vm2 = vcmp.gt.f32.partialorder %v364_v54, 0.0  ;;  %v366_v61 = vadd.f32 %v365_v57, %v11721_v39  ;;  %v810_v63 = vmul.f32 0.01, %v364_v54  ;;  %v917_v8 = vsel %vm701_vm1, %v362_v46, %v809_v53 }
 0x104   :  { %v367_v0 = vpop.f32.mrf.mxu0  ;;  %1317 = vmatprep.mubr.bf16.mxu1 %v1011_v58  ;;  %vm724_vm6 = vcmp.gt.f32.partialorder %v594_v3, 0.0  ;;  %v832_v10 = vmul.f32 0.01, %v594_v3  ;;  %vm718_vm7 = vcmp.gt.f32.partialorder %v586_v4, 0.0  ;;  %v11788_v12 = vpop.f32.mrf.mxu1  ;;  %v931_v18 = vsel %vm715_vm3, %v583_v1, %v823_v2 }
 0x105   :  { %vm704_vm5 = vcmp.gt.f32.partialorder %v366_v61, 0.0  ;;  %v812_v6 = vmul.f32 0.01, %v366_v61  ;;  %v368_v7 = vadd.f32 %v367_v0, %v11725_v43  ;;  %1318 = vmatmul.mubr.bf16.gmra.mxu1 %v1010_v59  ;;  %v918_v17 = vsel %vm702_vm2, %v364_v54, %v810_v63 }
 0x106   :  { %v371_v9 = vpop.f32.mrf.mxu0  ;;  %v940_v19 = vsel %vm724_vm6, %v594_v3, %v832_v10  ;;  %v826_v20 = vmul.f32 0.01, %v586_v4  ;;  %v11793_v21 = vpop.f32.mrf.mxu1  ;;  %vm733_vm10 = vcmp.gt.f32.partialorder %v607_v11, 0.0  ;;  %v841_v33 = vmul.f32 0.01, %v607_v11 }
 0x107   :  { %vm705_vm8 = vcmp.gt.f32.partialorder %v368_v7, 0.0  ;;  %v813_v13 = vmul.f32 0.01, %v368_v7  ;;  %v372_v14 = vadd.f32 %v371_v9, %v11721_v39  ;;  %v920_v15 = vsel %vm704_vm5, %v366_v61, %v812_v6 }
 0x108   :  { %v373_v16 = vpop.f32.mrf.mxu0  ;;  %v1013_v25 = vpack.c.bf16 %v920_v15, %v917_v8  ;;  %v1024_v28 = vpack.c.bf16 %v940_v19, %v937_v62  ;;  %v934_v29 = vsel %vm718_vm7, %v586_v4, %v826_v20  ;;  %v10093_v30 = vpop.f32.mrf.mxu1  ;;  %v599_v36 = vadd.f32 %v598_v52, %v11723_v40 }
 0x109   :  { %v815_v22 = vmul.f32 0.01, %v372_v14  ;;  %v374_v23 = vadd.f32 %v373_v16, %v11725_v43  ;;  %v921_v24 = vsel %vm705_vm8, %v368_v7, %v813_v13  ;;  %vm707_vm9 = vcmp.gt.f32.partialorder %v372_v14, 0.0 }
 0x10a   :  { %v375_v26 = vpop.f32.mrf.mxu0  ;;  %v1014_v27 = vpack.c.bf16 %v921_v24, %v918_v17  ;;  %v1021_v32 = vpack.c.bf16 %v934_v29, %v931_v18  ;;  %v610_v37 = vadd.f32 %v10089_v60, %v11723_v40  ;;  %v11803_v1 = vpop.f32.mrf.mxu1  ;;  %vm727_vm13 = vcmp.gt.f32.partialorder %v599_v36, 0.0 }
 0x10b   :  { %v376_v31 = vadd.f32 %v375_v26, %v11721_v39  ;;  %vm708_vm11 = vcmp.gt.f32.partialorder %v374_v23, 0.0  ;;  %v816_v34 = vmul.f32 0.01, %v374_v23  ;;  %v923_v42 = vsel %vm707_vm9, %v372_v14, %v815_v22 }
 0x10c   :  { %v377_v35 = vpop.f32.mrf.mxu0  ;;  %1325 = vmatprep.mubr.bf16.mxu1 %v1014_v27  ;;  %10122 = vmatprep.mubr.msk.bf16.mxu0 %vm1206_vm4, %v1021_v32  ;;  %v835_v45 = vmul.f32 0.01, %v599_v36  ;;  %vm736_vm14 = vcmp.gt.f32.partialorder %v610_v37, 0.0  ;;  %v844_v46 = vmul.f32 0.01, %v610_v37  ;;  %v11808_v50 = vpop.f32.mrf.mxu1  ;;  %v949_v53 = vsel %vm733_vm10, %v607_v11, %v841_v33 }
 0x10d   :  { %vm710_vm12 = vcmp.gt.f32.partialorder %v376_v31, 0.0  ;;  %v818_v38 = vmul.f32 0.01, %v376_v31  ;;  %v378_v41 = vadd.f32 %v377_v35, %v11725_v43  ;;  %10123 = vmatmul.mubr.msk.bf16.gmra.mxu0 %vm1206_vm4, %v1024_v28  ;;  %1326 = vmatmul.mubr.bf16.gmra.mxu1 %v1013_v25  ;;  %v924_v52 = vsel %vm708_vm11, %v374_v23, %v816_v34 }
 0x10e   :  { %v381_v44 = vpop.f32.mrf.mxu0  ;;  %v952_v54 = vsel %vm736_vm14, %v610_v37, %v844_v46  ;;  %v602_v55 = vadd.f32 %v11783_v5, %v11723_v40  ;;  %v943_v59 = vsel %vm727_vm13, %v599_v36, %v835_v45  ;;  %v11817_v3 = vpop.f32.mrf.mxu1  ;;  %v623_v7 = vadd.f32 %v11788_v12, %v11723_v40 }
 0x10f   :  { %vm711_vm15 = vcmp.gt.f32.partialorder %v378_v41, 0.0  ;;  %v819_v47 = vmul.f32 0.01, %v378_v41  ;;  %v382_v48 = vadd.f32 %v381_v44, %v11721_v39  ;;  %v926_v49 = vsel %vm710_vm12, %v376_v31, %v818_v38 }
 0x110   :  { %v383_v51 = vpop.f32.mrf.mxu0  ;;  %v1016_v58 = vpack.c.bf16 %v926_v49, %v923_v42  ;;  %vm730_vm0 = vcmp.gt.f32.partialorder %v602_v55, 0.0  ;;  %v838_v63 = vmul.f32 0.01, %v602_v55  ;;  %v1030_v2 = vpack.c.bf16 %v952_v54, %v949_v53  ;;  %v10097_v19 = vpop.f32.mrf.mxu1 }
 0x111   :  { %v384_v56 = vadd.f32 %v383_v51, %v11725_v43  ;;  %v927_v57 = vsel %vm711_vm15, %v378_v41, %v819_v47  ;;  %v821_v60 = vmul.f32 0.01, %v382_v48  ;;  %vm713_vm1 = vcmp.gt.f32.partialorder %v382_v48, 0.0 }
 0x112   :  { %v385_v61 = vpop.f32.mrf.mxu0  ;;  %v1017_v62 = vpack.c.bf16 %v927_v57, %v924_v52  ;;  %v946_v6 = vsel %vm730_vm0, %v602_v55, %v838_v63  ;;  %v615_v8 = vadd.f32 %v11793_v21, %v11723_v40  ;;  %v626_v11 = vadd.f32 %v10093_v30, %v11723_v40  ;;  %v633_v34 = vpop.f32.mrf.mxu1 }
 0x113   :  { %vm714_vm2 = vcmp.gt.f32.partialorder %v384_v56, 0.0  ;;  %v386_v0 = vadd.f32 %v385_v61, %v11721_v39  ;;  %v822_v4 = vmul.f32 0.01, %v384_v56  ;;  %v929_v14 = vsel %vm713_vm1, %v382_v48, %v821_v60 }
 0x114   :  { %v387_v5 = vpop.f32.mrf.mxu0  ;;  %1333 = vmatprep.mubr.bf16.mxu1 %v1017_v62  ;;  %v1027_v15 = vpack.c.bf16 %v946_v6, %v943_v59  ;;  %vm745_vm5 = vcmp.gt.f32.partialorder %v623_v7, 0.0  ;;  %v853_v16 = vmul.f32 0.01, %v623_v7  ;;  %vm739_vm7 = vcmp.gt.f32.partialorder %v615_v8, 0.0 }
 0x115   :  { %vm716_vm3 = vcmp.gt.f32.partialorder %v386_v0, 0.0  ;;  %v824_v9 = vmul.f32 0.01, %v386_v0  ;;  %v388_v10 = vadd.f32 %v387_v5, %v11725_v43  ;;  %1334 = vmatmul.mubr.bf16.gmra.mxu1 %v1016_v58  ;;  %v930_v21 = vsel %vm714_vm2, %v384_v56, %v822_v4 }
 0x116   :  { %v391_v13 = vpop.f32.mrf.mxu0  ;;  %10126 = vmatprep.mubr.msk.bf16.mxu0 %vm1206_vm4, %v1027_v15  ;;  %v847_v23 = vmul.f32 0.01, %v615_v8  ;;  %v961_v26 = vsel %vm745_vm5, %v623_v7, %v853_v16  ;;  %vm748_vm8 = vcmp.gt.f32.partialorder %v626_v11, 0.0  ;;  %v856_v29 = vmul.f32 0.01, %v626_v11 }
 0x117   :  { %vm717_vm6 = vcmp.gt.f32.partialorder %v388_v10, 0.0  ;;  %v825_v17 = vmul.f32 0.01, %v388_v10  ;;  %v392_v12 = vadd.f32 %v391_v13, %v11721_v39  ;;  %v932_v18 = vsel %vm716_vm3, %v386_v0, %v824_v9  ;;  %10127 = vmatmul.mubr.msk.bf16.gmra.mxu0 %vm1206_vm4, %v1030_v2 }
 0x118   :  { %v393_v20 = vpop.f32.mrf.mxu0  ;;  %v1019_v22 = vpack.c.bf16 %v932_v18, %v929_v14  ;;  %v618_v30 = vadd.f32 %v11803_v1, %v11723_v40  ;;  %v955_v33 = vsel %vm739_vm7, %v615_v8, %v847_v23  ;;  %v964_v36 = vsel %vm748_vm8, %v626_v11, %v856_v29  ;;  %v10100_v1 = vpop.f32.mrf.mxu1 }
 0x119   :  { %v394_v24 = vadd.f32 %v393_v20, %v11725_v43  ;;  %v933_v25 = vsel %vm717_vm6, %v388_v10, %v825_v17  ;;  %vm719_vm9 = vcmp.gt.f32.partialorder %v392_v12, 0.0  ;;  %v827_v31 = vmul.f32 0.01, %v392_v12 }
 0x11a   :  { %v395_v27 = vpop.f32.mrf.mxu0  ;;  %v1020_v28 = vpack.c.bf16 %v933_v25, %v930_v21  ;;  %vm742_vm11 = vcmp.gt.f32.partialorder %v618_v30, 0.0  ;;  %v850_v37 = vmul.f32 0.01, %v618_v30  ;;  %v639_v38 = vadd.f32 %v11808_v50, %v11723_v40  ;;  %v646_v59 = vpop.f32.mrf.mxu1 }
 0x11b   :  { %vm720_vm10 = vcmp.gt.f32.partialorder %v394_v24, 0.0  ;;  %v396_v32 = vadd.f32 %v395_v27, %v11721_v39  ;;  %v828_v41 = vmul.f32 0.01, %v394_v24  ;;  %v1036_v46 = vpack.c.bf16 %v964_v36, %v961_v26 }
 0x11c   :  { %v397_v35 = vpop.f32.mrf.mxu0  ;;  %1341 = vmatprep.mubr.bf16.mxu1 %v1020_v28  ;;  %v958_v47 = vsel %vm742_vm11, %v618_v30, %v850_v37  ;;  %vm757_vm13 = vcmp.gt.f32.partialorder %v639_v38, 0.0  ;;  %v865_v48 = vmul.f32 0.01, %v639_v38  ;;  %v631_v50 = vadd.f32 %v11817_v3, %v11723_v40  ;;  %v10101_v11 = vpop.f32.mrf.mxu1 }
 0x11d   :  { %vm722_vm12 = vcmp.gt.f32.partialorder %v396_v32, 0.0  ;;  %v830_v42 = vmul.f32 0.01, %v396_v32  ;;  %v398_v44 = vadd.f32 %v397_v35, %v11725_v43  ;;  %1342 = vmatmul.mubr.bf16.gmra.mxu1 %v1019_v22  ;;  %v1033_v54 = vpack.c.bf16 %v958_v47, %v955_v33 }
 0x11e   :  { %v401_v45 = vpop.f32.mrf.mxu0  ;;  %v936_v56 = vsel %vm720_vm10, %v394_v24, %v828_v41  ;;  %v935_v58 = vsel %vm719_vm9, %v392_v12, %v827_v31  ;;  %v973_v63 = vsel %vm757_vm13, %v639_v38, %v865_v48  ;;  %v642_v0 = vadd.f32 %v10097_v19, %v11723_v40  ;;  %v649_v26 = vpop.f32.mrf.mxu1 }
 0x11f   :  { %vm723_vm14 = vcmp.gt.f32.partialorder %v398_v44, 0.0  ;;  %v831_v49 = vmul.f32 0.01, %v398_v44  ;;  %v402_v51 = vadd.f32 %v401_v45, %v11721_v39  ;;  %v938_v52 = vsel %vm722_vm12, %v396_v32, %v830_v42  ;;  %10130 = vmatprep.mubr.msk.bf16.mxu0 %vm1206_vm4, %v1033_v54 }
 0x120   :  { %v403_v53 = vpop.f32.mrf.mxu0  ;;  %v1022_v62 = vpack.c.bf16 %v938_v52, %v935_v58  ;;  %10131 = vmatmul.mubr.msk.bf16.gmra.mxu0 %vm1206_vm4, %v1036_v46  ;;  %v859_v4 = vmul.f32 0.01, %v631_v50  ;;  %vm751_vm0 = vcmp.gt.f32.partialorder %v631_v50, 0.0  ;;  %vm760_vm1 = vcmp.gt.f32.partialorder %v642_v0, 0.0 }
 0x121   :  { %v404_v55 = vadd.f32 %v403_v53, %v11725_v43  ;;  %v939_v57 = vsel %vm723_vm14, %v398_v44, %v831_v49  ;;  %vm725_vm15 = vcmp.gt.f32.partialorder %v402_v51, 0.0  ;;  %v833_v2 = vmul.f32 0.01, %v402_v51 }
 0x122   :  { %v405_v60 = vpop.f32.mrf.mxu0  ;;  %v1023_v61 = vpack.c.bf16 %v939_v57, %v936_v56  ;;  %v868_v6 = vmul.f32 0.01, %v642_v0  ;;  %v634_v7 = vadd.f32 %v633_v34, %v11723_v40  ;;  %v967_v17 = vsel %vm751_vm0, %v631_v50, %v859_v4  ;;  %v10104_v34 = vpop.f32.mrf.mxu1 }
 0x123   :  { %v406_v3 = vadd.f32 %v405_v60, %v11721_v39  ;;  %v834_v8 = vmul.f32 0.01, %v404_v55  ;;  %vm726_vm3 = vcmp.gt.f32.partialorder %v404_v55, 0.0  ;;  %v655_v12 = vadd.f32 %v10100_v1, %v11723_v40 }
 0x124   :  { %v407_v5 = vpop.f32.mrf.mxu0  ;;  %1349 = vmatprep.mubr.bf16.mxu1 %v1023_v61  ;;  %v976_v14 = vsel %vm760_vm1, %v642_v0, %v868_v6  ;;  %vm754_vm5 = vcmp.gt.f32.partialorder %v634_v7, 0.0  ;;  %v862_v15 = vmul.f32 0.01, %v634_v7  ;;  %v941_v29 = vsel %vm725_vm15, %v402_v51, %v833_v2  ;;  %v662_v49 = vpop.f32.mrf.mxu1 }
 0x125   :  { %vm728_vm2 = vcmp.gt.f32.partialorder %v406_v3, 0.0  ;;  %v836_v9 = vmul.f32 0.01, %v406_v3  ;;  %v408_v10 = vadd.f32 %v407_v5, %v11725_v43  ;;  %1350 = vmatmul.mubr.bf16.gmra.mxu1 %v1022_v62  ;;  %v942_v23 = vsel %vm726_vm3, %v404_v55, %v834_v8 }
 0x126   :  { %v411_v13 = vpop.f32.mrf.mxu0  ;;  %v970_v21 = vsel %vm754_vm5, %v634_v7, %v862_v15  ;;  %v1042_v25 = vpack.c.bf16 %v976_v14, %v973_v63  ;;  %v647_v31 = vadd.f32 %v646_v59, %v11723_v40  ;;  %vm769_vm7 = vcmp.gt.f32.partialorder %v655_v12, 0.0 }
 0x127   :  { %vm729_vm6 = vcmp.gt.f32.partialorder %v408_v10, 0.0  ;;  %v837_v16 = vmul.f32 0.01, %v408_v10  ;;  %v11854_v18 = vadd.f32 %v411_v13, %v11721_v39  ;;  %v944_v20 = vsel %vm728_vm2, %v406_v3, %v836_v9  ;;  %v10105_v3 = vpop.f32.mrf.mxu1 }
 0x128   :  { %v413_v19 = vpop.f32.mrf.mxu0  ;;  %v1039_v30 = vpack.c.bf16 %v970_v21, %v967_v17  ;;  %v1025_v33 = vpack.c.bf16 %v944_v20, %v941_v29  ;;  %v877_v36 = vmul.f32 0.01, %v655_v12  ;;  %v658_v37 = vadd.f32 %v10101_v11, %v11723_v40 }
 0x129   :  { %v414_v22 = vadd.f32 %v413_v19, %v11725_v43  ;;  %v945_v24 = vsel %vm729_vm6, %v408_v10, %v837_v16  ;;  %vm731_vm8 = vcmp.gt.f32.partialorder %v11854_v18, 0.0  ;;  %vm763_vm10 = vcmp.gt.f32.partialorder %v647_v31, 0.0 }
 0x12a   :  { %v415_v27 = vpop.f32.mrf.mxu0  ;;  %v1026_v28 = vpack.c.bf16 %v945_v24, %v942_v23  ;;  %10134 = vmatprep.mubr.msk.bf16.mxu0 %vm1206_vm4, %v1039_v30  ;;  %v871_v42 = vmul.f32 0.01, %v647_v31  ;;  %vm772_vm11 = vcmp.gt.f32.partialorder %v658_v37, 0.0  ;;  %v880_v45 = vmul.f32 0.01, %v658_v37 }
 0x12b   :  { %v416_v32 = vadd.f32 %v415_v27, %v11721_v39  ;;  %vm732_vm9 = vcmp.gt.f32.partialorder %v414_v22, 0.0  ;;  %v840_v38 = vmul.f32 0.01, %v414_v22  ;;  %10135 = vmatmul.mubr.msk.bf16.gmra.mxu0 %vm1206_vm4, %v1042_v25  ;;  %v650_v46 = vadd.f32 %v649_v26, %v11723_v40 }
 0x12c   :  { %v417_v35 = vpop.f32.mrf.mxu0  ;;  %1357 = vmatprep.mubr.bf16.mxu1 %v1026_v28  ;;  %v839_v47 = vmul.f32 0.01, %v11854_v18  ;;  %v985_v52 = vsel %vm769_vm7, %v655_v12, %v877_v36  ;;  %v988_v53 = vsel %vm772_vm11, %v658_v37, %v880_v45  ;;  %v979_v57 = vsel %vm763_vm10, %v647_v31, %v871_v42  ;;  %v665_v12 = vpop.f32.mrf.mxu1 }
 0x12d   :  { %v418_v41 = vadd.f32 %v417_v35, %v11725_v43  ;;  %v842_v44 = vmul.f32 0.01, %v416_v32  ;;  %vm734_vm12 = vcmp.gt.f32.partialorder %v416_v32, 0.0  ;;  %1358 = vmatmul.mubr.bf16.gmra.mxu1 %v1025_v33  ;;  %vm766_vm14 = vcmp.gt.f32.partialorder %v650_v46, 0.0 }
 0x12e   :  { %v421_v1 = vpop.f32.mrf.mxu0  ;;  %v874_v54 = vmul.f32 0.01, %v650_v46  ;;  %v948_v55 = vsel %vm732_vm9, %v414_v22, %v840_v38  ;;  %v1048_v0 = vpack.c.bf16 %v988_v53, %v985_v52  ;;  %v671_v2 = vadd.f32 %v10104_v34, %v11723_v40 }
 0x12f   :  { %vm735_vm13 = vcmp.gt.f32.partialorder %v418_v41, 0.0  ;;  %v843_v48 = vmul.f32 0.01, %v418_v41  ;;  %v422_v58 = vadd.f32 %v421_v1, %v11721_v39  ;;  %v950_v61 = vsel %vm734_vm12, %v416_v32, %v842_v44 }
 0x130   :  { %v423_v51 = vpop.f32.mrf.mxu0  ;;  %v982_v62 = vsel %vm766_vm14, %v650_v46, %v874_v54  ;;  %v947_v6 = vsel %vm731_vm8, %v11854_v18, %v839_v47  ;;  %v663_v10 = vadd.f32 %v662_v49, %v11723_v40  ;;  %v674_v15 = vadd.f32 %v10105_v3, %v11723_v40 }
 0x131   :  { %v424_v50 = vadd.f32 %v423_v51, %v11725_v43  ;;  %v951_v56 = vsel %vm735_vm13, %v418_v41, %v843_v48  ;;  %v1045_v7 = vpack.c.bf16 %v982_v62, %v979_v57  ;;  %v1028_v9 = vpack.c.bf16 %v950_v61, %v947_v6 }
 0x132   :  { %v425_v59 = vpop.f32.mrf.mxu0  ;;  %v1029_v60 = vpack.c.bf16 %v951_v56, %v948_v55  ;;  %v845_v11 = vmul.f32 0.01, %v422_v58  ;;  %v889_v17 = vmul.f32 0.01, %v671_v2  ;;  %vm737_vm2 = vcmp.gt.f32.partialorder %v422_v58, 0.0 }
 0x133   :  { %v426_v63 = vadd.f32 %v425_v59, %v11721_v39  ;;  %v846_v4 = vmul.f32 0.01, %v424_v50  ;;  %vm738_vm15 = vcmp.gt.f32.partialorder %v424_v50, 0.0  ;;  %10138 = vmatprep.mubr.msk.bf16.mxu0 %vm1206_vm4, %v1045_v7  ;;  %vm781_vm3 = vcmp.gt.f32.partialorder %v671_v2, 0.0 }
 0x134   :  { %v427_v5 = vpop.f32.mrf.mxu0  ;;  %1365 = vmatprep.mubr.bf16.mxu1 %v1029_v60  ;;  %10139 = vmatmul.mubr.msk.bf16.gmra.mxu0 %vm1206_vm4, %v1048_v0  ;;  %v892_v20 = vmul.f32 0.01, %v674_v15  ;;  %v883_v23 = vmul.f32 0.01, %v663_v10  ;;  %vm784_vm5 = vcmp.gt.f32.partialorder %v674_v15, 0.0  ;;  %vm775_vm6 = vcmp.gt.f32.partialorder %v663_v10, 0.0 }
 0x135   :  { %v428_v8 = vadd.f32 %v427_v5, %v11725_v43  ;;  %v848_v13 = vmul.f32 0.01, %v426_v63  ;;  %vm740_vm0 = vcmp.gt.f32.partialorder %v426_v63, 0.0  ;;  %1366 = vmatmul.mubr.bf16.gmra.mxu1 %v1028_v9  ;;  %v954_v19 = vsel %vm738_vm15, %v424_v50, %v846_v4 }
 0x136   :  { %v431_v14 = vpop.f32.mrf.mxu0  ;;  %v666_v27 = vadd.f32 %v665_v12, %v11723_v40  ;;  %v953_v29 = vsel %vm737_vm2, %v422_v58, %v845_v11  ;;  %v997_v30 = vsel %vm781_vm3, %v671_v2, %v889_v17  ;;  %v1000_v33 = vsel %vm784_vm5, %v674_v15, %v892_v20 }
 0x137   :  { %vm741_vm1 = vcmp.gt.f32.partialorder %v428_v8, 0.0  ;;  %v849_v16 = vmul.f32 0.01, %v428_v8  ;;  %v956_v26 = vsel %vm740_vm0, %v426_v63, %v848_v13  ;;  %v432_v31 = vadd.f32 %v431_v14, %v11721_v39 }
 0x138   :  { %v433_v18 = vpop.f32.mrf.mxu0  ;;  %vm778_vm7 = vcmp.gt.f32.partialorder %v666_v27, 0.0  ;;  %v886_v34 = vmul.f32 0.01, %v666_v27  ;;  %v1031_v37 = vpack.c.bf16 %v956_v26, %v953_v29  ;;  %v991_v38 = vsel %vm775_vm6, %v663_v10, %v883_v23 }
 0x139   :  { %v434_v21 = vadd.f32 %v433_v18, %v11725_v43  ;;  %v957_v22 = vsel %vm741_vm1, %v428_v8, %v849_v16  ;;  %v1054_v1 = vpack.c.bf16 %v1000_v33, %v997_v30  ;;  %v851_v45 = vmul.f32 0.01, %v432_v31 }
 0x13a   :  { %v435_v24 = vpop.f32.mrf.mxu0  ;;  %v1032_v25 = vpack.c.bf16 %v957_v22, %v954_v19  ;;  %v994_v40 = vsel %vm778_vm7, %v666_v27, %v886_v34  ;;  %vm743_vm11 = vcmp.gt.f32.partialorder %v432_v31, 0.0 }
 0x13b   :  { %v436_v28 = vadd.f32 %v435_v24, %v11721_v39  ;;  %v852_v35 = vmul.f32 0.01, %v434_v21  ;;  %vm744_vm8 = vcmp.gt.f32.partialorder %v434_v21, 0.0  ;;  %v1051_v47 = vpack.c.bf16 %v994_v40, %v991_v38 }
 0x13c   :  { %v437_v32 = vpop.f32.mrf.mxu0  ;;  %1373 = vmatprep.mubr.bf16.mxu1 %v1032_v25  ;;  %v959_v57 = vsel %vm743_vm11, %v432_v31, %v851_v45 }
 0x13d   :  { %v438_v36 = vadd.f32 %v437_v32, %v11725_v43  ;;  %v854_v41 = vmul.f32 0.01, %v436_v28  ;;  %vm746_vm9 = vcmp.gt.f32.partialorder %v436_v28, 0.0  ;;  %1374 = vmatmul.mubr.bf16.gmra.mxu1 %v1031_v37  ;;  %v960_v49 = vsel %vm744_vm8, %v434_v21, %v852_v35  ;;  %10142 = vmatprep.mubr.msk.bf16.mxu0 %vm1206_vm4, %v1051_v47 }
 0x13e   :  { %v441_v42 = vpop.f32.mrf.mxu0  ;;  %10143 = vmatmul.mubr.msk.bf16.gmra.mxu0 %vm1206_vm4, %v1054_v1 }
 0x13f   :  { %vm747_vm10 = vcmp.gt.f32.partialorder %v438_v36, 0.0  ;;  %v855_v44 = vmul.f32 0.01, %v438_v36  ;;  %v962_v54 = vsel %vm746_vm9, %v436_v28, %v854_v41  ;;  %v442_v55 = vadd.f32 %v441_v42, %v11721_v39 }
 0x140   :  { %v443_v46 = vpop.f32.mrf.mxu0  ;;  %v1034_v60 = vpack.c.bf16 %v962_v54, %v959_v57 }
 0x141   :  { %v444_v48 = vadd.f32 %v443_v46, %v11725_v43  ;;  %v963_v51 = vsel %vm747_vm10, %v438_v36, %v855_v44  ;;  %v857_v0 = vmul.f32 0.01, %v442_v55  ;;  %vm749_vm15 = vcmp.gt.f32.partialorder %v442_v55, 0.0 }
 0x142   :  { %v445_v52 = vpop.f32.mrf.mxu0  ;;  %v1035_v53 = vpack.c.bf16 %v963_v51, %v960_v49 }
 0x143   :  { %v446_v50 = vadd.f32 %v445_v52, %v11721_v39  ;;  %v858_v58 = vmul.f32 0.01, %v444_v48  ;;  %vm750_vm12 = vcmp.gt.f32.partialorder %v444_v48, 0.0  ;;  %v965_v13 = vsel %vm749_vm15, %v442_v55, %v857_v0 }
 0x144   :  { %v447_v56 = vpop.f32.mrf.mxu0  ;;  %1381 = vmatprep.mubr.bf16.mxu1 %v1035_v53 }
 0x145   :  { %v448_v59 = vadd.f32 %v447_v56, %v11725_v43  ;;  %v860_v61 = vmul.f32 0.01, %v446_v50  ;;  %vm752_vm13 = vcmp.gt.f32.partialorder %v446_v50, 0.0  ;;  %1382 = vmatmul.mubr.bf16.gmra.mxu1 %v1034_v60  ;;  %v966_v4 = vsel %vm750_vm12, %v444_v48, %v858_v58 }
 0x146   :  { %v451_v62 = vpop.f32.mrf.mxu0 }
 0x147   :  { %vm753_vm14 = vcmp.gt.f32.partialorder %v448_v59, 0.0  ;;  %v861_v63 = vmul.f32 0.01, %v448_v59  ;;  %v968_v8 = vsel %vm752_vm13, %v446_v50, %v860_v61  ;;  %v452_v10 = vadd.f32 %v451_v62, %v11721_v39 }
 0x148   :  { %v453_v2 = vpop.f32.mrf.mxu0  ;;  %v1037_v16 = vpack.c.bf16 %v968_v8, %v965_v13 }
 0x149   :  { %v454_v3 = vadd.f32 %v453_v2, %v11725_v43  ;;  %v969_v5 = vsel %vm753_vm14, %v448_v59, %v861_v63  ;;  %v863_v19 = vmul.f32 0.01, %v452_v10  ;;  %vm755_vm3 = vcmp.gt.f32.partialorder %v452_v10, 0.0 }
 0x14a   :  { %v455_v6 = vpop.f32.mrf.mxu0  ;;  %v1038_v7 = vpack.c.bf16 %v969_v5, %v966_v4 }
 0x14b   :  { %v456_v9 = vadd.f32 %v455_v6, %v11721_v39  ;;  %v864_v14 = vmul.f32 0.01, %v454_v3  ;;  %vm756_vm0 = vcmp.gt.f32.partialorder %v454_v3, 0.0  ;;  %v971_v30 = vsel %vm755_vm3, %v452_v10, %v863_v19 }
 0x14c   :  { %v457_v11 = vpop.f32.mrf.mxu0  ;;  %1389 = vmatprep.mubr.bf16.mxu1 %v1038_v7 }
 0x14d   :  { %v458_v15 = vadd.f32 %v457_v11, %v11725_v43  ;;  %v866_v17 = vmul.f32 0.01, %v456_v9  ;;  %vm758_vm1 = vcmp.gt.f32.partialorder %v456_v9, 0.0  ;;  %1390 = vmatmul.mubr.bf16.gmra.mxu1 %v1037_v16  ;;  %v972_v22 = vsel %vm756_vm0, %v454_v3, %v864_v14 }
 0x14e   :  { %v461_v12 = vpop.f32.mrf.mxu0 }
 0x14f   :  { %vm759_vm2 = vcmp.gt.f32.partialorder %v458_v15, 0.0  ;;  %v867_v18 = vmul.f32 0.01, %v458_v15  ;;  %v974_v26 = vsel %vm758_vm1, %v456_v9, %v866_v17  ;;  %v462_v28 = vadd.f32 %v461_v12, %v11721_v39 }
 0x150   :  { %v463_v20 = vpop.f32.mrf.mxu0  ;;  %v1040_v33 = vpack.c.bf16 %v974_v26, %v971_v30 }
 0x151   :  { %v464_v21 = vadd.f32 %v463_v20, %v11725_v43  ;;  %v975_v23 = vsel %vm759_vm2, %v458_v15, %v867_v18  ;;  %v869_v37 = vmul.f32 0.01, %v462_v28  ;;  %vm761_vm8 = vcmp.gt.f32.partialorder %v462_v28, 0.0 }
 0x152   :  { %v465_v24 = vpop.f32.mrf.mxu0  ;;  %v1041_v25 = vpack.c.bf16 %v975_v23, %v972_v22 }
 0x153   :  { %v466_v27 = vadd.f32 %v465_v24, %v11721_v39  ;;  %v870_v31 = vmul.f32 0.01, %v464_v21  ;;  %vm762_vm5 = vcmp.gt.f32.partialorder %v464_v21, 0.0  ;;  %v977_v49 = vsel %vm761_vm8, %v462_v28, %v869_v37 }
 0x154   :  { %v467_v29 = vpop.f32.mrf.mxu0  ;;  %1397 = vmatprep.mubr.bf16.mxu1 %v1041_v25 }
 0x155   :  { %v468_v32 = vadd.f32 %v467_v29, %v11725_v43  ;;  %v872_v34 = vmul.f32 0.01, %v466_v27  ;;  %vm764_vm6 = vcmp.gt.f32.partialorder %v466_v27, 0.0  ;;  %1398 = vmatmul.mubr.bf16.gmra.mxu1 %v1040_v33  ;;  %v978_v42 = vsel %vm762_vm5, %v464_v21, %v870_v31 }
 0x156   :  { %v471_v35 = vpop.f32.mrf.mxu0 }
 0x157   :  { %vm765_vm7 = vcmp.gt.f32.partialorder %v468_v32, 0.0  ;;  %v873_v36 = vmul.f32 0.01, %v468_v32  ;;  %v980_v45 = vsel %vm764_vm6, %v466_v27, %v872_v34  ;;  %v472_v46 = vadd.f32 %v471_v35, %v11721_v39 }
 0x158   :  { %v473_v38 = vpop.f32.mrf.mxu0  ;;  %v1043_v54 = vpack.c.bf16 %v980_v45, %v977_v49 }
 0x159   :  { %v474_v41 = vadd.f32 %v473_v38, %v11725_v43  ;;  %v981_v40 = vsel %vm765_vm7, %v468_v32, %v873_v36  ;;  %v875_v55 = vmul.f32 0.01, %v472_v46  ;;  %vm767_vm12 = vcmp.gt.f32.partialorder %v472_v46, 0.0 }
 0x15a   :  { %v475_v44 = vpop.f32.mrf.mxu0  ;;  %v1044_v1 = vpack.c.bf16 %v981_v40, %v978_v42 }
 0x15b   :  { %v476_v47 = vadd.f32 %v475_v44, %v11721_v39  ;;  %v876_v51 = vmul.f32 0.01, %v474_v41  ;;  %vm768_vm9 = vcmp.gt.f32.partialorder %v474_v41, 0.0  ;;  %v983_v4 = vsel %vm767_vm12, %v472_v46, %v875_v55 }
 0x15c   :  { %v477_v48 = vpop.f32.mrf.mxu0  ;;  %1405 = vmatprep.mubr.bf16.mxu1 %v1044_v1 }
 0x15d   :  { %v878_v52 = vmul.f32 0.01, %v476_v47  ;;  %v478_v53 = vadd.f32 %v477_v48, %v11725_v43  ;;  %vm770_vm10 = vcmp.gt.f32.partialorder %v476_v47, 0.0  ;;  %1406 = vmatmul.mubr.bf16.gmra.mxu1 %v1043_v54  ;;  %v984_v60 = vsel %vm768_vm9, %v474_v41, %v876_v51 }
 0x15e   :  { %v481_v50 = vpop.f32.mrf.mxu0 }
 0x15f   :  { %vm771_vm11 = vcmp.gt.f32.partialorder %v478_v53, 0.0  ;;  %v879_v56 = vmul.f32 0.01, %v478_v53  ;;  %v482_v57 = vadd.f32 %v481_v50, %v11721_v39  ;;  %v986_v62 = vsel %vm770_vm10, %v476_v47, %v878_v52 }
 0x160   :  { %v483_v58 = vpop.f32.mrf.mxu0  ;;  %v1046_v7 = vpack.c.bf16 %v986_v62, %v983_v4 }
 0x161   :  { %v484_v59 = vadd.f32 %v483_v58, %v11725_v43  ;;  %v987_v61 = vsel %vm771_vm11, %v478_v53, %v879_v56  ;;  %v881_v5 = vmul.f32 0.01, %v482_v57  ;;  %vm773_vm14 = vcmp.gt.f32.partialorder %v482_v57, 0.0 }
 0x162   :  { %v485_v63 = vpop.f32.mrf.mxu0  ;;  %v1047_v0 = vpack.c.bf16 %v987_v61, %v984_v60 }
 0x163   :  { %v882_v2 = vmul.f32 0.01, %v484_v59  ;;  %v486_v3 = vadd.f32 %v485_v63, %v11721_v39  ;;  %vm774_vm13 = vcmp.gt.f32.partialorder %v484_v59, 0.0  ;;  %v989_v16 = vsel %vm773_vm14, %v482_v57, %v881_v5 }
 0x164   :  { %v487_v6 = vpop.f32.mrf.mxu0  ;;  %1413 = vmatprep.mubr.bf16.mxu1 %v1047_v0 }
 0x165   :  { %vm776_vm15 = vcmp.gt.f32.partialorder %v486_v3, 0.0  ;;  %v884_v8 = vmul.f32 0.01, %v486_v3  ;;  %v488_v9 = vadd.f32 %v487_v6, %v11725_v43  ;;  %1414 = vmatmul.mubr.bf16.gmra.mxu1 %v1046_v7  ;;  %v990_v13 = vsel %vm774_vm13, %v484_v59, %v882_v2 }
 0x166   :  { %v491_v10 = vpop.f32.mrf.mxu0 }
 0x167   :  { %vm777_vm0 = vcmp.gt.f32.partialorder %v488_v9, 0.0  ;;  %v885_v11 = vmul.f32 0.01, %v488_v9  ;;  %v492_v14 = vadd.f32 %v491_v10, %v11721_v39  ;;  %v992_v17 = vsel %vm776_vm15, %v486_v3, %v884_v8 }
 0x168   :  { %v493_v15 = vpop.f32.mrf.mxu0  ;;  %v1049_v23 = vpack.c.bf16 %v992_v17, %v989_v16 }
 0x169   :  { %v494_v12 = vadd.f32 %v493_v15, %v11725_v43  ;;  %v993_v18 = vsel %vm777_vm0, %v488_v9, %v885_v11  ;;  %v887_v24 = vmul.f32 0.01, %v492_v14  ;;  %vm779_vm2 = vcmp.gt.f32.partialorder %v492_v14, 0.0 }
 0x16a   :  { %v495_v19 = vpop.f32.mrf.mxu0  ;;  %v1050_v20 = vpack.c.bf16 %v993_v18, %v990_v13 }
 0x16b   :  { %v888_v21 = vmul.f32 0.01, %v494_v12  ;;  %v496_v22 = vadd.f32 %v495_v19, %v11721_v39  ;;  %vm780_vm1 = vcmp.gt.f32.partialorder %v494_v12, 0.0  ;;  %v995_v30 = vsel %vm779_vm2, %v492_v14, %v887_v24  ;;  %v11920_v39 = vld [vmem:[%s14419_s4] ss:$0 sm:$0xff] }
 0x16c   :  { %v497_v25 = vpop.f32.mrf.mxu0  ;;  %1421 = vmatprep.mubr.bf16.mxu1 %v1050_v20 }
 0x16d   :  { %vm782_vm3 = vcmp.gt.f32.partialorder %v496_v22, 0.0  ;;  %v890_v26 = vmul.f32 0.01, %v496_v22  ;;  %v498_v27 = vadd.f32 %v497_v25, %v11725_v43  ;;  %1422 = vmatmul.mubr.bf16.gmra.mxu1 %v1049_v23  ;;  %v996_v29 = vsel %vm780_vm1, %v494_v12, %v888_v21 }
 0x16f   :  { %vm783_vm5 = vcmp.gt.f32.partialorder %v498_v27, 0.0  ;;  %v891_v28 = vmul.f32 0.01, %v498_v27  ;;  %v998_v31 = vsel %vm782_vm3, %v496_v22, %v890_v26 }
 0x170   :  { %v1052_v34 = vpack.c.bf16 %v998_v31, %v995_v30 }
 0x171   :  { %v999_v32 = vsel %vm783_vm5, %v498_v27, %v891_v28  ;;  %v10946_v28 = vld [vmem:[%s14420_s5 + $0x8] ss:$12 sps:$4 sm:$0xff]  }
 0x172   :  { %v1053_v33 = vpack.c.bf16 %v999_v32, %v996_v29 }
 0x174   :  { %1429 = vmatprep.mubr.bf16.mxu1 %v1053_v33 }
 0x175   :  { %1430 = vmatmul.mubr.bf16.gmra.mxu1 %v1052_v34 }
 0x176   :  { %10150 = vmatprep.mubr.msk.bf16.mxu1 %vm1206_vm4, %v10946_v28 }
 0x1ad   :  { %v1295_v35 = vpop.f32.mrf.mxu1  ;;  %v10112_v43 = vpop.f32.mrf.mxu0 }
 0x1ae   :  { %v1296_v36 = vadd.f32 %v11920_v39, %v1295_v35 }
 0x1af   :  { %v1297_v37 = vpop.f32.mrf.mxu1  ;;  %v1472_v38 = vpop.f32.mrf.mxu0 }
 0x1b0   :  { %v1473_v41 = vadd.f32 %v1472_v38, %v1296_v36 }
 0x1b1   :  { %v1298_v42 = vpop.f32.mrf.mxu1  ;;  %v10113_v44 = vpop.f32.mrf.mxu0 }
 0x1b2   :  { %v1299_v40 = vadd.f32 %v11920_v39, %v1298_v42  ;;  %v1651_v46 = vmul.f32 0.01, %v1473_v41  ;;  %vm1615_vm6 = vcmp.gt.f32.partialorder %v1473_v41, 0.0 }
 0x1b3   :  { %v1300_v1 = vpop.f32.mrf.mxu1  ;;  %v1475_v45 = vpop.f32.mrf.mxu0 }
 0x1b4   :  { %v1476_v47 = vadd.f32 %v1475_v45, %v1299_v40  ;;  %v1687_v54 = vsel %vm1615_vm6, %v1473_v41, %v1651_v46  ;;  %v10950_v40 = vld [vmem:[%s14420_s5 + $0x4] ss:$12 sps:$4 sm:$0xff]  }
 0x1b5   :  { %v1303_v48 = vpop.f32.mrf.mxu1  ;;  %1949 = vmatprep.mubr.bf16.mxu0 %v10950_v40 }
 0x1b6   :  { %vm1616_vm7 = vcmp.gt.f32.partialorder %v1476_v47, 0.0  ;;  %v1652_v49 = vmul.f32 0.01, %v1476_v47  ;;  %v1304_v51 = vadd.f32 %v11920_v39, %v1303_v48  ;;  %v10116_v52 = vpop.f32.mrf.mxu0 }
 0x1b7   :  { %v1305_v53 = vpop.f32.mrf.mxu1 }
 0x1b8   :  { %v1688_v50 = vsel %vm1616_vm7, %v1476_v47, %v1652_v49  ;;  %v1481_v55 = vadd.f32 %v10112_v43, %v1304_v51  ;;  %v1488_v58 = vpop.f32.mrf.mxu0 }
 0x1b9   :  { %v11925_v56 = vpack.c.bf16 %v1688_v50, %v1687_v54  ;;  %v1306_v57 = vpop.f32.mrf.mxu1 }
 0x1ba   :  { %v1307_v59 = vadd.f32 %v11920_v39, %v1306_v57  ;;  %v1653_v61 = vmul.f32 0.01, %v1481_v55  ;;  %vm1617_vm8 = vcmp.gt.f32.partialorder %v1481_v55, 0.0  ;;  %v10117_v0 = vpop.f32.mrf.mxu0 }
 0x1bb   :  { %v1308_v60 = vpop.f32.mrf.mxu1 }
 0x1bc   :  { %v1484_v62 = vadd.f32 %v10113_v44, %v1307_v59  ;;  %v1689_v5 = vsel %vm1617_vm8, %v1481_v55, %v1653_v61  ;;  %v1491_v10 = vpop.f32.mrf.mxu0 }
 0x1bd   :  { %v1311_v63 = vpop.f32.mrf.mxu1 }
 0x1be   :  { %vm1618_vm9 = vcmp.gt.f32.partialorder %v1484_v62, 0.0  ;;  %v1654_v2 = vmul.f32 0.01, %v1484_v62  ;;  %v1312_v3 = vadd.f32 %v11920_v39, %v1311_v63 }
 0x1bf   :  { %v1313_v4 = vpop.f32.mrf.mxu1 }
 0x1c0   :  { %v1690_v6 = vsel %vm1618_vm9, %v1484_v62, %v1654_v2  ;;  %v1489_v7 = vadd.f32 %v1488_v58, %v1312_v3 }
 0x1c1   :  { %v11929_v8 = vpack.c.bf16 %v1690_v6, %v1689_v5  ;;  %v1314_v9 = vpop.f32.mrf.mxu1  ;;  %v10120_v17 = vpop.f32.mrf.mxu0 }
 0x1c2   :  { %v1315_v11 = vadd.f32 %v11920_v39, %v1314_v9  ;;  %v1655_v14 = vmul.f32 0.01, %v1489_v7  ;;  %vm1619_vm10 = vcmp.gt.f32.partialorder %v1489_v7, 0.0 }
 0x1c3   :  { %v1316_v13 = vpop.f32.mrf.mxu1  ;;  %v1504_v25 = vpop.f32.mrf.mxu0 }
 0x1c4   :  { %v1492_v15 = vadd.f32 %v1491_v10, %v1315_v11  ;;  %v1691_v20 = vsel %vm1619_vm10, %v1489_v7, %v1655_v14 }
 0x1c5   :  { %v1319_v16 = vpop.f32.mrf.mxu1  ;;  %v10121_v32 = vpop.f32.mrf.mxu0 }
 0x1c6   :  { %vm1620_vm11 = vcmp.gt.f32.partialorder %v1492_v15, 0.0  ;;  %v1656_v12 = vmul.f32 0.01, %v1492_v15  ;;  %v1320_v18 = vadd.f32 %v11920_v39, %v1319_v16 }
 0x1c7   :  { %v1321_v19 = vpop.f32.mrf.mxu1  ;;  %v1507_v42 = vpop.f32.mrf.mxu0 }
 0x1c8   :  { %v1692_v21 = vsel %vm1620_vm11, %v1492_v15, %v1656_v12  ;;  %v1497_v22 = vadd.f32 %v10116_v52, %v1320_v18 }
 0x1c9   :  { %v11933_v23 = vpack.c.bf16 %v1692_v21, %v1691_v20  ;;  %v1322_v24 = vpop.f32.mrf.mxu1 }
 0x1ca   :  { %v1323_v26 = vadd.f32 %v11920_v39, %v1322_v24  ;;  %vm1621_vm12 = vcmp.gt.f32.partialorder %v1497_v22, 0.0  ;;  %v1657_v29 = vmul.f32 0.01, %v1497_v22 }
 0x1cb   :  { %v1324_v27 = vpop.f32.mrf.mxu1 }
 0x1cc   :  { %v1500_v30 = vadd.f32 %v10117_v0, %v1323_v26  ;;  %v1693_v36 = vsel %vm1621_vm12, %v1497_v22, %v1657_v29 }
 0x1cd   :  { %v1327_v31 = vpop.f32.mrf.mxu1  ;;  %v10124_v48 = vpop.f32.mrf.mxu0 }
 0x1ce   :  { %vm1622_vm13 = vcmp.gt.f32.partialorder %v1500_v30, 0.0  ;;  %v1658_v33 = vmul.f32 0.01, %v1500_v30  ;;  %v1328_v34 = vadd.f32 %v11920_v39, %v1327_v31 }
 0x1cf   :  { %v1329_v35 = vpop.f32.mrf.mxu1  ;;  %v1520_v58 = vpop.f32.mrf.mxu0 }
 0x1d0   :  { %v1694_v43 = vsel %vm1622_vm13, %v1500_v30, %v1658_v33  ;;  %v1505_v37 = vadd.f32 %v1504_v25, %v1328_v34 }
 0x1d1   :  { %v11941_v38 = vpack.c.bf16 %v1694_v43, %v1693_v36  ;;  %v1330_v41 = vpop.f32.mrf.mxu1  ;;  %v10125_v0 = vpop.f32.mrf.mxu0 }
 0x1d2   :  { %v1331_v44 = vadd.f32 %v11920_v39, %v1330_v41  ;;  %v1659_v45 = vmul.f32 0.01, %v1505_v37  ;;  %vm1623_vm14 = vcmp.gt.f32.partialorder %v1505_v37, 0.0 }
 0x1d3   :  { %v1332_v1 = vpop.f32.mrf.mxu1  ;;  %v1523_v11 = vpop.f32.mrf.mxu0 }
 0x1d4   :  { %v1508_v46 = vadd.f32 %v1507_v42, %v1331_v44  ;;  %v1695_v53 = vsel %vm1623_vm14, %v1505_v37, %v1659_v45 }
 0x1d5   :  { %v1335_v47 = vpop.f32.mrf.mxu1 }
 0x1d6   :  { %vm1624_vm15 = vcmp.gt.f32.partialorder %v1508_v46, 0.0  ;;  %v1660_v49 = vmul.f32 0.01, %v1508_v46  ;;  %v1336_v51 = vadd.f32 %v11920_v39, %v1335_v47 }
 0x1d7   :  { %v1337_v52 = vpop.f32.mrf.mxu1  ;;  %v10128_v12 = vpop.f32.mrf.mxu0 }
 0x1d8   :  { %v1696_v54 = vsel %vm1624_vm15, %v1508_v46, %v1660_v49  ;;  %v1513_v50 = vadd.f32 %v10120_v17, %v1336_v51 }
 0x1d9   :  { %v11948_v55 = vpack.c.bf16 %v1696_v54, %v1695_v53  ;;  %v1338_v57 = vpop.f32.mrf.mxu1  ;;  %v1536_v27 = vpop.f32.mrf.mxu0 }
 0x1da   :  { %v1339_v59 = vadd.f32 %v11920_v39, %v1338_v57  ;;  %vm1625_vm0 = vcmp.gt.f32.partialorder %v1513_v50, 0.0  ;;  %v1661_v61 = vmul.f32 0.01, %v1513_v50 }
 0x1db   :  { %v1340_v60 = vpop.f32.mrf.mxu1  ;;  %v10129_v33 = vpop.f32.mrf.mxu0 }
 0x1dc   :  { %v1516_v62 = vadd.f32 %v10121_v32, %v1339_v59  ;;  %v1697_v5 = vsel %vm1625_vm0, %v1513_v50, %v1661_v61 }
 0x1dd   :  { %v1343_v63 = vpop.f32.mrf.mxu1  ;;  %v1539_v44 = vpop.f32.mrf.mxu0 }
 0x1de   :  { %vm1626_vm1 = vcmp.gt.f32.partialorder %v1516_v62, 0.0  ;;  %v1662_v2 = vmul.f32 0.01, %v1516_v62  ;;  %v1344_v3 = vadd.f32 %v11920_v39, %v1343_v63 }
 0x1df   :  { %v1345_v4 = vpop.f32.mrf.mxu1 }
 0x1e0   :  { %v1698_v6 = vsel %vm1626_vm1, %v1516_v62, %v1662_v2  ;;  %v1521_v7 = vadd.f32 %v1520_v58, %v1344_v3 }
 0x1e1   :  { %v11952_v9 = vpack.c.bf16 %v1698_v6, %v1697_v5  ;;  %v1346_v10 = vpop.f32.mrf.mxu1 }
 0x1e2   :  { %vm1627_vm2 = vcmp.gt.f32.partialorder %v1521_v7, 0.0  ;;  %v1347_v13 = vadd.f32 %v11920_v39, %v1346_v10  ;;  %v1663_v14 = vmul.f32 0.01, %v1521_v7 }
 0x1e3   :  { %v1348_v15 = vpop.f32.mrf.mxu1 }
 0x1e4   :  { %v1524_v16 = vadd.f32 %v1523_v11, %v1347_v13  ;;  %v1699_v21 = vsel %vm1627_vm2, %v1521_v7, %v1663_v14 }
 0x1e5   :  { %v1351_v17 = vpop.f32.mrf.mxu1 }
 0x1e6   :  { %vm1628_vm3 = vcmp.gt.f32.partialorder %v1524_v16, 0.0  ;;  %v1664_v18 = vmul.f32 0.01, %v1524_v16  ;;  %v1352_v19 = vadd.f32 %v11920_v39, %v1351_v17 }
 0x1e7   :  { %v1353_v20 = vpop.f32.mrf.mxu1 }
 0x1e8   :  { %v1700_v22 = vsel %vm1628_vm3, %v1524_v16, %v1664_v18  ;;  %v1529_v24 = vadd.f32 %v10124_v48, %v1352_v19 }
 0x1e9   :  { %v11956_v25 = vpack.c.bf16 %v1700_v22, %v1699_v21  ;;  %v1354_v26 = vpop.f32.mrf.mxu1 }
 0x1ea   :  { %v1355_v28 = vadd.f32 %v11920_v39, %v1354_v26  ;;  %v1665_v29 = vmul.f32 0.01, %v1529_v24  ;;  %vm1629_vm5 = vcmp.gt.f32.partialorder %v1529_v24, 0.0 }
 0x1eb   :  { %v1356_v30 = vpop.f32.mrf.mxu1 }
 0x1ec   :  { %v1532_v31 = vadd.f32 %v10125_v0, %v1355_v28  ;;  %v1701_v43 = vsel %vm1629_vm5, %v1529_v24, %v1665_v29  ;;  %v10132_v0 = vpop.f32.mrf.mxu0 }
 0x1ed   :  { %v1359_v32 = vpop.f32.mrf.mxu1 }
 0x1ee   :  { %vm1630_vm6 = vcmp.gt.f32.partialorder %v1532_v31, 0.0  ;;  %v1666_v34 = vmul.f32 0.01, %v1532_v31  ;;  %v1360_v35 = vadd.f32 %v11920_v39, %v1359_v32  ;;  %v1552_v7 = vpop.f32.mrf.mxu0 }
 0x1ef   :  { %v1361_v36 = vpop.f32.mrf.mxu1 }
 0x1f0   :  { %v1702_v37 = vsel %vm1630_vm6, %v1532_v31, %v1666_v34  ;;  %v1537_v41 = vadd.f32 %v1536_v27, %v1360_v35  ;;  %v10133_v13 = vpop.f32.mrf.mxu0 }
 0x1f1   :  { %v11960_v42 = vpack.c.bf16 %v1702_v37, %v1701_v43  ;;  %v1362_v40 = vpop.f32.mrf.mxu1 }
 0x1f2   :  { %v1363_v1 = vadd.f32 %v11920_v39, %v1362_v40  ;;  %vm1631_vm7 = vcmp.gt.f32.partialorder %v1537_v41, 0.0  ;;  %v1667_v46 = vmul.f32 0.01, %v1537_v41  ;;  %v11969_v16 = vpop.f32.mrf.mxu0 }
 0x1f3   :  { %v1364_v45 = vpop.f32.mrf.mxu1 }
 0x1f4   :  { %v1540_v47 = vadd.f32 %v1539_v44, %v1363_v1  ;;  %v1703_v53 = vsel %vm1631_vm7, %v1537_v41, %v1667_v46  ;;  %v10136_v18 = vpop.f32.mrf.mxu0 }
 0x1f5   :  { %v1367_v48 = vpop.f32.mrf.mxu1 }
 0x1f6   :  { %vm1632_vm8 = vcmp.gt.f32.partialorder %v1540_v47, 0.0  ;;  %v1668_v49 = vmul.f32 0.01, %v1540_v47  ;;  %v1368_v51 = vadd.f32 %v11920_v39, %v1367_v48  ;;  %v11971_v21 = vpop.f32.mrf.mxu0 }
 0x1f7   :  { %v1369_v52 = vpop.f32.mrf.mxu1 }
 0x1f8   :  { %v1704_v54 = vsel %vm1632_vm8, %v1540_v47, %v1668_v49  ;;  %v1545_v50 = vadd.f32 %v10128_v12, %v1368_v51  ;;  %v10137_v24 = vpop.f32.mrf.mxu0 }
 0x1f9   :  { %v11964_v57 = vpack.c.bf16 %v1704_v54, %v1703_v53  ;;  %v1370_v58 = vpop.f32.mrf.mxu1 }
 0x1fa   :  { %v1371_v59 = vadd.f32 %v11920_v39, %v1370_v58  ;;  %v1669_v61 = vmul.f32 0.01, %v1545_v50  ;;  %vm1633_vm9 = vcmp.gt.f32.partialorder %v1545_v50, 0.0  ;;  %v1571_v28 = vpop.f32.mrf.mxu0 }
 0x1fb   :  { %v1372_v60 = vpop.f32.mrf.mxu1 }
 0x1fc   :  { %v1548_v62 = vadd.f32 %v10129_v33, %v1371_v59  ;;  %v1705_v4 = vsel %vm1633_vm9, %v1545_v50, %v1669_v61  ;;  %v10140_v31 = vpop.f32.mrf.mxu0 }
 0x1fd   :  { %v1375_v63 = vpop.f32.mrf.mxu1 }
 0x1fe   :  { %vm1634_vm10 = vcmp.gt.f32.partialorder %v1548_v62, 0.0  ;;  %v1670_v2 = vmul.f32 0.01, %v1548_v62  ;;  %v1584_v34 = vpop.f32.mrf.mxu0  ;;  %v1376_v35 = vadd.f32 %v11920_v39, %v1375_v63 }
 0x1ff   :  { %v1377_v3 = vpop.f32.mrf.mxu1 }
 0x200   :  { %v1706_v5 = vsel %vm1634_vm10, %v1548_v62, %v1670_v2  ;;  %v10141_v44 = vpop.f32.mrf.mxu0  ;;  %v11977_v1 = vadd.f32 %v1552_v7, %v1376_v35 }
 0x201   :  { %v11967_v6 = vpack.c.bf16 %v1706_v5, %v1705_v4  ;;  %v1378_v10 = vpop.f32.mrf.mxu1 }
 0x202   :  { %v1587_v51 = vpop.f32.mrf.mxu0  ;;  %v11985_v53 = vmul.f32 0.01, %v11977_v1  ;;  %v1379_v7 = vadd.f32 %v11920_v39, %v1378_v10  ;;  %vm1635_vm7 = vcmp.gt.f32.partialorder %v11977_v1, 0.0 }
 0x203   :  { %v1380_v11 = vpop.f32.mrf.mxu1 }
 0x204   :  { %v11989_v61 = vpop.f32.mrf.mxu0 }
 0x205   :  { %v1383_v14 = vpop.f32.mrf.mxu1 }
 0x206   :  { %v1384_v43 = vadd.f32 %v11920_v39, %v1383_v14 }
 0x207   :  { %v1385_v15 = vpop.f32.mrf.mxu1 }
 0x208   :  { %v11980_v47 = vadd.f32 %v10132_v0, %v1384_v43 }
 0x209   :  { %v1386_v17 = vpop.f32.mrf.mxu1 }
 0x20a   :  { %v1387_v37 = vadd.f32 %v11920_v39, %v1386_v17  ;;  %v11992_v62 = vmul.f32 0.01, %v11980_v47  ;;  %vm1637_vm0 = vcmp.gt.f32.partialorder %v11980_v47, 0.0 }
 0x20b   :  { %v1388_v12 = vpop.f32.mrf.mxu1 }
 0x20c   :  { %v11982_v48 = vadd.f32 %v10133_v13, %v1387_v37  ;;  %v1600_v12 = vpop.f32.mrf.mxu0 }
 0x20d   :  { %v1391_v19 = vpop.f32.mrf.mxu1 }
 0x20e   :  { %v11995_v63 = vmul.f32 0.01, %v11982_v48  ;;  %vm1638_vm3 = vcmp.gt.f32.partialorder %v11982_v48, 0.0 }
 0x20f   :  { %v1393_v20 = vpop.f32.mrf.mxu1 }
 0x210   :  { %v1392_v20 = vadd.f32 %v11920_v39, %v1391_v19 }
 0x211   :  { %v1394_v22 = vpop.f32.mrf.mxu1 }
 0x212   :  { %v1395_v11 = vadd.f32 %v11920_v39, %v1394_v22  ;;  %v1569_v35 = vadd.f32 %v11971_v21, %v1392_v20 }
 0x213   :  { %v1396_v26 = vpop.f32.mrf.mxu1 }
 0x214   :  { %vm1639_vm6 = vcmp.gt.f32.partialorder %v1569_v35, 0.0 }
 0x215   :  { %v1399_v27 = vpop.f32.mrf.mxu1 }
 0x216   :  { %v1400_v2 = vadd.f32 %v11920_v39, %v1399_v27 }
 0x217   :  { %v1401_v29 = vpop.f32.mrf.mxu1 }
 0x218   :  { %v1577_v29 = vadd.f32 %v10136_v18, %v1400_v2 }
 0x219   :  { %v1402_v30 = vpop.f32.mrf.mxu1 }
 0x21a   :  { %v1403_v59 = vadd.f32 %v11920_v39, %v1402_v30  ;;  %v12003_v30 = vadd.f32 %v11969_v16, %v1379_v7  ;;  %vm1641_vm1 = vcmp.gt.f32.partialorder %v1577_v29, 0.0  ;;  %v1677_v16 = vmul.f32 0.01, %v1577_v29 }
 0x21b   :  { %v1404_v32 = vpop.f32.mrf.mxu1 }
 0x21c   :  { %v1580_v15 = vadd.f32 %v10137_v24, %v1403_v59  ;;  %v10145_v24 = vpop.f32.mrf.mxu0  ;;  %vm1636_vm2 = vcmp.gt.f32.partialorder %v12003_v30, 0.0 }
 0x21d   :  { %v1407_v33 = vpop.f32.mrf.mxu1 }
 0x21e   :  { %v1408_v41 = vadd.f32 %v11920_v39, %v1407_v33  ;;  %v1678_v32 = vmul.f32 0.01, %v1580_v15  ;;  %vm1642_vm15 = vcmp.gt.f32.partialorder %v1580_v15, 0.0  ;;  %v1603_v43 = vpop.f32.mrf.mxu0 }
 0x21f   :  { %v1409_v36 = vpop.f32.mrf.mxu1 }
 0x220   :  { %v1585_v49 = vadd.f32 %v1584_v34, %v1408_v41 }
 0x221   :  { %v1410_v40 = vpop.f32.mrf.mxu1 }
 0x222   :  { %v1411_v45 = vadd.f32 %v11920_v39, %v1410_v40  ;;  %vm1643_vm11 = vcmp.gt.f32.partialorder %v1585_v49, 0.0  ;;  %v1679_v3 = vmul.f32 0.01, %v1585_v49 }
 0x223   :  { %v1412_v46 = vpop.f32.mrf.mxu1 }
 0x224   :  { %v1588_v54 = vadd.f32 %v1587_v51, %v1411_v45  ;;  %v1713_v51 = vsel %vm1641_vm1, %v1577_v29, %v1677_v16  ;;  %v10962_v16 = vld [vmem:[%s14420_s5 + $0xb0] ss:$12 sps:$4 sm:$0xff]  }
 0x225   :  { %v1415_v52 = vpop.f32.mrf.mxu1 }
 0x226   :  { %v1416_v50 = vadd.f32 %v11920_v39, %v1415_v52  ;;  %v1680_v4 = vmul.f32 0.01, %v1588_v54  ;;  %vm1644_vm12 = vcmp.gt.f32.partialorder %v1588_v54, 0.0  ;;  %v11342_v52 = vld [vmem:[%s14419_s4] ss:$0 sm:$0xff] }
 0x227   :  { %v1417_v58 = vpop.f32.mrf.mxu1 }
 0x228   :  { %v1593_v60 = vadd.f32 %v10140_v31, %v1416_v50  ;;  %v1572_v31 = vadd.f32 %v1571_v28, %v1395_v11  ;;  %v1716_v22 = vsel %vm1644_vm12, %v1588_v54, %v1680_v4  ;;  %v1715_v28 = vsel %vm1643_vm11, %v1585_v49, %v1679_v3 }
 0x229   :  { %v1418_v0 = vpop.f32.mrf.mxu1  ;;  %v12012_v41 = vpack.c.bf16 %v1716_v22, %v1715_v28  ;;  %v10955_v22 = vld [vmem:[%s14420_s5 + $0x1c] ss:$12 sps:$4 sm:$0xff]   ;;  %v10965_v28 = vld [vmem:[%s14420_s5 + $0x4c] ss:$12 sps:$4 sm:$0xff]   ;;  %vm2927_vm12 = vcmask 523264  }
 0x22a   :  { %v1419_v5 = vadd.f32 %v11920_v39, %v1418_v0  ;;  %v1681_v13 = vmul.f32 0.01, %v1593_v60  ;;  %vm1645_vm13 = vcmp.gt.f32.partialorder %v1593_v60, 0.0  ;;  %v1676_v21 = vmul.f32 0.01, %v1572_v31 }
 0x22b   :  { %v1420_v14 = vpop.f32.mrf.mxu1  ;;  %vm1640_vm5 = vcmp.gt.f32.partialorder %v1572_v31, 0.0 }
 0x22c   :  { %v1596_v17 = vadd.f32 %v10141_v44, %v1419_v5  ;;  %v1717_v33 = vsel %vm1645_vm13, %v1593_v60, %v1681_v13  ;;  %v1714_v44 = vsel %vm1642_vm15, %v1580_v15, %v1678_v32  ;;  %v1712_v59 = vsel %vm1640_vm5, %v1572_v31, %v1676_v21  ;;  %v10952_v32 = vld [vmem:[%s14420_s5 + $0x50] ss:$12 sps:$4 sm:$0xff]  }
 0x22d   :  { %v1423_v26 = vpop.f32.mrf.mxu1  ;;  %v12024_v50 = vpack.c.bf16 %v1714_v44, %v1713_v51  ;;  %v1672_v14 = vmul.f32 0.01, %v12003_v30  ;;  %v10971_v21 = vld [vmem:[%s14420_s5 + $0x64] ss:$12 sps:$4 sm:$0xff]   ;;  %v10974_v44 = vld [vmem:[%s14420_s5 + $0xdc] ss:$12 sps:$4 sm:$0xff]  }
 0x22e   :  { %vm1646_vm14 = vcmp.gt.f32.partialorder %v1596_v17, 0.0  ;;  %v1682_v27 = vmul.f32 0.01, %v1596_v17  ;;  %v1424_v36 = vadd.f32 %v11920_v39, %v1423_v26  ;;  %v10980_v51 = vld [vmem:[%s14420_s5 + $0xf4] ss:$12 sps:$4 sm:$0xff]  }
 0x22f   :  { %v1425_v10 = vpop.f32.mrf.mxu1 }
 0x230   :  { %v1718_v34 = vsel %vm1646_vm14, %v1596_v17, %v1682_v27  ;;  %v1601_v45 = vadd.f32 %v1600_v12, %v1424_v36  ;;  %v1709_v17 = vsel %vm1637_vm0, %v11980_v47, %v11992_v62  ;;  %v1707_v62 = vsel %vm1635_vm7, %v11977_v1, %v11985_v53  ;;  %v10951_v1 = vld [vmem:[%s14420_s5 + $0x38] ss:$12 sps:$4 sm:$0xff]   ;;  %v10948_v53 = vld [vmem:[%s14420_s5] ss:$12 sps:$4 sm:$0xff]  }
 0x231   :  { %v12006_v19 = vpack.c.bf16 %v1718_v34, %v1717_v33  ;;  %v1426_v18 = vpop.f32.mrf.mxu1  ;;  %v10956_v33 = vld [vmem:[%s14420_s5 + $0x68] ss:$12 sps:$4 sm:$0xff]   ;;  %v10953_v34 = vld [vmem:[%s14420_s5 + $0x18] ss:$12 sps:$4 sm:$0xff]  }
 0x232   :  { %v1427_v37 = vadd.f32 %v11920_v39, %v1426_v18  ;;  %v1675_v39 = vmul.f32 0.01, %v1569_v35  ;;  %vm1647_vm8 = vcmp.gt.f32.partialorder %v1601_v45, 0.0  ;;  %v1683_v0 = vmul.f32 0.01, %v1601_v45 }
 0x233   :  { %v1428_v40 = vpop.f32.mrf.mxu1  ;;  %9122 = vmatprep.subr.bf16.mxu0 %v12006_v19  ;;  %v10961_v36 = vld [vmem:[%s14420_s5 + $0x98] ss:$12 sps:$4 sm:$0xff]   ;;  %v10958_v18 = vld [vmem:[%s14420_s5 + $0x30] ss:$12 sps:$4 sm:$0xff]  }
 0x234   :  { %9123 = vmatpush3.bf16.msra.mxu0 %v11960_v42  ;;  %v1604_v46 = vadd.f32 %v1603_v43, %v1427_v37  ;;  %v1711_v4 = vsel %vm1639_vm6, %v1569_v35, %v1675_v39  ;;  %v1719_v12 = vsel %vm1647_vm8, %v1601_v45, %v1683_v0  ;;  %v10960_v35 = vld [vmem:[%s14420_s5 + $0x34] ss:$12 sps:$4 sm:$0xff]   ;;  %v10968_v43 = vld [vmem:[%s14420_s5 + $0xc4] ss:$12 sps:$4 sm:$0xff]   ;;  %v12161_v45 = vld [vmem:[%s14421_s6 + $0x58] sm:$0xff]  }
 0x235   :  { %v1431_v49 = vpop.f32.mrf.mxu1  ;;  %9124 = vmatprep.subr.bf16.mxu0 %v12012_v41  ;;  %v12030_v11 = vpack.c.bf16 %v1712_v59, %v1711_v4  ;;  %v10963_v37 = vld [vmem:[%s14420_s5 + $0x48] ss:$12 sps:$4 sm:$0xff]   ;;  %v10966_v40 = vld [vmem:[%s14420_s5 + $0xc0] ss:$12 sps:$4 sm:$0xff]  }
 0x236   :  { %v1432_v54 = vadd.f32 %v11342_v52, %v1431_v49  ;;  %vm1648_vm9 = vcmp.gt.f32.partialorder %v1604_v46, 0.0  ;;  %v1684_v2 = vmul.f32 0.01, %v1604_v46  ;;  %v10972_v49 = vld [vmem:[%s14420_s5 + $0xd8] ss:$12 sps:$4 sm:$0xff]  }
 0x237   :  { %v1433_v58 = vpop.f32.mrf.mxu1  ;;  %v10977_v39 = vld [vmem:[%s14420_s5 + $0x7c] ss:$12 sps:$4 sm:$0xff]   ;;  %v10986_v59 = vld [vmem:[%s14420_s5 + $0x10c] ss:$12 sps:$4 sm:$0xff]  }
 0x238   :  { %v1609_v60 = vadd.f32 %v11989_v61, %v1432_v54  ;;  %9125 = vmatpush3.bf16.msra.mxu0 %v11956_v25  ;;  %v1710_v61 = vsel %vm1638_vm3, %v11982_v48, %v11995_v63  ;;  %v1720_v20 = vsel %vm1648_vm9, %v1604_v46, %v1684_v2  ;;  %v1708_v48 = vsel %vm1636_vm2, %v12003_v30, %v1672_v14  ;;  %v10947_v30 = vld [vmem:[%s14420_s5 + $0x20] ss:$12 sps:$4 sm:$0xff]   ;;  %v10978_v54 = vld [vmem:[%s14420_s5 + $0xf0] ss:$12 sps:$4 sm:$0xff]   ;;  %v10984_v0 = vld [vmem:[%s14420_s5 + $0x108] ss:$12 sps:$4 sm:$0xff]  }
 0x239   :  { %v1434_v3 = vpop.f32.mrf.mxu1  ;;  %9126 = vmatprep.subr.bf16.mxu0 %v12024_v50  ;;  %v12045_v27 = vpack.c.bf16 %v1710_v61, %v1709_v17  ;;  %v12051_v31 = vpack.c.bf16 %v1720_v20, %v1719_v12  ;;  %v12060_v10 = vpack.c.bf16 %v1708_v48, %v1707_v62  ;;  %v10969_v46 = vld [vmem:[%s14420_s5 + $0x60] ss:$12 sps:$4 sm:$0xff]   ;;  %v10987_v4 = vld [vmem:[%s14420_s5 + $0xa8] ss:$12 sps:$4 sm:$0xff]   ;;  %v10993_v14 = vld [vmem:[%s14420_s5 + $0x138] ss:$12 sps:$4 sm:$0xff]  }
 0x23a   :  { %vm1649_vm10 = vcmp.gt.f32.partialorder %v1609_v60, 0.0  ;;  %v1685_v5 = vmul.f32 0.01, %v1609_v60  ;;  %v1435_v7 = vadd.f32 %v11342_v52, %v1434_v3  ;;  %v10975_v52 = vld [vmem:[%s14420_s5 + $0x78] ss:$12 sps:$4 sm:$0xff]  }
 0x23b   :  { %v1436_v13 = vpop.f32.mrf.mxu1  ;;  %v10983_v58 = vld [vmem:[%s14420_s5 + $0x94] ss:$12 sps:$4 sm:$0xff]   ;;  %v10989_v2 = vld [vmem:[%s14420_s5 + $0xac] ss:$12 sps:$4 sm:$0xff]   ;;  %v10992_v3 = vld [vmem:[%s14420_s5 + $0x124] ss:$12 sps:$4 sm:$0xff]  }
 0x23c   :  { %v1612_v15 = vadd.f32 %v10145_v24, %v1435_v7  ;;  %9127 = vmatpush3.bf16.msra.mxu0 %v11952_v9  ;;  %v1721_v26 = vsel %vm1649_vm10, %v1609_v60, %v1685_v5  ;;  %v10957_v24 = vld [vmem:[%s14420_s5 + $0x80] ss:$12 sps:$4 sm:$0xff]   ;;  %v10981_v60 = vld [vmem:[%s14420_s5 + $0x90] ss:$12 sps:$4 sm:$0xff]   ;;  %v10996_v13 = vld [vmem:[%s14420_s5 + $0xc8] ss:$12 sps:$4 sm:$0xff]  }
 0x23d   :  { %9128 = vmatprep.subr.bf16.mxu0 %v12030_v11  ;;  %v10990_v5 = vld [vmem:[%s14420_s5 + $0x120] ss:$12 sps:$4 sm:$0xff]   ;;  %v10995_v7 = vld [vmem:[%s14420_s5 + $0x13c] ss:$12 sps:$4 sm:$0xff]   ;;  %v11001_v17 = vld [vmem:[%s14420_s5 + $0xf8] ss:$12 sps:$4 sm:$0xff]  }
 0x23e   :  { %vm1650_vm11 = vcmp.gt.f32.partialorder %v1612_v15, 0.0  ;;  %v1686_v29 = vmul.f32 0.01, %v1612_v15  ;;  %v10997_v61 = vld [vmem:[%s14420_s5 + $0xe0] ss:$12 sps:$4 sm:$0xff]  }
 0x23f   :  { %v10998_v12 = vld [vmem:[%s14420_s5 + $0x150] ss:$12 sps:$4 sm:$0xff]   ;;  %v11003_v48 = vld [vmem:[%s14420_s5 + $0x168] ss:$12 sps:$4 sm:$0xff]   ;;  %v11008_v62 = vld [vmem:[%s14420_s5 + $0x158] ss:$12 sps:$4 sm:$0xff]  }
 0x240   :  { %v1722_v63 = vsel %vm1650_vm11, %v1612_v15, %v1686_v29  ;;  %9129 = vmatpush3.bf16.msra.mxu0 %v11948_v55  ;;  %v11000_v15 = vld [vmem:[%s14420_s5 + $0x154] ss:$12 sps:$4 sm:$0xff]   ;;  %v11002_v20 = vld [vmem:[%s14420_s5 + $0x110] ss:$12 sps:$4 sm:$0xff]  }
 0x241   :  { %v12053_v47 = vpack.c.bf16 %v1722_v63, %v1721_v26  ;;  %9130 = vmatprep.subr.bf16.mxu0 %v12045_v27  ;;  %v11005_v26 = vld [vmem:[%s14420_s5 + $0x16c] ss:$12 sps:$4 sm:$0xff]   ;;  %v11006_v29 = vld [vmem:[%s14420_s5 + $0x128] ss:$12 sps:$4 sm:$0xff]  }
 0x242   :  { %v11007_v63 = vld [vmem:[%s14420_s5 + $0x140] ss:$12 sps:$4 sm:$0xff]  }
 0x243   :  { %10146 = vmatprep.subr.bf16.mxu1 %v12053_v47 }
 0x244   :  { %9131 = vmatpush3.bf16.msra.mxu0 %v11941_v38  ;;  %10147 = vmatpush3.bf16.msra.mxu1 %v12053_v47 }
 0x245   :  { %9132 = vmatprep.subr.bf16.mxu0 %v12060_v10  ;;  %10148 = vmatprep.subr.bf16.mxu1 %v12051_v31 }
 0x248   :  { %9133 = vmatpush3.bf16.msra.mxu0 %v11933_v23  ;;  %10149 = vmatpush3.bf16.msra.mxu1 %v12051_v31 }
 0x249   :  { %9134 = vmatprep.subr.bf16.mxu0 %v11967_v6  ;;  %9196 = vmatprep.subr.bf16.mxu1 %v12006_v19 }
 0x24b   :  { %10151 = vmatmul.mubr.msk.bf16.vlgmr.msra.gmra.mxu1 %vm1206_vm4, %v10947_v30  ;;  %v11009_v30 = vld [vmem:[%s14420_s5 + $0x188] ss:$12 sps:$4 sm:$0xff]  }
 0x24c   :  { %9135 = vmatpush3.bf16.msra.mxu0 %v11929_v8  ;;  %9197 = vmatpush3.bf16.msra.mxu1 %v11960_v42 }
 0x24d   :  { %9136 = vmatprep.subr.bf16.mxu0 %v11964_v57  ;;  %9198 = vmatprep.subr.bf16.mxu1 %v12012_v41 }
 0x24e   :  { %10154 = vmatprep.mubr.msk.bf16.mxu1 %vm1206_vm4, %v10951_v1  ;;  %v11011_v1 = vld [vmem:[%s14420_s5 + $0x170] ss:$12 sps:$4 sm:$0xff]  }
 0x250   :  { %9137 = vmatpush3.bf16.msra.mxu0 %v11925_v56  ;;  %9199 = vmatpush3.bf16.msra.mxu1 %v11956_v25 }
 0x251   :  { %9200 = vmatprep.subr.bf16.mxu1 %v12024_v50  ;;  %10166 = vmatprep.subr.bf16.mxu0 %v12053_v47 }
 0x253   :  { %1950 = vmatmul.mubr.bf16.vlgmr.msra.gmra.mxu0 %v10948_v53  ;;  %10155 = vmatmul.mubr.msk.bf16.gmra.mxu1 %vm1206_vm4, %v10952_v32  ;;  %v11012_v53 = vld [vmem:[%s14420_s5 + $0x1a0] ss:$12 sps:$4 sm:$0xff]   ;;  %v11013_v32 = vld [vmem:[%s14421_s6 + $0x50] sm:$0xff]  }
 0x254   :  { %9201 = vmatpush3.bf16.msra.mxu1 %v11952_v9  ;;  %10167 = vmatpush3.bf16.msra.mxu0 %v12053_v47 }
 0x255   :  { %9202 = vmatprep.subr.bf16.mxu1 %v12030_v11  ;;  %10168 = vmatprep.subr.bf16.mxu0 %v12051_v31 }
 0x256   :  { %1957 = vmatprep.mubr.bf16.mxu0 %v10955_v22  ;;  %10158 = vmatprep.mubr.msk.bf16.mxu1 %vm1206_vm4, %v10956_v33  ;;  %v11016_v22 = vld [vmem:[%s14420_s5 + $0x184] ss:$12 sps:$4 sm:$0xff]  }
 0x257   :  { %v11032_v33 = vld [vmem:[%s14420_s5 + $0x1b8] ss:$12 sps:$4 sm:$0xff]  }
 0x258   :  { %9203 = vmatpush3.bf16.msra.mxu1 %v11948_v55  ;;  %10169 = vmatpush3.bf16.msra.mxu0 %v12051_v31 }
 0x259   :  { %9204 = vmatprep.subr.bf16.mxu1 %v12045_v27  ;;  %9270 = vmatprep.subr.bf16.mxu0 %v12006_v19 }
 0x25b   :  { %1958 = vmatmul.mubr.bf16.gmra.mxu0 %v10953_v34  ;;  %10159 = vmatmul.mubr.msk.bf16.gmra.mxu1 %vm1206_vm4, %v10957_v24  ;;  %v11017_v34 = vld [vmem:[%s14421_s6 + $0x48] sm:$0xff]   ;;  %v11018_v24 = vld [vmem:[%s14421_s6 + $0x18] sm:$0xff]  }
 0x25c   :  { %9205 = vmatpush3.bf16.msra.mxu1 %v11941_v38  ;;  %1965 = vmatprep.mubr.bf16.mxu0 %v10960_v35  ;;  %v11014_v35 = vld [vmem:[%s14420_s5 + $0x180] ss:$12 sps:$4 sm:$0xff]  }
 0x25d   :  { %9206 = vmatprep.subr.bf16.mxu1 %v12060_v10  ;;  %10162 = vmatprep.mubr.msk.bf16.mxu1 %vm1206_vm4, %v10961_v36  ;;  %v11033_v36 = vld [vmem:[%s14420_s5 + $0x1d0] ss:$12 sps:$4 sm:$0xff]  }
 0x260   :  { %9207 = vmatpush3.bf16.msra.mxu1 %v11933_v23 }
 0x261   :  { %9208 = vmatprep.subr.bf16.mxu1 %v11967_v6 }
 0x263   :  { %1966 = vmatmul.mubr.bf16.gmra.mxu0 %v10958_v18  ;;  %10163 = vmatmul.mubr.msk.bf16.gmra.mxu1 %vm1206_vm4, %v10962_v16  ;;  %v11019_v18 = vld [vmem:[%s14421_s6 + $0x40] sm:$0xff]   ;;  %v11020_v16 = vld [vmem:[%s14421_s6 + $0x10] sm:$0xff]  }
 0x264   :  { %9209 = vmatpush3.bf16.msra.mxu1 %v11929_v8  ;;  %1973 = vmatprep.mubr.bf16.mxu0 %v10965_v28  ;;  %v11023_v28 = vld [vmem:[%s14420_s5 + $0x19c] ss:$12 sps:$4 sm:$0xff]  }
 0x265   :  { %9210 = vmatprep.subr.bf16.mxu1 %v11964_v57  ;;  %2336 = vmatprep.mubr.bf16.mxu1 %v10968_v43  ;;  %v11040_v43 = vld [vmem:[%s14420_s5 + $0x1e8] ss:$12 sps:$4 sm:$0xff]  }
 0x268   :  { %9211 = vmatpush3.bf16.msra.mxu1 %v11925_v56 }
 0x269   :  { %10186 = vmatprep.subr.bf16.mxu1 %v12053_v47 }
 0x26b   :  { %1974 = vmatmul.mubr.bf16.gmra.mxu0 %v10963_v37  ;;  %2337 = vmatmul.mubr.bf16.vlgmr.msra.gmra.mxu1 %v10966_v40  ;;  %v11024_v37 = vld [vmem:[%s14421_s6 + $0x8] sm:$0xff]   ;;  %v11021_v40 = vld [vmem:[%s14420_s5 + $0x198] ss:$12 sps:$4 sm:$0xff]  }
 0x26c   :  { %10187 = vmatpush3.bf16.msra.mxu1 %v12053_v47  ;;  %1981 = vmatprep.mubr.bf16.mxu0 %v10971_v21  ;;  %v11041_v21 = vld [vmem:[%s14420_s5 + $0x200] ss:$12 sps:$4 sm:$0xff]  }
 0x26d   :  { %10188 = vmatprep.subr.bf16.mxu1 %v12051_v31  ;;  %2344 = vmatprep.mubr.bf16.mxu1 %v10974_v44  ;;  %v11028_v44 = vld [vmem:[%s14420_s5 + $0x1b4] ss:$12 sps:$4 sm:$0xff]  }
 0x270   :  { %10189 = vmatpush3.bf16.msra.mxu1 %v12051_v31 }
 0x271   :  { %10206 = vmatprep.subr.bf16.mxu1 %v12161_v45 }
 0x273   :  { %1982 = vmatmul.mubr.bf16.gmra.mxu0 %v10969_v46  ;;  %2345 = vmatmul.mubr.bf16.gmra.mxu1 %v10972_v49  ;;  %v11048_v46 = vld [vmem:[%s14420_s5 + $0x218] ss:$12 sps:$4 sm:$0xff]   ;;  %v11026_v49 = vld [vmem:[%s14420_s5 + $0x1b0] ss:$12 sps:$4 sm:$0xff]  }
 0x274   :  { %1989 = vmatprep.mubr.bf16.mxu0 %v10977_v39  ;;  %2352 = vmatprep.mubr.bf16.mxu1 %v10980_v51  ;;  %v11049_v39 = vld [vmem:[%s14420_s5 + $0x230] ss:$12 sps:$4 sm:$0xff]   ;;  %v11031_v51 = vld [vmem:[%s14420_s5 + $0x1cc] ss:$12 sps:$4 sm:$0xff]  }
 0x27b   :  { %1990 = vmatmul.mubr.bf16.gmra.mxu0 %v10975_v52  ;;  %2353 = vmatmul.mubr.bf16.gmra.mxu1 %v10978_v54  ;;  %v11029_v52 = vld [vmem:[%s14420_s5 + $0x1c8] ss:$12 sps:$4 sm:$0xff]   ;;  %v11036_v54 = vld [vmem:[%s14420_s5 + $0x1e4] ss:$12 sps:$4 sm:$0xff]  }
 0x27c   :  { %1997 = vmatprep.mubr.bf16.mxu0 %v10983_v58  ;;  %2360 = vmatprep.mubr.bf16.mxu1 %v10986_v59  ;;  %v11034_v58 = vld [vmem:[%s14420_s5 + $0x1e0] ss:$12 sps:$4 sm:$0xff]   ;;  %v11039_v59 = vld [vmem:[%s14420_s5 + $0x1fc] ss:$12 sps:$4 sm:$0xff]  }
 0x283   :  { %1998 = vmatmul.mubr.bf16.gmra.mxu0 %v10981_v60  ;;  %2361 = vmatmul.mubr.bf16.gmra.mxu1 %v10984_v0  ;;  %v11037_v60 = vld [vmem:[%s14420_s5 + $0x1f8] ss:$12 sps:$4 sm:$0xff]   ;;  %v11044_v0 = vld [vmem:[%s14420_s5 + $0x214] ss:$12 sps:$4 sm:$0xff]  }
 0x284   :  { %2005 = vmatprep.mubr.bf16.mxu0 %v10989_v2  ;;  %2368 = vmatprep.mubr.bf16.mxu1 %v10992_v3  ;;  %v11042_v2 = vld [vmem:[%s14420_s5 + $0x210] ss:$12 sps:$4 sm:$0xff]   ;;  %v11047_v3 = vld [vmem:[%s14420_s5 + $0x22c] ss:$12 sps:$4 sm:$0xff]  }
 0x28b   :  { %2006 = vmatmul.mubr.bf16.gmra.mxu0 %v10987_v4  ;;  %2369 = vmatmul.mubr.bf16.gmra.mxu1 %v10990_v5  ;;  %v11045_v4 = vld [vmem:[%s14420_s5 + $0x228] ss:$12 sps:$4 sm:$0xff]  }
 0x28c   :  { %2376 = vmatprep.mubr.bf16.mxu1 %v10995_v7  ;;  %10170 = vmatprep.mubr.msk.bf16.mxu0 %vm1206_vm4, %v10996_v13 }
 0x293   :  { %2377 = vmatmul.mubr.bf16.gmra.mxu1 %v10993_v14  ;;  %10171 = vmatmul.mubr.msk.bf16.vlgmr.msra.gmra.mxu0 %vm1206_vm4, %v10997_v61 }
 0x294   :  { %9271 = vmatpush3.bf16.msra.mxu0 %v11960_v42  ;;  %2384 = vmatprep.mubr.bf16.mxu1 %v11000_v15 }
 0x295   :  { %9272 = vmatprep.subr.bf16.mxu0 %v12012_v41  ;;  %10174 = vmatprep.mubr.msk.bf16.mxu0 %vm1206_vm4, %v11001_v17 }
 0x298   :  { %9273 = vmatpush3.bf16.msra.mxu0 %v11956_v25 }
 0x299   :  { %9274 = vmatprep.subr.bf16.mxu0 %v12024_v50 }
 0x29b   :  { %2385 = vmatmul.mubr.bf16.gmra.mxu1 %v10998_v12  ;;  %10175 = vmatmul.mubr.msk.bf16.gmra.mxu0 %vm1206_vm4, %v11002_v20 }
 0x29c   :  { %9275 = vmatpush3.bf16.msra.mxu0 %v11952_v9  ;;  %2392 = vmatprep.mubr.bf16.mxu1 %v11005_v26 }
 0x29d   :  { %9276 = vmatprep.subr.bf16.mxu0 %v12030_v11  ;;  %10178 = vmatprep.mubr.msk.bf16.mxu0 %vm1206_vm4, %v11006_v29 }
 0x2a0   :  { %9277 = vmatpush3.bf16.msra.mxu0 %v11948_v55 }
 0x2a1   :  { %9278 = vmatprep.subr.bf16.mxu0 %v12045_v27 }
 0x2a3   :  { %2393 = vmatmul.mubr.bf16.gmra.mxu1 %v11003_v48  ;;  %10179 = vmatmul.mubr.msk.bf16.gmra.mxu0 %vm1206_vm4, %v11007_v63 }
 0x2a4   :  { %9279 = vmatpush3.bf16.msra.mxu0 %v11941_v38  ;;  %10182 = vmatprep.mubr.msk.bf16.mxu0 %vm1206_vm4, %v11008_v62 }
 0x2a5   :  { %9280 = vmatprep.subr.bf16.mxu0 %v12060_v10  ;;  %10190 = vmatprep.mubr.msk.bf16.mxu1 %vm1206_vm4, %v11009_v30 }
 0x2a8   :  { %9281 = vmatpush3.bf16.msra.mxu0 %v11933_v23 }
 0x2a9   :  { %9282 = vmatprep.subr.bf16.mxu0 %v11967_v6 }
 0x2ab   :  { %10183 = vmatmul.mubr.msk.bf16.gmra.mxu0 %vm1206_vm4, %v11011_v1  ;;  %10191 = vmatmul.mubr.msk.bf16.vlgmr.msra.gmra.mxu1 %vm1206_vm4, %v11012_v53 }
 0x2ac   :  { %9283 = vmatpush3.bf16.msra.mxu0 %v11929_v8  ;;  %10207 = vmatpush3.bf16.msra.mxu1 %v12161_v45  ;;  %v11025_v45 = vld [vmem:[%s14421_s6] sm:$0xff]  }
 0x2ad   :  { %9284 = vmatprep.subr.bf16.mxu0 %v11964_v57  ;;  %10208 = vmatprep.subr.bf16.mxu1 %v11013_v32 }
 0x2ae   :  { %2724 = vmatprep.mubr.bf16.mxu0 %v11016_v22  ;;  %10194 = vmatprep.mubr.msk.bf16.mxu1 %vm1206_vm4, %v11032_v33 }
 0x2b0   :  { %9285 = vmatpush3.bf16.msra.mxu0 %v11925_v56  ;;  %10209 = vmatpush3.bf16.msra.mxu1 %v11013_v32 }
 0x2b1   :  { %10210 = vmatprep.subr.bf16.mxu1 %v11017_v34  ;;  %10230 = vmatprep.subr.bf16.mxu0 %v11018_v24 }
 0x2b3   :  { %2725 = vmatmul.mubr.bf16.vlgmr.msra.gmra.mxu0 %v11014_v35  ;;  %10195 = vmatmul.mubr.msk.bf16.gmra.mxu1 %vm1206_vm4, %v11033_v36 }
 0x2b4   :  { %10211 = vmatpush3.bf16.msra.mxu1 %v11017_v34  ;;  %10231 = vmatpush3.bf16.msra.mxu0 %v11018_v24 }
 0x2b5   :  { %10212 = vmatprep.subr.bf16.mxu1 %v11019_v18  ;;  %10232 = vmatprep.subr.bf16.mxu0 %v11020_v16 }
 0x2b6   :  { %2732 = vmatprep.mubr.bf16.mxu0 %v11023_v28  ;;  %10198 = vmatprep.mubr.msk.bf16.mxu1 %vm1206_vm4, %v11040_v43 }
 0x2b8   :  { %10213 = vmatpush3.bf16.msra.mxu1 %v11019_v18  ;;  %10233 = vmatpush3.bf16.msra.mxu0 %v11020_v16 }
 0x2b9   :  { %9368 = vmatprep.subr.bf16.mxu1 %v12006_v19  ;;  %10234 = vmatprep.subr.bf16.mxu0 %v11024_v37 }
 0x2bb   :  { %2733 = vmatmul.mubr.bf16.gmra.mxu0 %v11021_v40  ;;  %10199 = vmatmul.mubr.msk.bf16.gmra.mxu1 %vm1206_vm4, %v11041_v21 }
 0x2bc   :  { %10235 = vmatpush3.bf16.msra.mxu0 %v11024_v37  ;;  %2740 = vmatprep.mubr.bf16.mxu0 %v11028_v44 }
 0x2bd   :  { %10236 = vmatprep.subr.bf16.mxu0 %v11025_v45  ;;  %10202 = vmatprep.mubr.msk.bf16.mxu1 %vm1206_vm4, %v11048_v46 }
 0x2c0   :  { %10237 = vmatpush3.bf16.msra.mxu0 %v11025_v45 }
 0x2c1   :  { %10254 = vmatprep.subr.bf16.mxu0 %v12053_v47 }
 0x2c3   :  { %2741 = vmatmul.mubr.bf16.gmra.mxu0 %v11026_v49  ;;  %10203 = vmatmul.mubr.msk.bf16.gmra.mxu1 %vm1206_vm4, %v11049_v39 }
 0x2c4   :  { %2748 = vmatprep.mubr.bf16.mxu0 %v11031_v51 }
 0x2cb   :  { %2749 = vmatmul.mubr.bf16.gmra.mxu0 %v11029_v52 }
 0x2cc   :  { %2756 = vmatprep.mubr.bf16.mxu0 %v11036_v54 }
 0x2d3   :  { %2757 = vmatmul.mubr.bf16.gmra.mxu0 %v11034_v58 }
 0x2d4   :  { %2764 = vmatprep.mubr.bf16.mxu0 %v11039_v59  ;;  %v12395_v59 = vld [vmem:[%s14421_s6 + $0x78] sm:$0xff]  }
 0x2db   :  { %2765 = vmatmul.mubr.bf16.gmra.mxu0 %v11037_v60 }
 0x2dc   :  { %2772 = vmatprep.mubr.bf16.mxu0 %v11044_v0 }
 0x2e3   :  { %2773 = vmatmul.mubr.bf16.gmra.mxu0 %v11042_v2 }
 0x2e4   :  { %2780 = vmatprep.mubr.bf16.mxu0 %v11047_v3 }
 0x2eb   :  { %2781 = vmatmul.mubr.bf16.gmra.mxu0 %v11045_v4 }
 0x30b   :  { %v10152_v5 = vpop.f32.mrf.mxu1 }
 0x30d   :  { %v2048_v7 = vpop.f32.mrf.mxu1 }
 0x30f   :  { %v10153_v13 = vpop.f32.mrf.mxu1 }
 0x311   :  { %v2051_v14 = vpop.f32.mrf.mxu1 }
 0x313   :  { %v9138_v61 = vpop.f32.mrf.mxu0  ;;  %v10156_v15 = vpop.f32.mrf.mxu1 }
 0x315   :  { %v9139_v17 = vpop.f32.mrf.mxu0  ;;  %v2064_v12 = vpop.f32.mrf.mxu1 }
 0x316   :  { %v9140_v29 = vadd.f32 %v9139_v17, %v9138_v61 }
 0x317   :  { %v9141_v20 = vpop.f32.mrf.mxu0  ;;  %v10157_v26 = vpop.f32.mrf.mxu1 }
 0x318   :  { %v2049_v53 = vadd.f32 %v9140_v29, %v2048_v7 }
 0x319   :  { %v9142_v48 = vpop.f32.mrf.mxu0  ;;  %v2067_v63 = vpop.f32.mrf.mxu1 }
 0x31a   :  { %v9143_v62 = vadd.f32 %v9142_v48, %v9141_v20 }
 0x31b   :  { %v9144_v30 = vpop.f32.mrf.mxu0  ;;  %v12376_v1 = vpop.f32.mrf.mxu1 }
 0x31c   :  { %v2052_v32 = vadd.f32 %v9143_v62, %v2051_v14 }
 0x31d   :  { %v9145_v22 = vpop.f32.mrf.mxu0  ;;  %v2080_v33 = vpop.f32.mrf.mxu1 }
 0x31e   :  { %v2111_v34 = vpack.c.bf16 %v2052_v32, %v2049_v53  ;;  %v9146_v36 = vadd.f32 %v9145_v22, %v9144_v30 }
 0x31f   :  { %v9147_v24 = vpop.f32.mrf.mxu0  ;;  %v12378_v35 = vpop.f32.mrf.mxu1 }
 0x320   :  { %10238 = vmatprep.mubr.msk.bf16.mxu0 %vm2927_vm12, %v2111_v34  ;;  %v2057_v40 = vadd.f32 %v10152_v5, %v9146_v36 }
 0x321   :  { %v9148_v18 = vpop.f32.mrf.mxu0  ;;  %v2083_v16 = vpop.f32.mrf.mxu1 }
 0x322   :  { %v9149_v28 = vadd.f32 %v9148_v18, %v9147_v24 }
 0x323   :  { %v9150_v43 = vpop.f32.mrf.mxu0  ;;  %v12381_v37 = vpop.f32.mrf.mxu1 }
 0x324   :  { %v2060_v21 = vadd.f32 %v10153_v13, %v9149_v28 }
 0x325   :  { %v9151_v44 = vpop.f32.mrf.mxu0  ;;  %v12383_v45 = vpop.f32.mrf.mxu1 }
 0x326   :  { %v2112_v46 = vpack.c.bf16 %v2060_v21, %v2057_v40  ;;  %v9152_v51 = vadd.f32 %v9151_v44, %v9150_v43 }
 0x327   :  { %v9153_v49 = vpop.f32.mrf.mxu0  ;;  %v12385_v39 = vpop.f32.mrf.mxu1 }
 0x328   :  { %10239 = vmatmul.mubr.msk.bf16.vlgmr.msra.gmra.mxu0 %vm2927_vm12, %v2112_v46  ;;  %v2065_v2 = vadd.f32 %v9152_v51, %v2064_v12 }
 0x329   :  { %10255 = vmatpush3.bf16.msra.mxu0 %v12053_v47  ;;  %v9154_v52 = vpop.f32.mrf.mxu0  ;;  %v12389_v54 = vpop.f32.mrf.mxu1 }
 0x32a   :  { %v9155_v58 = vadd.f32 %v9154_v52, %v9153_v49  ;;  %10256 = vmatprep.subr.bf16.mxu0 %v12051_v31 }
 0x32b   :  { %v9156_v60 = vpop.f32.mrf.mxu0  ;;  %v9212_v0 = vpop.f32.mrf.mxu1 }
 0x32c   :  { %v2068_v3 = vadd.f32 %v9155_v58, %v2067_v63 }
 0x32d   :  { %10257 = vmatpush3.bf16.msra.mxu0 %v12051_v31  ;;  %v9157_v4 = vpop.f32.mrf.mxu0  ;;  %v9213_v5 = vpop.f32.mrf.mxu1 }
 0x32e   :  { %v2113_v7 = vpack.c.bf16 %v2068_v3, %v2065_v2  ;;  %v12398_v13 = vadd.f32 %v9213_v5, %v9212_v0  ;;  %10274 = vmatprep.subr.bf16.mxu0 %v12395_v59  ;;  %v9158_v17 = vadd.f32 %v9157_v4, %v9156_v60 }
 0x32f   :  { %v9159_v14 = vpop.f32.mrf.mxu0  ;;  %v12401_v61 = vpop.f32.mrf.mxu1 }
 0x330   :  { %10242 = vmatprep.mubr.msk.bf16.mxu0 %vm2927_vm12, %v2113_v7  ;;  %v2073_v62 = vadd.f32 %v10156_v15, %v9158_v17 }
 0x331   :  { %v9160_v20 = vpop.f32.mrf.mxu0  ;;  %v12404_v29 = vpop.f32.mrf.mxu1 }
 0x332   :  { %v9161_v12 = vadd.f32 %v9160_v20, %v9159_v14 }
 0x333   :  { %v9162_v48 = vpop.f32.mrf.mxu0  ;;  %v9218_v63 = vpop.f32.mrf.mxu1 }
 0x334   :  { %v2076_v30 = vadd.f32 %v10157_v26, %v9161_v12 }
 0x335   :  { %v9163_v53 = vpop.f32.mrf.mxu0  ;;  %v9219_v32 = vpop.f32.mrf.mxu1 }
 0x336   :  { %v2114_v22 = vpack.c.bf16 %v2076_v30, %v2073_v62  ;;  %v9220_v34 = vadd.f32 %v9219_v32, %v9218_v63  ;;  %v9164_v18 = vadd.f32 %v9163_v53, %v9162_v48 }
 0x337   :  { %v9165_v24 = vpop.f32.mrf.mxu0  ;;  %v9221_v36 = vpop.f32.mrf.mxu1 }
 0x338   :  { %10243 = vmatmul.mubr.msk.bf16.gmra.mxu0 %vm2927_vm12, %v2114_v22  ;;  %v2081_v46 = vadd.f32 %v9164_v18, %v2080_v33 }
 0x339   :  { %v9166_v28 = vpop.f32.mrf.mxu0  ;;  %v9222_v43 = vpop.f32.mrf.mxu1 }
 0x33a   :  { %v9167_v40 = vadd.f32 %v9166_v28, %v9165_v24 }
 0x33b   :  { %v9168_v21 = vpop.f32.mrf.mxu0  ;;  %v9224_v44 = vpop.f32.mrf.mxu1 }
 0x33c   :  { %v2084_v49 = vadd.f32 %v9167_v40, %v2083_v16 }
 0x33d   :  { %v9169_v51 = vpop.f32.mrf.mxu0  ;;  %v9225_v52 = vpop.f32.mrf.mxu1 }
 0x33e   :  { %v2115_v15 = vpack.c.bf16 %v2084_v49, %v2081_v46  ;;  %v12407_v26 = vadd.f32 %v9225_v52, %v9224_v44  ;;  %v9170_v0 = vadd.f32 %v9169_v51, %v9168_v21 }
 0x33f   :  { %v9171_v58 = vpop.f32.mrf.mxu0  ;;  %v12409_v60 = vpop.f32.mrf.mxu1 }
 0x340   :  { %10246 = vmatprep.mubr.msk.bf16.mxu0 %vm2927_vm12, %v2115_v15  ;;  %v2089_v33 = vadd.f32 %v12376_v1, %v9170_v0 }
 0x341   :  { %v9172_v2 = vpop.f32.mrf.mxu0  ;;  %v12412_v3 = vpop.f32.mrf.mxu1 }
 0x342   :  { %v9173_v4 = vadd.f32 %v9172_v2, %v9171_v58  ;;  %v9223_v2 = vadd.f32 %v9222_v43, %v9221_v36 }
 0x343   :  { %v9174_v5 = vpop.f32.mrf.mxu0  ;;  %v9230_v7 = vpop.f32.mrf.mxu1 }
 0x344   :  { %v2092_v16 = vadd.f32 %v12378_v35, %v9173_v4 }
 0x345   :  { %v9175_v14 = vpop.f32.mrf.mxu0  ;;  %v9231_v17 = vpop.f32.mrf.mxu1 }
 0x346   :  { %v2116_v20 = vpack.c.bf16 %v2092_v16, %v2089_v33  ;;  %v9232_v12 = vadd.f32 %v9231_v17, %v9230_v7  ;;  %v9176_v62 = vadd.f32 %v9175_v14, %v9174_v5  ;;  %v11050_v7 = vld [vmem:[%s14420_s5 + $0x248] ss:$12 sps:$4 sm:$0xff]  }
 0x347   :  { %v9177_v48 = vpop.f32.mrf.mxu0  ;;  %v9233_v63 = vpop.f32.mrf.mxu1 }
 0x348   :  { %10247 = vmatmul.mubr.msk.bf16.gmra.mxu0 %vm2927_vm12, %v2116_v20  ;;  %v2097_v18 = vadd.f32 %v9176_v62, %v12383_v45 }
 0x349   :  { %v9178_v30 = vpop.f32.mrf.mxu0  ;;  %v9234_v53 = vpop.f32.mrf.mxu1 }
 0x34a   :  { %v9179_v32 = vadd.f32 %v9178_v30, %v9177_v48 }
 0x34b   :  { %v9180_v22 = vpop.f32.mrf.mxu0  ;;  %v9236_v24 = vpop.f32.mrf.mxu1 }
 0x34c   :  { %v2100_v1 = vadd.f32 %v9179_v32, %v12389_v54 }
 0x34d   :  { %v9181_v28 = vpop.f32.mrf.mxu0  ;;  %v9237_v35 = vpop.f32.mrf.mxu1 }
 0x34e   :  { %v2117_v40 = vpack.c.bf16 %v2100_v1, %v2097_v18  ;;  %v12419_v21 = vadd.f32 %v9237_v35, %v9236_v24  ;;  %v9182_v49 = vadd.f32 %v9181_v28, %v9180_v22  ;;  %v9235_v22 = vadd.f32 %v9234_v53, %v9233_v63  ;;  %v11072_v1 = vld [vmem:[%s14420_s5 + $0x278] ss:$12 sps:$4 sm:$0xff]  }
 0x34f   :  { %v9183_v44 = vpop.f32.mrf.mxu0  ;;  %v12421_v46 = vpop.f32.mrf.mxu1  ;;  %v9229_v28 = vadd.f32 %v12412_v3, %v12409_v60  ;;  %v11054_v3 = vld [vmem:[%s14421_s6 + $0x68] sm:$0xff]  }
 0x350   :  { %10250 = vmatprep.mubr.msk.bf16.mxu0 %vm2927_vm12, %v2117_v40  ;;  %v2105_v45 = vadd.f32 %v12381_v37, %v9182_v49  ;;  %v9217_v37 = vadd.f32 %v12404_v29, %v12401_v61  ;;  %v11052_v29 = vld [vmem:[%s14420_s5 + $0x260] ss:$12 sps:$4 sm:$0xff]  }
 0x351   :  { %v9184_v51 = vpop.f32.mrf.mxu0  ;;  %v9240_v52 = vpop.f32.mrf.mxu1 }
 0x352   :  { %v9185_v15 = vadd.f32 %v9184_v51, %v9183_v44 }
 0x353   :  { %v10172_v58 = vpop.f32.mrf.mxu0  ;;  %v9242_v0 = vpop.f32.mrf.mxu1 }
 0x354   :  { %v2108_v54 = vadd.f32 %v12385_v39, %v9185_v15  ;;  %v12426_v4 = vadd.f32 %v10172_v58, %v9220_v34 }
 0x355   :  { %v2435_v5 = vpop.f32.mrf.mxu0  ;;  %v9243_v33 = vpop.f32.mrf.mxu1 }
 0x356   :  { %v2118_v16 = vpack.c.bf16 %v2108_v54, %v2105_v45  ;;  %v12432_v14 = vadd.f32 %v12398_v13, %v2435_v5  ;;  %v9244_v17 = vadd.f32 %v9243_v33, %v9242_v0  ;;  %v11073_v45 = vld [vmem:[%s14420_s5 + $0x290] ss:$12 sps:$4 sm:$0xff]   ;;  %v9241_v33 = vadd.f32 %v9240_v52, %v12421_v46 }
 0x357   :  { %v10173_v20 = vpop.f32.mrf.mxu0  ;;  %v9245_v48 = vpop.f32.mrf.mxu1 }
 0x358   :  { %v12436_v36 = vadd.f32 %v10173_v20, %v9223_v2  ;;  %10251 = vmatmul.mubr.msk.bf16.gmra.mxu0 %vm2927_vm12, %v2118_v16 }
 0x359   :  { %v2438_v39 = vpop.f32.mrf.mxu0  ;;  %10258 = vmatprep.mubr.msk.bf16.mxu0 %vm1206_vm4, %v11050_v7  ;;  %v9246_v34 = vpop.f32.mrf.mxu1  ;;  %v11080_v7 = vld [vmem:[%s14420_s5 + $0x2a8] ss:$12 sps:$4 sm:$0xff]  }
 0x35a   :  { %v2499_v43 = vpack.c.bf16 %v12436_v36, %v12426_v4  ;;  %v12442_v62 = vadd.f32 %v9217_v37, %v2438_v39  ;;  %v9247_v2 = vadd.f32 %v9246_v34, %v9245_v48 }
 0x35b   :  { %v10176_v13 = vpop.f32.mrf.mxu0  ;;  %v9248_v30 = vpop.f32.mrf.mxu1 }
 0x35c   :  { %v2498_v32 = vpack.c.bf16 %v12442_v62, %v12432_v14  ;;  %v12446_v61 = vadd.f32 %v10176_v13, %v9232_v12  ;;  %v11053_v12 = vld [vmem:[%s14421_s6 + $0x70] sm:$0xff]   ;;  %v11091_v14 = vld [vmem:[%s14421_s6 + $0x98] sm:$0xff]  }
 0x35d   :  { %v2451_v24 = vpop.f32.mrf.mxu0  ;;  %v9249_v18 = vpop.f32.mrf.mxu1 }
 0x35e   :  { %v12457_v35 = vadd.f32 %v12407_v26, %v2451_v24  ;;  %v9250_v63 = vadd.f32 %v9249_v18, %v9248_v30  ;;  %v11081_v24 = vld [vmem:[%s14420_s5 + $0x2c0] ss:$12 sps:$4 sm:$0xff]  }
 0x35f   :  { %v10177_v53 = vpop.f32.mrf.mxu0  ;;  %v9251_v40 = vpop.f32.mrf.mxu1 }
 0x360   :  { %v12462_v44 = vadd.f32 %v10177_v53, %v9235_v22  ;;  %10259 = vmatmul.mubr.msk.bf16.vlgmr.msra.gmra.mxu0 %vm1206_vm4, %v11052_v29 }
 0x361   :  { %10275 = vmatpush3.bf16.msra.mxu0 %v12395_v59  ;;  %v2454_v49 = vpop.f32.mrf.mxu0  ;;  %v9252_v51 = vpop.f32.mrf.mxu1  ;;  %10262 = vmatprep.mubr.msk.bf16.mxu0 %vm1206_vm4, %v11072_v1 }
 0x362   :  { %v2501_v26 = vpack.c.bf16 %v12462_v44, %v12446_v61  ;;  %v12469_v60 = vadd.f32 %v9229_v28, %v2454_v49  ;;  %10276 = vmatprep.subr.bf16.mxu0 %v11053_v12  ;;  %v11093_v61 = vld [vmem:[%s14421_s6 + $0x90] sm:$0xff]   ;;  %v11095_v44 = vld [vmem:[%s14421_s6 + $0x80] sm:$0xff]  }
 0x363   :  { %v10180_v15 = vpop.f32.mrf.mxu0  ;;  %v9254_v58 = vpop.f32.mrf.mxu1 }
 0x364   :  { %v2500_v0 = vpack.c.bf16 %v12469_v60, %v12457_v35  ;;  %v12476_v59 = vadd.f32 %v10180_v15, %v9244_v17  ;;  %v11055_v17 = vld [vmem:[%s14421_s6 + $0x60] sm:$0xff]   ;;  %v11094_v35 = vld [vmem:[%s14421_s6 + $0x88] sm:$0xff]  }
 0x365   :  { %10277 = vmatpush3.bf16.msra.mxu0 %v11053_v12  ;;  %v2467_v54 = vpop.f32.mrf.mxu0  ;;  %v9255_v5 = vpop.f32.mrf.mxu1  ;;  %v9253_v12 = vadd.f32 %v9252_v51, %v9251_v40  ;;  %v11089_v40 = vld [vmem:[%s14420_s5 + $0x2f0] ss:$12 sps:$4 sm:$0xff]  }
 0x366   :  { %v12486_v16 = vadd.f32 %v12419_v21, %v2467_v54  ;;  %10278 = vmatprep.subr.bf16.mxu0 %v11054_v3  ;;  %v9256_v20 = vadd.f32 %v9255_v5, %v9254_v58  ;;  %v11088_v58 = vld [vmem:[%s14420_s5 + $0x2d8] ss:$12 sps:$4 sm:$0xff]  }
 0x367   :  { %v10181_v48 = vpop.f32.mrf.mxu0  ;;  %v9257_v37 = vpop.f32.mrf.mxu1 }
 0x368   :  { %v12491_v39 = vadd.f32 %v10181_v48, %v9247_v2  ;;  %10263 = vmatmul.mubr.msk.bf16.gmra.mxu0 %vm1206_vm4, %v11073_v45 }
 0x369   :  { %10279 = vmatpush3.bf16.msra.mxu0 %v11054_v3  ;;  %v2470_v34 = vpop.f32.mrf.mxu0  ;;  %v9258_v13 = vpop.f32.mrf.mxu1  ;;  %10266 = vmatprep.mubr.msk.bf16.mxu0 %vm1206_vm4, %v11080_v7 }
 0x36a   :  { %v12495_v46 = vadd.f32 %v9241_v33, %v2470_v34  ;;  %10280 = vmatprep.subr.bf16.mxu0 %v11055_v17  ;;  %v9259_v29 = vadd.f32 %v9258_v13, %v9257_v37  ;;  %v14427_v4 = vpack.c.bf16 %v12491_v39, %v12476_v59 }
 0x36b   :  { %v10184_v52 = vpop.f32.mrf.mxu0  ;;  %v10192_v1 = vpop.f32.mrf.mxu1 }
 0x36c   :  { %v2502_v30 = vpack.c.bf16 %v12495_v46, %v12486_v16  ;;  %v12501_v22 = vadd.f32 %v10184_v52, %v9256_v20 }
 0x36d   :  { %10281 = vmatpush3.bf16.msra.mxu0 %v11055_v17  ;;  %v2483_v18 = vpop.f32.mrf.mxu0  ;;  %v2823_v15 = vpop.f32.mrf.mxu1 }
 0x36e   :  { %9466 = vmatprep.subr.bf16.mxu0 %v12006_v19  ;;  %v12507_v28 = vadd.f32 %v9250_v63, %v2483_v18 }
 0x36f   :  { %v10185_v53 = vpop.f32.mrf.mxu0  ;;  %v10193_v5 = vpop.f32.mrf.mxu1 }
 0x370   :  { %v12509_v49 = vadd.f32 %v10185_v53, %v9259_v29  ;;  %10267 = vmatmul.mubr.msk.bf16.gmra.mxu0 %vm1206_vm4, %v11081_v24 }
 0x371   :  { %v2486_v3 = vpop.f32.mrf.mxu0  ;;  %10270 = vmatprep.mubr.msk.bf16.mxu0 %vm1206_vm4, %v11088_v58  ;;  %v2826_v20 = vpop.f32.mrf.mxu1 }
 0x372   :  { %v12515_v2 = vadd.f32 %v9253_v12, %v2486_v3  ;;  %v14429_v62 = vpack.c.bf16 %v12509_v49, %v12501_v22 }
 0x373   :  { %v9286_v54 = vpop.f32.mrf.mxu0  ;;  %v10196_v29 = vpop.f32.mrf.mxu1 }
 0x374   :  { %v14428_v36 = vpack.c.bf16 %v12515_v2, %v12507_v28 }
 0x375   :  { %v9287_v51 = vpop.f32.mrf.mxu0  ;;  %v2839_v3 = vpop.f32.mrf.mxu1 }
 0x376   :  { %v9288_v33 = vadd.f32 %v9287_v51, %v9286_v54 }
 0x377   :  { %v9289_v7 = vpop.f32.mrf.mxu0  ;;  %v10197_v63 = vpop.f32.mrf.mxu1 }
 0x378   :  { %10271 = vmatmul.mubr.msk.bf16.gmra.mxu0 %vm1206_vm4, %v11089_v40  ;;  %v2824_v34 = vadd.f32 %v9288_v33, %v2823_v15 }
 0x379   :  { %v9290_v17 = vpop.f32.mrf.mxu0  ;;  %v2842_v33 = vpop.f32.mrf.mxu1 }
 0x37a   :  { %v9291_v48 = vadd.f32 %v9290_v17, %v9289_v7 }
 0x37b   :  { %v9292_v37 = vpop.f32.mrf.mxu0 }
 0x37c   :  { %v2827_v13 = vadd.f32 %v9291_v48, %v2826_v20 }
 0x37d   :  { %v9293_v52 = vpop.f32.mrf.mxu0 }
 0x37e   :  { %v2886_v24 = vpack.c.bf16 %v2827_v13, %v2824_v34  ;;  %v9294_v12 = vadd.f32 %v9293_v52, %v9292_v37 }
 0x37f   :  { %v9295_v18 = vpop.f32.mrf.mxu0 }
 0x380   :  { %10214 = vmatprep.mubr.msk.bf16.mxu1 %vm2927_vm12, %v2886_v24  ;;  %v2832_v54 = vadd.f32 %v10192_v1, %v9294_v12 }
 0x381   :  { %v9296_v53 = vpop.f32.mrf.mxu0 }
 0x382   :  { %v9297_v58 = vadd.f32 %v9296_v53, %v9295_v18 }
 0x383   :  { %v9298_v45 = vpop.f32.mrf.mxu0 }
 0x384   :  { %v2835_v51 = vadd.f32 %v10193_v5, %v9297_v58  ;;  %v10200_v5 = vpop.f32.mrf.mxu1 }
 0x385   :  { %v9299_v40 = vpop.f32.mrf.mxu0 }
 0x386   :  { %v2887_v21 = vpack.c.bf16 %v2835_v51, %v2832_v54  ;;  %v9300_v17 = vadd.f32 %v9299_v40, %v9298_v45  ;;  %v2855_v24 = vpop.f32.mrf.mxu1 }
 0x387   :  { %v9301_v7 = vpop.f32.mrf.mxu0 }
 0x388   :  { %10215 = vmatmul.mubr.msk.bf16.vlgmr.msra.gmra.mxu1 %vm2927_vm12, %v2887_v21  ;;  %v2840_v37 = vadd.f32 %v9300_v17, %v2839_v3  ;;  %v10201_v54 = vpop.f32.mrf.mxu1 }
 0x389   :  { %9369 = vmatpush3.bf16.msra.mxu1 %v11960_v42  ;;  %v9302_v15 = vpop.f32.mrf.mxu0 }
 0x38a   :  { %v9303_v20 = vadd.f32 %v9302_v15, %v9301_v7  ;;  %9370 = vmatprep.subr.bf16.mxu1 %v12012_v41  ;;  %v2858_v15 = vpop.f32.mrf.mxu1 }
 0x38b   :  { %v9304_v48 = vpop.f32.mrf.mxu0 }
 0x38c   :  { %v2843_v34 = vadd.f32 %v9303_v20, %v2842_v33 }
 0x38d   :  { %9371 = vmatpush3.bf16.msra.mxu1 %v11956_v25  ;;  %v9305_v1 = vpop.f32.mrf.mxu0 }
 0x38e   :  { %9372 = vmatprep.subr.bf16.mxu1 %v12024_v50  ;;  %v2888_v13 = vpack.c.bf16 %v2843_v34, %v2840_v37  ;;  %v9306_v52 = vadd.f32 %v9305_v1, %v9304_v48  ;;  %v10204_v37 = vpop.f32.mrf.mxu1 }
 0x38f   :  { %v9307_v45 = vpop.f32.mrf.mxu0 }
 0x390   :  { %10218 = vmatprep.mubr.msk.bf16.mxu1 %vm2927_vm12, %v2888_v13  ;;  %v2848_v53 = vadd.f32 %v10196_v29, %v9306_v52  ;;  %v2871_v52 = vpop.f32.mrf.mxu1 }
 0x391   :  { %9373 = vmatpush3.bf16.msra.mxu1 %v11952_v9  ;;  %v9308_v21 = vpop.f32.mrf.mxu0 }
 0x392   :  { %v9309_v18 = vadd.f32 %v9308_v21, %v9307_v45  ;;  %9374 = vmatprep.subr.bf16.mxu1 %v12030_v11 }
 0x393   :  { %v9310_v12 = vpop.f32.mrf.mxu0 }
 0x394   :  { %v2851_v3 = vadd.f32 %v10197_v63, %v9309_v18 }
 0x395   :  { %9375 = vmatpush3.bf16.msra.mxu1 %v11948_v55  ;;  %v9311_v58 = vpop.f32.mrf.mxu0 }
 0x396   :  { %v2889_v51 = vpack.c.bf16 %v2851_v3, %v2848_v53  ;;  %9376 = vmatprep.subr.bf16.mxu1 %v12045_v27  ;;  %v9312_v7 = vadd.f32 %v9311_v58, %v9310_v12  ;;  %v10205_v58 = vpop.f32.mrf.mxu1 }
 0x397   :  { %v9313_v40 = vpop.f32.mrf.mxu0 }
 0x398   :  { %10219 = vmatmul.mubr.msk.bf16.gmra.mxu1 %vm2927_vm12, %v2889_v51  ;;  %v2856_v63 = vadd.f32 %v9312_v7, %v2855_v24  ;;  %v11059_v24 = vld [vmem:[%s14421_s6 + $0x38] sm:$0xff]  }
 0x399   :  { %9377 = vmatpush3.bf16.msra.mxu1 %v11941_v38  ;;  %v9314_v17 = vpop.f32.mrf.mxu0 }
 0x39a   :  { %v9315_v33 = vadd.f32 %v9314_v17, %v9313_v40  ;;  %9378 = vmatprep.subr.bf16.mxu1 %v12060_v10 }
 0x39b   :  { %v9316_v29 = vpop.f32.mrf.mxu0 }
 0x39c   :  { %v2859_v20 = vadd.f32 %v9315_v33, %v2858_v15  ;;  %v2874_v15 = vpop.f32.mrf.mxu1 }
 0x39d   :  { %9379 = vmatpush3.bf16.msra.mxu1 %v11933_v23  ;;  %v9317_v48 = vpop.f32.mrf.mxu0 }
 0x39e   :  { %9380 = vmatprep.subr.bf16.mxu1 %v11967_v6  ;;  %v2890_v34 = vpack.c.bf16 %v2859_v20, %v2856_v63  ;;  %v9318_v13 = vadd.f32 %v9317_v48, %v9316_v29 }
 0x39f   :  { %v9319_v1 = vpop.f32.mrf.mxu0 }
 0x3a0   :  { %10222 = vmatprep.mubr.msk.bf16.mxu1 %vm2927_vm12, %v2890_v34  ;;  %v2864_v12 = vadd.f32 %v10200_v5, %v9318_v13 }
 0x3a1   :  { %9381 = vmatpush3.bf16.msra.mxu1 %v11929_v8  ;;  %v9320_v45 = vpop.f32.mrf.mxu0 }
 0x3a2   :  { %v9321_v21 = vadd.f32 %v9320_v45, %v9319_v1  ;;  %9382 = vmatprep.subr.bf16.mxu1 %v11964_v57 }
 0x3a3   :  { %v9322_v18 = vpop.f32.mrf.mxu0 }
 0x3a4   :  { %v2867_v53 = vadd.f32 %v10201_v54, %v9321_v21 }
 0x3a5   :  { %9383 = vmatpush3.bf16.msra.mxu1 %v11925_v56  ;;  %v9323_v3 = vpop.f32.mrf.mxu0 }
 0x3a6   :  { %v2891_v51 = vpack.c.bf16 %v2867_v53, %v2864_v12  ;;  %10298 = vmatprep.subr.bf16.mxu1 %v11059_v24  ;;  %v9324_v7 = vadd.f32 %v9323_v3, %v9322_v18  ;;  %v11058_v18 = vld [vmem:[%s14420_s5 + $0x244] ss:$12 sps:$4 sm:$0xff]   ;;  %v11063_v53 = vld [vmem:[%s14420_s5 + $0x25c] ss:$12 sps:$4 sm:$0xff]  }
 0x3a7   :  { %v9325_v40 = vpop.f32.mrf.mxu0  ;;  %v11064_v3 = vld [vmem:[%s14421_s6 + $0x28] sm:$0xff]  }
 0x3a8   :  { %10223 = vmatmul.mubr.msk.bf16.gmra.mxu1 %vm2927_vm12, %v2891_v51  ;;  %v2872_v63 = vadd.f32 %v9324_v7, %v2871_v52  ;;  %v11056_v52 = vld [vmem:[%s14420_s5 + $0x240] ss:$12 sps:$4 sm:$0xff]  }
 0x3a9   :  { %v9326_v17 = vpop.f32.mrf.mxu0  ;;  %v11068_v51 = vld [vmem:[%s14420_s5 + $0x274] ss:$12 sps:$4 sm:$0xff]   ;;  %v11071_v7 = vld [vmem:[%s14420_s5 + $0x28c] ss:$12 sps:$4 sm:$0xff]  }
 0x3aa   :  { %v9327_v33 = vadd.f32 %v9326_v17, %v9325_v40  ;;  %v11066_v40 = vld [vmem:[%s14420_s5 + $0x270] ss:$12 sps:$4 sm:$0xff]   ;;  %v11069_v17 = vld [vmem:[%s14420_s5 + $0x288] ss:$12 sps:$4 sm:$0xff]  }
 0x3ab   :  { %v9328_v29 = vpop.f32.mrf.mxu0 }
 0x3ac   :  { %v2875_v20 = vadd.f32 %v9327_v33, %v2874_v15  ;;  %v11076_v15 = vld [vmem:[%s14420_s5 + $0x2a4] ss:$12 sps:$4 sm:$0xff]   ;;  %v11074_v33 = vld [vmem:[%s14420_s5 + $0x2a0] ss:$12 sps:$4 sm:$0xff]  }
 0x3ad   :  { %v9329_v48 = vpop.f32.mrf.mxu0 }
 0x3ae   :  { %v2892_v34 = vpack.c.bf16 %v2875_v20, %v2872_v63  ;;  %v9330_v54 = vadd.f32 %v9329_v48, %v9328_v29  ;;  %v11079_v29 = vld [vmem:[%s14420_s5 + $0x2bc] ss:$12 sps:$4 sm:$0xff]   ;;  %v11077_v63 = vld [vmem:[%s14420_s5 + $0x2b8] ss:$12 sps:$4 sm:$0xff]   ;;  %v11084_v20 = vld [vmem:[%s14420_s5 + $0x2d4] ss:$12 sps:$4 sm:$0xff]  }
 0x3af   :  { %v9331_v5 = vpop.f32.mrf.mxu0  ;;  %v11082_v48 = vld [vmem:[%s14420_s5 + $0x2d0] ss:$12 sps:$4 sm:$0xff]  }
 0x3b0   :  { %10226 = vmatprep.mubr.msk.bf16.mxu1 %vm2927_vm12, %v2892_v34  ;;  %v2880_v45 = vadd.f32 %v10204_v37, %v9330_v54  ;;  %v11060_v37 = vld [vmem:[%s14421_s6 + $0x30] sm:$0xff]   ;;  %v11087_v34 = vld [vmem:[%s14420_s5 + $0x2ec] ss:$12 sps:$4 sm:$0xff]  }
 0x3b1   :  { %v9332_v1 = vpop.f32.mrf.mxu0 }
 0x3b2   :  { %v9333_v13 = vadd.f32 %v9332_v1, %v9331_v5  ;;  %v11085_v5 = vld [vmem:[%s14420_s5 + $0x2e8] ss:$12 sps:$4 sm:$0xff]  }
 0x3b4   :  { %v2883_v21 = vadd.f32 %v10205_v58, %v9333_v13  ;;  %v11061_v58 = vld [vmem:[%s14420_s5 + $0x258] ss:$12 sps:$4 sm:$0xff]  }
 0x3b5   :  { %v11108_v13 = vld [vmem:[%s14420_s5 + $0x338] ss:$12 sps:$4 sm:$0xff]  }
 0x3b6   :  { %v2893_v12 = vpack.c.bf16 %v2883_v21, %v2880_v45  ;;  %v11109_v45 = vld [vmem:[%s14420_s5 + $0x350] ss:$12 sps:$4 sm:$0xff]  }
 0x3b8   :  { %10227 = vmatmul.mubr.msk.bf16.gmra.mxu1 %vm2927_vm12, %v2893_v12 }
 0x3b9   :  { %3403 = vmatprep.mubr.bf16.mxu1 %v11058_v18 }
 0x3c0   :  { %3404 = vmatmul.mubr.bf16.vlgmr.msra.gmra.mxu1 %v11056_v52 }
 0x3c1   :  { %10299 = vmatpush3.bf16.msra.mxu1 %v11059_v24  ;;  %3411 = vmatprep.mubr.bf16.mxu1 %v11063_v53  ;;  %v11065_v24 = vld [vmem:[%s14421_s6 + $0x20] sm:$0xff]  }
 0x3c2   :  { %10300 = vmatprep.subr.bf16.mxu1 %v11060_v37 }
 0x3c5   :  { %10301 = vmatpush3.bf16.msra.mxu1 %v11060_v37 }
 0x3c6   :  { %10302 = vmatprep.subr.bf16.mxu1 %v11064_v3 }
 0x3c8   :  { %3412 = vmatmul.mubr.bf16.gmra.mxu1 %v11061_v58 }
 0x3c9   :  { %10303 = vmatpush3.bf16.msra.mxu1 %v11064_v3  ;;  %3419 = vmatprep.mubr.bf16.mxu1 %v11068_v51 }
 0x3ca   :  { %10304 = vmatprep.subr.bf16.mxu1 %v11065_v24 }
 0x3cd   :  { %10305 = vmatpush3.bf16.msra.mxu1 %v11065_v24  ;;  %v11116_v24 = vld [vmem:[%s14420_s5 + $0x368] ss:$12 sps:$4 sm:$0xff]  }
 0x3ce   :  { %10322 = vmatprep.subr.bf16.mxu1 %v12053_v47 }
 0x3d0   :  { %3420 = vmatmul.mubr.bf16.gmra.mxu1 %v11066_v40  ;;  %v11117_v40 = vld [vmem:[%s14420_s5 + $0x380] ss:$12 sps:$4 sm:$0xff]  }
 0x3d1   :  { %3427 = vmatprep.mubr.bf16.mxu1 %v11071_v7 }
 0x3d8   :  { %3428 = vmatmul.mubr.bf16.gmra.mxu1 %v11069_v17 }
 0x3d9   :  { %3435 = vmatprep.mubr.bf16.mxu1 %v11076_v15 }
 0x3e0   :  { %3436 = vmatmul.mubr.bf16.gmra.mxu1 %v11074_v33 }
 0x3e1   :  { %3443 = vmatprep.mubr.bf16.mxu1 %v11079_v29 }
 0x3e8   :  { %3444 = vmatmul.mubr.bf16.gmra.mxu1 %v11077_v63 }
 0x3e9   :  { %3451 = vmatprep.mubr.bf16.mxu1 %v11084_v20 }
 0x3f0   :  { %3452 = vmatmul.mubr.bf16.gmra.mxu1 %v11082_v48 }
 0x3f1   :  { %3459 = vmatprep.mubr.bf16.mxu1 %v11087_v34 }
 0x3f8   :  { %3460 = vmatmul.mubr.bf16.gmra.mxu1 %v11085_v5 }
 0x3f9   :  { %10306 = vmatprep.mubr.msk.bf16.mxu1 %vm2927_vm12, %v2498_v32  ;;  %v11092_v32 = vld [vmem:[%s14420_s5 + $0x320] ss:$12 sps:$4 sm:$0xff]  }
 0x400   :  { %10307 = vmatmul.mubr.msk.bf16.vlgmr.msra.gmra.mxu1 %vm2927_vm12, %v2499_v43  ;;  %v11090_v43 = vld [vmem:[%s14420_s5 + $0x308] ss:$12 sps:$4 sm:$0xff]  }
 0x401   :  { %10323 = vmatpush3.bf16.msra.mxu1 %v12053_v47  ;;  %10310 = vmatprep.mubr.msk.bf16.mxu1 %vm2927_vm12, %v2500_v0 }
 0x402   :  { %10324 = vmatprep.subr.bf16.mxu1 %v12051_v31 }
 0x405   :  { %10325 = vmatpush3.bf16.msra.mxu1 %v12051_v31 }
 0x406   :  { %10342 = vmatprep.subr.bf16.mxu1 %v11091_v14 }
 0x408   :  { %10311 = vmatmul.mubr.msk.bf16.gmra.mxu1 %vm2927_vm12, %v2501_v26  ;;  %v12666_v26 = vpop.f32.mrf.mxu0 }
 0x409   :  { %10314 = vmatprep.mubr.msk.bf16.mxu1 %vm2927_vm12, %v2502_v30 }
 0x40a   :  { %v12668_v60 = vpop.f32.mrf.mxu0 }
 0x40c   :  { %v12670_v0 = vpop.f32.mrf.mxu0 }
 0x40e   :  { %v12672_v59 = vpop.f32.mrf.mxu0 }
 0x40f   :  { %14430 = vst [vmem:[#allocation2_spill] sm:$0xff] %v12672_v59 }
 0x410   :  { %10315 = vmatmul.mubr.msk.bf16.gmra.mxu1 %vm2927_vm12, %v14427_v4  ;;  %v12676_v39 = vpop.f32.mrf.mxu0  ;;  %v11124_v4 = vld [vmem:[%s14420_s5 + $0x398] ss:$12 sps:$4 sm:$0xff]  }
 0x411   :  { %10318 = vmatprep.mubr.msk.bf16.mxu1 %vm2927_vm12, %v14428_v36  ;;  %v11125_v36 = vld [vmem:[%s14420_s5 + $0x3b0] ss:$12 sps:$4 sm:$0xff]  }
 0x412   :  { %v12680_v30 = vpop.f32.mrf.mxu0 }
 0x414   :  { %v12684_v28 = vpop.f32.mrf.mxu0 }
 0x416   :  { %v12688_v2 = vpop.f32.mrf.mxu0 }
 0x417   :  { %14432 = vst [vmem:[#allocation4_spill] sm:$0xff] %v12688_v2 }
 0x418   :  { %10319 = vmatmul.mubr.msk.bf16.gmra.mxu1 %vm2927_vm12, %v14429_v62  ;;  %v12692_v1 = vpop.f32.mrf.mxu0 }
 0x419   :  { %10326 = vmatprep.mubr.msk.bf16.mxu1 %vm1206_vm4, %v11090_v43 }
 0x41a   :  { %v12704_v18 = vpop.f32.mrf.mxu0 }
 0x41c   :  { %v12708_v52 = vpop.f32.mrf.mxu0 }
 0x41e   :  { %v12712_v37 = vpop.f32.mrf.mxu0 }
 0x41f   :  { %14434 = vst [vmem:[#allocation6_spill] sm:$0xff] %v12712_v37 }
 0x420   :  { %10327 = vmatmul.mubr.msk.bf16.vlgmr.msra.gmra.mxu1 %vm1206_vm4, %v11092_v32  ;;  %v12716_v58 = vpop.f32.mrf.mxu0 }
 0x421   :  { %10343 = vmatpush3.bf16.msra.mxu1 %v11091_v14  ;;  %10330 = vmatprep.mubr.msk.bf16.mxu1 %vm1206_vm4, %v11108_v13 }
 0x422   :  { %10344 = vmatprep.subr.bf16.mxu1 %v11093_v61  ;;  %v12726_v7 = vpop.f32.mrf.mxu0 }
 0x423   :  { %14435 = vst [vmem:[#allocation7_spill] sm:$0xff] %v12726_v7 }
 0x424   :  { %v12732_v15 = vpop.f32.mrf.mxu0 }
 0x425   :  { %10345 = vmatpush3.bf16.msra.mxu1 %v11093_v61  ;;  %14436 = vst [vmem:[#allocation8_spill] sm:$0xff] %v12732_v15 }
 0x426   :  { %10346 = vmatprep.subr.bf16.mxu1 %v11094_v35  ;;  %v12736_v29 = vpop.f32.mrf.mxu0 }
 0x427   :  { %14438 = vst [vmem:[#allocation10_spill] sm:$0xff] %v12736_v29 }
 0x428   :  { %10331 = vmatmul.mubr.msk.bf16.gmra.mxu1 %vm1206_vm4, %v11109_v45  ;;  %v10260_v48 = vpop.f32.mrf.mxu0 }
 0x429   :  { %10347 = vmatpush3.bf16.msra.mxu1 %v11094_v35  ;;  %10334 = vmatprep.mubr.msk.bf16.mxu1 %vm1206_vm4, %v11116_v24 }
 0x42a   :  { %10348 = vmatprep.subr.bf16.mxu1 %v11095_v44  ;;  %v3502_v14 = vpop.f32.mrf.mxu0 }
 0x42c   :  { %v10261_v32 = vpop.f32.mrf.mxu0 }
 0x42d   :  { %10349 = vmatpush3.bf16.msra.mxu1 %v11095_v44 }
 0x42e   :  { %10366 = vmatprep.subr.bf16.mxu1 %v12053_v47  ;;  %v3505_v13 = vpop.f32.mrf.mxu0 }
 0x430   :  { %10335 = vmatmul.mubr.msk.bf16.gmra.mxu1 %vm1206_vm4, %v11117_v40  ;;  %v10264_v37 = vpop.f32.mrf.mxu0 }
 0x431   :  { %10338 = vmatprep.mubr.msk.bf16.mxu1 %vm1206_vm4, %v11124_v4 }
 0x432   :  { %v3518_v59 = vpop.f32.mrf.mxu0 }
 0x438   :  { %10339 = vmatmul.mubr.msk.bf16.gmra.mxu1 %vm1206_vm4, %v11125_v36 }
 0x448   :  { %v12674_v16 = vpop.f32.mrf.mxu1 }
 0x44a   :  { %v12678_v46 = vpop.f32.mrf.mxu1 }
 0x44c   :  { %v12682_v22 = vpop.f32.mrf.mxu1 }
 0x44e   :  { %v12686_v49 = vpop.f32.mrf.mxu1 }
 0x44f   :  { %14431 = vst [vmem:[#allocation3_spill] sm:$0xff] %v12686_v49 }
 0x458   :  { %v12690_v54 = vpop.f32.mrf.mxu1 }
 0x45a   :  { %v12700_v21 = vpop.f32.mrf.mxu1 }
 0x45c   :  { %v12706_v12 = vpop.f32.mrf.mxu1 }
 0x45e   :  { %v12710_v53 = vpop.f32.mrf.mxu1 }
 0x45f   :  { %14433 = vst [vmem:[#allocation5_spill] sm:$0xff] %v12710_v53 }
 0x468   :  { %v12714_v3 = vpop.f32.mrf.mxu1 }
 0x46a   :  { %v12718_v51 = vpop.f32.mrf.mxu1 }
 0x46c   :  { %v12730_v17 = vpop.f32.mrf.mxu1 }
 0x46e   :  { %v12734_v33 = vpop.f32.mrf.mxu1 }
 0x46f   :  { %14437 = vst [vmem:[#allocation9_spill] sm:$0xff] %v12734_v33 }
 0x478   :  { %v12738_v63 = vpop.f32.mrf.mxu1 }
 0x47a   :  { %v12740_v20 = vpop.f32.mrf.mxu1 }
 0x47c   :  { %v12742_v34 = vpop.f32.mrf.mxu1 }
 0x47d   :  { %14439 = vst [vmem:[#allocation11_spill] sm:$0xff] %v12742_v34 }
 0x47e   :  { %v12744_v5 = vpop.f32.mrf.mxu1 }
 0x47f   :  { %14440 = vst [vmem:[#allocation12_spill] sm:$0xff] %v12744_v5 }
 0x480   :  { %v9384_v43 = vpop.f32.mrf.mxu1 }
 0x482   :  { %v9385_v62 = vpop.f32.mrf.mxu1 }
 0x483   :  { %v9386_v35 = vadd.f32 %v9385_v62, %v9384_v43  ;;  %v10265_v62 = vpop.f32.mrf.mxu0 }
 0x484   :  { %v9387_v61 = vpop.f32.mrf.mxu1 }
 0x485   :  { %v3503_v40 = vadd.f32 %v9386_v35, %v3502_v14  ;;  %v3521_v14 = vpop.f32.mrf.mxu0 }
 0x486   :  { %v9388_v44 = vpop.f32.mrf.mxu1 }
 0x487   :  { %v9389_v45 = vadd.f32 %v9388_v44, %v9387_v61 }
 0x488   :  { %v9390_v24 = vpop.f32.mrf.mxu1 }
 0x489   :  { %v3506_v29 = vadd.f32 %v9389_v45, %v3505_v13 }
 0x48a   :  { %v9391_v5 = vpop.f32.mrf.mxu1 }
 0x48b   :  { %v3565_v33 = vpack.c.bf16 %v3506_v29, %v3503_v40  ;;  %v9392_v53 = vadd.f32 %v9391_v5, %v9390_v24 }
 0x48c   :  { %v9393_v2 = vpop.f32.mrf.mxu1 }
 0x48d   :  { %10282 = vmatprep.mubr.msk.bf16.mxu0 %vm2927_vm12, %v3565_v33  ;;  %v3511_v15 = vadd.f32 %v10260_v48, %v9392_v53  ;;  %v10268_v48 = vpop.f32.mrf.mxu0 }
 0x48e   :  { %v9394_v4 = vpop.f32.mrf.mxu1 }
 0x48f   :  { %v9395_v36 = vadd.f32 %v9394_v4, %v9393_v2 }
 0x490   :  { %v9396_v49 = vpop.f32.mrf.mxu1 }
 0x491   :  { %v3514_v34 = vadd.f32 %v10261_v32, %v9395_v36  ;;  %v3534_v32 = vpop.f32.mrf.mxu0 }
 0x492   :  { %v9397_v43 = vpop.f32.mrf.mxu1 }
 0x493   :  { %v3566_v7 = vpack.c.bf16 %v3514_v34, %v3511_v15  ;;  %v9398_v44 = vadd.f32 %v9397_v43, %v9396_v49  ;;  %v10269_v4 = vpop.f32.mrf.mxu0 }
 0x494   :  { %v9399_v61 = vpop.f32.mrf.mxu1 }
 0x495   :  { %10283 = vmatmul.mubr.msk.bf16.vlgmr.msra.gmra.mxu0 %vm2927_vm12, %v3566_v7  ;;  %v3519_v35 = vadd.f32 %v9398_v44, %v3518_v59 }
 0x496   :  { %9467 = vmatpush3.bf16.msra.mxu0 %v11960_v42  ;;  %v9400_v29 = vpop.f32.mrf.mxu1 }
 0x497   :  { %v9401_v5 = vadd.f32 %v9400_v29, %v9399_v61  ;;  %9468 = vmatprep.subr.bf16.mxu0 %v12012_v41  ;;  %v3537_v29 = vpop.f32.mrf.mxu0 }
 0x498   :  { %v9402_v33 = vpop.f32.mrf.mxu1 }
 0x499   :  { %v3522_v2 = vadd.f32 %v9401_v5, %v3521_v14 }
 0x49a   :  { %9469 = vmatpush3.bf16.msra.mxu0 %v11956_v25  ;;  %v9403_v53 = vpop.f32.mrf.mxu1 }
 0x49b   :  { %9470 = vmatprep.subr.bf16.mxu0 %v12024_v50  ;;  %v3567_v15 = vpack.c.bf16 %v3522_v2, %v3519_v35  ;;  %v9404_v34 = vadd.f32 %v9403_v53, %v9402_v33  ;;  %v10272_v35 = vpop.f32.mrf.mxu0 }
 0x49c   :  { %v9405_v49 = vpop.f32.mrf.mxu1 }
 0x49d   :  { %10286 = vmatprep.mubr.msk.bf16.mxu0 %vm2927_vm12, %v3567_v15  ;;  %v3527_v45 = vadd.f32 %v10264_v37, %v9404_v34  ;;  %v3550_v34 = vpop.f32.mrf.mxu0 }
 0x49e   :  { %9471 = vmatpush3.bf16.msra.mxu0 %v11952_v9  ;;  %v9406_v7 = vpop.f32.mrf.mxu1 }
 0x49f   :  { %v9407_v13 = vadd.f32 %v9406_v7, %v9405_v49  ;;  %9472 = vmatprep.subr.bf16.mxu0 %v12030_v11 }
 0x4a0   :  { %v9408_v59 = vpop.f32.mrf.mxu1 }
 0x4a1   :  { %v3530_v24 = vadd.f32 %v10265_v62, %v9407_v13 }
 0x4a2   :  { %9473 = vmatpush3.bf16.msra.mxu0 %v11948_v55  ;;  %v9409_v40 = vpop.f32.mrf.mxu1 }
 0x4a3   :  { %v3568_v36 = vpack.c.bf16 %v3530_v24, %v3527_v45  ;;  %9474 = vmatprep.subr.bf16.mxu0 %v12045_v27  ;;  %v9410_v61 = vadd.f32 %v9409_v40, %v9408_v59  ;;  %v10273_v24 = vpop.f32.mrf.mxu0 }
 0x4a4   :  { %v9411_v43 = vpop.f32.mrf.mxu1 }
 0x4a5   :  { %10287 = vmatmul.mubr.msk.bf16.gmra.mxu0 %vm2927_vm12, %v3568_v36  ;;  %v3535_v62 = vadd.f32 %v9410_v61, %v3534_v32 }
 0x4a6   :  { %9475 = vmatpush3.bf16.msra.mxu0 %v11941_v38  ;;  %v9412_v44 = vpop.f32.mrf.mxu1 }
 0x4a7   :  { %v9413_v14 = vadd.f32 %v9412_v44, %v9411_v43  ;;  %9476 = vmatprep.subr.bf16.mxu0 %v12060_v10  ;;  %v3553_v44 = vpop.f32.mrf.mxu0 }
 0x4a8   :  { %v9414_v37 = vpop.f32.mrf.mxu1 }
 0x4a9   :  { %v3538_v5 = vadd.f32 %v9413_v14, %v3537_v29 }
 0x4aa   :  { %9477 = vmatpush3.bf16.msra.mxu0 %v11933_v23  ;;  %v9415_v33 = vpop.f32.mrf.mxu1 }
 0x4ab   :  { %9478 = vmatprep.subr.bf16.mxu0 %v11967_v6  ;;  %v3569_v2 = vpack.c.bf16 %v3538_v5, %v3535_v62  ;;  %v9416_v15 = vadd.f32 %v9415_v33, %v9414_v37 }
 0x4ac   :  { %v9417_v53 = vpop.f32.mrf.mxu1 }
 0x4ad   :  { %10290 = vmatprep.mubr.msk.bf16.mxu0 %vm2927_vm12, %v3569_v2  ;;  %v3543_v13 = vadd.f32 %v10268_v48, %v9416_v15 }
 0x4ae   :  { %9479 = vmatpush3.bf16.msra.mxu0 %v11929_v8  ;;  %v9418_v49 = vpop.f32.mrf.mxu1 }
 0x4af   :  { %v9419_v7 = vadd.f32 %v9418_v49, %v9417_v53  ;;  %9480 = vmatprep.subr.bf16.mxu0 %v11964_v57 }
 0x4b0   :  { %v9420_v32 = vpop.f32.mrf.mxu1 }
 0x4b1   :  { %v3546_v59 = vadd.f32 %v10269_v4, %v9419_v7  ;;  %v11098_v7 = vld [vmem:[%s14420_s5 + $0x304] ss:$12 sps:$4 sm:$0xff]  }
 0x4b2   :  { %9481 = vmatpush3.bf16.msra.mxu0 %v11925_v56  ;;  %v9421_v45 = vpop.f32.mrf.mxu1 }
 0x4b3   :  { %v3570_v40 = vpack.c.bf16 %v3546_v59, %v3543_v13  ;;  %9552 = vmatprep.subr.bf16.mxu0 %v12006_v19  ;;  %v9422_v43 = vadd.f32 %v9421_v45, %v9420_v32  ;;  %v11101_v13 = vld [vmem:[%s14420_s5 + $0x31c] ss:$12 sps:$4 sm:$0xff]   ;;  %v11104_v59 = vld [vmem:[%s14420_s5 + $0x334] ss:$12 sps:$4 sm:$0xff]  }
 0x4b4   :  { %v9423_v36 = vpop.f32.mrf.mxu1  ;;  %v11102_v45 = vld [vmem:[%s14420_s5 + $0x330] ss:$12 sps:$4 sm:$0xff]  }
 0x4b5   :  { %10291 = vmatmul.mubr.msk.bf16.gmra.mxu0 %vm2927_vm12, %v3570_v40  ;;  %v3551_v37 = vadd.f32 %v9422_v43, %v3550_v34  ;;  %v11096_v34 = vld [vmem:[%s14420_s5 + $0x300] ss:$12 sps:$4 sm:$0xff]   ;;  %v11105_v40 = vld [vmem:[%s14420_s5 + $0x348] ss:$12 sps:$4 sm:$0xff]  }
 0x4b6   :  { %v9424_v61 = vpop.f32.mrf.mxu1  ;;  %v11110_v43 = vld [vmem:[%s14420_s5 + $0x360] ss:$12 sps:$4 sm:$0xff]  }
 0x4b7   :  { %v9425_v29 = vadd.f32 %v9424_v61, %v9423_v36  ;;  %v11112_v36 = vld [vmem:[%s14420_s5 + $0x364] ss:$12 sps:$4 sm:$0xff]   ;;  %v11115_v61 = vld [vmem:[%s14420_s5 + $0x37c] ss:$12 sps:$4 sm:$0xff]  }
 0x4b8   :  { %v9426_v14 = vpop.f32.mrf.mxu1 }
 0x4b9   :  { %v3554_v62 = vadd.f32 %v9425_v29, %v3553_v44  ;;  %v11113_v44 = vld [vmem:[%s14420_s5 + $0x378] ss:$12 sps:$4 sm:$0xff]   ;;  %v11120_v29 = vld [vmem:[%s14420_s5 + $0x394] ss:$12 sps:$4 sm:$0xff]  }
 0x4ba   :  { %v9427_v5 = vpop.f32.mrf.mxu1 }
 0x4bb   :  { %v3571_v48 = vpack.c.bf16 %v3554_v62, %v3551_v37  ;;  %v9428_v33 = vadd.f32 %v9427_v5, %v9426_v14  ;;  %v11118_v14 = vld [vmem:[%s14420_s5 + $0x390] ss:$12 sps:$4 sm:$0xff]   ;;  %v11123_v37 = vld [vmem:[%s14420_s5 + $0x3ac] ss:$12 sps:$4 sm:$0xff]   ;;  %v11121_v62 = vld [vmem:[%s14420_s5 + $0x3a8] ss:$12 sps:$4 sm:$0xff]  }
 0x4bc   :  { %v9429_v4 = vpop.f32.mrf.mxu1  ;;  %v11128_v5 = vld [vmem:[%s14420_s5 + $0x3c4] ss:$12 sps:$4 sm:$0xff]  }
 0x4bd   :  { %10294 = vmatprep.mubr.msk.bf16.mxu0 %vm2927_vm12, %v3571_v48  ;;  %v3559_v15 = vadd.f32 %v10272_v35, %v9428_v33  ;;  %v11099_v35 = vld [vmem:[%s14420_s5 + $0x318] ss:$12 sps:$4 sm:$0xff]   ;;  %v11126_v48 = vld [vmem:[%s14420_s5 + $0x3c0] ss:$12 sps:$4 sm:$0xff]  }
 0x4be   :  { %v9430_v2 = vpop.f32.mrf.mxu1  ;;  %v11129_v33 = vld [vmem:[%s14420_s5 + $0x3d8] ss:$12 sps:$4 sm:$0xff]  }
 0x4bf   :  { %v9431_v53 = vadd.f32 %v9430_v2, %v9429_v4  ;;  %v11131_v4 = vld [vmem:[%s14420_s5 + $0x3dc] ss:$12 sps:$4 sm:$0xff]   ;;  %v11134_v2 = vld [vmem:[%s14420_s5 + $0x3f4] ss:$12 sps:$4 sm:$0xff]  }
 0x4c1   :  { %v3562_v49 = vadd.f32 %v10273_v24, %v9431_v53  ;;  %v11107_v24 = vld [vmem:[%s14420_s5 + $0x34c] ss:$12 sps:$4 sm:$0xff]   ;;  %v11132_v53 = vld [vmem:[%s14420_s5 + $0x3f0] ss:$12 sps:$4 sm:$0xff]  }
 0x4c3   :  { %v3572_v32 = vpack.c.bf16 %v3562_v49, %v3559_v15  ;;  %v11137_v15 = vld [vmem:[%s14420_s5 + $0x40c] ss:$12 sps:$4 sm:$0xff]   ;;  %v11135_v49 = vld [vmem:[%s14420_s5 + $0x408] ss:$12 sps:$4 sm:$0xff]  }
 0x4c5   :  { %10295 = vmatmul.mubr.msk.bf16.gmra.mxu0 %vm2927_vm12, %v3572_v32  ;;  %v11138_v32 = vld [vmem:[%s14420_s5 + $0x420] ss:$12 sps:$4 sm:$0xff]  }
 0x4c6   :  { %4081 = vmatprep.mubr.bf16.mxu0 %v11098_v7  ;;  %v11140_v7 = vld [vmem:[%s14420_s5 + $0x424] ss:$12 sps:$4 sm:$0xff]  }
 0x4cd   :  { %4082 = vmatmul.mubr.bf16.vlgmr.msra.gmra.mxu0 %v11096_v34  ;;  %v11143_v34 = vld [vmem:[%s14420_s5 + $0x43c] ss:$12 sps:$4 sm:$0xff]  }
 0x4ce   :  { %9553 = vmatpush3.bf16.msra.mxu0 %v11960_v42  ;;  %4089 = vmatprep.mubr.bf16.mxu0 %v11101_v13  ;;  %v11141_v13 = vld [vmem:[%s14420_s5 + $0x438] ss:$12 sps:$4 sm:$0xff]  }
 0x4cf   :  { %9554 = vmatprep.subr.bf16.mxu0 %v12012_v41 }
 0x4d2   :  { %9555 = vmatpush3.bf16.msra.mxu0 %v11956_v25 }
 0x4d3   :  { %9556 = vmatprep.subr.bf16.mxu0 %v12024_v50 }
 0x4d5   :  { %4090 = vmatmul.mubr.bf16.gmra.mxu0 %v11099_v35  ;;  %v11146_v35 = vld [vmem:[%s14420_s5 + $0x454] ss:$12 sps:$4 sm:$0xff]  }
 0x4d6   :  { %9557 = vmatpush3.bf16.msra.mxu0 %v11952_v9  ;;  %4097 = vmatprep.mubr.bf16.mxu0 %v11104_v59  ;;  %v11144_v59 = vld [vmem:[%s14420_s5 + $0x450] ss:$12 sps:$4 sm:$0xff]  }
 0x4d7   :  { %9558 = vmatprep.subr.bf16.mxu0 %v12030_v11 }
 0x4da   :  { %9559 = vmatpush3.bf16.msra.mxu0 %v11948_v55 }
 0x4db   :  { %9560 = vmatprep.subr.bf16.mxu0 %v12045_v27 }
 0x4dd   :  { %4098 = vmatmul.mubr.bf16.gmra.mxu0 %v11102_v45  ;;  %v11149_v45 = vld [vmem:[%s14420_s5 + $0x46c] ss:$12 sps:$4 sm:$0xff]  }
 0x4de   :  { %9561 = vmatpush3.bf16.msra.mxu0 %v11941_v38  ;;  %4105 = vmatprep.mubr.bf16.mxu0 %v11107_v24  ;;  %v11147_v24 = vld [vmem:[%s14420_s5 + $0x468] ss:$12 sps:$4 sm:$0xff]  }
 0x4df   :  { %9562 = vmatprep.subr.bf16.mxu0 %v12060_v10 }
 0x4e2   :  { %9563 = vmatpush3.bf16.msra.mxu0 %v11933_v23 }
 0x4e3   :  { %9564 = vmatprep.subr.bf16.mxu0 %v11967_v6 }
 0x4e5   :  { %4106 = vmatmul.mubr.bf16.gmra.mxu0 %v11105_v40  ;;  %v11152_v40 = vld [vmem:[%s14420_s5 + $0x484] ss:$12 sps:$4 sm:$0xff]  }
 0x4e6   :  { %9565 = vmatpush3.bf16.msra.mxu0 %v11929_v8  ;;  %4113 = vmatprep.mubr.bf16.mxu0 %v11112_v36  ;;  %v12909_v36 = vpop.f32.mrf.mxu1 }
 0x4e7   :  { %9566 = vmatprep.subr.bf16.mxu0 %v11964_v57 }
 0x4ea   :  { %9567 = vmatpush3.bf16.msra.mxu0 %v11925_v56 }
 0x4eb   :  { %9638 = vmatprep.subr.bf16.mxu0 %v12006_v19 }
 0x4ed   :  { %4114 = vmatmul.mubr.bf16.gmra.mxu0 %v11110_v43  ;;  %v11150_v43 = vld [vmem:[%s14420_s5 + $0x480] ss:$12 sps:$4 sm:$0xff]  }
 0x4ee   :  { %4121 = vmatprep.mubr.bf16.mxu0 %v11115_v61  ;;  %v11155_v61 = vld [vmem:[%s14420_s5 + $0x49c] ss:$12 sps:$4 sm:$0xff]  }
 0x4f5   :  { %4122 = vmatmul.mubr.bf16.gmra.mxu0 %v11113_v44  ;;  %v12917_v44 = vpop.f32.mrf.mxu1 }
 0x4f6   :  { %4129 = vmatprep.mubr.bf16.mxu0 %v11120_v29 }
 0x4f7   :  { %v12921_v29 = vpop.f32.mrf.mxu1 }
 0x4fd   :  { %4130 = vmatmul.mubr.bf16.gmra.mxu0 %v11118_v14  ;;  %v11153_v14 = vld [vmem:[%s14420_s5 + $0x498] ss:$12 sps:$4 sm:$0xff]  }
 0x4fe   :  { %4137 = vmatprep.mubr.bf16.mxu0 %v11123_v37  ;;  %v11158_v37 = vld [vmem:[%s14420_s5 + $0x4b4] ss:$12 sps:$4 sm:$0xff]  }
 0x505   :  { %4138 = vmatmul.mubr.bf16.gmra.mxu0 %v11121_v62  ;;  %v12931_v62 = vpop.f32.mrf.mxu1 }
 0x506   :  { %4630 = vmatprep.mubr.bf16.mxu0 %v11128_v5  ;;  %14441 = vst [vmem:[#allocation13_spill] sm:$0xff] %v12931_v62 }
 0x507   :  { %v12935_v5 = vpop.f32.mrf.mxu1 }
 0x50d   :  { %4631 = vmatmul.mubr.bf16.vlgmr.msra.gmra.mxu0 %v11126_v48  ;;  %v11156_v48 = vld [vmem:[%s14420_s5 + $0x4b0] ss:$12 sps:$4 sm:$0xff]  }
 0x50e   :  { %9639 = vmatpush3.bf16.msra.mxu0 %v11960_v42  ;;  %4638 = vmatprep.mubr.bf16.mxu0 %v11131_v4  ;;  %v11161_v4 = vld [vmem:[%s14420_s5 + $0x4cc] ss:$12 sps:$4 sm:$0xff]  }
 0x50f   :  { %9640 = vmatprep.subr.bf16.mxu0 %v12012_v41 }
 0x512   :  { %9641 = vmatpush3.bf16.msra.mxu0 %v11956_v25 }
 0x513   :  { %9642 = vmatprep.subr.bf16.mxu0 %v12024_v50 }
 0x515   :  { %4639 = vmatmul.mubr.bf16.gmra.mxu0 %v11129_v33 }
 0x516   :  { %9643 = vmatpush3.bf16.msra.mxu0 %v11952_v9  ;;  %4646 = vmatprep.mubr.bf16.mxu0 %v11134_v2  ;;  %v12947_v2 = vpop.f32.mrf.mxu1 }
 0x517   :  { %9644 = vmatprep.subr.bf16.mxu0 %v12030_v11 }
 0x51a   :  { %9645 = vmatpush3.bf16.msra.mxu0 %v11948_v55 }
 0x51b   :  { %9646 = vmatprep.subr.bf16.mxu0 %v12045_v27 }
 0x51d   :  { %4647 = vmatmul.mubr.bf16.gmra.mxu0 %v11132_v53 }
 0x51e   :  { %9647 = vmatpush3.bf16.msra.mxu0 %v11941_v38  ;;  %4654 = vmatprep.mubr.bf16.mxu0 %v11137_v15  ;;  %v12953_v15 = vpop.f32.mrf.mxu1 }
 0x51f   :  { %9648 = vmatprep.subr.bf16.mxu0 %v12060_v10  ;;  %14442 = vst [vmem:[#allocation14_spill] sm:$0xff] %v12953_v15 }
 0x522   :  { %9649 = vmatpush3.bf16.msra.mxu0 %v11933_v23 }
 0x523   :  { %9650 = vmatprep.subr.bf16.mxu0 %v11967_v6 }
 0x525   :  { %4655 = vmatmul.mubr.bf16.gmra.mxu0 %v11135_v49  ;;  %v11159_v49 = vld [vmem:[%s14420_s5 + $0x4c8] ss:$12 sps:$4 sm:$0xff]  }
 0x526   :  { %9651 = vmatpush3.bf16.msra.mxu0 %v11929_v8  ;;  %4662 = vmatprep.mubr.bf16.mxu0 %v11140_v7  ;;  %v11164_v7 = vld [vmem:[%s14420_s5 + $0x4e4] ss:$12 sps:$4 sm:$0xff]  }
 0x527   :  { %9652 = vmatprep.subr.bf16.mxu0 %v11964_v57 }
 0x52a   :  { %9653 = vmatpush3.bf16.msra.mxu0 %v11925_v56 }
 0x52b   :  { %9724 = vmatprep.subr.bf16.mxu0 %v12006_v19 }
 0x52d   :  { %4663 = vmatmul.mubr.bf16.gmra.mxu0 %v11138_v32 }
 0x52e   :  { %4670 = vmatprep.mubr.bf16.mxu0 %v11143_v34  ;;  %v12965_v34 = vpop.f32.mrf.mxu1 }
 0x52f   :  { %14443 = vst [vmem:[#allocation15_spill] sm:$0xff] %v12965_v34 }
 0x535   :  { %4671 = vmatmul.mubr.bf16.gmra.mxu0 %v11141_v13 }
 0x536   :  { %4678 = vmatprep.mubr.bf16.mxu0 %v11146_v35  ;;  %v12971_v35 = vpop.f32.mrf.mxu1 }
 0x537   :  { %14445 = vst [vmem:[#allocation17_spill] sm:$0xff] %v12971_v35 }
 0x53d   :  { %4679 = vmatmul.mubr.bf16.gmra.mxu0 %v11144_v59 }
 0x53e   :  { %4686 = vmatprep.mubr.bf16.mxu0 %v11149_v45  ;;  %v11162_v45 = vld [vmem:[%s14420_s5 + $0x4e0] ss:$12 sps:$4 sm:$0xff]  }
 0x545   :  { %4687 = vmatmul.mubr.bf16.gmra.mxu0 %v11147_v24  ;;  %v11167_v24 = vld [vmem:[%s14420_s5 + $0x4fc] ss:$12 sps:$4 sm:$0xff]  }
 0x546   :  { %5179 = vmatprep.mubr.bf16.mxu0 %v11152_v40  ;;  %v12983_v40 = vpop.f32.mrf.mxu1 }
 0x547   :  { %14446 = vst [vmem:[#allocation18_spill] sm:$0xff] %v12983_v40 }
 0x54d   :  { %5180 = vmatmul.mubr.bf16.vlgmr.msra.gmra.mxu0 %v11150_v43 }
 0x54e   :  { %9725 = vmatpush3.bf16.msra.mxu0 %v11960_v42  ;;  %5187 = vmatprep.mubr.bf16.mxu0 %v11155_v61  ;;  %v12987_v61 = vpop.f32.mrf.mxu1 }
 0x54f   :  { %9726 = vmatprep.subr.bf16.mxu0 %v12012_v41  ;;  %14447 = vst [vmem:[#allocation19_spill] sm:$0xff] %v12987_v61 }
 0x552   :  { %9727 = vmatpush3.bf16.msra.mxu0 %v11956_v25 }
 0x553   :  { %9728 = vmatprep.subr.bf16.mxu0 %v12024_v50 }
 0x555   :  { %5188 = vmatmul.mubr.bf16.gmra.mxu0 %v11153_v14  ;;  %v12944_v33 = vpop.f32.mrf.mxu0 }
 0x556   :  { %9729 = vmatpush3.bf16.msra.mxu0 %v11952_v9  ;;  %5195 = vmatprep.mubr.bf16.mxu0 %v11158_v37  ;;  %v11165_v37 = vld [vmem:[%s14420_s5 + $0x4f8] ss:$12 sps:$4 sm:$0xff]  }
 0x557   :  { %9730 = vmatprep.subr.bf16.mxu0 %v12030_v11  ;;  %v12950_v53 = vpop.f32.mrf.mxu0 }
 0x559   :  { %v12962_v32 = vpop.f32.mrf.mxu0 }
 0x55a   :  { %9731 = vmatpush3.bf16.msra.mxu0 %v11948_v55 }
 0x55b   :  { %9732 = vmatprep.subr.bf16.mxu0 %v12045_v27  ;;  %v12968_v13 = vpop.f32.mrf.mxu0 }
 0x55c   :  { %14444 = vst [vmem:[#allocation16_spill] sm:$0xff] %v12968_v13 }
 0x55d   :  { %5196 = vmatmul.mubr.bf16.gmra.mxu0 %v11156_v48  ;;  %v11170_v48 = vld [vmem:[%s14420_s5 + $0x514] ss:$12 sps:$4 sm:$0xff]  }
 0x55e   :  { %9733 = vmatpush3.bf16.msra.mxu0 %v11941_v38  ;;  %5203 = vmatprep.mubr.bf16.mxu0 %v11161_v4  ;;  %v12997_v4 = vpop.f32.mrf.mxu1 }
 0x55f   :  { %9734 = vmatprep.subr.bf16.mxu0 %v12060_v10  ;;  %14449 = vst [vmem:[#allocation21_spill] sm:$0xff] %v12997_v4  ;;  %v11171_v4 = vld [vmem:[%s14420_s5 + $0x528] ss:$12 sps:$4 sm:$0xff]  }
 0x562   :  { %9735 = vmatpush3.bf16.msra.mxu0 %v11933_v23 }
 0x563   :  { %9736 = vmatprep.subr.bf16.mxu0 %v11967_v6 }
 0x565   :  { %5204 = vmatmul.mubr.bf16.gmra.mxu0 %v11159_v49  ;;  %v12973_v59 = vpop.f32.mrf.mxu0 }
 0x566   :  { %9737 = vmatpush3.bf16.msra.mxu0 %v11929_v8  ;;  %5211 = vmatprep.mubr.bf16.mxu0 %v11164_v7  ;;  %v13003_v7 = vpop.f32.mrf.mxu1 }
 0x567   :  { %9738 = vmatprep.subr.bf16.mxu0 %v11964_v57  ;;  %v12985_v43 = vpop.f32.mrf.mxu0  ;;  %14452 = vst [vmem:[#allocation24_spill] sm:$0xff] %v13003_v7 }
 0x568   :  { %v13013_v62 = vpop.f32.mrf.mxu1 }
 0x569   :  { %v12989_v14 = vpop.f32.mrf.mxu0  ;;  %14454 = vst [vmem:[#allocation26_spill] sm:$0xff] %v13013_v62  ;;  %v11174_v62 = vld [vmem:[%s14420_s5 + $0x540] ss:$12 sps:$4 sm:$0xff]  }
 0x56a   :  { %9739 = vmatpush3.bf16.msra.mxu0 %v11925_v56  ;;  %14448 = vst [vmem:[#allocation20_spill] sm:$0xff] %v12989_v14 }
 0x56b   :  { %9810 = vmatprep.subr.bf16.mxu0 %v12006_v19  ;;  %v12999_v19 = vpop.f32.mrf.mxu0 }
 0x56c   :  { %14450 = vst [vmem:[#allocation22_spill] sm:$0xff] %v12999_v19  ;;  %v11176_v19 = vld [vmem:[%s14420_s5 + $0x544] ss:$12 sps:$4 sm:$0xff]  }
 0x56d   :  { %5212 = vmatmul.mubr.bf16.gmra.mxu0 %v11162_v45  ;;  %v11168_v45 = vld [vmem:[%s14420_s5 + $0x510] ss:$12 sps:$4 sm:$0xff]  }
 0x56e   :  { %5219 = vmatprep.mubr.bf16.mxu0 %v11167_v24  ;;  %v11173_v24 = vld [vmem:[%s14420_s5 + $0x52c] ss:$12 sps:$4 sm:$0xff]  }
 0x575   :  { %5220 = vmatmul.mubr.bf16.gmra.mxu0 %v11165_v37  ;;  %v13001_v49 = vpop.f32.mrf.mxu0 }
 0x576   :  { %5227 = vmatprep.mubr.bf16.mxu0 %v11170_v48  ;;  %14451 = vst [vmem:[#allocation23_spill] sm:$0xff] %v13001_v49  ;;  %v13017_v48 = vpop.f32.mrf.mxu1 }
 0x577   :  { %v13011_v34 = vpop.f32.mrf.mxu0  ;;  %14456 = vst [vmem:[#allocation28_spill] sm:$0xff] %v13017_v48 }
 0x578   :  { %14453 = vst [vmem:[#allocation25_spill] sm:$0xff] %v13011_v34  ;;  %v13027_v7 = vpop.f32.mrf.mxu1 }
 0x579   :  { %v13015_v37 = vpop.f32.mrf.mxu0  ;;  %14458 = vst [vmem:[#allocation30_spill] sm:$0xff] %v13027_v7 }
 0x57a   :  { %14455 = vst [vmem:[#allocation27_spill] sm:$0xff] %v13015_v37 }
 0x57b   :  { %v13025_v13 = vpop.f32.mrf.mxu0 }
 0x57c   :  { %14457 = vst [vmem:[#allocation29_spill] sm:$0xff] %v13025_v13 }
 0x57d   :  { %5228 = vmatmul.mubr.bf16.gmra.mxu0 %v11168_v45 }
 0x57e   :  { %5235 = vmatprep.mubr.bf16.mxu0 %v11173_v24  ;;  %v10328_v24 = vpop.f32.mrf.mxu1 }
 0x580   :  { %v4180_v40 = vpop.f32.mrf.mxu1 }
 0x585   :  { %v13029_v61 = vpop.f32.mrf.mxu0  ;;  %5236 = vmatmul.mubr.bf16.gmra.mxu0 %v11171_v4 }
 0x586   :  { %14459 = vst [vmem:[#allocation31_spill] sm:$0xff] %v13029_v61  ;;  %5728 = vmatprep.mubr.bf16.mxu0 %v11176_v19  ;;  %v10329_v19 = vpop.f32.mrf.mxu1 }
 0x587   :  { %v13031_v45 = vpop.f32.mrf.mxu0 }
 0x588   :  { %14460 = vst [vmem:[#allocation32_spill] sm:$0xff] %v13031_v45  ;;  %v4183_v45 = vpop.f32.mrf.mxu1 }
 0x589   :  { %v13033_v48 = vpop.f32.mrf.mxu0 }
 0x58a   :  { %14461 = vst [vmem:[#allocation33_spill] sm:$0xff] %v13033_v48 }
 0x58b   :  { %v13038_v37 = vpop.f32.mrf.mxu0 }
 0x58c   :  { %14462 = vst [vmem:[#allocation34_spill] sm:$0xff] %v13038_v37 }
 0x58d   :  { %v9482_v34 = vpop.f32.mrf.mxu0  ;;  %5729 = vmatmul.mubr.bf16.vlgmr.msra.gmra.mxu0 %v11174_v62 }
 0x58e   :  { %9811 = vmatpush3.bf16.msra.mxu0 %v11960_v42 }
 0x58f   :  { %9812 = vmatprep.subr.bf16.mxu0 %v12012_v41  ;;  %v9483_v4 = vpop.f32.mrf.mxu0  ;;  %v10332_v41 = vpop.f32.mrf.mxu1 }
 0x590   :  { %v9484_v13 = vadd.f32 %v9483_v4, %v9482_v34 }
 0x591   :  { %v9485_v7 = vpop.f32.mrf.mxu0 }
 0x592   :  { %9813 = vmatpush3.bf16.msra.mxu0 %v11956_v25  ;;  %v4181_v37 = vadd.f32 %v9484_v13, %v4180_v40 }
 0x593   :  { %9814 = vmatprep.subr.bf16.mxu0 %v12024_v50  ;;  %v9486_v48 = vpop.f32.mrf.mxu0  ;;  %v4196_v50 = vpop.f32.mrf.mxu1 }
 0x594   :  { %v9487_v61 = vadd.f32 %v9486_v48, %v9485_v7 }
 0x595   :  { %v9488_v35 = vpop.f32.mrf.mxu0  ;;  %v10333_v40 = vpop.f32.mrf.mxu1 }
 0x596   :  { %9815 = vmatpush3.bf16.msra.mxu0 %v11952_v9  ;;  %v4184_v62 = vadd.f32 %v9487_v61, %v4183_v45 }
 0x597   :  { %9816 = vmatprep.subr.bf16.mxu0 %v12030_v11  ;;  %v9489_v42 = vpop.f32.mrf.mxu0 }
 0x598   :  { %v4243_v49 = vpack.c.bf16 %v4184_v62, %v4181_v37  ;;  %v9490_v14 = vadd.f32 %v9489_v42, %v9488_v35 }
 0x599   :  { %v9491_v15 = vpop.f32.mrf.mxu0 }
 0x59a   :  { %9817 = vmatpush3.bf16.msra.mxu0 %v11948_v55  ;;  %10350 = vmatprep.mubr.msk.bf16.mxu1 %vm2927_vm12, %v4243_v49  ;;  %v4189_v9 = vadd.f32 %v10328_v24, %v9490_v14 }
 0x59b   :  { %9818 = vmatprep.subr.bf16.mxu0 %v12045_v27  ;;  %v9492_v25 = vpop.f32.mrf.mxu0  ;;  %v4199_v27 = vpop.f32.mrf.mxu1 }
 0x59c   :  { %v9493_v34 = vadd.f32 %v9492_v25, %v9491_v15 }
 0x59d   :  { %v9494_v7 = vpop.f32.mrf.mxu0  ;;  %v10336_v49 = vpop.f32.mrf.mxu1 }
 0x59e   :  { %v4192_v13 = vadd.f32 %v10329_v19, %v9493_v34  ;;  %9819 = vmatpush3.bf16.msra.mxu0 %v11941_v38  ;;  %v13059_v38 = vld [vmem:[%s14421_s6 + $0xb8] sm:$0xff]  }
 0x59f   :  { %9820 = vmatprep.subr.bf16.mxu0 %v12060_v10  ;;  %v9495_v11 = vpop.f32.mrf.mxu0  ;;  %v4212_v19 = vpop.f32.mrf.mxu1 }
 0x5a0   :  { %v4244_v61 = vpack.c.bf16 %v4192_v13, %v4189_v9  ;;  %v9496_v37 = vadd.f32 %v9495_v11, %v9494_v7 }
 0x5a1   :  { %v9497_v35 = vpop.f32.mrf.mxu0  ;;  %v10337_v34 = vpop.f32.mrf.mxu1 }
 0x5a2   :  { %9821 = vmatpush3.bf16.msra.mxu0 %v11933_v23  ;;  %10351 = vmatmul.mubr.msk.bf16.vlgmr.msra.gmra.mxu1 %vm2927_vm12, %v4244_v61  ;;  %v4197_v23 = vadd.f32 %v9496_v37, %v4196_v50 }
 0x5a3   :  { %10367 = vmatpush3.bf16.msra.mxu1 %v12053_v47  ;;  %9822 = vmatprep.subr.bf16.mxu0 %v11967_v6  ;;  %v9498_v55 = vpop.f32.mrf.mxu0  ;;  %v4215_v11 = vpop.f32.mrf.mxu1 }
 0x5a4   :  { %v9499_v15 = vadd.f32 %v9498_v55, %v9497_v35  ;;  %10368 = vmatprep.subr.bf16.mxu1 %v12051_v31 }
 0x5a5   :  { %v9500_v10 = vpop.f32.mrf.mxu0 }
 0x5a6   :  { %9823 = vmatpush3.bf16.msra.mxu0 %v11929_v8  ;;  %v4200_v14 = vadd.f32 %v9499_v15, %v4199_v27  ;;  %v10340_v27 = vpop.f32.mrf.mxu1 }
 0x5a7   :  { %10369 = vmatpush3.bf16.msra.mxu1 %v12051_v31  ;;  %9824 = vmatprep.subr.bf16.mxu0 %v11964_v57  ;;  %v9501_v6 = vpop.f32.mrf.mxu0 }
 0x5a8   :  { %v4245_v48 = vpack.c.bf16 %v4200_v14, %v4197_v23  ;;  %10386 = vmatprep.subr.bf16.mxu1 %v13059_v38  ;;  %v9502_v24 = vadd.f32 %v9501_v6, %v9500_v10 }
 0x5a9   :  { %v9503_v45 = vpop.f32.mrf.mxu0 }
 0x5aa   :  { %9825 = vmatpush3.bf16.msra.mxu0 %v11925_v56  ;;  %10354 = vmatprep.mubr.msk.bf16.mxu1 %vm2927_vm12, %v4245_v48  ;;  %v4205_v42 = vadd.f32 %v10332_v41, %v9502_v24 }
 0x5ab   :  { %v9504_v4 = vpop.f32.mrf.mxu0 }
 0x5ac   :  { %v9505_v8 = vadd.f32 %v9504_v4, %v9503_v45 }
 0x5ad   :  { %v9506_v62 = vpop.f32.mrf.mxu0 }
 0x5ae   :  { %v4208_v25 = vadd.f32 %v10333_v40, %v9505_v8  ;;  %v4228_v40 = vpop.f32.mrf.mxu1 }
 0x5af   :  { %v9507_v50 = vpop.f32.mrf.mxu0 }
 0x5b0   :  { %v4246_v57 = vpack.c.bf16 %v4208_v25, %v4205_v42  ;;  %v9508_v9 = vadd.f32 %v9507_v50, %v9506_v62  ;;  %v10341_v4 = vpop.f32.mrf.mxu1 }
 0x5b1   :  { %v9509_v7 = vpop.f32.mrf.mxu0 }
 0x5b2   :  { %10355 = vmatmul.mubr.msk.bf16.gmra.mxu1 %vm2927_vm12, %v4246_v57  ;;  %v4213_v56 = vadd.f32 %v9508_v9, %v4212_v19  ;;  %v4231_v25 = vpop.f32.mrf.mxu1 }
 0x5b3   :  { %v9510_v13 = vpop.f32.mrf.mxu0 }
 0x5b4   :  { %v9511_v61 = vadd.f32 %v9510_v13, %v9509_v7 }
 0x5b5   :  { %v9512_v35 = vpop.f32.mrf.mxu0 }
 0x5b6   :  { %v4216_v37 = vadd.f32 %v9511_v61, %v4215_v11 }
 0x5b7   :  { %v9513_v55 = vpop.f32.mrf.mxu0 }
 0x5b8   :  { %v4247_v15 = vpack.c.bf16 %v4216_v37, %v4213_v56  ;;  %v9514_v23 = vadd.f32 %v9513_v55, %v9512_v35  ;;  %v11177_v55 = vld [vmem:[%s14420_s5 + $0x3c8] ss:$12 sps:$4 sm:$0xff]  }
 0x5b9   :  { %v9515_v10 = vpop.f32.mrf.mxu0 }
 0x5ba   :  { %10358 = vmatprep.mubr.msk.bf16.mxu1 %vm2927_vm12, %v4247_v15  ;;  %v4221_v48 = vadd.f32 %v10336_v49, %v9514_v23  ;;  %v11181_v23 = vld [vmem:[%s14420_s5 + $0x3f8] ss:$12 sps:$4 sm:$0xff]  }
 0x5bb   :  { %v9516_v41 = vpop.f32.mrf.mxu0 }
 0x5bc   :  { %v9517_v14 = vadd.f32 %v9516_v41, %v9515_v10  ;;  %v11179_v10 = vld [vmem:[%s14420_s5 + $0x3e0] ss:$12 sps:$4 sm:$0xff]  }
 0x5bd   :  { %v9518_v6 = vpop.f32.mrf.mxu0  ;;  %v11182_v41 = vld [vmem:[%s14421_s6 + $0xa8] sm:$0xff]  }
 0x5be   :  { %v4224_v45 = vadd.f32 %v10337_v34, %v9517_v14  ;;  %v11185_v14 = vld [vmem:[%s14420_s5 + $0x428] ss:$12 sps:$4 sm:$0xff]  }
 0x5bf   :  { %v9519_v24 = vpop.f32.mrf.mxu0 }
 0x5c0   :  { %v4248_v8 = vpack.c.bf16 %v4224_v45, %v4221_v48  ;;  %v9520_v42 = vadd.f32 %v9519_v24, %v9518_v6  ;;  %v11186_v6 = vld [vmem:[%s14420_s5 + $0x440] ss:$12 sps:$4 sm:$0xff]   ;;  %v11187_v48 = vld [vmem:[%s14420_s5 + $0x458] ss:$12 sps:$4 sm:$0xff]   ;;  %v11188_v45 = vld [vmem:[%s14420_s5 + $0x470] ss:$12 sps:$4 sm:$0xff]  }
 0x5c1   :  { %v9521_v62 = vpop.f32.mrf.mxu0 }
 0x5c2   :  { %10359 = vmatmul.mubr.msk.bf16.gmra.mxu1 %vm2927_vm12, %v4248_v8  ;;  %v4229_v7 = vadd.f32 %v9520_v42, %v4228_v40  ;;  %v11183_v40 = vld [vmem:[%s14420_s5 + $0x410] ss:$12 sps:$4 sm:$0xff]  }
 0x5c3   :  { %v9522_v19 = vpop.f32.mrf.mxu0 }
 0x5c4   :  { %v9523_v50 = vadd.f32 %v9522_v19, %v9521_v62 }
 0x5c5   :  { %v9524_v57 = vpop.f32.mrf.mxu0 }
 0x5c6   :  { %v4232_v9 = vadd.f32 %v9523_v50, %v4231_v25 }
 0x5c7   :  { %v9525_v13 = vpop.f32.mrf.mxu0 }
 0x5c8   :  { %v4249_v11 = vpack.c.bf16 %v4232_v9, %v4229_v7  ;;  %v9526_v35 = vadd.f32 %v9525_v13, %v9524_v57  ;;  %v3140_v13 = vadd.f32 %v12666_v26, %v12674_v16 }
 0x5c9   :  { %v9527_v61 = vpop.f32.mrf.mxu0 }
 0x5ca   :  { %10362 = vmatprep.mubr.msk.bf16.mxu1 %vm2927_vm12, %v4249_v11  ;;  %v4237_v56 = vadd.f32 %v10340_v27, %v9526_v35  ;;  %v11180_v27 = vld [vmem:[%s14421_s6 + $0xb0] sm:$0xff]  }
 0x5cb   :  { %v9528_v49 = vpop.f32.mrf.mxu0 }
 0x5cc   :  { %v9529_v34 = vadd.f32 %v9528_v49, %v9527_v61  ;;  %v3132_v61 = vadd.f32 %v12668_v60, %v12678_v46  ;;  %v3156_v60 = vadd.f32 %v12676_v39, %v12690_v54 }
 0x5cd   :  { %v13115_v24 = vpop.f32.mrf.mxu0 }
 0x5ce   :  { %v4240_v37 = vadd.f32 %v10341_v4, %v9529_v34 }
 0x5cf   :  { %v13117_v4 = vpop.f32.mrf.mxu0 }
 0x5d0   :  { %v4250_v15 = vpack.c.bf16 %v4240_v37, %v4237_v56  ;;  %v3143_v56 = vadd.f32 %v12670_v0, %v12682_v22 }
 0x5d1   :  { %v13119_v8 = vpop.f32.mrf.mxu0 }
 0x5d2   :  { %10363 = vmatmul.mubr.msk.bf16.gmra.mxu1 %vm2927_vm12, %v4250_v15 }
 0x5d3   :  { %10370 = vmatprep.mubr.msk.bf16.mxu1 %vm1206_vm4, %v11177_v55  ;;  %v13121_v62 = vpop.f32.mrf.mxu0 }
 0x5d5   :  { %v13123_v42 = vpop.f32.mrf.mxu0 }
 0x5d7   :  { %v13125_v19 = vpop.f32.mrf.mxu0 }
 0x5d9   :  { %v9577_v25 = vpop.f32.mrf.mxu0 }
 0x5da   :  { %10371 = vmatmul.mubr.msk.bf16.vlgmr.msra.gmra.mxu1 %vm1206_vm4, %v11179_v10 }
 0x5db   :  { %10387 = vmatpush3.bf16.msra.mxu1 %v13059_v38  ;;  %10374 = vmatprep.mubr.msk.bf16.mxu1 %vm1206_vm4, %v11181_v23  ;;  %v11184_v38 = vld [vmem:[%s14421_s6 + $0xa0] sm:$0xff]   ;;  %v9578_v50 = vpop.f32.mrf.mxu0 }
 0x5dc   :  { %10388 = vmatprep.subr.bf16.mxu1 %v11180_v27 }
 0x5dd   :  { %v13127_v57 = vpop.f32.mrf.mxu0 }
 0x5df   :  { %10389 = vmatpush3.bf16.msra.mxu1 %v11180_v27  ;;  %v13129_v7 = vpop.f32.mrf.mxu0  ;;  %v3148_v27 = vadd.f32 %v12680_v30, %v12700_v21  ;;  %v3172_v30 = vadd.f32 %v12692_v1, %v12714_v3 }
 0x5e0   :  { %10390 = vmatprep.subr.bf16.mxu1 %v11182_v41 }
 0x5e1   :  { %v13131_v9 = vpop.f32.mrf.mxu0 }
 0x5e2   :  { %10375 = vmatmul.mubr.msk.bf16.gmra.mxu1 %vm1206_vm4, %v11183_v40  ;;  %v3159_v40 = vadd.f32 %v12684_v28, %v12706_v12  ;;  %v3164_v28 = vadd.f32 %v12704_v18, %v12718_v51  ;;  %v3188_v18 = vadd.f32 %v12716_v58, %v12738_v63 }
 0x5e3   :  { %10391 = vmatpush3.bf16.msra.mxu1 %v11182_v41  ;;  %10378 = vmatprep.mubr.msk.bf16.mxu1 %vm1206_vm4, %v11185_v14  ;;  %v13139_v49 = vpop.f32.mrf.mxu0 }
 0x5e4   :  { %10392 = vmatprep.subr.bf16.mxu1 %v11184_v38 }
 0x5e5   :  { %v13147_v10 = vpop.f32.mrf.mxu0 }
 0x5e7   :  { %10393 = vmatpush3.bf16.msra.mxu1 %v11184_v38  ;;  %v13149_v26 = vpop.f32.mrf.mxu0 }
 0x5e8   :  { %10410 = vmatprep.subr.bf16.mxu1 %v12053_v47 }
 0x5e9   :  { %v9589_v16 = vpop.f32.mrf.mxu0 }
 0x5ea   :  { %10379 = vmatmul.mubr.msk.bf16.gmra.mxu1 %vm1206_vm4, %v11186_v6 }
 0x5eb   :  { %10382 = vmatprep.mubr.msk.bf16.mxu1 %vm1206_vm4, %v11187_v48  ;;  %v9590_v22 = vpop.f32.mrf.mxu0 }
 0x5ed   :  { %v13165_v48 = vpop.f32.mrf.mxu0 }
 0x5f2   :  { %10383 = vmatmul.mubr.msk.bf16.gmra.mxu1 %vm1206_vm4, %v11188_v45  ;;  %v13167_v45 = vpop.f32.mrf.mxu0 }
 0x5f4   :  { %v13169_v39 = vpop.f32.mrf.mxu0 }
 0x662   :  { %v10352_v11 = vpop.f32.mrf.mxu1 }
 0x663   :  { %v13137_v35 = vadd.f32 %v10352_v11, %v3140_v13  ;;  %v13179_v13 = vpop.f32.mrf.mxu0 }
 0x664   :  { %v4342_v34 = vpop.f32.mrf.mxu1 }
 0x665   :  { %v13143_v37 = vadd.f32 %v4342_v34, %v3132_v61  ;;  %v3175_v61 = vadd.f32 %v12708_v52, %v12730_v17 }
 0x666   :  { %v10353_v55 = vpop.f32.mrf.mxu1 }
 0x667   :  { %v13145_v15 = vadd.f32 %v10353_v55, %v3143_v56 }
 0x668   :  { %v13151_v23 = vpop.f32.mrf.mxu1 }
 0x669   :  { %14463 = vst [vmem:[#allocation35_spill] sm:$0xff] %v13151_v23 }
 0x672   :  { %v10356_v46 = vpop.f32.mrf.mxu1 }
 0x673   :  { %v13157_v0 = vadd.f32 %v10356_v46, %v3156_v60  ;;  %v13187_v60 = vpop.f32.mrf.mxu0 }
 0x674   :  { %v4358_v41 = vpop.f32.mrf.mxu1 }
 0x675   :  { %v13161_v14 = vadd.f32 %v4358_v41, %v3148_v27  ;;  %v13189_v1 = vpop.f32.mrf.mxu0  ;;  %v14466_v27 = vld [vmem:[#allocation7_spill] sm:$0xff] }
 0x676   :  { %v10357_v38 = vpop.f32.mrf.mxu1  ;;  %v3180_v41 = vadd.f32 %v14466_v27, %v12740_v20  ;;  %v9570_v27 = vadd.f32 %v13117_v4, %v13115_v24  ;;  %v9591_v24 = vadd.f32 %v9590_v22, %v9589_v16  ;;  %v11190_v16 = vld [vmem:[%s14421_s6 + $0xd8] sm:$0xff]  }
 0x677   :  { %v13163_v6 = vadd.f32 %v10357_v38, %v3159_v40  ;;  %v9601_v3 = vpop.f32.mrf.mxu0  ;;  %v14467_v38 = vld [vmem:[#allocation11_spill] sm:$0xff] }
 0x678   :  { %v13171_v54 = vpop.f32.mrf.mxu1 }
 0x679   :  { %14464 = vst [vmem:[#allocation36_spill] sm:$0xff] %v13171_v54  ;;  %v9602_v17 = vpop.f32.mrf.mxu0 }
 0x682   :  { %v10360_v21 = vpop.f32.mrf.mxu1 }
 0x683   :  { %v13177_v12 = vadd.f32 %v10360_v21, %v3172_v30  ;;  %v14468_v30 = vld [vmem:[#allocation8_spill] sm:$0xff] }
 0x684   :  { %v4374_v11 = vpop.f32.mrf.mxu1  ;;  %v3191_v21 = vadd.f32 %v14468_v30, %v14467_v38  ;;  %v9576_v38 = vadd.f32 %v13125_v19, %v13123_v42  ;;  %v9588_v19 = vadd.f32 %v13149_v26, %v13147_v10  ;;  %v9603_v10 = vadd.f32 %v9602_v17, %v9601_v3 }
 0x685   :  { %v13183_v34 = vadd.f32 %v4374_v11, %v3164_v28 }
 0x686   :  { %v10361_v56 = vpop.f32.mrf.mxu1 }
 0x687   :  { %v13185_v55 = vadd.f32 %v10361_v56, %v3175_v61  ;;  %v13205_v56 = vpop.f32.mrf.mxu0 }
 0x688   :  { %v13191_v46 = vpop.f32.mrf.mxu1 }
 0x689   :  { %14465 = vst [vmem:[#allocation37_spill] sm:$0xff] %v13191_v46  ;;  %v13209_v63 = vpop.f32.mrf.mxu0 }
 0x692   :  { %v10364_v51 = vpop.f32.mrf.mxu1 }
 0x693   :  { %v13197_v52 = vadd.f32 %v10364_v51, %v3188_v18  ;;  %v9579_v18 = vadd.f32 %v9578_v50, %v9577_v25 }
 0x694   :  { %v4390_v40 = vpop.f32.mrf.mxu1 }
 0x695   :  { %v13201_v28 = vadd.f32 %v4390_v40, %v3180_v41  ;;  %v9573_v41 = vadd.f32 %v13121_v62, %v13119_v8  ;;  %v9607_v40 = vpop.f32.mrf.mxu0  ;;  %v9582_v8 = vadd.f32 %v13129_v7, %v13127_v57  ;;  %v9585_v62 = vadd.f32 %v13139_v49, %v13131_v9 }
 0x696   :  { %v10365_v11 = vpop.f32.mrf.mxu1 }
 0x697   :  { %14469 = vst [vmem:[#allocation7_spill] sm:$0xff] %v13201_v28  ;;  %v13203_v61 = vadd.f32 %v10365_v11, %v3191_v21  ;;  %v9608_v28 = vpop.f32.mrf.mxu0 }
 0x698   :  { %v13207_v46 = vpop.f32.mrf.mxu1 }
 0x699   :  { %14470 = vst [vmem:[#allocation11_spill] sm:$0xff] %v13203_v61  ;;  %14471 = vst [vmem:[#allocation8_spill] sm:$0xff] %v13207_v46  ;;  %v9610_v42 = vpop.f32.mrf.mxu0 }
 0x69a   :  { %v10372_v58 = vpop.f32.mrf.mxu1 }
 0x69b   :  { %v4738_v54 = vadd.f32 %v10372_v58, %v9576_v38  ;;  %v9611_v9 = vpop.f32.mrf.mxu0 }
 0x69c   :  { %v4729_v20 = vpop.f32.mrf.mxu1 }
 0x69d   :  { %v4730_v11 = vadd.f32 %v9570_v27, %v4729_v20  ;;  %v9600_v27 = vadd.f32 %v13189_v1, %v13187_v60  ;;  %v9609_v60 = vadd.f32 %v9608_v28, %v9607_v40  ;;  %v11191_v28 = vld [vmem:[%s14420_s5 + $0x4a0] ss:$12 sps:$4 sm:$0xff]  }
 0x69e   :  { %v10373_v51 = vpop.f32.mrf.mxu1  ;;  %v11194_v40 = vld [vmem:[%s14421_s6 + $0xc8] sm:$0xff]  }
 0x69f   :  { %v4741_v30 = vadd.f32 %v10373_v51, %v9579_v18  ;;  %v9594_v18 = vadd.f32 %v13167_v45, %v13165_v48  ;;  %v9613_v51 = vpop.f32.mrf.mxu0  ;;  %v9612_v48 = vadd.f32 %v9611_v9, %v9610_v42  ;;  %v11195_v42 = vld [vmem:[%s14420_s5 + $0x4d0] ss:$12 sps:$4 sm:$0xff]  }
 0x6a0   :  { %v4732_v21 = vpop.f32.mrf.mxu1  ;;  %v11203_v9 = vld [vmem:[%s14420_s5 + $0x55c] ss:$12 sps:$4 sm:$0xff]  }
 0x6a1   :  { %v4733_v46 = vadd.f32 %v9573_v41, %v4732_v21  ;;  %v4793_v25 = vpack.c.bf16 %v4741_v30, %v4738_v54  ;;  %v9614_v17 = vpop.f32.mrf.mxu0  ;;  %5736 = vmatprep.mubr.bf16.mxu0 %v11203_v9 }
 0x6a2   :  { %v10376_v23 = vpop.f32.mrf.mxu1 }
 0x6a3   :  { %v4792_v61 = vpack.c.bf16 %v4733_v46, %v4730_v11  ;;  %v4754_v57 = vadd.f32 %v10376_v23, %v9588_v19  ;;  %v9597_v23 = vadd.f32 %v13179_v13, %v13169_v39  ;;  %v9615_v39 = vadd.f32 %v9614_v17, %v9613_v51  ;;  %v11226_v17 = vld [vmem:[%s14420_s5 + $0x5d4] ss:$12 sps:$4 sm:$0xff]  }
 0x6a4   :  { %v4745_v50 = vpop.f32.mrf.mxu1  ;;  %v9606_v13 = vadd.f32 %v13209_v63, %v13205_v56  ;;  %v11193_v56 = vld [vmem:[%s14420_s5 + $0x4b8] ss:$12 sps:$4 sm:$0xff]   ;;  %v11192_v63 = vld [vmem:[%s14421_s6 + $0xd0] sm:$0xff]  }
 0x6a5   :  { %10394 = vmatprep.mubr.msk.bf16.mxu1 %vm2927_vm12, %v4792_v61  ;;  %v4746_v22 = vadd.f32 %v9582_v8, %v4745_v50 }
 0x6a6   :  { %v10377_v4 = vpop.f32.mrf.mxu1  ;;  %10395 = vmatmul.mubr.msk.bf16.vlgmr.msra.gmra.mxu1 %vm2927_vm12, %v4793_v25 }
 0x6a7   :  { %10411 = vmatpush3.bf16.msra.mxu1 %v12053_v47  ;;  %v4757_v54 = vadd.f32 %v10377_v4, %v9591_v24 }
 0x6a8   :  { %10412 = vmatprep.subr.bf16.mxu1 %v12051_v31  ;;  %v4748_v46 = vpop.f32.mrf.mxu1 }
 0x6a9   :  { %v4749_v61 = vadd.f32 %v9585_v62, %v4748_v46  ;;  %v4795_v49 = vpack.c.bf16 %v4757_v54, %v4754_v57  ;;  %v11189_v46 = vld [vmem:[%s14420_s5 + $0x488] ss:$12 sps:$4 sm:$0xff]   ;;  %v11198_v57 = vld [vmem:[%s14420_s5 + $0x500] ss:$12 sps:$4 sm:$0xff]  }
 0x6aa   :  { %v10380_v7 = vpop.f32.mrf.mxu1 }
 0x6ab   :  { %v4794_v58 = vpack.c.bf16 %v4749_v61, %v4746_v22  ;;  %10413 = vmatpush3.bf16.msra.mxu1 %v12051_v31  ;;  %v4770_v11 = vadd.f32 %v10380_v7, %v9600_v27  ;;  %v11197_v61 = vld [vmem:[%s14420_s5 + $0x4e8] ss:$12 sps:$4 sm:$0xff]   ;;  %v11199_v7 = vld [vmem:[%s14420_s5 + $0x518] ss:$12 sps:$4 sm:$0xff]   ;;  %v11210_v27 = vld [vmem:[%s14420_s5 + $0x5a0] ss:$12 sps:$4 sm:$0xff]  }
 0x6ac   :  { %v4761_v20 = vpop.f32.mrf.mxu1  ;;  %10430 = vmatprep.subr.bf16.mxu1 %v11190_v16 }
 0x6ad   :  { %10398 = vmatprep.mubr.msk.bf16.mxu1 %vm2927_vm12, %v4794_v58  ;;  %v4762_v30 = vadd.f32 %v9594_v18, %v4761_v20  ;;  %v11200_v58 = vld [vmem:[%s14420_s5 + $0x530] ss:$12 sps:$4 sm:$0xff]   ;;  %v11206_v20 = vld [vmem:[%s14420_s5 + $0x574] ss:$12 sps:$4 sm:$0xff]   ;;  %v13302_v18 = vpop.f32.mrf.mxu0 }
 0x6ae   :  { %v10381_v26 = vpop.f32.mrf.mxu1  ;;  %10399 = vmatmul.mubr.msk.bf16.gmra.mxu1 %vm2927_vm12, %v4795_v49  ;;  %v11201_v49 = vld [vmem:[%s14420_s5 + $0x558] ss:$12 sps:$4 sm:$0xff]  }
 0x6af   :  { %v4773_v41 = vadd.f32 %v10381_v26, %v9603_v10  ;;  %5737 = vmatmul.mubr.bf16.gmra.mxu0 %v11201_v49  ;;  %v11204_v10 = vld [vmem:[%s14420_s5 + $0x570] ss:$12 sps:$4 sm:$0xff]   ;;  %v11209_v26 = vld [vmem:[%s14420_s5 + $0x58c] ss:$12 sps:$4 sm:$0xff]   ;;  %v13307_v51 = vpop.f32.mrf.mxu0 }
 0x6b0   :  { %v4764_v38 = vpop.f32.mrf.mxu1  ;;  %5744 = vmatprep.mubr.bf16.mxu0 %v11206_v20  ;;  %v14473_v20 = vld [vmem:[#allocation14_spill] sm:$0xff] }
 0x6b1   :  { %v4765_v21 = vadd.f32 %v9597_v23, %v4764_v38  ;;  %v4797_v50 = vpack.c.bf16 %v4773_v41, %v4770_v11  ;;  %v11207_v23 = vld [vmem:[%s14420_s5 + $0x588] ss:$12 sps:$4 sm:$0xff]   ;;  %v11212_v41 = vld [vmem:[%s14420_s5 + $0x5a4] ss:$12 sps:$4 sm:$0xff]   ;;  %v13315_v38 = vpop.f32.mrf.mxu0 }
 0x6b2   :  { %v10384_v25 = vpop.f32.mrf.mxu1 }
 0x6b3   :  { %v4796_v3 = vpack.c.bf16 %v4765_v21, %v4762_v30  ;;  %v4786_v19 = vadd.f32 %v10384_v25, %v9612_v48  ;;  %v13317_v30 = vpop.f32.mrf.mxu0  ;;  %v11219_v21 = vld [vmem:[%s14420_s5 + $0x5bc] ss:$12 sps:$4 sm:$0xff]   ;;  %v11217_v25 = vld [vmem:[%s14420_s5 + $0x5b8] ss:$12 sps:$4 sm:$0xff]  }
 0x6b4   :  { %v4777_v24 = vpop.f32.mrf.mxu1 }
 0x6b5   :  { %10402 = vmatprep.mubr.msk.bf16.mxu1 %vm2927_vm12, %v4796_v3  ;;  %v4778_v8 = vadd.f32 %v9606_v13, %v4777_v24  ;;  %v13322_v11 = vpop.f32.mrf.mxu0  ;;  %v11224_v24 = vld [vmem:[%s14420_s5 + $0x5d0] ss:$12 sps:$4 sm:$0xff]  }
 0x6b6   :  { %v10385_v45 = vpop.f32.mrf.mxu1  ;;  %10403 = vmatmul.mubr.msk.bf16.gmra.mxu1 %vm2927_vm12, %v4797_v50 }
 0x6b7   :  { %v4789_v1 = vadd.f32 %v10385_v45, %v9615_v39  ;;  %5745 = vmatmul.mubr.bf16.gmra.mxu0 %v11204_v10  ;;  %v13327_v3 = vpop.f32.mrf.mxu0  ;;  %v11229_v45 = vld [vmem:[%s14420_s5 + $0x5e8] ss:$12 sps:$4 sm:$0xff]   ;;  %v11231_v39 = vld [vmem:[%s14420_s5 + $0x5ec] ss:$12 sps:$4 sm:$0xff]  }
 0x6b8   :  { %v4780_v4 = vpop.f32.mrf.mxu1  ;;  %5752 = vmatprep.mubr.bf16.mxu0 %v11209_v26 }
 0x6b9   :  { %v4781_v62 = vadd.f32 %v9609_v60, %v4780_v4  ;;  %v4799_v22 = vpack.c.bf16 %v4789_v1, %v4786_v19  ;;  %v13332_v50 = vpop.f32.mrf.mxu0 }
 0x6bb   :  { %v4798_v54 = vpack.c.bf16 %v4781_v62, %v4778_v8  ;;  %v13337_v48 = vpop.f32.mrf.mxu0 }
 0x6bd   :  { %10406 = vmatprep.mubr.msk.bf16.mxu1 %vm2927_vm12, %v4798_v54  ;;  %v13345_v13 = vpop.f32.mrf.mxu0 }
 0x6be   :  { %10407 = vmatmul.mubr.msk.bf16.gmra.mxu1 %vm2927_vm12, %v4799_v22  ;;  %v3818_v22 = vadd.f32 %v12909_v36, %v12944_v33 }
 0x6bf   :  { %10414 = vmatprep.mubr.msk.bf16.mxu1 %vm1206_vm4, %v11189_v46  ;;  %5753 = vmatmul.mubr.bf16.gmra.mxu0 %v11207_v23  ;;  %v13347_v60 = vpop.f32.mrf.mxu0 }
 0x6c0   :  { %5760 = vmatprep.mubr.bf16.mxu0 %v11212_v41 }
 0x6c1   :  { %v13349_v1 = vpop.f32.mrf.mxu0 }
 0x6c3   :  { %v13351_v4 = vpop.f32.mrf.mxu0 }
 0x6c5   :  { %v13353_v8 = vpop.f32.mrf.mxu0 }
 0x6c6   :  { %10415 = vmatmul.mubr.msk.bf16.vlgmr.msra.gmra.mxu1 %vm1206_vm4, %v11191_v28 }
 0x6c7   :  { %10431 = vmatpush3.bf16.msra.mxu1 %v11190_v16  ;;  %10418 = vmatprep.mubr.msk.bf16.mxu1 %vm1206_vm4, %v11193_v56  ;;  %v11196_v16 = vld [vmem:[%s14421_s6 + $0xc0] sm:$0xff]   ;;  %v13355_v62 = vpop.f32.mrf.mxu0  ;;  %v3810_v56 = vadd.f32 %v12917_v44, %v12950_v53  ;;  %v3834_v44 = vadd.f32 %v12935_v5, %v12973_v59  ;;  %v3826_v53 = vadd.f32 %v12947_v2, %v12985_v43  ;;  %v14475_v59 = vld [vmem:[#allocation23_spill] sm:$0xff] }
 0x6c8   :  { %10432 = vmatprep.subr.bf16.mxu1 %v11192_v63  ;;  %5761 = vmatmul.mubr.bf16.gmra.mxu0 %v11210_v27 }
 0x6c9   :  { %5768 = vmatprep.mubr.bf16.mxu0 %v11219_v21  ;;  %v13357_v19 = vpop.f32.mrf.mxu0  ;;  %v14476_v21 = vld [vmem:[#allocation17_spill] sm:$0xff] }
 0x6ca   :  { %v3850_v2 = vadd.f32 %v14476_v21, %v14475_v59  ;;  %v14485_v59 = vld [vmem:[#allocation26_spill] sm:$0xff] }
 0x6cb   :  { %10433 = vmatpush3.bf16.msra.mxu1 %v11192_v63  ;;  %v13359_v54 = vpop.f32.mrf.mxu0 }
 0x6cc   :  { %10434 = vmatprep.subr.bf16.mxu1 %v11194_v40 }
 0x6cd   :  { %v13361_v46 = vpop.f32.mrf.mxu0 }
 0x6ce   :  { %10419 = vmatmul.mubr.msk.bf16.gmra.mxu1 %vm1206_vm4, %v11195_v42 }
 0x6cf   :  { %10435 = vmatpush3.bf16.msra.mxu1 %v11194_v40  ;;  %10422 = vmatprep.mubr.msk.bf16.mxu1 %vm1206_vm4, %v11197_v61  ;;  %v13369_v40 = vpop.f32.mrf.mxu0  ;;  %v3821_v61 = vadd.f32 %v12921_v29, %v12962_v32  ;;  %v14472_v32 = vld [vmem:[#allocation20_spill] sm:$0xff] }
 0x6d0   :  { %10436 = vmatprep.subr.bf16.mxu1 %v11196_v16  ;;  %5769 = vmatmul.mubr.bf16.gmra.mxu0 %v11217_v25  ;;  %v3837_v10 = vadd.f32 %v14473_v20, %v14472_v32  ;;  %v14477_v25 = vld [vmem:[#allocation25_spill] sm:$0xff]  ;;  %v14483_v32 = vld [vmem:[#allocation24_spill] sm:$0xff] }
 0x6d1   :  { %5776 = vmatprep.mubr.bf16.mxu0 %v11226_v17  ;;  %v14478_v17 = vld [vmem:[#allocation18_spill] sm:$0xff] }
 0x6d3   :  { %10437 = vmatpush3.bf16.msra.mxu1 %v11196_v16 }
 0x6d4   :  { %10454 = vmatprep.subr.bf16.mxu1 %v12053_v47 }
 0x6d6   :  { %10423 = vmatmul.mubr.msk.bf16.gmra.mxu1 %vm1206_vm4, %v11198_v57 }
 0x6d7   :  { %10426 = vmatprep.mubr.msk.bf16.mxu1 %vm1206_vm4, %v11199_v7 }
 0x6d8   :  { %5777 = vmatmul.mubr.bf16.gmra.mxu0 %v11224_v24  ;;  %v3842_v24 = vadd.f32 %v14478_v17, %v14477_v25  ;;  %v14487_v17 = vld [vmem:[#allocation33_spill] sm:$0xff] }
 0x6d9   :  { %5784 = vmatprep.mubr.bf16.mxu0 %v11231_v39 }
 0x6de   :  { %10427 = vmatmul.mubr.msk.bf16.gmra.mxu1 %vm1206_vm4, %v11200_v58  ;;  %v13377_v58 = vpop.f32.mrf.mxu0 }
 0x6e0   :  { %5785 = vmatmul.mubr.bf16.gmra.mxu0 %v11229_v45  ;;  %v13387_v49 = vpop.f32.mrf.mxu0 }
 0x6e2   :  { %v13395_v41 = vpop.f32.mrf.mxu0 }
 0x6e4   :  { %v13405_v39 = vpop.f32.mrf.mxu0 }
 0x766   :  { %v10396_v28 = vpop.f32.mrf.mxu1 }
 0x767   :  { %v13367_v63 = vadd.f32 %v10396_v28, %v3818_v22  ;;  %v14479_v28 = vld [vmem:[#allocation27_spill] sm:$0xff] }
 0x768   :  { %v4891_v42 = vpop.f32.mrf.mxu1 }
 0x769   :  { %v13373_v16 = vadd.f32 %v4891_v42, %v3810_v56  ;;  %v14480_v56 = vld [vmem:[#allocation19_spill] sm:$0xff] }
 0x76a   :  { %v10397_v57 = vpop.f32.mrf.mxu1  ;;  %v3853_v42 = vadd.f32 %v14480_v56, %v14479_v28 }
 0x76b   :  { %v13375_v7 = vadd.f32 %v10397_v57, %v3821_v61 }
 0x76c   :  { %v13379_v36 = vpop.f32.mrf.mxu1 }
 0x76e   :  { %v10400_v33 = vpop.f32.mrf.mxu1 }
 0x76f   :  { %v13385_v9 = vadd.f32 %v10400_v33, %v3834_v44  ;;  %v9687_v33 = vpop.f32.mrf.mxu0 }
 0x770   :  { %v4907_v29 = vpop.f32.mrf.mxu1 }
 0x771   :  { %v13391_v26 = vadd.f32 %v4907_v29, %v3826_v53  ;;  %v14482_v29 = vld [vmem:[#allocation31_spill] sm:$0xff] }
 0x772   :  { %v10401_v23 = vpop.f32.mrf.mxu1  ;;  %v3866_v20 = vadd.f32 %v14483_v32, %v14482_v29 }
 0x773   :  { %v13393_v27 = vadd.f32 %v10401_v23, %v3837_v10  ;;  %v14484_v23 = vld [vmem:[#allocation32_spill] sm:$0xff] }
 0x774   :  { %v13397_v5 = vpop.f32.mrf.mxu1  ;;  %v3858_v21 = vadd.f32 %v14485_v59, %v14484_v23  ;;  %v9656_v59 = vadd.f32 %v13307_v51, %v13302_v18  ;;  %v9677_v18 = vadd.f32 %v13359_v54, %v13357_v19  ;;  %v11214_v19 = vld [vmem:[%s14421_s6 + $0xf8] sm:$0xff]  }
 0x775   :  { %14474 = vst [vmem:[#allocation20_spill] sm:$0xff] %v13397_v5 }
 0x776   :  { %v10404_v43 = vpop.f32.mrf.mxu1 }
 0x777   :  { %v13403_v45 = vadd.f32 %v10404_v43, %v3850_v2  ;;  %v9688_v43 = vpop.f32.mrf.mxu0 }
 0x778   :  { %v4923_v22 = vpop.f32.mrf.mxu1 }
 0x779   :  { %v13409_v61 = vadd.f32 %v4923_v22, %v3842_v24  ;;  %v14488_v24 = vld [vmem:[#allocation28_spill] sm:$0xff] }
 0x77a   :  { %v10405_v57 = vpop.f32.mrf.mxu1  ;;  %v3869_v22 = vadd.f32 %v14488_v24, %v14487_v17  ;;  %v9662_v17 = vadd.f32 %v13327_v3, %v13322_v11  ;;  %v9674_v3 = vadd.f32 %v13355_v62, %v13353_v8  ;;  %v9689_v8 = vadd.f32 %v9688_v43, %v9687_v33 }
 0x77b   :  { %v13411_v44 = vadd.f32 %v10405_v57, %v3853_v42  ;;  %v13427_v57 = vpop.f32.mrf.mxu0 }
 0x77c   :  { %v13413_v53 = vpop.f32.mrf.mxu1 }
 0x77d   :  { %14481 = vst [vmem:[#allocation14_spill] sm:$0xff] %v13413_v53  ;;  %v13431_v32 = vpop.f32.mrf.mxu0 }
 0x77e   :  { %v10408_v10 = vpop.f32.mrf.mxu1 }
 0x77f   :  { %v13419_v2 = vadd.f32 %v10408_v10, %v3866_v20  ;;  %v9665_v20 = vadd.f32 %v13337_v48, %v13332_v50 }
 0x780   :  { %v4939_v25 = vpop.f32.mrf.mxu1 }
 0x781   :  { %14486 = vst [vmem:[#allocation23_spill] sm:$0xff] %v13419_v2  ;;  %v13423_v28 = vadd.f32 %v4939_v25, %v3858_v21  ;;  %v9659_v21 = vadd.f32 %v13317_v30, %v13315_v38  ;;  %v9693_v25 = vpop.f32.mrf.mxu0  ;;  %v9668_v38 = vadd.f32 %v13347_v60, %v13345_v13  ;;  %v9671_v30 = vadd.f32 %v13351_v4, %v13349_v1 }
 0x782   :  { %v10409_v56 = vpop.f32.mrf.mxu1 }
 0x783   :  { %14489 = vst [vmem:[#allocation17_spill] sm:$0xff] %v13423_v28  ;;  %v13425_v42 = vadd.f32 %v10409_v56, %v3869_v22  ;;  %v9694_v2 = vpop.f32.mrf.mxu0 }
 0x784   :  { %v13429_v53 = vpop.f32.mrf.mxu1 }
 0x785   :  { %14490 = vst [vmem:[#allocation25_spill] sm:$0xff] %v13425_v42  ;;  %14491 = vst [vmem:[#allocation18_spill] sm:$0xff] %v13429_v53  ;;  %v9696_v11 = vpop.f32.mrf.mxu0 }
 0x786   :  { %v10416_v29 = vpop.f32.mrf.mxu1 }
 0x787   :  { %v5287_v5 = vadd.f32 %v10416_v29, %v9662_v17  ;;  %v9697_v1 = vpop.f32.mrf.mxu0 }
 0x788   :  { %v5278_v23 = vpop.f32.mrf.mxu1 }
 0x789   :  { %v5279_v56 = vadd.f32 %v9656_v59, %v5278_v23  ;;  %v9686_v59 = vadd.f32 %v13405_v39, %v13395_v41  ;;  %v9695_v41 = vadd.f32 %v9694_v2, %v9693_v25  ;;  %v11215_v2 = vld [vmem:[%s14420_s5 + $0x560] ss:$12 sps:$4 sm:$0xff]  }
 0x78a   :  { %v10417_v10 = vpop.f32.mrf.mxu1  ;;  %v11221_v25 = vld [vmem:[%s14421_s6 + $0xe8] sm:$0xff]  }
 0x78b   :  { %v5290_v24 = vadd.f32 %v10417_v10, %v9665_v20  ;;  %v9680_v20 = vadd.f32 %v13369_v40, %v13361_v46  ;;  %v9699_v10 = vpop.f32.mrf.mxu0  ;;  %v9698_v46 = vadd.f32 %v9697_v1, %v9696_v11  ;;  %v11222_v11 = vld [vmem:[%s14420_s5 + $0x590] ss:$12 sps:$4 sm:$0xff]  }
 0x78c   :  { %v5281_v22 = vpop.f32.mrf.mxu1  ;;  %v11236_v1 = vld [vmem:[%s14420_s5 + $0x604] ss:$12 sps:$4 sm:$0xff]  }
 0x78d   :  { %v5282_v53 = vadd.f32 %v9659_v21, %v5281_v22  ;;  %v5342_v50 = vpack.c.bf16 %v5290_v24, %v5287_v5  ;;  %v9700_v43 = vpop.f32.mrf.mxu0  ;;  %6277 = vmatprep.mubr.bf16.mxu0 %v11236_v1 }
 0x78e   :  { %v10420_v42 = vpop.f32.mrf.mxu1 }
 0x78f   :  { %v5341_v28 = vpack.c.bf16 %v5282_v53, %v5279_v56  ;;  %v5303_v13 = vadd.f32 %v10420_v42, %v9674_v3  ;;  %v9683_v42 = vadd.f32 %v13387_v49, %v13377_v58  ;;  %v9701_v58 = vadd.f32 %v9700_v43, %v9699_v10  ;;  %v13534_v10 = vpop.f32.mrf.mxu0 }
 0x790   :  { %v5294_v48 = vpop.f32.mrf.mxu1  ;;  %v9692_v49 = vadd.f32 %v13431_v32, %v13427_v57  ;;  %v11220_v57 = vld [vmem:[%s14420_s5 + $0x578] ss:$12 sps:$4 sm:$0xff]   ;;  %v11216_v32 = vld [vmem:[%s14421_s6 + $0xf0] sm:$0xff]  }
 0x791   :  { %10438 = vmatprep.mubr.msk.bf16.mxu1 %vm2927_vm12, %v5341_v28  ;;  %v5295_v54 = vadd.f32 %v9668_v38, %v5294_v48 }
 0x792   :  { %v10421_v51 = vpop.f32.mrf.mxu1  ;;  %10439 = vmatmul.mubr.msk.bf16.vlgmr.msra.gmra.mxu1 %vm2927_vm12, %v5342_v50 }
 0x793   :  { %10455 = vmatpush3.bf16.msra.mxu1 %v12053_v47  ;;  %v5306_v5 = vadd.f32 %v10421_v51, %v9677_v18 }
 0x794   :  { %10456 = vmatprep.subr.bf16.mxu1 %v12051_v31  ;;  %v5297_v53 = vpop.f32.mrf.mxu1 }
 0x795   :  { %v5298_v28 = vadd.f32 %v9671_v30, %v5297_v53  ;;  %v5344_v4 = vpack.c.bf16 %v5306_v5, %v5303_v13  ;;  %v11213_v53 = vld [vmem:[%s14420_s5 + $0x548] ss:$12 sps:$4 sm:$0xff]   ;;  %v11228_v13 = vld [vmem:[%s14420_s5 + $0x5c0] ss:$12 sps:$4 sm:$0xff]  }
 0x796   :  { %v10424_v60 = vpop.f32.mrf.mxu1 }
 0x797   :  { %v5343_v29 = vpack.c.bf16 %v5298_v28, %v5295_v54  ;;  %10457 = vmatpush3.bf16.msra.mxu1 %v12051_v31  ;;  %v5319_v56 = vadd.f32 %v10424_v60, %v9686_v59  ;;  %v11227_v28 = vld [vmem:[%s14420_s5 + $0x5a8] ss:$12 sps:$4 sm:$0xff]   ;;  %v11232_v60 = vld [vmem:[%s14420_s5 + $0x5d8] ss:$12 sps:$4 sm:$0xff]  }
 0x798   :  { %v5310_v23 = vpop.f32.mrf.mxu1  ;;  %10474 = vmatprep.subr.bf16.mxu1 %v11214_v19  ;;  %v11243_v59 = vld [vmem:[%s14420_s5 + $0x648] ss:$12 sps:$4 sm:$0xff]  }
 0x799   :  { %10442 = vmatprep.mubr.msk.bf16.mxu1 %vm2927_vm12, %v5343_v29  ;;  %v5311_v24 = vadd.f32 %v9680_v20, %v5310_v23  ;;  %v11233_v29 = vld [vmem:[%s14420_s5 + $0x5f0] ss:$12 sps:$4 sm:$0xff]  }
 0x79a   :  { %v10425_v62 = vpop.f32.mrf.mxu1  ;;  %10443 = vmatmul.mubr.msk.bf16.gmra.mxu1 %vm2927_vm12, %v5344_v4  ;;  %v11234_v4 = vld [vmem:[%s14420_s5 + $0x600] ss:$12 sps:$4 sm:$0xff]   ;;  %v11239_v23 = vld [vmem:[%s14420_s5 + $0x61c] ss:$12 sps:$4 sm:$0xff]  }
 0x79b   :  { %v5322_v21 = vadd.f32 %v10425_v62, %v9689_v8  ;;  %6278 = vmatmul.mubr.bf16.vlgmr.msra.gmra.mxu0 %v11234_v4  ;;  %v11237_v8 = vld [vmem:[%s14420_s5 + $0x618] ss:$12 sps:$4 sm:$0xff]   ;;  %v11242_v62 = vld [vmem:[%s14420_s5 + $0x634] ss:$12 sps:$4 sm:$0xff]   ;;  %v11240_v20 = vld [vmem:[%s14420_s5 + $0x630] ss:$12 sps:$4 sm:$0xff]  }
 0x79c   :  { %v5313_v17 = vpop.f32.mrf.mxu1  ;;  %6285 = vmatprep.mubr.bf16.mxu0 %v11239_v23 }
 0x79d   :  { %v5314_v22 = vadd.f32 %v9683_v42, %v5313_v17  ;;  %v5346_v48 = vpack.c.bf16 %v5322_v21, %v5319_v56  ;;  %v11245_v42 = vld [vmem:[%s14420_s5 + $0x64c] ss:$12 sps:$4 sm:$0xff]   ;;  %v13539_v21 = vpop.f32.mrf.mxu0 }
 0x79e   :  { %v10428_v50 = vpop.f32.mrf.mxu1  ;;  %v11246_v17 = vld [vmem:[%s14420_s5 + $0x660] ss:$12 sps:$4 sm:$0xff]  }
 0x79f   :  { %v5345_v33 = vpack.c.bf16 %v5314_v22, %v5311_v24  ;;  %v5335_v3 = vadd.f32 %v10428_v50, %v9698_v46  ;;  %v11248_v24 = vld [vmem:[%s14420_s5 + $0x664] ss:$12 sps:$4 sm:$0xff]   ;;  %v13547_v22 = vpop.f32.mrf.mxu0  ;;  %v11258_v46 = vld [vmem:[%s14420_s5 + $0x694] ss:$12 sps:$4 sm:$0xff]  }
 0x7a0   :  { %v5326_v18 = vpop.f32.mrf.mxu1  ;;  %v11251_v50 = vld [vmem:[%s14420_s5 + $0x678] ss:$12 sps:$4 sm:$0xff]  }
 0x7a1   :  { %10446 = vmatprep.mubr.msk.bf16.mxu1 %vm2927_vm12, %v5345_v33  ;;  %v5327_v38 = vadd.f32 %v9692_v49, %v5326_v18  ;;  %v13549_v56 = vpop.f32.mrf.mxu0  ;;  %v11253_v33 = vld [vmem:[%s14420_s5 + $0x67c] ss:$12 sps:$4 sm:$0xff]  }
 0x7a2   :  { %v10429_v40 = vpop.f32.mrf.mxu1  ;;  %10447 = vmatmul.mubr.msk.bf16.gmra.mxu1 %vm2927_vm12, %v5346_v48  ;;  %v11256_v18 = vld [vmem:[%s14420_s5 + $0x690] ss:$12 sps:$4 sm:$0xff]   ;;  %v11261_v49 = vld [vmem:[%s14420_s5 + $0x6a8] ss:$12 sps:$4 sm:$0xff]  }
 0x7a3   :  { %v5338_v39 = vadd.f32 %v10429_v40, %v9701_v58  ;;  %6286 = vmatmul.mubr.bf16.gmra.mxu0 %v11237_v8  ;;  %v13557_v43 = vpop.f32.mrf.mxu0 }
 0x7a4   :  { %v5329_v51 = vpop.f32.mrf.mxu1  ;;  %6293 = vmatprep.mubr.bf16.mxu0 %v11242_v62 }
 0x7a5   :  { %v5330_v30 = vadd.f32 %v9695_v41, %v5329_v51  ;;  %v5348_v54 = vpack.c.bf16 %v5338_v39, %v5335_v3  ;;  %v13559_v48 = vpop.f32.mrf.mxu0  ;;  %v11263_v41 = vld [vmem:[%s14420_s5 + $0x6ac] ss:$12 sps:$4 sm:$0xff]  }
 0x7a7   :  { %v5347_v5 = vpack.c.bf16 %v5330_v30, %v5327_v38  ;;  %v9749_v40 = vpop.f32.mrf.mxu0 }
 0x7a9   :  { %10450 = vmatprep.mubr.msk.bf16.mxu1 %vm2927_vm12, %v5347_v5  ;;  %v9750_v58 = vpop.f32.mrf.mxu0 }
 0x7aa   :  { %10451 = vmatmul.mubr.msk.bf16.gmra.mxu1 %vm2927_vm12, %v5348_v54 }
 0x7ab   :  { %10458 = vmatprep.mubr.msk.bf16.mxu1 %vm1206_vm4, %v11213_v53  ;;  %6294 = vmatmul.mubr.bf16.gmra.mxu0 %v11240_v20  ;;  %v13573_v39 = vpop.f32.mrf.mxu0 }
 0x7ac   :  { %6301 = vmatprep.mubr.bf16.mxu0 %v11245_v42 }
 0x7ad   :  { %v13575_v51 = vpop.f32.mrf.mxu0 }
 0x7af   :  { %v13577_v38 = vpop.f32.mrf.mxu0 }
 0x7b1   :  { %v13579_v30 = vpop.f32.mrf.mxu0 }
 0x7b2   :  { %10459 = vmatmul.mubr.msk.bf16.vlgmr.msra.gmra.mxu1 %vm1206_vm4, %v11215_v2 }
 0x7b3   :  { %10475 = vmatpush3.bf16.msra.mxu1 %v11214_v19  ;;  %10462 = vmatprep.mubr.msk.bf16.mxu1 %vm1206_vm4, %v11220_v57  ;;  %v11223_v19 = vld [vmem:[%s14421_s6 + $0xe0] sm:$0xff]   ;;  %v13581_v3 = vpop.f32.mrf.mxu0 }
 0x7b4   :  { %10476 = vmatprep.subr.bf16.mxu1 %v11216_v32  ;;  %6302 = vmatmul.mubr.bf16.gmra.mxu0 %v11243_v59 }
 0x7b5   :  { %6309 = vmatprep.mubr.bf16.mxu0 %v11248_v24  ;;  %v13583_v5 = vpop.f32.mrf.mxu0 }
 0x7b7   :  { %10477 = vmatpush3.bf16.msra.mxu1 %v11216_v32  ;;  %v9761_v53 = vpop.f32.mrf.mxu0 }
 0x7b8   :  { %10478 = vmatprep.subr.bf16.mxu1 %v11221_v25 }
 0x7b9   :  { %v9762_v54 = vpop.f32.mrf.mxu0 }
 0x7ba   :  { %10463 = vmatmul.mubr.msk.bf16.gmra.mxu1 %vm1206_vm4, %v11222_v11 }
 0x7bb   :  { %10479 = vmatpush3.bf16.msra.mxu1 %v11221_v25  ;;  %10466 = vmatprep.mubr.msk.bf16.mxu1 %vm1206_vm4, %v11227_v28  ;;  %v13585_v2 = vpop.f32.mrf.mxu0 }
 0x7bc   :  { %10480 = vmatprep.subr.bf16.mxu1 %v11223_v19  ;;  %6310 = vmatmul.mubr.bf16.gmra.mxu0 %v11246_v17 }
 0x7bd   :  { %6317 = vmatprep.mubr.bf16.mxu0 %v11253_v33  ;;  %v13590_v25 = vpop.f32.mrf.mxu0 }
 0x7bf   :  { %10481 = vmatpush3.bf16.msra.mxu1 %v11223_v19 }
 0x7c0   :  { %10498 = vmatprep.subr.bf16.mxu1 %v12053_v47 }
 0x7c2   :  { %10467 = vmatmul.mubr.msk.bf16.gmra.mxu1 %vm1206_vm4, %v11228_v13 }
 0x7c3   :  { %10470 = vmatprep.mubr.msk.bf16.mxu1 %vm1206_vm4, %v11232_v60  ;;  %v13598_v60 = vpop.f32.mrf.mxu0 }
 0x7c4   :  { %6318 = vmatmul.mubr.bf16.gmra.mxu0 %v11251_v50 }
 0x7c5   :  { %6325 = vmatprep.mubr.bf16.mxu0 %v11258_v46 }
 0x7ca   :  { %10471 = vmatmul.mubr.msk.bf16.gmra.mxu1 %vm1206_vm4, %v11233_v29 }
 0x7cc   :  { %6326 = vmatmul.mubr.bf16.gmra.mxu0 %v11256_v18 }
 0x7cd   :  { %6333 = vmatprep.mubr.bf16.mxu0 %v11263_v41  ;;  %v14495_v41 = vld [vmem:[#allocation7_spill] sm:$0xff] }
 0x7d4   :  { %6334 = vmatmul.mubr.bf16.gmra.mxu0 %v11261_v49 }
 0x852   :  { %v10440_v57 = vpop.f32.mrf.mxu1 }
 0x853   :  { %v13588_v32 = vadd.f32 %v10440_v57, %v13137_v35  ;;  %v13605_v35 = vpop.f32.mrf.mxu0 }
 0x854   :  { %v5440_v11 = vpop.f32.mrf.mxu1 }
 0x855   :  { %v13593_v28 = vadd.f32 %v5440_v11, %v13143_v37 }
 0x856   :  { %v10441_v19 = vpop.f32.mrf.mxu1 }
 0x857   :  { %v13596_v13 = vadd.f32 %v10441_v19, %v13145_v15  ;;  %v13613_v15 = vpop.f32.mrf.mxu0  ;;  %v14497_v19 = vld [vmem:[#allocation11_spill] sm:$0xff] }
 0x858   :  { %v13600_v29 = vpop.f32.mrf.mxu1 }
 0x85a   :  { %v10444_v1 = vpop.f32.mrf.mxu1 }
 0x85b   :  { %v13603_v4 = vadd.f32 %v10444_v1, %v13157_v0  ;;  %v13620_v0 = vpop.f32.mrf.mxu0 }
 0x85c   :  { %v5456_v23 = vpop.f32.mrf.mxu1 }
 0x85d   :  { %v13608_v8 = vadd.f32 %v5456_v23, %v13161_v14 }
 0x85e   :  { %v10445_v37 = vpop.f32.mrf.mxu1 }
 0x85f   :  { %v13611_v62 = vadd.f32 %v10445_v37, %v13163_v6  ;;  %v9773_v6 = vpop.f32.mrf.mxu0 }
 0x860   :  { %v13615_v20 = vpop.f32.mrf.mxu1 }
 0x861   :  { %v9774_v49 = vpop.f32.mrf.mxu0 }
 0x862   :  { %v10448_v42 = vpop.f32.mrf.mxu1 }
 0x863   :  { %v13618_v59 = vadd.f32 %v10448_v42, %v13177_v12  ;;  %v13639_v1 = vpop.f32.mrf.mxu0 }
 0x864   :  { %v5472_v17 = vpop.f32.mrf.mxu1 }
 0x865   :  { %v13623_v24 = vadd.f32 %v5472_v17, %v13183_v34  ;;  %v9777_v37 = vpop.f32.mrf.mxu0  ;;  %v9751_v17 = vadd.f32 %v9750_v58, %v9749_v40 }
 0x866   :  { %v10449_v14 = vpop.f32.mrf.mxu1 }
 0x867   :  { %v13626_v50 = vadd.f32 %v10449_v14, %v13185_v55 }
 0x868   :  { %v13628_v33 = vpop.f32.mrf.mxu1 }
 0x869   :  { %14492 = vst [vmem:[#allocation27_spill] sm:$0xff] %v13626_v50  ;;  %14493 = vst [vmem:[#allocation19_spill] sm:$0xff] %v13628_v33 }
 0x86a   :  { %v10452_v18 = vpop.f32.mrf.mxu1 }
 0x86b   :  { %v13631_v46 = vadd.f32 %v10452_v18, %v13197_v52  ;;  %v9742_v52 = vadd.f32 %v13539_v21, %v13534_v10  ;;  %v9745_v18 = vadd.f32 %v13549_v56, %v13547_v22  ;;  %v9763_v10 = vadd.f32 %v9762_v54, %v9761_v53 }
 0x86c   :  { %v5488_v12 = vpop.f32.mrf.mxu1  ;;  %v9754_v22 = vadd.f32 %v13575_v51, %v13573_v39  ;;  %v9757_v56 = vadd.f32 %v13579_v30, %v13577_v38 }
 0x86d   :  { %14494 = vst [vmem:[#allocation31_spill] sm:$0xff] %v13631_v46  ;;  %v13634_v57 = vadd.f32 %v5488_v12, %v14495_v41  ;;  %v9779_v12 = vpop.f32.mrf.mxu0  ;;  %v9748_v41 = vadd.f32 %v13559_v48, %v13557_v43  ;;  %v9760_v48 = vadd.f32 %v13583_v5, %v13581_v3  ;;  %v9766_v3 = vadd.f32 %v13590_v25, %v13585_v2 }
 0x86e   :  { %v10453_v11 = vpop.f32.mrf.mxu1  ;;  %v9769_v5 = vadd.f32 %v13605_v35, %v13598_v60  ;;  %v9778_v35 = vadd.f32 %v9777_v37, %v13639_v1  ;;  %v11254_v1 = vld [vmem:[%s14420_s5 + $0x638] ss:$12 sps:$4 sm:$0xff]   ;;  %v11255_v37 = vld [vmem:[%s14420_s5 + $0x650] ss:$12 sps:$4 sm:$0xff]  }
 0x86f   :  { %14496 = vst [vmem:[#allocation24_spill] sm:$0xff] %v13634_v57  ;;  %v13637_v34 = vadd.f32 %v10453_v11, %v14497_v19  ;;  %v9780_v33 = vpop.f32.mrf.mxu0 }
 0x870   :  { %v13641_v55 = vpop.f32.mrf.mxu1 }
 0x871   :  { %14498 = vst [vmem:[#allocation32_spill] sm:$0xff] %v13637_v34  ;;  %14499 = vst [vmem:[#allocation26_spill] sm:$0xff] %v13641_v55  ;;  %v9782_v43 = vpop.f32.mrf.mxu0 }
 0x872   :  { %v10460_v23 = vpop.f32.mrf.mxu1 }
 0x873   :  { %v5836_v55 = vadd.f32 %v10460_v23, %v9748_v41  ;;  %v9783_v39 = vpop.f32.mrf.mxu0 }
 0x874   :  { %v5827_v42 = vpop.f32.mrf.mxu1  ;;  %v9784_v2 = vadd.f32 %v9783_v39, %v9782_v43  ;;  %v11260_v43 = vld [vmem:[%s14420_s5 + $0x680] ss:$12 sps:$4 sm:$0xff]  }
 0x875   :  { %v5828_v34 = vadd.f32 %v9742_v52, %v5827_v42  ;;  %v9772_v42 = vadd.f32 %v13620_v0, %v13613_v15  ;;  %v9781_v15 = vadd.f32 %v9780_v33, %v9779_v12  ;;  %v11250_v33 = vld [vmem:[%s14420_s5 + $0x620] ss:$12 sps:$4 sm:$0xff]   ;;  %v11259_v12 = vld [vmem:[%s14420_s5 + $0x668] ss:$12 sps:$4 sm:$0xff]  }
 0x876   :  { %v10461_v14 = vpop.f32.mrf.mxu1 }
 0x877   :  { %v5839_v11 = vadd.f32 %v10461_v14, %v9751_v17 }
 0x878   :  { %v5830_v19 = vpop.f32.mrf.mxu1 }
 0x879   :  { %v5831_v57 = vadd.f32 %v9745_v18, %v5830_v19  ;;  %v5891_v40 = vpack.c.bf16 %v5839_v11, %v5836_v55 }
 0x87a   :  { %v10464_v46 = vpop.f32.mrf.mxu1 }
 0x87b   :  { %v5890_v50 = vpack.c.bf16 %v5831_v57, %v5828_v34  ;;  %v5852_v34 = vadd.f32 %v10464_v46, %v9760_v48  ;;  %v9785_v46 = vpop.f32.mrf.mxu0 }
 0x87c   :  { %v5843_v58 = vpop.f32.mrf.mxu1 }
 0x87d   :  { %10482 = vmatprep.mubr.msk.bf16.mxu1 %vm2927_vm12, %v5890_v50  ;;  %v5844_v53 = vadd.f32 %v9754_v22, %v5843_v58 }
 0x87e   :  { %v10465_v21 = vpop.f32.mrf.mxu1  ;;  %10483 = vmatmul.mubr.msk.bf16.vlgmr.msra.gmra.mxu1 %vm2927_vm12, %v5891_v40 }
 0x87f   :  { %10499 = vmatpush3.bf16.msra.mxu1 %v12053_v47  ;;  %v5855_v57 = vadd.f32 %v10465_v21, %v9763_v10  ;;  %v9775_v47 = vadd.f32 %v9774_v49, %v9773_v6  ;;  %v9786_v49 = vpop.f32.mrf.mxu0 }
 0x880   :  { %10500 = vmatprep.subr.bf16.mxu1 %v12051_v31  ;;  %v5846_v50 = vpop.f32.mrf.mxu1  ;;  %v9787_v60 = vadd.f32 %v9786_v49, %v9785_v46 }
 0x881   :  { %v5847_v54 = vadd.f32 %v9757_v56, %v5846_v50  ;;  %v5893_v51 = vpack.c.bf16 %v5855_v57, %v5852_v34  ;;  %v11249_v56 = vld [vmem:[%s14420_s5 + $0x608] ss:$12 sps:$4 sm:$0xff]   ;;  %v11264_v57 = vld [vmem:[%s14420_s5 + $0x698] ss:$12 sps:$4 sm:$0xff]   ;;  %v11265_v50 = vld [vmem:[%s14420_s5 + $0x6b0] ss:$12 sps:$4 sm:$0xff]  }
 0x882   :  { %v10468_v55 = vpop.f32.mrf.mxu1  ;;  %v11268_v34 = vld [vmem:[%s14421_s6 + $0x108] sm:$0xff]  }
 0x883   :  { %v5892_v23 = vpack.c.bf16 %v5847_v54, %v5844_v53  ;;  %10501 = vmatpush3.bf16.msra.mxu1 %v12051_v31  ;;  %v5868_v18 = vadd.f32 %v10468_v55, %v9772_v42  ;;  %v11266_v53 = vld [vmem:[%s14421_s6 + $0x118] sm:$0xff]   ;;  %v11267_v54 = vld [vmem:[%s14421_s6 + $0x110] sm:$0xff]   ;;  %v11269_v55 = vld [vmem:[%s14421_s6 + $0x100] sm:$0xff]  }
 0x884   :  { %v5859_v38 = vpop.f32.mrf.mxu1  ;;  %10518 = vmatprep.subr.bf16.mxu1 %v11266_v53 }
 0x885   :  { %10486 = vmatprep.mubr.msk.bf16.mxu1 %vm2927_vm12, %v5892_v23  ;;  %v5860_v14 = vadd.f32 %v9766_v3, %v5859_v38  ;;  %v9826_v23 = vpop.f32.mrf.mxu0 }
 0x886   :  { %v10469_v30 = vpop.f32.mrf.mxu1  ;;  %10487 = vmatmul.mubr.msk.bf16.gmra.mxu1 %vm2927_vm12, %v5893_v51 }
 0x887   :  { %v5871_v31 = vadd.f32 %v10469_v30, %v9775_v47  ;;  %v9827_v39 = vpop.f32.mrf.mxu0 }
 0x888   :  { %v5862_v17 = vpop.f32.mrf.mxu1 }
 0x889   :  { %v5863_v52 = vadd.f32 %v9769_v5, %v5862_v17  ;;  %v5895_v11 = vpack.c.bf16 %v5871_v31, %v5868_v18  ;;  %v9829_v51 = vpop.f32.mrf.mxu0 }
 0x88a   :  { %v10472_v41 = vpop.f32.mrf.mxu1 }
 0x88b   :  { %v5894_v6 = vpack.c.bf16 %v5863_v52, %v5860_v14  ;;  %v5884_v21 = vadd.f32 %v10472_v41, %v9784_v2  ;;  %v9830_v38 = vpop.f32.mrf.mxu0 }
 0x88c   :  { %v5875_v19 = vpop.f32.mrf.mxu1 }
 0x88d   :  { %10490 = vmatprep.mubr.msk.bf16.mxu1 %vm2927_vm12, %v5894_v6  ;;  %v5876_v58 = vadd.f32 %v9778_v35, %v5875_v19  ;;  %v9832_v47 = vpop.f32.mrf.mxu0 }
 0x88e   :  { %v10473_v25 = vpop.f32.mrf.mxu1  ;;  %10491 = vmatmul.mubr.msk.bf16.gmra.mxu1 %vm2927_vm12, %v5895_v11 }
 0x88f   :  { %v5887_v0 = vadd.f32 %v10473_v25, %v9787_v60  ;;  %v9833_v30 = vpop.f32.mrf.mxu0  ;;  %v14500_v25 = vld [vmem:[#allocation16_spill] sm:$0xff]  ;;  %v14501_v60 = vld [vmem:[#allocation13_spill] sm:$0xff] }
 0x890   :  { %v5878_v40 = vpop.f32.mrf.mxu1  ;;  %v3813_v35 = vadd.f32 %v14501_v60, %v14500_v25 }
 0x891   :  { %v5879_v10 = vadd.f32 %v9781_v15, %v5878_v40  ;;  %v5897_v48 = vpack.c.bf16 %v5887_v0, %v5884_v21  ;;  %v9835_v3 = vpop.f32.mrf.mxu0 }
 0x892   :  { %v4955_v40 = vadd.f32 %v13379_v36, %v3813_v35 }
 0x893   :  { %v5896_v22 = vpack.c.bf16 %v5879_v10, %v5876_v58  ;;  %v9836_v5 = vpop.f32.mrf.mxu0 }
 0x895   :  { %10494 = vmatprep.mubr.msk.bf16.mxu1 %vm2927_vm12, %v5896_v22  ;;  %v13717_v46 = vpop.f32.mrf.mxu0 }
 0x896   :  { %10495 = vmatmul.mubr.msk.bf16.gmra.mxu1 %vm2927_vm12, %v5897_v48 }
 0x897   :  { %10502 = vmatprep.mubr.msk.bf16.mxu1 %vm1206_vm4, %v11249_v56  ;;  %v13719_v42 = vpop.f32.mrf.mxu0 }
 0x899   :  { %v13721_v31 = vpop.f32.mrf.mxu0 }
 0x89b   :  { %v13723_v17 = vpop.f32.mrf.mxu0 }
 0x89d   :  { %v13725_v14 = vpop.f32.mrf.mxu0 }
 0x89e   :  { %10503 = vmatmul.mubr.msk.bf16.vlgmr.msra.gmra.mxu1 %vm1206_vm4, %v11250_v33 }
 0x89f   :  { %10506 = vmatprep.mubr.msk.bf16.mxu1 %vm1206_vm4, %v11254_v1  ;;  %10519 = vmatpush3.bf16.msra.mxu1 %v11266_v53  ;;  %v13727_v52 = vpop.f32.mrf.mxu0 }
 0x8a0   :  { %10520 = vmatprep.subr.bf16.mxu1 %v11267_v54 }
 0x8a1   :  { %v9847_v18 = vpop.f32.mrf.mxu0 }
 0x8a3   :  { %10521 = vmatpush3.bf16.msra.mxu1 %v11267_v54  ;;  %v9848_v41 = vpop.f32.mrf.mxu0 }
 0x8a4   :  { %10522 = vmatprep.subr.bf16.mxu1 %v11268_v34 }
 0x8a5   :  { %v13729_v6 = vpop.f32.mrf.mxu0 }
 0x8a6   :  { %10507 = vmatmul.mubr.msk.bf16.gmra.mxu1 %vm1206_vm4, %v11255_v37 }
 0x8a7   :  { %10510 = vmatprep.mubr.msk.bf16.mxu1 %vm1206_vm4, %v11259_v12  ;;  %10523 = vmatpush3.bf16.msra.mxu1 %v11268_v34  ;;  %v13734_v19 = vpop.f32.mrf.mxu0 }
 0x8a8   :  { %10524 = vmatprep.subr.bf16.mxu1 %v11269_v55 }
 0x8a9   :  { %v13745_v10 = vpop.f32.mrf.mxu0 }
 0x8ab   :  { %10525 = vmatpush3.bf16.msra.mxu1 %v11269_v55  ;;  %v13752_v48 = vpop.f32.mrf.mxu0  ;;  %v14506_v55 = vld [vmem:[#allocation23_spill] sm:$0xff] }
 0x8ae   :  { %10511 = vmatmul.mubr.msk.bf16.gmra.mxu1 %vm1206_vm4, %v11260_v43 }
 0x8af   :  { %10514 = vmatprep.mubr.msk.bf16.mxu1 %vm1206_vm4, %v11264_v57 }
 0x8b6   :  { %10515 = vmatmul.mubr.msk.bf16.gmra.mxu1 %vm1206_vm4, %v11265_v50  ;;  %vm11345_vm4 = vmmov 0  }
 0x93e   :  { %v10484_v49 = vpop.f32.mrf.mxu1 }
 0x93f   :  { %v13732_v11 = vadd.f32 %v10484_v49, %v13367_v63 }
 0x940   :  { %v5989_v2 = vpop.f32.mrf.mxu1 }
 0x941   :  { %v13739_v15 = vadd.f32 %v5989_v2, %v13373_v16 }
 0x942   :  { %v10485_v0 = vpop.f32.mrf.mxu1 }
 0x943   :  { %v13743_v58 = vadd.f32 %v10485_v0, %v13375_v7  ;;  %v13760_v7 = vpop.f32.mrf.mxu0  ;;  %v14510_v0 = vld [vmem:[#allocation25_spill] sm:$0xff] }
 0x944   :  { %v5992_v21 = vpop.f32.mrf.mxu1 }
 0x945   :  { %v13747_v63 = vadd.f32 %v5992_v21, %v4955_v40 }
 0x946   :  { %v10488_v22 = vpop.f32.mrf.mxu1 }
 0x947   :  { %v13750_v56 = vadd.f32 %v10488_v22, %v13385_v9  ;;  %v9857_v9 = vpop.f32.mrf.mxu0 }
 0x948   :  { %v6005_v33 = vpop.f32.mrf.mxu1 }
 0x949   :  { %v13755_v16 = vadd.f32 %v6005_v33, %v13391_v26  ;;  %v9859_v54 = vpop.f32.mrf.mxu0 }
 0x94a   :  { %v10489_v1 = vpop.f32.mrf.mxu1 }
 0x94b   :  { %v13758_v36 = vadd.f32 %v10489_v1, %v13393_v27  ;;  %v9860_v2 = vpop.f32.mrf.mxu0  ;;  %v9837_v1 = vadd.f32 %v9836_v5, %v9835_v3 }
 0x94c   :  { %v13762_v37 = vpop.f32.mrf.mxu1 }
 0x94d   :  { %v9862_v40 = vpop.f32.mrf.mxu0 }
 0x94e   :  { %v10492_v12 = vpop.f32.mrf.mxu1 }
 0x94f   :  { %v13765_v43 = vadd.f32 %v10492_v12, %v13403_v45  ;;  %v14508_v45 = vld [vmem:[#allocation17_spill] sm:$0xff]  ;;  %v9863_v22 = vpop.f32.mrf.mxu0 }
 0x950   :  { %v6021_v57 = vpop.f32.mrf.mxu1 }
 0x951   :  { %14502 = vst [vmem:[#allocation33_spill] sm:$0xff] %v13765_v43  ;;  %v13768_v50 = vadd.f32 %v6021_v57, %v13409_v61  ;;  %v9828_v57 = vadd.f32 %v9827_v39, %v9826_v23  ;;  %v9840_v23 = vadd.f32 %v13719_v42, %v13717_v46  ;;  %v9843_v39 = vadd.f32 %v13723_v17, %v13721_v31 }
 0x952   :  { %v10493_v53 = vpop.f32.mrf.mxu1  ;;  %v9861_v46 = vadd.f32 %v9860_v2, %v9859_v54  ;;  %v9852_v31 = vadd.f32 %v13734_v19, %v13729_v6  ;;  %v9855_v17 = vadd.f32 %v13752_v48, %v13745_v10  ;;  %v9864_v10 = vadd.f32 %v9863_v22, %v9862_v40  ;;  %v13814_v22 = vld [vmem:[%s14423_s7] ss:$0 sm:$0xff] }
 0x953   :  { %14503 = vst [vmem:[#allocation28_spill] sm:$0xff] %v13768_v50  ;;  %v13771_v26 = vadd.f32 %v10493_v53, %v13411_v44  ;;  %v9831_v53 = vadd.f32 %v9830_v38, %v9829_v51  ;;  %v9846_v38 = vadd.f32 %v13727_v52, %v13725_v14  ;;  %v9858_v52 = vadd.f32 %v9857_v9, %v13760_v7 }
 0x954   :  { %v13773_v27 = vpop.f32.mrf.mxu1 }
 0x955   :  { %14504 = vst [vmem:[#allocation7_spill] sm:$0xff] %v13771_v26  ;;  %14505 = vst [vmem:[#allocation11_spill] sm:$0xff] %v13773_v27 }
 0x956   :  { %v10496_v34 = vpop.f32.mrf.mxu1 }
 0x957   :  { %v13776_v49 = vadd.f32 %v10496_v34, %v14506_v55  ;;  %v9865_v34 = vpop.f32.mrf.mxu0  ;;  %v9834_v55 = vadd.f32 %v9833_v30, %v9832_v47 }
 0x958   :  { %v6037_v25 = vpop.f32.mrf.mxu1 }
 0x959   :  { %14507 = vst [vmem:[#allocation16_spill] sm:$0xff] %v13776_v49  ;;  %v13779_v60 = vadd.f32 %v6037_v25, %v14508_v45 }
 0x95a   :  { %v10497_v35 = vpop.f32.mrf.mxu1 }
 0x95b   :  { %14509 = vst [vmem:[#allocation13_spill] sm:$0xff] %v13779_v60  ;;  %v13782_v61 = vadd.f32 %v10497_v35, %v14510_v0  ;;  %v9866_v0 = vpop.f32.mrf.mxu0 }
 0x95c   :  { %v13784_v21 = vpop.f32.mrf.mxu1  ;;  %v9867_v48 = vadd.f32 %v9866_v0, %v9865_v34  ;;  %v14513_v0 = vld [vmem:[#allocation3_spill] sm:$0xff] }
 0x95d   :  { %14511 = vst [vmem:[#allocation23_spill] sm:$0xff] %v13782_v61  ;;  %14512 = vst [vmem:[#allocation17_spill] sm:$0xff] %v13784_v21  ;;  %v9849_v21 = vadd.f32 %v9848_v41, %v9847_v18  ;;  %v9868_v51 = vpop.f32.mrf.mxu0 }
 0x95e   :  { %v10504_v44 = vpop.f32.mrf.mxu1 }
 0x95f   :  { %v6385_v60 = vadd.f32 %v10504_v44, %v9834_v55  ;;  %v9869_v41 = vpop.f32.mrf.mxu0 }
 0x960   :  { %v6376_v33 = vpop.f32.mrf.mxu1 }
 0x961   :  { %v6377_v25 = vadd.f32 %v9828_v57, %v6376_v33  ;;  %v9871_v14 = vpop.f32.mrf.mxu0  ;;  %v9870_v57 = vadd.f32 %v9869_v41, %v9868_v51 }
 0x962   :  { %v10505_v12 = vpop.f32.mrf.mxu1 }
 0x963   :  { %v6388_v49 = vadd.f32 %v10505_v12, %v9837_v1  ;;  %v9872_v54 = vpop.f32.mrf.mxu0 }
 0x964   :  { %v6379_v27 = vpop.f32.mrf.mxu1  ;;  %v9873_v19 = vadd.f32 %v9872_v54, %v9871_v14  ;;  %v14521_v54 = vld [vmem:[#allocation20_spill] sm:$0xff] }
 0x965   :  { %v6380_v45 = vadd.f32 %v9831_v53, %v6379_v27  ;;  %v6440_v61 = vpack.c.bf16 %v6388_v49, %v6385_v60 }
 0x966   :  { %v10508_v26 = vpop.f32.mrf.mxu1 }
 0x967   :  { %v6439_v35 = vpack.c.bf16 %v6380_v45, %v6377_v25  ;;  %v6401_v27 = vadd.f32 %v10508_v26, %v9846_v38 }
 0x968   :  { %v6392_v50 = vpop.f32.mrf.mxu1 }
 0x969   :  { %10526 = vmatprep.mubr.msk.bf16.mxu1 %vm2927_vm12, %v6439_v35  ;;  %v6393_v3 = vadd.f32 %v9840_v23, %v6392_v50  ;;  %v11344_v23 = vmov 0.0  }
 0x96a   :  { %v10509_v43 = vpop.f32.mrf.mxu1  ;;  %10527 = vmatmul.mubr.msk.bf16.vlgmr.msra.gmra.mxu1 %vm2927_vm12, %v6440_v61  ;;  %10542 = vmatprep.subr.bf16.mxu0 %v11344_v23 }
 0x96b   :  { %v6404_v47 = vadd.f32 %v10509_v43, %v9849_v21  ;;  %10562 = vmatprep.subr.bf16.mxu1 %v11344_v23  ;;  %10558 = vmatprep.mubr.msk.bf16.mxu0 %vm11345_vm4, %v11344_v23 }
 0x96c   :  { %v6395_v30 = vpop.f32.mrf.mxu1 }
 0x96d   :  { %v6396_v5 = vadd.f32 %v9843_v39, %v6395_v30  ;;  %v6442_v60 = vpack.c.bf16 %v6404_v47, %v6401_v27  ;;  %v14514_v39 = vld [vmem:[#allocation2_spill] sm:$0xff] }
 0x96e   :  { %v10512_v49 = vpop.f32.mrf.mxu1  ;;  %v3135_v51 = vadd.f32 %v14514_v39, %v14513_v0 }
 0x96f   :  { %v6441_v18 = vpack.c.bf16 %v6396_v5, %v6393_v3  ;;  %v6417_v44 = vadd.f32 %v10512_v49, %v9858_v52  ;;  %v14515_v3 = vld [vmem:[#allocation35_spill] sm:$0xff] }
 0x970   :  { %v6408_v61 = vpop.f32.mrf.mxu1  ;;  %v4406_v5 = vadd.f32 %v14515_v3, %v3135_v51 }
 0x971   :  { %10530 = vmatprep.mubr.msk.bf16.mxu1 %vm2927_vm12, %v6441_v18  ;;  %v6409_v26 = vadd.f32 %v9852_v31, %v6408_v61 }
 0x972   :  { %v10513_v42 = vpop.f32.mrf.mxu1  ;;  %10531 = vmatmul.mubr.msk.bf16.gmra.mxu1 %vm2927_vm12, %v6442_v60  ;;  %v5504_v60 = vadd.f32 %v13600_v29, %v4406_v5  ;;  %v14526_v5 = vld [vmem:[#allocation37_spill] sm:$0xff] }
 0x973   :  { %v6420_v43 = vadd.f32 %v10513_v42, %v9861_v46  ;;  %v14517_v42 = vld [vmem:[#allocation4_spill] sm:$0xff] }
 0x974   :  { %v6411_v50 = vpop.f32.mrf.mxu1 }
 0x975   :  { %v6412_v21 = vadd.f32 %v9855_v17, %v6411_v50  ;;  %v6444_v2 = vpack.c.bf16 %v6420_v43, %v6417_v44  ;;  %v14519_v50 = vld [vmem:[#allocation15_spill] sm:$0xff] }
 0x976   :  { %v10516_v33 = vpop.f32.mrf.mxu1 }
 0x977   :  { %v6443_v1 = vpack.c.bf16 %v6412_v21, %v6409_v26  ;;  %v6433_v25 = vadd.f32 %v10516_v33, %v9870_v57  ;;  %v14520_v26 = vld [vmem:[#allocation36_spill] sm:$0xff] }
 0x978   :  { %v6424_v12 = vpop.f32.mrf.mxu1 }
 0x979   :  { %10534 = vmatprep.mubr.msk.bf16.mxu1 %vm2927_vm12, %v6443_v1  ;;  %v6425_v53 = vadd.f32 %v9864_v10, %v6424_v12 }
 0x97a   :  { %v10517_v6 = vpop.f32.mrf.mxu1  ;;  %10535 = vmatmul.mubr.msk.bf16.gmra.mxu1 %vm2927_vm12, %v6444_v2 }
 0x97b   :  { %v6436_v7 = vadd.f32 %v10517_v6, %v9873_v19 }
 0x97c   :  { %v6427_v9 = vpop.f32.mrf.mxu1 }
 0x97d   :  { %v6428_v55 = vadd.f32 %v9867_v48, %v6427_v9  ;;  %v6446_v35 = vpack.c.bf16 %v6436_v7, %v6433_v25 }
 0x97f   :  { %v6445_v45 = vpack.c.bf16 %v6428_v55, %v6425_v53  ;;  %v14523_v55 = vld [vmem:[#allocation6_spill] sm:$0xff] }
 0x981   :  { %10538 = vmatprep.mubr.msk.bf16.mxu1 %vm2927_vm12, %v6445_v45 }
 0x982   :  { %10539 = vmatmul.mubr.msk.bf16.gmra.mxu1 %vm2927_vm12, %v6446_v35 }
 0x983   :  { %10578 = vmatprep.mubr.msk.bf16.mxu1 %vm11345_vm4, %v11344_v23 }
 0xa2a   :  { %v10528_v40 = vpop.f32.mrf.mxu1 }
 0xa2b   :  { %v6603_v34 = vadd.f32 %v10528_v40, %v13588_v32 }
 0xa2c   :  { %v6538_v38 = vpop.f32.mrf.mxu1 }
 0xa2d   :  { %v6619_v47 = vadd.f32 %v6603_v34, %v13732_v11  ;;  %v6601_v30 = vadd.f32 %v6538_v38, %v13593_v28  ;;  %v14516_v11 = vld [vmem:[#allocation5_spill] sm:$0xff] }
 0xa2e   :  { %v10529_v27 = vpop.f32.mrf.mxu1  ;;  %v3151_v28 = vadd.f32 %v14517_v42, %v14516_v11  ;;  %v14529_v42 = vld [vmem:[#allocation33_spill] sm:$0xff] }
 0xa2f   :  { %v6642_v49 = vadd.f32 %v13814_v22, %v6619_v47  ;;  %v6617_v18 = vadd.f32 %v6601_v30, %v13739_v15  ;;  %v6604_v41 = vadd.f32 %v10529_v27, %v13596_v13  ;;  %v14518_v15 = vld [vmem:[#allocation22_spill] sm:$0xff]  ;;  %v14524_v47 = vld [vmem:[#allocation29_spill] sm:$0xff] }
 0xa30   :  { %v6541_v32 = vpop.f32.mrf.mxu1  ;;  %v3829_v13 = vadd.f32 %v14519_v50, %v14518_v15  ;;  %v4410_v29 = vadd.f32 %v14520_v26, %v3151_v28  ;;  %v14525_v30 = vld [vmem:[#allocation21_spill] sm:$0xff] }
 0xa31   :  { %vm6658_vm13 = vcmp.gt.f32.partialorder %v6642_v49, 0.0  ;;  %v6640_v61 = vadd.f32 %v13814_v22, %v6617_v18  ;;  %v6620_v46 = vadd.f32 %v6604_v41, %v13743_v58  ;;  %v6602_v31 = vadd.f32 %v6541_v32, %v5504_v60  ;;  %v14527_v60 = vld [vmem:[#allocation14_spill] sm:$0xff] }
 0xa32   :  { %v10532_v17 = vpop.f32.mrf.mxu1  ;;  %v6674_v14 = vmul.f32 0.01, %v6642_v49  ;;  %v4959_v2 = vadd.f32 %v14521_v54, %v3829_v13  ;;  %v5508_v12 = vadd.f32 %v13615_v20, %v4410_v29  ;;  %v14522_v20 = vld [vmem:[#allocation9_spill] sm:$0xff]  ;;  %v3845_v3 = vadd.f32 %v14525_v30, %v14524_v47  ;;  %v14532_v29 = vld [vmem:[#allocation12_spill] sm:$0xff] }
 0xa33   :  { %v6672_v52 = vmul.f32 0.01, %v6640_v61  ;;  %v6643_v43 = vadd.f32 %v13814_v22, %v6620_v46  ;;  %v6618_v21 = vadd.f32 %v6602_v31, %v13747_v63  ;;  %v6607_v44 = vadd.f32 %v10532_v17, %v13603_v4  ;;  %v14543_v30 = vld [vmem:[#allocation16_spill] sm:$0xff] }
 0xa34   :  { %v6554_v33 = vpop.f32.mrf.mxu1  ;;  %vm6656_vm14 = vcmp.gt.f32.partialorder %v6640_v61, 0.0  ;;  %v6690_v10 = vsel %vm6658_vm13, %v6642_v49, %v6674_v14  ;;  %v3167_v25 = vadd.f32 %v14523_v55, %v14522_v20  ;;  %v6057_v40 = vadd.f32 %v13762_v37, %v4959_v2  ;;  %v14535_v2 = vld [vmem:[#allocation11_spill] sm:$0xff]  ;;  %v14538_v20 = vld [vmem:[#allocation8_spill] sm:$0xff] }
 0xa35   :  { %vm6659_vm15 = vcmp.gt.f32.partialorder %v6643_v43, 0.0  ;;  %v6675_v58 = vmul.f32 0.01, %v6643_v43  ;;  %v6605_v1 = vadd.f32 %v6554_v33, %v13608_v8  ;;  %v6641_v57 = vadd.f32 %v13814_v22, %v6618_v21  ;;  %v14533_v21 = vld [vmem:[#allocation10_spill] sm:$0xff] }
 0xa36   :  { %v6623_v6 = vadd.f32 %v6607_v44, %v13750_v56  ;;  %v10533_v19 = vpop.f32.mrf.mxu1  ;;  %v4414_v27 = vadd.f32 %v14526_v5, %v3167_v25  ;;  %v4963_v32 = vadd.f32 %v14527_v60, %v3845_v3  ;;  %v3183_v44 = vadd.f32 %v14533_v21, %v14532_v29 }
 0xa37   :  { %v6691_v63 = vsel %vm6659_vm15, %v6643_v43, %v6675_v58  ;;  %v6621_v4 = vadd.f32 %v6605_v1, %v13755_v16  ;;  %v6608_v48 = vadd.f32 %v10533_v19, %v13611_v62  ;;  %vm6657_vm0 = vcmp.gt.f32.partialorder %v6641_v57, 0.0  ;;  %v14531_v43 = vld [vmem:[#allocation27_spill] sm:$0xff] }
 0xa38   :  { %v13844_v7 = vpack.c.bf16 %v6691_v63, %v6690_v10  ;;  %v6673_v8 = vmul.f32 0.01, %v6641_v57  ;;  %v6646_v9 = vadd.f32 %v13814_v22, %v6623_v6  ;;  %v6557_v53 = vpop.f32.mrf.mxu1  ;;  %v6688_v16 = vsel %vm6656_vm14, %v6640_v61, %v6672_v52  ;;  %v14528_v61 = vld [vmem:[#allocation19_spill] sm:$0xff]  ;;  %v14530_v52 = vld [vmem:[#allocation28_spill] sm:$0xff] }
 0xa39   :  { %v6644_v56 = vadd.f32 %v13814_v22, %v6621_v4  ;;  %v6624_v45 = vadd.f32 %v6608_v48, %v13758_v36  ;;  %v6606_v35 = vadd.f32 %v6557_v53, %v5508_v12  ;;  %v5512_v46 = vadd.f32 %v14528_v61, %v4414_v27  ;;  %v14534_v58 = vld [vmem:[#allocation7_spill] sm:$0xff] }
 0xa3a   :  { %v6689_v62 = vsel %vm6657_vm0, %v6641_v57, %v6673_v8  ;;  %vm6662_vm1 = vcmp.gt.f32.partialorder %v6646_v9, 0.0  ;;  %v10536_v34 = vpop.f32.mrf.mxu1  ;;  %v6678_v39 = vmul.f32 0.01, %v6646_v9  ;;  %v6061_v12 = vadd.f32 %v14535_v2, %v4963_v32  ;;  %v14536_v8 = vld [vmem:[#allocation34_spill] sm:$0xff] }
 0xa3b   :  { %v13853_v0 = vpack.c.bf16 %v6689_v62, %v6688_v16  ;;  %v6676_v51 = vmul.f32 0.01, %v6644_v56  ;;  %v6647_v38 = vadd.f32 %v13814_v22, %v6624_v45  ;;  %v6622_v36 = vadd.f32 %v6606_v35, %v6057_v40  ;;  %v14539_v45 = vld [vmem:[#allocation31_spill] sm:$0xff]  ;;  %v14540_v16 = vld [vmem:[#allocation24_spill] sm:$0xff] }
 0xa3c   :  { %v6611_v49 = vadd.f32 %v10536_v34, %v13618_v59  ;;  %v6570_v37 = vpop.f32.mrf.mxu1  ;;  %vm6660_vm2 = vcmp.gt.f32.partialorder %v6644_v56, 0.0  ;;  %v6694_v17 = vsel %vm6662_vm1, %v6646_v9, %v6678_v39  ;;  %v14537_v9 = vld [vmem:[#allocation30_spill] sm:$0xff]  ;;  %v4418_v55 = vadd.f32 %v14538_v20, %v3183_v44  ;;  %v11279_v20 = vld [vmem:[%s14422_s9 + $0x30] sm:$0xff]  }
 0xa3d   :  { %vm6663_vm3 = vcmp.gt.f32.partialorder %v6647_v38, 0.0  ;;  %v6679_v18 = vmul.f32 0.01, %v6647_v38  ;;  %v6609_v41 = vadd.f32 %v6570_v37, %v13623_v24  ;;  %v6645_v11 = vadd.f32 %v13814_v22, %v6622_v36  ;;  %v14541_v34 = vld [vmem:[#allocation18_spill] sm:$0xff] }
 0xa3e   :  { %v6627_v28 = vadd.f32 %v6611_v49, %v14529_v42  ;;  %v10537_v31 = vpop.f32.mrf.mxu1  ;;  %v6692_v57 = vsel %vm6660_vm2, %v6644_v56, %v6676_v51  ;;  %v3861_v53 = vadd.f32 %v14537_v9, %v14536_v8  ;;  %v14542_v51 = vld [vmem:[#allocation26_spill] sm:$0xff]  ;;  %v14544_v49 = vld [vmem:[#allocation13_spill] sm:$0xff]  ;;  %v11275_v8 = vld [vmem:[%s14422_s9 + $0x90] sm:$0xff]  }
 0xa3f   :  { %v6695_v14 = vsel %vm6663_vm3, %v6647_v38, %v6679_v18  ;;  %v6625_v59 = vadd.f32 %v6609_v41, %v14530_v52  ;;  %v6612_v15 = vadd.f32 %v10537_v31, %v14531_v43  ;;  %vm6661_vm5 = vcmp.gt.f32.partialorder %v6645_v11, 0.0  ;;  %v14545_v18 = vld [vmem:[#allocation32_spill] sm:$0xff]  ;;  %v14547_v31 = vld [vmem:[#allocation17_spill] sm:$0xff]  ;;  %v8886_v9 = vld [vmem:[%s14424_s8 + $0x8] sm:$0xf] }
 0xa40   :  { %v13868_v50 = vpack.c.bf16 %v6695_v14, %v6694_v17  ;;  %v6677_v24 = vmul.f32 0.01, %v6645_v11  ;;  %v6650_v13 = vadd.f32 %v13814_v22, %v6627_v28  ;;  %v6573_v26 = vpop.f32.mrf.mxu1  ;;  %v4967_v39 = vadd.f32 %v14541_v34, %v3861_v53  ;;  %v11278_v53 = vld [vmem:[%s14422_s9 + $0x38] sm:$0xff]  }
 0xa41   :  { %v6648_v33 = vadd.f32 %v13814_v22, %v6625_v59  ;;  %v6628_v1 = vadd.f32 %v6612_v15, %v14534_v58  ;;  %v6610_v54 = vadd.f32 %v6573_v26, %v5512_v46  ;;  %v5516_v38 = vadd.f32 %v14542_v51, %v4418_v55  ;;  %v11280_v55 = vld [vmem:[%s14422_s9 + $0x28] sm:$0xff]  }
 0xa42   :  { %v6693_v6 = vsel %vm6661_vm5, %v6645_v11, %v6677_v24  ;;  %vm6666_vm6 = vcmp.gt.f32.partialorder %v6650_v13, 0.0  ;;  %v10540_v19 = vpop.f32.mrf.mxu1  ;;  %v6682_v63 = vmul.f32 0.01, %v6650_v13  ;;  %v14546_v11 = vld [vmem:[#allocation23_spill] sm:$0xff]  ;;  %v6065_v17 = vadd.f32 %v14547_v31, %v4967_v39  ;;  %v11286_v39 = vld [vmem:[%s14422_s9 + $0xf8] sm:$0xff]  }
 0xa43   :  { %v13877_v10 = vpack.c.bf16 %v6693_v6, %v6692_v57  ;;  %v6680_v4 = vmul.f32 0.01, %v6648_v33  ;;  %v6651_v48 = vadd.f32 %v13814_v22, %v6628_v1  ;;  %v6626_v25 = vadd.f32 %v6610_v54, %v6061_v12  ;;  %v8869_v57 = vld [vmem:[%s14424_s8 + $0x4] sm:$0xf]  ;;  %v11270_v6 = vld [vmem:[%s14422_s9 + $0xb8] sm:$0xff]  }
 0xa44   :  { %v6615_v35 = vadd.f32 %v10540_v19, %v14539_v45  ;;  %v6586_v40 = vpop.f32.mrf.mxu1  ;;  %vm6664_vm7 = vcmp.gt.f32.partialorder %v6648_v33, 0.0  ;;  %v6698_v27 = vsel %vm6666_vm6, %v6650_v13, %v6682_v63  ;;  %v11271_v19 = vld [vmem:[%s14422_s9 + $0xb0] sm:$0xff]   ;;  %v11272_v63 = vld [vmem:[%s14422_s9 + $0xa8] sm:$0xff]   ;;  %v11282_v45 = vld [vmem:[%s14422_s9 + $0x18] sm:$0xff]  }
 0xa45   :  { %vm6667_vm8 = vcmp.gt.f32.partialorder %v6651_v48, 0.0  ;;  %v6683_v56 = vmul.f32 0.01, %v6651_v48  ;;  %v6613_v62 = vadd.f32 %v6586_v40, %v14540_v16  ;;  %v6649_v47 = vadd.f32 %v13814_v22, %v6626_v25  ;;  %v11281_v25 = vld [vmem:[%s14422_s9 + $0x20] sm:$0xff]   ;;  %v11284_v40 = vld [vmem:[%s14422_s9 + $0x8] sm:$0xff]  }
 0xa46   :  { %v6631_v3 = vadd.f32 %v6615_v35, %v14543_v30  ;;  %v10541_v5 = vpop.f32.mrf.mxu1  ;;  %v6696_v14 = vsel %vm6664_vm7, %v6648_v33, %v6680_v4  ;;  %v11273_v4 = vld [vmem:[%s14422_s9 + $0xa0] sm:$0xff]   ;;  %v11283_v35 = vld [vmem:[%s14422_s9 + $0x10] sm:$0xff]   ;;  %v11276_v16 = vld [vmem:[%s14422_s9 + $0x88] sm:$0xff]  }
 0xa47   :  { %v6699_v36 = vsel %vm6667_vm8, %v6651_v48, %v6683_v56  ;;  %v6629_v37 = vadd.f32 %v6613_v62, %v14544_v49  ;;  %v6616_v41 = vadd.f32 %v10541_v5, %v14545_v18  ;;  %vm6665_vm9 = vcmp.gt.f32.partialorder %v6649_v47, 0.0  ;;  %v11274_v48 = vld [vmem:[%s14422_s9 + $0x98] sm:$0xff]   ;;  %v11285_v56 = vld [vmem:[%s14422_s9] sm:$0xff]   ;;  %v11287_v5 = vld [vmem:[%s14422_s9 + $0xf0] sm:$0xff]  }
 0xa48   :  { %v13892_v60 = vpack.c.bf16 %v6699_v36, %v6698_v27  ;;  %v6681_v32 = vmul.f32 0.01, %v6649_v47  ;;  %v6654_v61 = vadd.f32 %v13814_v22, %v6631_v3  ;;  %v6589_v46 = vpop.f32.mrf.mxu1  ;;  %v11277_v62 = vld [vmem:[%s14422_s9 + $0x80] sm:$0xff]   ;;  %v8919_v31 = vld [vmem:[%s14424_s8 + $0xc] sm:$0xf] }
 0xa49   :  { %v6632_v42 = vadd.f32 %v6616_v41, %v14546_v11  ;;  %v6614_v28 = vadd.f32 %v6589_v46, %v5516_v38  ;;  %v6652_v59 = vadd.f32 %v13814_v22, %v6629_v37  ;;  %v11288_v37 = vld [vmem:[%s14422_s9 + $0xe8] sm:$0xff]   ;;  %v11289_v18 = vld [vmem:[%s14422_s9 + $0xe0] sm:$0xff]   ;;  %v11290_v41 = vld [vmem:[%s14422_s9 + $0xd8] sm:$0xff]  }
 0xa4a   :  { %v6697_v52 = vsel %vm6665_vm9, %v6649_v47, %v6681_v32  ;;  %vm6670_vm10 = vcmp.gt.f32.partialorder %v6654_v61, 0.0  ;;  %v6686_v15 = vmul.f32 0.01, %v6654_v61  ;;  %v11291_v32 = vld [vmem:[%s14422_s9 + $0xd0] sm:$0xff]  }
 0xa4b   :  { %v13899_v43 = vpack.c.bf16 %v6697_v52, %v6696_v14  ;;  %v6655_v24 = vadd.f32 %v13814_v22, %v6632_v42  ;;  %v6630_v13 = vadd.f32 %v6614_v28, %v6065_v17  ;;  %v6684_v29 = vmul.f32 0.01, %v6652_v59  ;;  %v11294_v17 = vld [vmem:[%s14422_s9 + $0x78] sm:$0xff]   ;;  %v11295_v14 = vld [vmem:[%s14422_s9 + $0x70] sm:$0xff]   ;;  %v11296_v52 = vld [vmem:[%s14422_s9 + $0x68] sm:$0xff]  }
 0xa4c   :  { %v6702_v44 = vsel %vm6670_vm10, %v6654_v61, %v6686_v15  ;;  %vm6668_vm12 = vcmp.gt.f32.partialorder %v6652_v59, 0.0  ;;  %v11298_v15 = vld [vmem:[%s14422_s9 + $0x58] sm:$0xff]  }
 0xa4d   :  { %vm6671_vm11 = vcmp.gt.f32.partialorder %v6655_v24, 0.0  ;;  %v6687_v26 = vmul.f32 0.01, %v6655_v24  ;;  %v6653_v21 = vadd.f32 %v13814_v22, %v6630_v13  ;;  %v6700_v54 = vsel %vm6668_vm12, %v6652_v59, %v6684_v29  ;;  %v6712_v22 = vld [vmem:[%s14424_s8] sm:$0xf]  ;;  %v11300_v13 = vld [vmem:[%s14422_s9 + $0x48] sm:$0xff]  }
 0xa4e   :  { %v11297_v59 = vld [vmem:[%s14422_s9 + $0x60] sm:$0xff]  }
 0xa4f   :  { %v6703_v58 = vsel %vm6671_vm11, %v6655_v24, %v6687_v26  ;;  %vm6669_vm13 = vcmp.gt.f32.partialorder %v6653_v21, 0.0  ;;  %v6685_v33 = vmul.f32 0.01, %v6653_v21  ;;  %v11299_v24 = vld [vmem:[%s14422_s9 + $0x50] sm:$0xff]   ;;  %v11301_v26 = vld [vmem:[%s14422_s9 + $0x40] sm:$0xff]  }
 0xa50   :  { %v13903_v1 = vpack.c.bf16 %v6703_v58, %v6702_v44  ;;  %v11293_v44 = vld [vmem:[%s14422_s9 + $0xc0] sm:$0xff]  }
 0xa51   :  { %v6701_v2 = vsel %vm6669_vm13, %v6653_v21, %v6685_v33  ;;  %v11292_v21 = vld [vmem:[%s14422_s9 + $0xc8] sm:$0xff]  }
 0xa52   :  { %10543 = vmatpush3.bf16.msra.mxu0 %v13903_v1  ;;  %10563 = vmatpush3.bf16.msra.mxu1 %v13903_v1  ;;  %v13907_v12 = vpack.c.bf16 %v6701_v2, %v6700_v54 }
 0xa53   :  { %10544 = vmatprep.subr.bf16.mxu0 %v11344_v23  ;;  %10564 = vmatprep.subr.bf16.mxu1 %v11344_v23 }
 0xa56   :  { %10545 = vmatpush3.bf16.msra.mxu0 %v13907_v12  ;;  %10565 = vmatpush3.bf16.msra.mxu1 %v13907_v12 }
 0xa57   :  { %10546 = vmatprep.subr.bf16.mxu0 %v11344_v23  ;;  %10566 = vmatprep.subr.bf16.mxu1 %v11344_v23 }
 0xa5a   :  { %10547 = vmatpush3.bf16.msra.mxu0 %v13892_v60  ;;  %10567 = vmatpush3.bf16.msra.mxu1 %v13892_v60 }
 0xa5b   :  { %10548 = vmatprep.subr.bf16.mxu0 %v11344_v23  ;;  %10568 = vmatprep.subr.bf16.mxu1 %v11344_v23 }
 0xa5e   :  { %10549 = vmatpush3.bf16.msra.mxu0 %v13899_v43  ;;  %10569 = vmatpush3.bf16.msra.mxu1 %v13899_v43 }
 0xa5f   :  { %10550 = vmatprep.subr.bf16.mxu0 %v11344_v23  ;;  %10570 = vmatprep.subr.bf16.mxu1 %v11344_v23 }
 0xa62   :  { %10551 = vmatpush3.bf16.msra.mxu0 %v13868_v50  ;;  %10571 = vmatpush3.bf16.msra.mxu1 %v13868_v50 }
 0xa63   :  { %10552 = vmatprep.subr.bf16.mxu0 %v11344_v23  ;;  %10572 = vmatprep.subr.bf16.mxu1 %v11344_v23 }
 0xa66   :  { %10553 = vmatpush3.bf16.msra.mxu0 %v13877_v10  ;;  %10573 = vmatpush3.bf16.msra.mxu1 %v13877_v10 }
 0xa67   :  { %10554 = vmatprep.subr.bf16.mxu0 %v11344_v23  ;;  %10574 = vmatprep.subr.bf16.mxu1 %v11344_v23 }
 0xa6a   :  { %10555 = vmatpush3.bf16.msra.mxu0 %v13844_v7  ;;  %10575 = vmatpush3.bf16.msra.mxu1 %v13844_v7 }
 0xa6b   :  { %10556 = vmatprep.subr.bf16.mxu0 %v11344_v23  ;;  %10576 = vmatprep.subr.bf16.mxu1 %v11344_v23 }
 0xa6e   :  { %10557 = vmatpush3.bf16.msra.mxu0 %v13853_v0  ;;  %10577 = vmatpush3.bf16.msra.mxu1 %v13853_v0 }
 0xa6f   :  { %10582 = vmatprep.subr.bf16.mxu0 %v11344_v23  ;;  %10602 = vmatprep.subr.bf16.mxu1 %v11344_v23 }
 0xa71   :  { %10559 = vmatmul.mubr.bf16.vlgmr.msra.gmra.mxu0 %v6712_v22  ;;  %10579 = vmatmul.mubr.bf16.vlgmr.msra.gmra.mxu1 %v8869_v57 }
 0xa72   :  { %10583 = vmatpush3.bf16.msra.mxu0 %v13903_v1  ;;  %10598 = vmatprep.mubr.msk.bf16.mxu0 %vm11345_vm4, %v11344_v23 }
 0xa73   :  { %10584 = vmatprep.subr.bf16.mxu0 %v11344_v23  ;;  %10603 = vmatpush3.bf16.msra.mxu1 %v11270_v6 }
 0xa74   :  { %10604 = vmatprep.subr.bf16.mxu1 %v11344_v23  ;;  %10618 = vmatprep.mubr.msk.bf16.mxu1 %vm11345_vm4, %v11344_v23 }
 0xa76   :  { %10585 = vmatpush3.bf16.msra.mxu0 %v13907_v12 }
 0xa77   :  { %10586 = vmatprep.subr.bf16.mxu0 %v11344_v23  ;;  %10605 = vmatpush3.bf16.msra.mxu1 %v11271_v19 }
 0xa78   :  { %10606 = vmatprep.subr.bf16.mxu1 %v11344_v23 }
 0xa7a   :  { %10587 = vmatpush3.bf16.msra.mxu0 %v13892_v60 }
 0xa7b   :  { %10588 = vmatprep.subr.bf16.mxu0 %v11344_v23  ;;  %10607 = vmatpush3.bf16.msra.mxu1 %v11272_v63 }
 0xa7c   :  { %10608 = vmatprep.subr.bf16.mxu1 %v11344_v23 }
 0xa7e   :  { %10589 = vmatpush3.bf16.msra.mxu0 %v13899_v43 }
 0xa7f   :  { %10590 = vmatprep.subr.bf16.mxu0 %v11344_v23  ;;  %10609 = vmatpush3.bf16.msra.mxu1 %v11273_v4 }
 0xa80   :  { %10610 = vmatprep.subr.bf16.mxu1 %v11344_v23 }
 0xa82   :  { %10591 = vmatpush3.bf16.msra.mxu0 %v13868_v50 }
 0xa83   :  { %10592 = vmatprep.subr.bf16.mxu0 %v11344_v23  ;;  %10611 = vmatpush3.bf16.msra.mxu1 %v11274_v48 }
 0xa84   :  { %10612 = vmatprep.subr.bf16.mxu1 %v11344_v23 }
 0xa86   :  { %10593 = vmatpush3.bf16.msra.mxu0 %v13877_v10 }
 0xa87   :  { %10594 = vmatprep.subr.bf16.mxu0 %v11344_v23  ;;  %10613 = vmatpush3.bf16.msra.mxu1 %v11275_v8 }
 0xa88   :  { %10614 = vmatprep.subr.bf16.mxu1 %v11344_v23 }
 0xa8a   :  { %10595 = vmatpush3.bf16.msra.mxu0 %v13844_v7 }
 0xa8b   :  { %10596 = vmatprep.subr.bf16.mxu0 %v11344_v23  ;;  %10615 = vmatpush3.bf16.msra.mxu1 %v11276_v16  ;;  %v11304_v16 = vld [vmem:[%s14422_s9 + $0x128] sm:$0xff]  }
 0xa8c   :  { %10616 = vmatprep.subr.bf16.mxu1 %v11344_v23 }
 0xa8e   :  { %10597 = vmatpush3.bf16.msra.mxu0 %v13853_v0 }
 0xa8f   :  { %10622 = vmatprep.subr.bf16.mxu0 %v11344_v23  ;;  %10617 = vmatpush3.bf16.msra.mxu1 %v11277_v62  ;;  %v11305_v62 = vld [vmem:[%s14422_s9 + $0x120] sm:$0xff]  }
 0xa90   :  { %10642 = vmatprep.subr.bf16.mxu1 %v11344_v23 }
 0xa91   :  { %10599 = vmatmul.mubr.bf16.vlgmr.msra.gmra.mxu0 %v8886_v9 }
 0xa92   :  { %10638 = vmatprep.mubr.msk.bf16.mxu0 %vm11345_vm4, %v11344_v23  ;;  %10623 = vmatpush3.bf16.msra.mxu0 %v11278_v53 }
 0xa93   :  { %10624 = vmatprep.subr.bf16.mxu0 %v11344_v23 }
 0xa96   :  { %10625 = vmatpush3.bf16.msra.mxu0 %v11279_v20  ;;  %v8952_v20 = vld [vmem:[%s14424_s8 + $0x10] sm:$0xf] }
 0xa97   :  { %10626 = vmatprep.subr.bf16.mxu0 %v11344_v23 }
 0xa9a   :  { %10627 = vmatpush3.bf16.msra.mxu0 %v11280_v55 }
 0xa9b   :  { %10628 = vmatprep.subr.bf16.mxu0 %v11344_v23 }
 0xa9e   :  { %10629 = vmatpush3.bf16.msra.mxu0 %v11281_v25 }
 0xa9f   :  { %10630 = vmatprep.subr.bf16.mxu0 %v11344_v23 }
 0xaa2   :  { %10631 = vmatpush3.bf16.msra.mxu0 %v11282_v45  ;;  %v11302_v45 = vld [vmem:[%s14422_s9 + $0x138] sm:$0xff]  }
 0xaa3   :  { %10632 = vmatprep.subr.bf16.mxu0 %v11344_v23 }
 0xaa6   :  { %10633 = vmatpush3.bf16.msra.mxu0 %v11283_v35 }
 0xaa7   :  { %10634 = vmatprep.subr.bf16.mxu0 %v11344_v23 }
 0xaaa   :  { %10635 = vmatpush3.bf16.msra.mxu0 %v11284_v40  ;;  %v11303_v40 = vld [vmem:[%s14422_s9 + $0x130] sm:$0xff]  }
 0xaab   :  { %10636 = vmatprep.subr.bf16.mxu0 %v11344_v23 }
 0xaae   :  { %10637 = vmatpush3.bf16.msra.mxu0 %v11285_v56 }
 0xaaf   :  { %10662 = vmatprep.subr.bf16.mxu0 %v11344_v23 }
 0xb31   :  { %v6747_v34 = vpop.f32.mrf.mxu0  ;;  %v14037_v51 = vpop.f32.mrf.mxu1 }
 0xb32   :  { %v6753_v38 = vpack.c.bf16 %v6747_v34, %v6747_v34  ;;  %v6812_v29 = vpack.c.bf16 %v14037_v51, %v14037_v51  ;;  %v11306_v34 = vld [vmem:[%s14422_s9 + $0x118] sm:$0xff]   ;;  %v11307_v51 = vld [vmem:[%s14422_s9 + $0x110] sm:$0xff]  }
 0xb33   :  { %v10560_v47 = vpop.f32.mrf.mxu0  ;;  %v10580_v30 = vpop.f32.mrf.mxu1 }
 0xb34   :  { %10639 = vmatmul.mubr.bf16.vlgmr.msra.gmra.mxu0 %v6753_v38  ;;  %v11308_v38 = vld [vmem:[%s14422_s9 + $0x108] sm:$0xff]   ;;  %v9002_v47 = vld [vmem:[%s14424_s8 + $0x18] sm:$0xf]  ;;  %v11309_v30 = vld [vmem:[%s14422_s9 + $0x100] sm:$0xff]  }
 0xb35   :  { %v6750_v3 = vpop.f32.mrf.mxu0  ;;  %10663 = vmatpush3.bf16.msra.mxu0 %v11286_v39  ;;  %v6809_v27 = vpop.f32.mrf.mxu1  ;;  %10678 = vmatprep.mubr.msk.bf16.mxu0 %vm11345_vm4, %v11344_v23  ;;  %v8977_v39 = vld [vmem:[%s14424_s8 + $0x14] sm:$0xf] }
 0xb36   :  { %10664 = vmatprep.subr.bf16.mxu0 %v11344_v23  ;;  %v9027_v3 = vld [vmem:[%s14424_s8 + $0x1c] sm:$0xf] }
 0xb37   :  { %v10561_v36 = vpop.f32.mrf.mxu0  ;;  %v10581_v49 = vpop.f32.mrf.mxu1 }
 0xb39   :  { %10665 = vmatpush3.bf16.msra.mxu0 %v11287_v5 }
 0xb3a   :  { %10666 = vmatprep.subr.bf16.mxu0 %v11344_v23 }
 0xb3d   :  { %10667 = vmatpush3.bf16.msra.mxu0 %v11288_v37  ;;  %v11312_v37 = vld [vmem:[%s14422_s9 + $0x168] sm:$0xff]  }
 0xb3e   :  { %10668 = vmatprep.subr.bf16.mxu0 %v11344_v23 }
 0xb41   :  { %10669 = vmatpush3.bf16.msra.mxu0 %v11289_v18  ;;  %v11313_v18 = vld [vmem:[%s14422_s9 + $0x160] sm:$0xff]  }
 0xb42   :  { %10670 = vmatprep.subr.bf16.mxu0 %v11344_v23 }
 0xb45   :  { %10671 = vmatpush3.bf16.msra.mxu0 %v11290_v41  ;;  %v11314_v41 = vld [vmem:[%s14422_s9 + $0x158] sm:$0xff]  }
 0xb46   :  { %10672 = vmatprep.subr.bf16.mxu0 %v11344_v23 }
 0xb49   :  { %10673 = vmatpush3.bf16.msra.mxu0 %v11291_v32  ;;  %v11315_v32 = vld [vmem:[%s14422_s9 + $0x150] sm:$0xff]  }
 0xb4a   :  { %10674 = vmatprep.subr.bf16.mxu0 %v11344_v23 }
 0xb4d   :  { %10675 = vmatpush3.bf16.msra.mxu0 %v11292_v21 }
 0xb4e   :  { %10676 = vmatprep.subr.bf16.mxu0 %v11344_v23 }
 0xb51   :  { %v6866_v61 = vpop.f32.mrf.mxu0  ;;  %10677 = vmatpush3.bf16.msra.mxu0 %v11293_v44  ;;  %v11326_v44 = vld [vmem:[%s14422_s9 + $0x1f8] sm:$0xff]  }
 0xb52   :  { %v6872_v46 = vpack.c.bf16 %v6866_v61, %v6866_v61  ;;  %10702 = vmatprep.subr.bf16.mxu0 %v11344_v23  ;;  %v11316_v61 = vld [vmem:[%s14422_s9 + $0x148] sm:$0xff]  }
 0xb53   :  { %v10600_v11 = vpop.f32.mrf.mxu0 }
 0xb54   :  { %10619 = vmatmul.mubr.bf16.vlgmr.msra.gmra.mxu1 %v6872_v46  ;;  %v11317_v46 = vld [vmem:[%s14422_s9 + $0x140] sm:$0xff]  }
 0xb55   :  { %10643 = vmatpush3.bf16.msra.mxu1 %v13903_v1  ;;  %10658 = vmatprep.mubr.msk.bf16.mxu1 %vm11345_vm4, %v11344_v23  ;;  %v6869_v42 = vpop.f32.mrf.mxu0 }
 0xb56   :  { %10644 = vmatprep.subr.bf16.mxu1 %v11344_v23  ;;  %v11318_v42 = vld [vmem:[%s14422_s9 + $0x1b8] sm:$0xff]  }
 0xb57   :  { %v10601_v28 = vpop.f32.mrf.mxu0 }
 0xb59   :  { %10645 = vmatpush3.bf16.msra.mxu1 %v13907_v12 }
 0xb5a   :  { %10646 = vmatprep.subr.bf16.mxu1 %v11344_v23 }
 0xb5d   :  { %10647 = vmatpush3.bf16.msra.mxu1 %v13892_v60 }
 0xb5e   :  { %10648 = vmatprep.subr.bf16.mxu1 %v11344_v23 }
 0xb61   :  { %10649 = vmatpush3.bf16.msra.mxu1 %v13899_v43 }
 0xb62   :  { %10650 = vmatprep.subr.bf16.mxu1 %v11344_v23 }
 0xb65   :  { %10651 = vmatpush3.bf16.msra.mxu1 %v13868_v50 }
 0xb66   :  { %10652 = vmatprep.subr.bf16.mxu1 %v11344_v23 }
 0xb69   :  { %10653 = vmatpush3.bf16.msra.mxu1 %v13877_v10 }
 0xb6a   :  { %10654 = vmatprep.subr.bf16.mxu1 %v11344_v23 }
 0xb6d   :  { %10655 = vmatpush3.bf16.msra.mxu1 %v13844_v7 }
 0xb6e   :  { %10656 = vmatprep.subr.bf16.mxu1 %v11344_v23 }
 0xb71   :  { %10657 = vmatpush3.bf16.msra.mxu1 %v13853_v0 }
 0xb72   :  { %10682 = vmatprep.subr.bf16.mxu1 %v11344_v23 }
 0xb74   :  { %10659 = vmatmul.mubr.bf16.vlgmr.msra.gmra.mxu1 %v8919_v31 }
 0xb75   :  { %10683 = vmatpush3.bf16.msra.mxu1 %v11294_v17  ;;  %10698 = vmatprep.mubr.msk.bf16.mxu1 %vm11345_vm4, %v11344_v23  ;;  %v11319_v17 = vld [vmem:[%s14422_s9 + $0x1b0] sm:$0xff]  }
 0xb76   :  { %10684 = vmatprep.subr.bf16.mxu1 %v11344_v23 }
 0xb79   :  { %10685 = vmatpush3.bf16.msra.mxu1 %v11295_v14 }
 0xb7a   :  { %10686 = vmatprep.subr.bf16.mxu1 %v11344_v23 }
 0xb7d   :  { %10687 = vmatpush3.bf16.msra.mxu1 %v11296_v52 }
 0xb7e   :  { %10688 = vmatprep.subr.bf16.mxu1 %v11344_v23 }
 0xb81   :  { %10689 = vmatpush3.bf16.msra.mxu1 %v11297_v59  ;;  %v11320_v59 = vld [vmem:[%s14422_s9 + $0x1a8] sm:$0xff]  }
 0xb82   :  { %10690 = vmatprep.subr.bf16.mxu1 %v11344_v23 }
 0xb85   :  { %10691 = vmatpush3.bf16.msra.mxu1 %v11298_v15  ;;  %v11321_v15 = vld [vmem:[%s14422_s9 + $0x1a0] sm:$0xff]  }
 0xb86   :  { %10692 = vmatprep.subr.bf16.mxu1 %v11344_v23 }
 0xb89   :  { %10693 = vmatpush3.bf16.msra.mxu1 %v11299_v24  ;;  %v11322_v24 = vld [vmem:[%s14422_s9 + $0x198] sm:$0xff]  }
 0xb8a   :  { %10694 = vmatprep.subr.bf16.mxu1 %v11344_v23 }
 0xb8d   :  { %10695 = vmatpush3.bf16.msra.mxu1 %v11300_v13  ;;  %v11323_v13 = vld [vmem:[%s14422_s9 + $0x190] sm:$0xff]  }
 0xb8e   :  { %10696 = vmatprep.subr.bf16.mxu1 %v11344_v23 }
 0xb91   :  { %10697 = vmatpush3.bf16.msra.mxu1 %v11301_v26  ;;  %v11324_v26 = vld [vmem:[%s14422_s9 + $0x188] sm:$0xff]  }
 0xb92   :  { %10722 = vmatprep.subr.bf16.mxu1 %v11344_v23 }
 0xb94   :  { %10699 = vmatmul.mubr.bf16.vlgmr.msra.gmra.mxu1 %v6812_v29  ;;  %v11325_v29 = vld [vmem:[%s14422_s9 + $0x180] sm:$0xff]  }
 0xb95   :  { %10738 = vmatprep.mubr.msk.bf16.mxu1 %vm11345_vm4, %v11344_v23  ;;  %10723 = vmatpush3.bf16.msra.mxu1 %v11302_v45  ;;  %v11335_v45 = vld [vmem:[%s14422_s9 + $0x230] sm:$0xff]  }
 0xb96   :  { %10724 = vmatprep.subr.bf16.mxu1 %v11344_v23 }
 0xb99   :  { %10725 = vmatpush3.bf16.msra.mxu1 %v11303_v40 }
 0xb9a   :  { %10726 = vmatprep.subr.bf16.mxu1 %v11344_v23 }
 0xb9d   :  { %10727 = vmatpush3.bf16.msra.mxu1 %v11304_v16  ;;  %v11337_v16 = vld [vmem:[%s14422_s9 + $0x220] sm:$0xff]  }
 0xb9e   :  { %10728 = vmatprep.subr.bf16.mxu1 %v11344_v23 }
 0xba1   :  { %10729 = vmatpush3.bf16.msra.mxu1 %v11305_v62  ;;  %v11338_v62 = vld [vmem:[%s14422_s9 + $0x218] sm:$0xff]  }
 0xba2   :  { %10730 = vmatprep.subr.bf16.mxu1 %v11344_v23 }
 0xba5   :  { %10731 = vmatpush3.bf16.msra.mxu1 %v11306_v34  ;;  %v11339_v34 = vld [vmem:[%s14422_s9 + $0x210] sm:$0xff]  }
 0xba6   :  { %10732 = vmatprep.subr.bf16.mxu1 %v11344_v23 }
 0xba9   :  { %10733 = vmatpush3.bf16.msra.mxu1 %v11307_v51  ;;  %v11341_v51 = vld [vmem:[%s14422_s9 + $0x200] sm:$0xff]  }
 0xbaa   :  { %10734 = vmatprep.subr.bf16.mxu1 %v11344_v23 }
 0xbad   :  { %10735 = vmatpush3.bf16.msra.mxu1 %v11308_v38 }
 0xbae   :  { %10736 = vmatprep.subr.bf16.mxu1 %v11344_v23 }
 0xbb1   :  { %10737 = vmatpush3.bf16.msra.mxu1 %v11309_v30 }
 0xbb2   :  { %10762 = vmatprep.subr.bf16.mxu1 %v11344_v23 }
 0xbf4   :  { %v7060_v58 = vpop.f32.mrf.mxu0 }
 0xbf6   :  { %v10640_v33 = vpop.f32.mrf.mxu0 }
 0xbf8   :  { %v7063_v54 = vpop.f32.mrf.mxu0 }
 0xbf9   :  { %v11327_v54 = vld [vmem:[%s14422_s9 + $0x1f0] sm:$0xff]  }
 0xbfa   :  { %v10641_v2 = vpop.f32.mrf.mxu0 }
 0xc14   :  { %v6972_v22 = vpop.f32.mrf.mxu1 }
 0xc15   :  { %v14129_v57 = vadd.f32 %v7060_v58, %v6972_v22 }
 0xc16   :  { %v10620_v6 = vpop.f32.mrf.mxu1 }
 0xc17   :  { %v11328_v6 = vld [vmem:[%s14422_s9 + $0x1e8] sm:$0xff]  }
 0xc18   :  { %v6975_v19 = vpop.f32.mrf.mxu1 }
 0xc19   :  { %v11329_v19 = vld [vmem:[%s14422_s9 + $0x1e0] sm:$0xff]  }
 0xc1a   :  { %v10621_v63 = vpop.f32.mrf.mxu1 }
 0xc1b   :  { %v11330_v63 = vld [vmem:[%s14422_s9 + $0x1d8] sm:$0xff]  }
 0xc34   :  { %v7102_v4 = vpop.f32.mrf.mxu1 }
 0xc35   :  { %v7108_v48 = vpack.c.bf16 %v7102_v4, %v7102_v4  ;;  %v11331_v4 = vld [vmem:[%s14422_s9 + $0x1d0] sm:$0xff]  }
 0xc36   :  { %v10660_v8 = vpop.f32.mrf.mxu1 }
 0xc37   :  { %10679 = vmatmul.mubr.bf16.vlgmr.msra.gmra.mxu0 %v7108_v48  ;;  %v11332_v48 = vld [vmem:[%s14422_s9 + $0x1c8] sm:$0xff]   ;;  %v11333_v8 = vld [vmem:[%s14422_s9 + $0x1c0] sm:$0xff]  }
 0xc38   :  { %10703 = vmatpush3.bf16.msra.mxu0 %v13903_v1  ;;  %10718 = vmatprep.mubr.msk.bf16.mxu0 %vm11345_vm4, %v11344_v23  ;;  %v7105_v9 = vpop.f32.mrf.mxu1 }
 0xc39   :  { %10704 = vmatprep.subr.bf16.mxu0 %v11344_v23 }
 0xc3a   :  { %v10661_v53 = vpop.f32.mrf.mxu1 }
 0xc3b   :  { %v11334_v53 = vld [vmem:[%s14422_s9 + $0x238] sm:$0xff]  }
 0xc3c   :  { %10705 = vmatpush3.bf16.msra.mxu0 %v13907_v12 }
 0xc3d   :  { %10706 = vmatprep.subr.bf16.mxu0 %v11344_v23 }
 0xc40   :  { %10707 = vmatpush3.bf16.msra.mxu0 %v13892_v60 }
 0xc41   :  { %10708 = vmatprep.subr.bf16.mxu0 %v11344_v23 }
 0xc44   :  { %10709 = vmatpush3.bf16.msra.mxu0 %v13899_v43 }
 0xc45   :  { %10710 = vmatprep.subr.bf16.mxu0 %v11344_v23 }
 0xc48   :  { %10711 = vmatpush3.bf16.msra.mxu0 %v13868_v50 }
 0xc49   :  { %10712 = vmatprep.subr.bf16.mxu0 %v11344_v23 }
 0xc4c   :  { %10713 = vmatpush3.bf16.msra.mxu0 %v13877_v10 }
 0xc4d   :  { %10714 = vmatprep.subr.bf16.mxu0 %v11344_v23 }
 0xc50   :  { %10715 = vmatpush3.bf16.msra.mxu0 %v13844_v7 }
 0xc51   :  { %10716 = vmatprep.subr.bf16.mxu0 %v11344_v23 }
 0xc54   :  { %10717 = vmatpush3.bf16.msra.mxu0 %v13853_v0  ;;  %v14151_v55 = vpop.f32.mrf.mxu1 }
 0xc55   :  { %10742 = vmatprep.subr.bf16.mxu0 %v11344_v23 }
 0xc56   :  { %v10700_v25 = vpop.f32.mrf.mxu1 }
 0xc57   :  { %10719 = vmatmul.mubr.bf16.vlgmr.msra.gmra.mxu0 %v8952_v20 }
 0xc58   :  { %10743 = vmatpush3.bf16.msra.mxu0 %v13903_v1  ;;  %10758 = vmatprep.mubr.msk.bf16.mxu0 %vm11345_vm4, %v11344_v23  ;;  %v7299_v35 = vpop.f32.mrf.mxu1 }
 0xc59   :  { %10744 = vmatprep.subr.bf16.mxu0 %v11344_v23 }
 0xc5a   :  { %v10701_v56 = vpop.f32.mrf.mxu1 }
 0xc5b   :  { %v11336_v56 = vld [vmem:[%s14422_s9 + $0x228] sm:$0xff]  }
 0xc5c   :  { %10745 = vmatpush3.bf16.msra.mxu0 %v13907_v12 }
 0xc5d   :  { %10746 = vmatprep.subr.bf16.mxu0 %v11344_v23 }
 0xc60   :  { %10747 = vmatpush3.bf16.msra.mxu0 %v13892_v60 }
 0xc61   :  { %10748 = vmatprep.subr.bf16.mxu0 %v11344_v23 }
 0xc64   :  { %10749 = vmatpush3.bf16.msra.mxu0 %v13899_v43 }
 0xc65   :  { %10750 = vmatprep.subr.bf16.mxu0 %v11344_v23 }
 0xc68   :  { %10751 = vmatpush3.bf16.msra.mxu0 %v13868_v50 }
 0xc69   :  { %10752 = vmatprep.subr.bf16.mxu0 %v11344_v23 }
 0xc6c   :  { %10753 = vmatpush3.bf16.msra.mxu0 %v13877_v10 }
 0xc6d   :  { %10754 = vmatprep.subr.bf16.mxu0 %v11344_v23 }
 0xc70   :  { %10755 = vmatpush3.bf16.msra.mxu0 %v13844_v7 }
 0xc71   :  { %10756 = vmatprep.subr.bf16.mxu0 %v11344_v23 }
 0xc74   :  { %10757 = vmatpush3.bf16.msra.mxu0 %v13853_v0 }
 0xc75   :  { %10782 = vmatprep.subr.bf16.mxu0 %v11344_v23 }
 0xc77   :  { %10759 = vmatmul.mubr.bf16.vlgmr.msra.gmra.mxu0 %v8977_v39  ;;  %v11340_v39 = vld [vmem:[%s14422_s9 + $0x208] sm:$0xff]  }
 0xc78   :  { %10783 = vmatpush3.bf16.msra.mxu0 %v13903_v1  ;;  %10798 = vmatprep.mubr.msk.bf16.mxu0 %vm11345_vm4, %v11344_v23 }
 0xc79   :  { %10784 = vmatprep.subr.bf16.mxu0 %v11344_v23 }
 0xc7c   :  { %10785 = vmatpush3.bf16.msra.mxu0 %v13907_v12 }
 0xc7d   :  { %10786 = vmatprep.subr.bf16.mxu0 %v11344_v23 }
 0xc80   :  { %10787 = vmatpush3.bf16.msra.mxu0 %v13892_v60 }
 0xc81   :  { %10788 = vmatprep.subr.bf16.mxu0 %v11344_v23 }
 0xc84   :  { %10789 = vmatpush3.bf16.msra.mxu0 %v13899_v43 }
 0xc85   :  { %10790 = vmatprep.subr.bf16.mxu0 %v11344_v23 }
 0xc88   :  { %10791 = vmatpush3.bf16.msra.mxu0 %v13868_v50 }
 0xc89   :  { %10792 = vmatprep.subr.bf16.mxu0 %v11344_v23 }
 0xc8c   :  { %10793 = vmatpush3.bf16.msra.mxu0 %v13877_v10 }
 0xc8d   :  { %10794 = vmatprep.subr.bf16.mxu0 %v11344_v23 }
 0xc90   :  { %10795 = vmatpush3.bf16.msra.mxu0 %v13844_v7 }
 0xc91   :  { %10796 = vmatprep.subr.bf16.mxu0 %v11344_v23 }
 0xc94   :  { %10797 = vmatpush3.bf16.msra.mxu0 %v13853_v0 }
 0xc95   :  { %10822 = vmatprep.subr.bf16.mxu0 %v11344_v23 }
 0xc97   :  { %10799 = vmatmul.mubr.bf16.vlgmr.msra.gmra.mxu0 %v9002_v47 }
 0xc98   :  { %10823 = vmatpush3.bf16.msra.mxu0 %v13903_v1  ;;  %10838 = vmatprep.mubr.msk.bf16.mxu0 %vm11345_vm4, %v11344_v23 }
 0xc99   :  { %10824 = vmatprep.subr.bf16.mxu0 %v11344_v23 }
 0xc9c   :  { %10825 = vmatpush3.bf16.msra.mxu0 %v13907_v12 }
 0xc9d   :  { %10826 = vmatprep.subr.bf16.mxu0 %v11344_v23 }
 0xca0   :  { %10827 = vmatpush3.bf16.msra.mxu0 %v13892_v60 }
 0xca1   :  { %10828 = vmatprep.subr.bf16.mxu0 %v11344_v23 }
 0xca4   :  { %10829 = vmatpush3.bf16.msra.mxu0 %v13899_v43 }
 0xca5   :  { %10830 = vmatprep.subr.bf16.mxu0 %v11344_v23 }
 0xca8   :  { %10831 = vmatpush3.bf16.msra.mxu0 %v13868_v50 }
 0xca9   :  { %10832 = vmatprep.subr.bf16.mxu0 %v11344_v23 }
 0xcac   :  { %10833 = vmatpush3.bf16.msra.mxu0 %v13877_v10 }
 0xcad   :  { %10834 = vmatprep.subr.bf16.mxu0 %v11344_v23 }
 0xcb0   :  { %10835 = vmatpush3.bf16.msra.mxu0 %v13844_v7 }
 0xcb1   :  { %10836 = vmatprep.subr.bf16.mxu0 %v11344_v23 }
 0xcb4   :  { %10837 = vmatpush3.bf16.msra.mxu0 %v13853_v0 }
 0xcb5   :  { %10862 = vmatprep.subr.bf16.mxu0 %v11344_v23 }
 0xcb7   :  { %10839 = vmatmul.mubr.bf16.vlgmr.msra.gmra.mxu0 %v9027_v3 }
 0xcb8   :  { %10863 = vmatpush3.bf16.msra.mxu0 %v13903_v1  ;;  %10878 = vmatprep.mubr.msk.bf16.mxu0 %vm11345_vm4, %v11344_v23 }
 0xcb9   :  { %10864 = vmatprep.subr.bf16.mxu0 %v11344_v23 }
 0xcbc   :  { %10865 = vmatpush3.bf16.msra.mxu0 %v13907_v12 }
 0xcbd   :  { %10866 = vmatprep.subr.bf16.mxu0 %v11344_v23 }
 0xcc0   :  { %10867 = vmatpush3.bf16.msra.mxu0 %v13892_v60  ;;  %v9052_v60 = vld [vmem:[%s14424_s8 + $0x20] sm:$0xf] }
 0xcc1   :  { %10868 = vmatprep.subr.bf16.mxu0 %v11344_v23 }
 0xcc4   :  { %10869 = vmatpush3.bf16.msra.mxu0 %v13899_v43 }
 0xcc5   :  { %10870 = vmatprep.subr.bf16.mxu0 %v11344_v23 }
 0xcc8   :  { %10871 = vmatpush3.bf16.msra.mxu0 %v13868_v50 }
 0xcc9   :  { %10872 = vmatprep.subr.bf16.mxu0 %v11344_v23 }
 0xccc   :  { %10873 = vmatpush3.bf16.msra.mxu0 %v13877_v10  ;;  %v11310_v10 = vld [vmem:[%s14422_s9 + $0x178] sm:$0xff]  }
 0xccd   :  { %10874 = vmatprep.subr.bf16.mxu0 %v11344_v23 }
 0xcd0   :  { %10875 = vmatpush3.bf16.msra.mxu0 %v13844_v7 }
 0xcd1   :  { %10876 = vmatprep.subr.bf16.mxu0 %v11344_v23 }
 0xcd4   :  { %10877 = vmatpush3.bf16.msra.mxu0 %v13853_v0  ;;  %v11311_v0 = vld [vmem:[%s14422_s9 + $0x170] sm:$0xff]  }
 0xcd7   :  { %10879 = vmatmul.mubr.bf16.vlgmr.msra.gmra.mxu0 %v9052_v60 }
 0xcf7   :  { %v14269_v43 = vpop.f32.mrf.mxu0 }
 0xcf9   :  { %v10680_v50 = vpop.f32.mrf.mxu0 }
 0xcfb   :  { %v7211_v1 = vpop.f32.mrf.mxu0 }
 0xcfd   :  { %v10681_v12 = vpop.f32.mrf.mxu0 }
 0xd17   :  { %v7338_v5 = vpop.f32.mrf.mxu0 }
 0xd18   :  { %v7344_v7 = vpack.c.bf16 %v7338_v5, %v7338_v5 }
 0xd19   :  { %v10720_v27 = vpop.f32.mrf.mxu0 }
 0xd1a   :  { %10739 = vmatmul.mubr.bf16.vlgmr.msra.gmra.mxu1 %v7344_v7  ;;  %v7297_v7 = vadd.f32 %v14151_v55, %v14269_v43  ;;  %v9077_v55 = vld [vmem:[%s14425_s10] ss:$0 sm:$0xff] }
 0xd1b   :  { %10763 = vmatpush3.bf16.msra.mxu1 %v11310_v10  ;;  %v7341_v36 = vpop.f32.mrf.mxu0  ;;  %10778 = vmatprep.mubr.msk.bf16.mxu1 %vm11345_vm4, %v11344_v23 }
 0xd1c   :  { %10764 = vmatprep.subr.bf16.mxu1 %v11344_v23 }
 0xd1d   :  { %v10721_v49 = vpop.f32.mrf.mxu0 }
 0xd1f   :  { %10765 = vmatpush3.bf16.msra.mxu1 %v11311_v0 }
 0xd20   :  { %10766 = vmatprep.subr.bf16.mxu1 %v11344_v23 }
 0xd23   :  { %10767 = vmatpush3.bf16.msra.mxu1 %v11312_v37 }
 0xd24   :  { %10768 = vmatprep.subr.bf16.mxu1 %v11344_v23 }
 0xd27   :  { %10769 = vmatpush3.bf16.msra.mxu1 %v11313_v18 }
 0xd28   :  { %10770 = vmatprep.subr.bf16.mxu1 %v11344_v23 }
 0xd2b   :  { %10771 = vmatpush3.bf16.msra.mxu1 %v11314_v41 }
 0xd2c   :  { %10772 = vmatprep.subr.bf16.mxu1 %v11344_v23 }
 0xd2f   :  { %10773 = vmatpush3.bf16.msra.mxu1 %v11315_v32 }
 0xd30   :  { %10774 = vmatprep.subr.bf16.mxu1 %v11344_v23 }
 0xd33   :  { %10775 = vmatpush3.bf16.msra.mxu1 %v11316_v61 }
 0xd34   :  { %10776 = vmatprep.subr.bf16.mxu1 %v11344_v23 }
 0xd37   :  { %v7487_v11 = vpop.f32.mrf.mxu0  ;;  %10777 = vmatpush3.bf16.msra.mxu1 %v11317_v46 }
 0xd38   :  { %v7493_v28 = vpack.c.bf16 %v7487_v11, %v7487_v11  ;;  %10802 = vmatprep.subr.bf16.mxu1 %v11344_v23 }
 0xd39   :  { %v10760_v31 = vpop.f32.mrf.mxu0 }
 0xd3a   :  { %10779 = vmatmul.mubr.bf16.vlgmr.msra.gmra.mxu1 %v7493_v28 }
 0xd3b   :  { %10803 = vmatpush3.bf16.msra.mxu1 %v11318_v42  ;;  %v7490_v14 = vpop.f32.mrf.mxu0  ;;  %10818 = vmatprep.mubr.msk.bf16.mxu1 %vm11345_vm4, %v11344_v23 }
 0xd3c   :  { %10804 = vmatprep.subr.bf16.mxu1 %v11344_v23 }
 0xd3d   :  { %v10761_v52 = vpop.f32.mrf.mxu0 }
 0xd3f   :  { %10805 = vmatpush3.bf16.msra.mxu1 %v11319_v17 }
 0xd40   :  { %10806 = vmatprep.subr.bf16.mxu1 %v11344_v23 }
 0xd43   :  { %10807 = vmatpush3.bf16.msra.mxu1 %v11320_v59 }
 0xd44   :  { %10808 = vmatprep.subr.bf16.mxu1 %v11344_v23 }
 0xd47   :  { %10809 = vmatpush3.bf16.msra.mxu1 %v11321_v15 }
 0xd48   :  { %10810 = vmatprep.subr.bf16.mxu1 %v11344_v23 }
 0xd4b   :  { %10811 = vmatpush3.bf16.msra.mxu1 %v11322_v24 }
 0xd4c   :  { %10812 = vmatprep.subr.bf16.mxu1 %v11344_v23 }
 0xd4f   :  { %10813 = vmatpush3.bf16.msra.mxu1 %v11323_v13 }
 0xd50   :  { %10814 = vmatprep.subr.bf16.mxu1 %v11344_v23 }
 0xd53   :  { %10815 = vmatpush3.bf16.msra.mxu1 %v11324_v26 }
 0xd54   :  { %10816 = vmatprep.subr.bf16.mxu1 %v11344_v23 }
 0xd57   :  { %v7636_v21 = vpop.f32.mrf.mxu0  ;;  %10817 = vmatpush3.bf16.msra.mxu1 %v11325_v29 }
 0xd58   :  { %v7642_v58 = vpack.c.bf16 %v7636_v21, %v7636_v21  ;;  %10842 = vmatprep.subr.bf16.mxu1 %v11344_v23 }
 0xd59   :  { %v10800_v33 = vpop.f32.mrf.mxu0 }
 0xd5a   :  { %10819 = vmatmul.mubr.bf16.vlgmr.msra.gmra.mxu1 %v7642_v58 }
 0xd5b   :  { %10843 = vmatpush3.bf16.msra.mxu1 %v11326_v44  ;;  %v7639_v2 = vpop.f32.mrf.mxu0  ;;  %10858 = vmatprep.mubr.msk.bf16.mxu1 %vm11345_vm4, %v11344_v23 }
 0xd5c   :  { %10844 = vmatprep.subr.bf16.mxu1 %v11344_v23 }
 0xd5d   :  { %v10801_v22 = vpop.f32.mrf.mxu0 }
 0xd5f   :  { %10845 = vmatpush3.bf16.msra.mxu1 %v11327_v54 }
 0xd60   :  { %10846 = vmatprep.subr.bf16.mxu1 %v11344_v23 }
 0xd63   :  { %10847 = vmatpush3.bf16.msra.mxu1 %v11328_v6 }
 0xd64   :  { %10848 = vmatprep.subr.bf16.mxu1 %v11344_v23 }
 0xd67   :  { %10849 = vmatpush3.bf16.msra.mxu1 %v11329_v19 }
 0xd68   :  { %10850 = vmatprep.subr.bf16.mxu1 %v11344_v23 }
 0xd6b   :  { %10851 = vmatpush3.bf16.msra.mxu1 %v11330_v63 }
 0xd6c   :  { %10852 = vmatprep.subr.bf16.mxu1 %v11344_v23 }
 0xd6f   :  { %10853 = vmatpush3.bf16.msra.mxu1 %v11331_v4 }
 0xd70   :  { %10854 = vmatprep.subr.bf16.mxu1 %v11344_v23 }
 0xd73   :  { %10855 = vmatpush3.bf16.msra.mxu1 %v11332_v48 }
 0xd74   :  { %10856 = vmatprep.subr.bf16.mxu1 %v11344_v23 }
 0xd77   :  { %v7785_v9 = vpop.f32.mrf.mxu0  ;;  %10857 = vmatpush3.bf16.msra.mxu1 %v11333_v8 }
 0xd78   :  { %v7791_v20 = vpack.c.bf16 %v7785_v9, %v7785_v9  ;;  %10882 = vmatprep.subr.bf16.mxu1 %v11344_v23 }
 0xd79   :  { %v10840_v25 = vpop.f32.mrf.mxu0 }
 0xd7a   :  { %10859 = vmatmul.mubr.bf16.vlgmr.msra.gmra.mxu1 %v7791_v20 }
 0xd7b   :  { %10883 = vmatpush3.bf16.msra.mxu1 %v11334_v53  ;;  %v7788_v35 = vpop.f32.mrf.mxu0  ;;  %10898 = vmatprep.mubr.msk.bf16.mxu1 %vm11345_vm4, %v11344_v23 }
 0xd7c   :  { %10884 = vmatprep.subr.bf16.mxu1 %v11344_v23 }
 0xd7d   :  { %v10841_v40 = vpop.f32.mrf.mxu0 }
 0xd7f   :  { %10885 = vmatpush3.bf16.msra.mxu1 %v11335_v45 }
 0xd80   :  { %10886 = vmatprep.subr.bf16.mxu1 %v11344_v23 }
 0xd83   :  { %10887 = vmatpush3.bf16.msra.mxu1 %v11336_v56 }
 0xd84   :  { %10888 = vmatprep.subr.bf16.mxu1 %v11344_v23 }
 0xd87   :  { %10889 = vmatpush3.bf16.msra.mxu1 %v11337_v16 }
 0xd88   :  { %10890 = vmatprep.subr.bf16.mxu1 %v11344_v23 }
 0xd8b   :  { %10891 = vmatpush3.bf16.msra.mxu1 %v11338_v62 }
 0xd8c   :  { %10892 = vmatprep.subr.bf16.mxu1 %v11344_v23 }
 0xd8f   :  { %10893 = vmatpush3.bf16.msra.mxu1 %v11339_v34 }
 0xd90   :  { %10894 = vmatprep.subr.bf16.mxu1 %v11344_v23 }
 0xd93   :  { %10895 = vmatpush3.bf16.msra.mxu1 %v11340_v39 }
 0xd94   :  { %10896 = vmatprep.subr.bf16.mxu1 %v11344_v23 }
 0xd97   :  { %v7934_v38 = vpop.f32.mrf.mxu0  ;;  %10897 = vmatpush3.bf16.msra.mxu1 %v11341_v51 }
 0xd98   :  { %v7940_v47 = vpack.c.bf16 %v7934_v38, %v7934_v38 }
 0xd99   :  { %v10880_v30 = vpop.f32.mrf.mxu0 }
 0xd9a   :  { %10899 = vmatmul.mubr.bf16.vlgmr.msra.gmra.mxu1 %v7940_v47 }
 0xd9b   :  { %v7937_v3 = vpop.f32.mrf.mxu0 }
 0xd9d   :  { %v10881_v60 = vpop.f32.mrf.mxu0 }
 0xdda   :  { %v7444_v50 = vpop.f32.mrf.mxu1 }
 0xddb   :  { %v7450_v1 = vadd.f32 %v7444_v50, %v14129_v57 }
 0xddc   :  { %v10740_v12 = vpop.f32.mrf.mxu1 }
 0xdde   :  { %v7447_v5 = vpop.f32.mrf.mxu1 }
 0xde0   :  { %v10741_v10 = vpop.f32.mrf.mxu1 }
 0xdfa   :  { %v7593_v27 = vpop.f32.mrf.mxu1 }
 0xdfb   :  { %v7599_v0 = vadd.f32 %v7593_v27, %v7297_v7 }
 0xdfc   :  { %v10780_v36 = vpop.f32.mrf.mxu1 }
 0xdfe   :  { %v7596_v23 = vpop.f32.mrf.mxu1 }
 0xe00   :  { %v10781_v49 = vpop.f32.mrf.mxu1 }
 0xe1a   :  { %v7742_v37 = vpop.f32.mrf.mxu1 }
 0xe1b   :  { %v7748_v57 = vadd.f32 %v7742_v37, %v7450_v1 }
 0xe1c   :  { %v10820_v18 = vpop.f32.mrf.mxu1 }
 0xe1e   :  { %v7745_v41 = vpop.f32.mrf.mxu1 }
 0xe20   :  { %v10821_v32 = vpop.f32.mrf.mxu1 }
 0xe3a   :  { %v7891_v61 = vpop.f32.mrf.mxu1 }
 0xe3b   :  { %v7897_v31 = vadd.f32 %v7891_v61, %v7599_v0 }
 0xe3c   :  { %v10860_v46 = vpop.f32.mrf.mxu1 }
 0xe3e   :  { %v7894_v11 = vpop.f32.mrf.mxu1 }
 0xe40   :  { %v10861_v42 = vpop.f32.mrf.mxu1 }
 0xe5a   :  { %v8040_v28 = vpop.f32.mrf.mxu1 }
 0xe5b   :  { %v8046_v17 = vadd.f32 %v8040_v28, %v7748_v57 }
 0xe5c   :  { %v10900_v43 = vpop.f32.mrf.mxu1 }
 0xe5d   :  { %v8047_v14 = vadd.f32 %v8046_v17, %v7897_v31 }
 0xe5e   :  { %v8043_v52 = vpop.f32.mrf.mxu1 }
 0xe5f   :  { %v8055_v59 = vadd.f32 %v9077_v55, %v8047_v14 }
 0xe60   :  { %v10901_v15 = vpop.f32.mrf.mxu1 }
 0xe61   :  { %8056 = vst [vmem:[%s14426_s11] sm:$0xff] %v8055_v59 }

</bundles_post_ra>
